<compile_context>
chip_gen: v5e
topology: v5e:2x2
jax: 0.10.0
libtpu: 0.0.40
codegen_flags: <defaults>
</compile_context>

<pallas_src>
import functools

import jax
import jax.numpy as jnp
from jax.experimental import pallas as pl
from jax.experimental.pallas import tpu as pltpu


# ---------------------------------------------------------------------------
# Chip-aware configuration helpers
# ---------------------------------------------------------------------------
def _device_kind() -> str:
    try:
        return jax.devices()[0].device_kind.lower()
    except Exception:
        return ""


def _num_tensorcores() -> int:
    """TensorCores per chip: 2 on v7x, 1 on v5e/v6e (grid steps == TC count)."""
    try:
        info = pltpu.get_tpu_info()
        for attr in ("num_cores", "num_cores_per_chip", "tensorcores_per_chip",
                     "num_tensorcores"):
            v = getattr(info, attr, None)
            if v:
                return max(1, int(v))
    except Exception:
        pass
    kind = _device_kind()
    if ("v7" in kind) or ("7x" in kind):
        return 2
    return 1


def _default_compute_dtype():
    """bf16 MXU operands on v6e/v7x (f32 accumulate); f32 on v5e/unknown."""
    kind = _device_kind()
    if any(tag in kind for tag in ("v6", "trillium", "v7", "7x")):
        return jnp.bfloat16
    return jnp.float32


# ---------------------------------------------------------------------------
# Kernel
# ---------------------------------------------------------------------------
def _time_attention_kernel(x_ref, wqkv_ref, wproj_ref, bproj_ref, bias_ref,
                           hmap_ref, hexp_ref, o_ref, *, compute_dtype):
    # x_ref:    (BB, N, dim)
    # wqkv_ref: (dim, 3*C)   Q columns pre-scaled, pre-cast to compute_dtype
    # wproj_ref:(C, dim)     pre-cast to compute_dtype
    # bproj_ref:(1, dim)     f32
    # bias_ref: (N, N, H)    f32 relative-position bias, already in (n, m, h) layout
    # hmap_ref: (C, H)       0/1 head-contraction map, compute_dtype
    # hexp_ref: (H, C)       0/1 head-expansion map,   compute_dtype
    # o_ref:    (BB, N, dim)
    BB, N, dim = x_ref.shape
    C, H = hmap_ref.shape
    cdt = compute_dtype

    # --- fused qkv projection: one MXU matmul on the whole (BB*N, dim) slab ---
    x2d = x_ref[...].reshape(BB * N, dim).astype(cdt)
    qkv = jnp.dot(x2d, wqkv_ref[...],
                  preferred_element_type=jnp.float32)            # (BB*N, 3C) f32
    qkv = qkv.reshape(BB, N, 3 * C)

    # Three wide lane slices (Q already carries the softmax scale).
    q = qkv[:, :, 0:C]                                           # (BB, N, C)
    k = qkv[:, :, C:2 * C]                                       # (BB, N, C)
    v = qkv[:, :, 2 * C:3 * C]                                   # (BB, N, C)

    # --- scores for all windows and heads at once (head stays in the lane dim) ---
    # prod[b, n, m, c] = q[b, n, c] * k[b, m, c]                 (VPU broadcast-multiply)
    prod = q[:, :, None, :] * k[:, None, :, :]                   # (BB, N, N, C) f32
    # per-head contraction over head_dim via a tiny constant (C, H) matmul on the MXU
    s = jnp.dot(prod.reshape(BB * N * N, C).astype(cdt), hmap_ref[...],
                preferred_element_type=jnp.float32)              # (BB*N*N, H) f32
    s = s.reshape(BB, N, N, H) + bias_ref[...][None]             # + rel-pos bias

    # --- numerically stable softmax over the key axis (sublane axis), f32 ---
    m_max = jnp.max(s, axis=2, keepdims=True)                    # (BB, N, 1, H)
    p = jnp.exp(s - m_max)
    inv = pl.reciprocal(jnp.sum(p, axis=2, keepdims=True), approx=True)
    probs = p * inv                                              # (BB, N, N, H)

    # --- PV: expand per-head probs back to C lanes, weight V, reduce over keys ---
    pe = jnp.dot(probs.reshape(BB * N * N, H).astype(cdt), hexp_ref[...],
                 preferred_element_type=jnp.float32)             # (BB*N*N, C)
    pe = pe.reshape(BB, N, N, C)
    ctx = jnp.sum(pe * v[:, None, :, :], axis=2)                 # (BB, N, C) f32

    # --- output projection: single K=C contraction + bias ---
    proj = jnp.dot(ctx.reshape(BB * N, C).astype(cdt), wproj_ref[...],
                   preferred_element_type=jnp.float32)           # (BB*N, dim)
    proj = proj + bproj_ref[...]                                 # broadcast (1, dim)
    o_ref[...] = proj.reshape(BB, N, dim).astype(o_ref.dtype)


# ---------------------------------------------------------------------------
# One-time host-side parameter prep (hoisted out of the per-call path)
# ---------------------------------------------------------------------------
def prepare_time_attention_params(w_qkv, w_proj, b_proj, rel_bias_table, rel_pos_index,
                                  *, num_heads, scale, seq_len):
    dim, three_c = w_qkv.shape
    C = three_c // 3
    hd = C // num_heads

    # Fold the softmax scale into the Q columns of the qkv weight.
    w_qkv_scaled = jnp.concatenate([w_qkv[:, :C] * scale, w_qkv[:, C:]], axis=1)

    # Relative-position bias gathered once, directly in the kernel's (n, m, h) layout.
    idx = rel_pos_index[:seq_len, :seq_len].reshape(-1)
    bias_nmh = rel_bias_table[idx].reshape(seq_len, seq_len, num_heads)
    bias_nmh = jnp.asarray(bias_nmh, jnp.float32)

    # Head-contraction / head-expansion 0/1 maps: hmap[c, h] = 1 iff c // hd == h.
    head_of_col = jnp.arange(C) // hd
    hmap = (head_of_col[:, None] == jnp.arange(num_heads)[None, :]).astype(jnp.float32)
    hexp = hmap.T

    b_proj2d = b_proj.reshape(1, dim)
    return w_qkv_scaled, w_proj, b_proj2d, bias_nmh, hmap, hexp


# ---------------------------------------------------------------------------
# Wrapper
# ---------------------------------------------------------------------------
def time_attention(x, w_qkv_scaled, w_proj, b_proj2d, bias_nmh, hmap, hexp,
                   *, block_b=None, compute_dtype=None):
    """Pallas TimeAttention forward on prepared params.

    x:            (B, N, dim)
    w_qkv_scaled: (dim, 3*(dim//2))   Q columns pre-scaled
    w_proj:       (C, dim)
    b_proj2d:     (1, dim)
    bias_nmh:     (N, N, H)
    hmap/hexp:    (C, H) / (H, C) head maps
    """
    B, N, dim = x.shape
    C, H = hmap.shape

    if compute_dtype is None:
        compute_dtype = _default_compute_dtype()

    # Grid-step count == TensorCore count; BB is never VMEM-constrained here.
    if block_b is None:
        num_blocks = max(1, min(_num_tensorcores(), B))
        BB = pl.cdiv(B, num_blocks)
    else:
        BB = min(block_b, B)
    num_blocks = pl.cdiv(B, BB)
    B_pad = num_blocks * BB
    if B_pad != B:
        x = jnp.pad(x, ((0, B_pad - B), (0, 0), (0, 0)))

    # Pre-cast matmul operands once (halves weight DMA bytes when bf16).
    wqkv_c = w_qkv_scaled.astype(compute_dtype)
    wproj_c = w_proj.astype(compute_dtype)
    hmap_c = hmap.astype(compute_dtype)
    hexp_c = hexp.astype(compute_dtype)
    bproj_f32 = b_proj2d.astype(jnp.float32)
    bias_f32 = bias_nmh.astype(jnp.float32)

    kernel = functools.partial(_time_attention_kernel, compute_dtype=compute_dtype)

    out = pl.pallas_call(
        kernel,
        out_shape=jax.ShapeDtypeStruct((B_pad, N, dim), x.dtype),
        grid_spec=pltpu.PrefetchScalarGridSpec(
            num_scalar_prefetch=0,
            grid=(num_blocks,),
            in_specs=[
                pl.BlockSpec((BB, N, dim), lambda b: (b, 0, 0)),     # x slab
                pl.BlockSpec((dim, 3 * C), lambda b: (0, 0)),        # w_qkv (scaled)
                pl.BlockSpec((C, dim), lambda b: (0, 0)),            # w_proj
                pl.BlockSpec((1, dim), lambda b: (0, 0)),            # proj bias
                pl.BlockSpec((N, N, H), lambda b: (0, 0, 0)),        # rel-pos bias
                pl.BlockSpec((C, H), lambda b: (0, 0)),              # head map
                pl.BlockSpec((H, C), lambda b: (0, 0)),              # head expand
            ],
            out_specs=pl.BlockSpec((BB, N, dim), lambda b: (b, 0, 0)),
        ),
        compiler_params=pltpu.CompilerParams(
            dimension_semantics=("parallel",)),
    )(x, wqkv_c, wproj_c, bproj_f32, bias_f32, hmap_c, hexp_c)

    return out[:B] if B_pad != B else out


# ---------------------------------------------------------------------------
# Pure-JAX reference mirroring the PyTorch forward
# ---------------------------------------------------------------------------
def reference_time_attention(x, w_qkv, w_proj, b_proj, rel_bias_table,
                             rel_pos_index, *, num_heads, scale):
    B, N, dim = x.shape
    C = dim // 2
    hd = C // num_heads
    qkv = x @ w_qkv                                        # (B, N, 3C)
    qkv = qkv.reshape(B, N, 3, num_heads, hd).transpose(2, 0, 3, 1, 4)
    q, k, v = qkv[0], qkv[1], qkv[2]                       # (B, H, N, hd)
    q = q * scale
    attn = jnp.einsum('bhnd,bhmd->bhnm', q, k)
    idx = rel_pos_index[:N, :N].reshape(-1)
    rel_bias = rel_bias_table[idx].reshape(N, N, num_heads).transpose(2, 0, 1)
    attn = attn + rel_bias[None]
    attn = jax.nn.softmax(attn, axis=-1)
    out = jnp.einsum('bhnm,bhmd->bhnd', attn, v)
    out = out.transpose(0, 2, 1, 3).reshape(B, N, C)
    return out @ w_proj + b_proj


def make_relative_position_index(frames):
    # For window (frames, 1, 1): index[i, j] = i - j + frames - 1
    i = jnp.arange(frames)[:, None]
    j = jnp.arange(frames)[None, :]
    return (i - j + frames - 1).astype(jnp.int32)


if __name__ == "__main__":
    B = 16
    dim = 32
    num_heads = 4
    frames = 8
    N = frames                  # sequence length along the time window
    C = dim // 2
    # PyTorch module computes scale from dim // num_heads (its quirk), kept as-is.
    scale = (dim // num_heads) ** (-0.5)

    key = jax.random.PRNGKey(0)
    kx, kqkv, kproj, kbproj, ktab = jax.random.split(key, 5)

    x = jax.random.normal(kx, (B, N, dim), jnp.float32)
    # nn.Linear(dim, 3*C, bias=False): weight (3C, dim); stored transposed (dim, 3C)
    w_qkv = 0.1 * jax.random.normal(kqkv, (dim, 3 * C), jnp.float32)
    # nn.Linear(C, dim): weight (dim, C) + bias (dim,); stored transposed (C, dim)
    w_proj = 0.1 * jax.random.normal(kproj, (C, dim), jnp.float32)
    b_proj = 0.1 * jax.random.normal(kbproj, (dim,), jnp.float32)
    rel_bias_table = 0.05 * jax.random.normal(ktab, (2 * frames - 1, num_heads), jnp.float32)
    rel_pos_index = make_relative_position_index(frames)

    # One-time host prep: scale folded into Wq, bias gathered to (N, N, H), head maps.
    w_qkv_s, w_proj_p, b_proj2d, bias_nmh, hmap, hexp = prepare_time_attention_params(
        w_qkv, w_proj, b_proj, rel_bias_table, rel_pos_index,
        num_heads=num_heads, scale=scale, seq_len=N)

    # Chip-aware defaults (grid = #TensorCores; bf16 operands on v6e/v7x, f32 on v5e).
    cdt = _default_compute_dtype()
    out = time_attention(x, w_qkv_s, w_proj_p, b_proj2d, bias_nmh, hmap, hexp,
                         compute_dtype=cdt)
    out = jax.block_until_ready(out)

    ref = reference_time_attention(x, w_qkv, w_proj, b_proj, rel_bias_table,
                                   rel_pos_index, num_heads=num_heads, scale=scale)
    ref = jax.block_until_ready(ref)

    assert out.shape == (B, N, dim)
    # Tolerance: approx (EUP) reciprocal in f32 mode; bf16 MXU operands need more slack.
    if jnp.dtype(cdt) == jnp.dtype(jnp.float32):
        atol = rtol = 2e-3
    else:
        atol = rtol = 5e-2
    max_diff = jnp.max(jnp.abs(out - ref))
    assert jnp.allclose(out, ref, atol=atol, rtol=rtol), f"max abs diff {max_diff}"
    print("KERNEL_OK")
</pallas_src>

<mosaic_0001>
module attributes {stable_mosaic.version = 11 : i64} {
  func.func @_time_attention_kernel(%arg0: i32, %arg1: memref<16x8x32xf32, #tpu.memory_space<vmem>>, %arg2: memref<32x48xf32, #tpu.memory_space<vmem>>, %arg3: memref<16x32xf32, #tpu.memory_space<vmem>>, %arg4: memref<1x32xf32, #tpu.memory_space<vmem>>, %arg5: memref<8x8x4xf32, #tpu.memory_space<vmem>>, %arg6: memref<16x4xf32, #tpu.memory_space<vmem>>, %arg7: memref<4x16xf32, #tpu.memory_space<vmem>>, %arg8: memref<16x8x32xf32, #tpu.memory_space<vmem>>) attributes {dimension_semantics = [#tpu.dimension_semantics<parallel>], iteration_bounds = array<i64: 1>, scalar_prefetch = 0 : i64, scratch_operands = 0 : i64, tpu.core_type = #tpu.core_type<tc>, window_params = [{transform_indices = @transform_0, window_bounds = array<i64: 16, 8, 32>}, {pipeline_mode = #tpu.pipeline_mode<synchronous>, transform_indices = @transform_1, window_bounds = array<i64: 32, 48>}, {pipeline_mode = #tpu.pipeline_mode<synchronous>, transform_indices = @transform_2, window_bounds = array<i64: 16, 32>}, {pipeline_mode = #tpu.pipeline_mode<synchronous>, transform_indices = @transform_3, window_bounds = array<i64: 1, 32>}, {pipeline_mode = #tpu.pipeline_mode<synchronous>, transform_indices = @transform_4, window_bounds = array<i64: 8, 8, 4>}, {pipeline_mode = #tpu.pipeline_mode<synchronous>, transform_indices = @transform_5, window_bounds = array<i64: 16, 4>}, {pipeline_mode = #tpu.pipeline_mode<synchronous>, transform_indices = @transform_6, window_bounds = array<i64: 4, 16>}, {transform_indices = @transform_7, window_bounds = array<i64: 16, 8, 32>}]} {
    %c0 = arith.constant 0 : index
    %c0_0 = arith.constant 0 : index
    %c0_1 = arith.constant 0 : index
    %0 = vector.load %arg1[%c0, %c0_0, %c0_1] : memref<16x8x32xf32, #tpu.memory_space<vmem>>, vector<16x8x32xf32>
    %1 = vector.shape_cast %0 : vector<16x8x32xf32> to vector<128x32xf32>
    %c0_2 = arith.constant 0 : index
    %c0_3 = arith.constant 0 : index
    %2 = vector.load %arg2[%c0_2, %c0_3] : memref<32x48xf32, #tpu.memory_space<vmem>>, vector<32x48xf32>
    %cst = arith.constant dense<0.000000e+00> : vector<128x48xf32>
    %3 = tpu.matmul %1, %2, %cst {dimension_numbers = #tpu.dot_dimension_numbers<[1], [0], [0], [1], [0, 0, 1, 1], [], []>} : vector<128x32xf32>, vector<32x48xf32>, vector<128x48xf32> -> vector<128x48xf32>
    %4 = vector.shape_cast %3 : vector<128x48xf32> to vector<16x8x48xf32>
    %5 = vector.extract_strided_slice %4 {offsets = [0, 0, 0], sizes = [16, 8, 16], strides = [1, 1, 1]} : vector<16x8x48xf32> to vector<16x8x16xf32>
    %6 = vector.extract_strided_slice %4 {offsets = [0, 0, 16], sizes = [16, 8, 16], strides = [1, 1, 1]} : vector<16x8x48xf32> to vector<16x8x16xf32>
    %7 = vector.extract_strided_slice %4 {offsets = [0, 0, 32], sizes = [16, 8, 16], strides = [1, 1, 1]} : vector<16x8x48xf32> to vector<16x8x16xf32>
    %8 = vector.shape_cast %5 : vector<16x8x16xf32> to vector<16x8x1x16xf32>
    %9 = vector.shape_cast %6 : vector<16x8x16xf32> to vector<16x1x8x16xf32>
    %10 = vector.broadcast %8 : vector<16x8x1x16xf32> to vector<16x8x8x16xf32>
    %11 = vector.broadcast %9 : vector<16x1x8x16xf32> to vector<16x8x8x16xf32>
    %12 = arith.mulf %10, %11 : vector<16x8x8x16xf32>
    %13 = vector.shape_cast %12 : vector<16x8x8x16xf32> to vector<1024x16xf32>
    %c0_4 = arith.constant 0 : index
    %c0_5 = arith.constant 0 : index
    %14 = vector.load %arg6[%c0_4, %c0_5] : memref<16x4xf32, #tpu.memory_space<vmem>>, vector<16x4xf32>
    %cst_6 = arith.constant dense<0.000000e+00> : vector<1024x4xf32>
    %15 = tpu.matmul %13, %14, %cst_6 {dimension_numbers = #tpu.dot_dimension_numbers<[1], [0], [0], [1], [0, 0, 1, 1], [], []>} : vector<1024x16xf32>, vector<16x4xf32>, vector<1024x4xf32> -> vector<1024x4xf32>
    %16 = vector.shape_cast %15 : vector<1024x4xf32> to vector<16x8x8x4xf32>
    %c0_7 = arith.constant 0 : index
    %c0_8 = arith.constant 0 : index
    %c0_9 = arith.constant 0 : index
    %17 = vector.load %arg5[%c0_7, %c0_8, %c0_9] : memref<8x8x4xf32, #tpu.memory_space<vmem>>, vector<8x8x4xf32>
    %18 = vector.shape_cast %17 : vector<8x8x4xf32> to vector<1x8x8x4xf32>
    %19 = vector.broadcast %18 : vector<1x8x8x4xf32> to vector<16x8x8x4xf32>
    %20 = arith.addf %16, %19 : vector<16x8x8x4xf32>
    %cst_10 = arith.constant dense<0xFF800000> : vector<16x8x4xf32>
    %21 = vector.multi_reduction <maximumf>, %20, %cst_10 [2] : vector<16x8x8x4xf32> to vector<16x8x4xf32>
    %22 = vector.shape_cast %21 : vector<16x8x4xf32> to vector<16x8x1x4xf32>
    %23 = vector.broadcast %22 : vector<16x8x1x4xf32> to vector<16x8x8x4xf32>
    %24 = arith.subf %20, %23 : vector<16x8x8x4xf32>
    %25 = math.exp %24 : vector<16x8x8x4xf32>
    %cst_11 = arith.constant dense<0.000000e+00> : vector<16x8x4xf32>
    %26 = vector.multi_reduction <add>, %25, %cst_11 [2] : vector<16x8x8x4xf32> to vector<16x8x4xf32>
    %27 = vector.shape_cast %26 : vector<16x8x4xf32> to vector<16x8x1x4xf32>
    %28 = tpu.reciprocal %27 {approx = true} : vector<16x8x1x4xf32> -> vector<16x8x1x4xf32>
    %29 = vector.broadcast %28 : vector<16x8x1x4xf32> to vector<16x8x8x4xf32>
    %30 = arith.mulf %25, %29 : vector<16x8x8x4xf32>
    %31 = vector.shape_cast %30 : vector<16x8x8x4xf32> to vector<1024x4xf32>
    %c0_12 = arith.constant 0 : index
    %c0_13 = arith.constant 0 : index
    %32 = vector.load %arg7[%c0_12, %c0_13] : memref<4x16xf32, #tpu.memory_space<vmem>>, vector<4x16xf32>
    %cst_14 = arith.constant dense<0.000000e+00> : vector<1024x16xf32>
    %33 = tpu.matmul %31, %32, %cst_14 {dimension_numbers = #tpu.dot_dimension_numbers<[1], [0], [0], [1], [0, 0, 1, 1], [], []>} : vector<1024x4xf32>, vector<4x16xf32>, vector<1024x16xf32> -> vector<1024x16xf32>
    %34 = vector.shape_cast %33 : vector<1024x16xf32> to vector<16x8x8x16xf32>
    %35 = vector.shape_cast %7 : vector<16x8x16xf32> to vector<16x1x8x16xf32>
    %36 = vector.broadcast %35 : vector<16x1x8x16xf32> to vector<16x8x8x16xf32>
    %37 = arith.mulf %34, %36 : vector<16x8x8x16xf32>
    %cst_15 = arith.constant dense<0.000000e+00> : vector<16x8x16xf32>
    %38 = vector.multi_reduction <add>, %37, %cst_15 [2] : vector<16x8x8x16xf32> to vector<16x8x16xf32>
    %39 = vector.shape_cast %38 : vector<16x8x16xf32> to vector<128x16xf32>
    %c0_16 = arith.constant 0 : index
    %c0_17 = arith.constant 0 : index
    %40 = vector.load %arg3[%c0_16, %c0_17] : memref<16x32xf32, #tpu.memory_space<vmem>>, vector<16x32xf32>
    %cst_18 = arith.constant dense<0.000000e+00> : vector<128x32xf32>
    %41 = tpu.matmul %39, %40, %cst_18 {dimension_numbers = #tpu.dot_dimension_numbers<[1], [0], [0], [1], [0, 0, 1, 1], [], []>} : vector<128x16xf32>, vector<16x32xf32>, vector<128x32xf32> -> vector<128x32xf32>
    %c0_19 = arith.constant 0 : index
    %c0_20 = arith.constant 0 : index
    %42 = vector.load %arg4[%c0_19, %c0_20] : memref<1x32xf32, #tpu.memory_space<vmem>>, vector<1x32xf32>
    %43 = vector.broadcast %42 : vector<1x32xf32> to vector<128x32xf32>
    %44 = arith.addf %41, %43 : vector<128x32xf32>
    %45 = vector.shape_cast %44 : vector<128x32xf32> to vector<16x8x32xf32>
    %c0_21 = arith.constant 0 : index
    %c0_22 = arith.constant 0 : index
    %c0_23 = arith.constant 0 : index
    %46 = vector.load %arg8[%c0_21, %c0_22, %c0_23] : memref<16x8x32xf32, #tpu.memory_space<vmem>>, vector<16x8x32xf32>
    tpu.vector_store %arg8[%c0_21, %c0_22, %c0_23], %45 {strides = array<i32>} : memref<16x8x32xf32, #tpu.memory_space<vmem>>, vector<16x8x32xf32>,
    return
  }
  func.func @transform_0(%arg0: i32) -> (i32, i32, i32) {
    %c0_i32 = arith.constant 0 : i32
    %c0_i32_0 = arith.constant 0 : i32
    %c0_i32_1 = arith.constant 0 : i32
    return %arg0, %c0_i32, %c0_i32_0 : i32, i32, i32
  }
  func.func @transform_1(%arg0: i32) -> (i32, i32) {
    %c0_i32 = arith.constant 0 : i32
    %c0_i32_0 = arith.constant 0 : i32
    %c0_i32_1 = arith.constant 0 : i32
    return %c0_i32, %c0_i32_0 : i32, i32
  }
  func.func @transform_2(%arg0: i32) -> (i32, i32) {
    %c0_i32 = arith.constant 0 : i32
    %c0_i32_0 = arith.constant 0 : i32
    %c0_i32_1 = arith.constant 0 : i32
    return %c0_i32, %c0_i32_0 : i32, i32
  }
  func.func @transform_3(%arg0: i32) -> (i32, i32) {
    %c0_i32 = arith.constant 0 : i32
    %c0_i32_0 = arith.constant 0 : i32
    %c0_i32_1 = arith.constant 0 : i32
    return %c0_i32, %c0_i32_0 : i32, i32
  }
  func.func @transform_4(%arg0: i32) -> (i32, i32, i32) {
    %c0_i32 = arith.constant 0 : i32
    %c0_i32_0 = arith.constant 0 : i32
    %c0_i32_1 = arith.constant 0 : i32
    %c0_i32_2 = arith.constant 0 : i32
    return %c0_i32, %c0_i32_0, %c0_i32_1 : i32, i32, i32
  }
  func.func @transform_5(%arg0: i32) -> (i32, i32) {
    %c0_i32 = arith.constant 0 : i32
    %c0_i32_0 = arith.constant 0 : i32
    %c0_i32_1 = arith.constant 0 : i32
    return %c0_i32, %c0_i32_0 : i32, i32
  }
  func.func @transform_6(%arg0: i32) -> (i32, i32) {
    %c0_i32 = arith.constant 0 : i32
    %c0_i32_0 = arith.constant 0 : i32
    %c0_i32_1 = arith.constant 0 : i32
    return %c0_i32, %c0_i32_0 : i32, i32
  }
  func.func @transform_7(%arg0: i32) -> (i32, i32, i32) {
    %c0_i32 = arith.constant 0 : i32
    %c0_i32_0 = arith.constant 0 : i32
    %c0_i32_1 = arith.constant 0 : i32
    return %arg0, %c0_i32, %c0_i32_0 : i32, i32, i32
  }
}

</mosaic_0001>

<bundles_post_ra>
// kernel: tpu_custom_call.1
= control target key start
LH: loop header
LB: loop body
LE: loop exit
PB: predicated region body
PF: predicated region fallthrough
CT: control target
= control target key end

     0   :  { %12 = vsyncpa [#allocation3], 0  ;;  %s10702_s0 = inlined_call_operand.hbm [shape: f32[16,8,32], index: 0, kind: input, shape index: {}]   ;;  %s10703_s1 = inlined_call_operand.vmem [shape: f32[32,48], index: 1, kind: input, shape index: {}]   ;;  %s10704_s2 = inlined_call_operand.vmem [shape: f32[16,32], index: 2, kind: input, shape index: {}]   ;;  %s10705_s3 = inlined_call_operand.vmem [shape: f32[1,32], index: 3, kind: input, shape index: {}]   ;;  %s10706_s4 = inlined_call_operand.vmem [shape: f32[8,8,4], index: 4, kind: input, shape index: {}]   ;;  %s10707_s5 = inlined_call_operand.vmem [shape: f32[16,4], index: 5, kind: input, shape index: {}]   ;;  %s10708_s6 = inlined_call_operand.vmem [shape: f32[4,16], index: 6, kind: input, shape index: {}]   ;;  %s10709_s7 = inlined_call_operand.hbm [shape: f32[16,8,32], index: 7, kind: output, shape index: {}]  }
   0x1   :  { %13 = vsyncpa [#allocation4], 0  ;;  %s18_s26 = sshll.u32 %s10702_s0, 4  ;;  %s7259_s27 = smov [#allocation2]   ;;  %s19_s26 = int_to_ptr.hbm [resolvable:$true] %s18_s26 }
   0x2   :  { %s20_s28 = sshll.u32 %s7259_s27, 4  ;;  %s7260_s29 = smov 128   ;;  %s21_s28 = int_to_ptr.vmem [resolvable:$true] %s20_s28 }
   0x3   :  { %s7261_s30 = smov 8  }
   0x4   :  { %26 = dma.hbm_to_vmem [thread:$0]  %s19_s26, 2048, %s21_s28, [#allocation3], %s7260_s29, %s7260_s29, %s7261_s30  }
   0x5   :  { %7255 = dma.done.wait [#allocation3], 2048  }
   0x6   :  { %7256 = vsyncadd [#allocation3], 4294965248  ;;  %v62_v0 = vld [vmem:[%s10703_s1 + $0x18] sm:$0xff]  ;;  %v61_v1 = vld [vmem:[%s10703_s1 + $0x10] sm:$0xff]  ;;  %vm63_vm0 = vcmask 261120   ;;  %vm739_vm1 = vcmask 130048  }
   0x7   :  { %124 = vmatpush.msra.mxu0 %v62_v0  ;;  %v60_v2 = vld [vmem:[%s10703_s1 + $0x8] sm:$0xff]  ;;  %v59_v3 = vld [vmem:[%s10703_s1] sm:$0xff]  ;;  %v45_v6 = vld [vmem:[#allocation2 + $0x10] sm:$0xff]  ;;  %s7262_s1 = smov 112   ;;  %vm1661_vm2 = vcmask 31744   ;;  %vm4479_vm3 = vcmask 1043456  }
   0x8   :  { %v43_v4 = vld [vmem:[#allocation2] sm:$0xff]  ;;  %v44_v5 = vld [vmem:[#allocation2 + $0x8] sm:$0xff]  ;;  %v46_v7 = vld [vmem:[#allocation2 + $0x18] sm:$0xff]  ;;  %vm6090_vm4 = vcmask 1041409   ;;  %vm6092_vm5 = vcmask 1042434   ;;  %vm6094_vm6 = vcmask 1043459  }
   0x9   :  { %125 = vmatpush.msra.mxu0 %v61_v1  ;;  %v47_v8 = vld [vmem:[#allocation2 + $0x20] sm:$0xff]  ;;  %v48_v9 = vld [vmem:[#allocation2 + $0x28] sm:$0xff]  ;;  %v49_v10 = vld [vmem:[#allocation2 + $0x30] sm:$0xff]  ;;  %vm6096_vm7 = vcmask 1044484   ;;  %vm6098_vm8 = vcmask 1045509   ;;  %vm6100_vm9 = vcmask 1046534  }
   0xa   :  { %v50_v11 = vld [vmem:[#allocation2 + $0x38] sm:$0xff]  ;;  %v51_v12 = vld [vmem:[#allocation2 + $0x40] sm:$0xff]  ;;  %v52_v13 = vld [vmem:[#allocation2 + $0x48] sm:$0xff]  ;;  %vm6102_vm10 = vcmask 1047559   ;;  %s6328_s26 = sshll.u32 %s10709_s7, 4  ;;  %s6329_s26 = int_to_ptr.hbm [resolvable:$true] %s6328_s26 }
   0xb   :  { %126 = vmatpush.msra.mxu0 %v60_v2  ;;  %v53_v14 = vld [vmem:[#allocation2 + $0x50] sm:$0xff]  ;;  %v54_v15 = vld [vmem:[#allocation2 + $0x58] sm:$0xff]  ;;  %v55_v16 = vld [vmem:[#allocation2 + $0x60] sm:$0xff] }
   0xc   :  { %v56_v17 = vld [vmem:[#allocation2 + $0x68] sm:$0xff]  ;;  %v57_v18 = vld [vmem:[#allocation2 + $0x70] sm:$0xff]  ;;  %v58_v19 = vld [vmem:[#allocation2 + $0x78] sm:$0xff] }
   0xd   :  { %127 = vmatpush.msra.mxu0 %v59_v3  ;;  %v738_v31 = vld [vmem:[%s10707_s5 + $0x8] sm:$0xff]  ;;  %v737_v32 = vld [vmem:[%s10707_s5] sm:$0xff]  ;;  %s7263_s5 = smov 96  }
   0xe   :  { %6341 = vmatmul.msk.f32.vlgmr.msra.gmra.mxu0 %vm63_vm0, %v43_v4  ;;  %1138 = vmatpush.msra.mxu1 %v738_v31 }
   0xf   :  { %6630 = vmatpush.msra.mxu3 %v738_v31 }
  0x10   :  { %1139 = vmatpush.msra.mxu1 %v737_v32 }
  0x11   :  { %6631 = vmatpush.msra.mxu3 %v737_v32 }
  0x16   :  { %6342 = vmatmul.msk.f32.gmra.mxu0 %vm63_vm0, %v44_v5 }
  0x1e   :  { %6343 = vmatmul.msk.f32.gmra.mxu0 %vm63_vm0, %v45_v6 }
  0x26   :  { %6344 = vmatmul.msk.f32.gmra.mxu0 %vm63_vm0, %v46_v7 }
  0x2e   :  { %6345 = vmatmul.msk.f32.gmra.mxu0 %vm63_vm0, %v47_v8 }
  0x36   :  { %6346 = vmatmul.msk.f32.gmra.mxu0 %vm63_vm0, %v48_v9 }
  0x3e   :  { %6347 = vmatmul.msk.f32.gmra.mxu0 %vm63_vm0, %v49_v10 }
  0x46   :  { %6348 = vmatmul.msk.f32.gmra.mxu0 %vm63_vm0, %v50_v11 }
  0x4e   :  { %6349 = vmatmul.msk.f32.gmra.mxu0 %vm63_vm0, %v51_v12 }
  0x56   :  { %6350 = vmatmul.msk.f32.gmra.mxu0 %vm63_vm0, %v52_v13 }
  0x5e   :  { %6351 = vmatmul.msk.f32.gmra.mxu0 %vm63_vm0, %v53_v14 }
  0x66   :  { %6352 = vmatmul.msk.f32.gmra.mxu0 %vm63_vm0, %v54_v15 }
  0x6e   :  { %6353 = vmatmul.msk.f32.gmra.mxu0 %vm63_vm0, %v55_v16 }
  0x76   :  { %6354 = vmatmul.msk.f32.gmra.mxu0 %vm63_vm0, %v56_v17 }
  0x7e   :  { %6355 = vmatmul.msk.f32.gmra.mxu0 %vm63_vm0, %v57_v18 }
  0x86   :  { %6356 = vmatmul.msk.f32.gmra.mxu0 %vm63_vm0, %v58_v19 }
  0x8b   :  { %v7339_v20 = vpop.f32.mrf.mxu0 }
  0x8c   :  { %561 = vrot.lane.b32.xlu0 %v7339_v20, %s7262_s1  ;;  %v305_v37 = vperm.slane %v7339_v20, 0  ;;  %v193_v40 = vrot.slane %v7339_v20, 1  ;;  %v194_v44 = vrot.slane %v7339_v20, 2  ;;  %v195_v47 = vrot.slane %v7339_v20, 3 }
  0x8d   :  { %v196_v50 = vrot.slane %v7339_v20, 4  ;;  %v197_v53 = vrot.slane %v7339_v20, 5  ;;  %v198_v56 = vrot.slane %v7339_v20, 6  ;;  %v199_v59 = vrot.slane %v7339_v20, 7 }
  0x8e   :  { %v306_v42 = vperm.slane %v193_v40, 0  ;;  %v307_v45 = vperm.slane %v194_v44, 0  ;;  %v308_v48 = vperm.slane %v195_v47, 0 }
  0x8f   :  { %v309_v51 = vperm.slane %v196_v50, 0  ;;  %v310_v54 = vperm.slane %v197_v53, 0  ;;  %v311_v57 = vperm.slane %v198_v56, 0  ;;  %v312_v61 = vperm.slane %v199_v59, 0 }
  0x93   :  { %v7343_v21 = vpop.f32.mrf.mxu0 }
  0x94   :  { %563 = vrot.lane.b32.xlu0 %v7343_v21, %s7262_s1  ;;  %v313_v0 = vperm.slane %v7343_v21, 0  ;;  %v200_v2 = vrot.slane %v7343_v21, 1  ;;  %v201_v9 = vrot.slane %v7343_v21, 2  ;;  %v202_v15 = vrot.slane %v7343_v21, 3 }
  0x95   :  { %v203_v31 = vrot.slane %v7343_v21, 4  ;;  %v206_v56 = vrot.slane %v7343_v21, 7 }
  0x96   :  { %v314_v4 = vperm.slane %v200_v2, 0  ;;  %v315_v11 = vperm.slane %v201_v9, 0  ;;  %v316_v17 = vperm.slane %v202_v15, 0 }
  0x9b   :  { %v7347_v22 = vpop.f32.mrf.mxu0 }
  0x9c   :  { %565 = vrot.lane.b32.xlu1 %v7347_v22, %s7262_s1  ;;  %v321_v2 = vperm.slane %v7347_v22, 0 }
  0xa3   :  { %v7351_v23 = vpop.f32.mrf.mxu0 }
  0xa4   :  { %567 = vrot.lane.b32.xlu1 %v7351_v23, %s7262_s1 }
  0xab   :  { %v7355_v24 = vpop.f32.mrf.mxu0 }
  0xac   :  { %569 = vrot.lane.b32.xlu2 %v7355_v24, %s7262_s1 }
  0xb3   :  { %v7359_v25 = vpop.f32.mrf.mxu0 }
  0xb4   :  { %571 = vrot.lane.b32.xlu2 %v7359_v25, %s7262_s1 }
  0xbb   :  { %v7363_v26 = vpop.f32.mrf.mxu0 }
  0xbc   :  { %573 = vrot.lane.b32.xlu0 %v7363_v26, %s7262_s1 }
  0xc3   :  { %v7367_v27 = vpop.f32.mrf.mxu0 }
  0xc4   :  { %575 = vrot.lane.b32.xlu1 %v7367_v27, %s7262_s1 }
  0xcb   :  { %v7371_v28 = vpop.f32.mrf.mxu0 }
  0xcc   :  { %577 = vrot.lane.b32.xlu2 %v7371_v28, %s7262_s1 }
  0xd3   :  { %v7375_v29 = vpop.f32.mrf.mxu0 }
  0xd4   :  { %579 = vrot.lane.b32.xlu0 %v7375_v29, %s7262_s1  ;;  %v377_v3 = vperm.slane %v7375_v29, 0  ;;  %v256_v5 = vrot.slane %v7375_v29, 1  ;;  %v257_v13 = vrot.slane %v7375_v29, 2  ;;  %v258_v19 = vrot.slane %v7375_v29, 3 }
  0xd5   :  { %v261_v53 = vrot.slane %v7375_v29, 6 }
  0xd6   :  { %v378_v10 = vperm.slane %v256_v5, 0  ;;  %v379_v16 = vperm.slane %v257_v13, 0  ;;  %v380_v32 = vperm.slane %v258_v19, 0  ;;  %v207_v5 = vrot.slane %v7347_v22, 1 }
  0xd7   :  { %v208_v19 = vrot.slane %v7347_v22, 2 }
  0xdb   :  { %v7379_v30 = vpop.f32.mrf.mxu0 }
  0xdc   :  { %581 = vrot.lane.b32.xlu1 %v7379_v30, %s7262_s1 }
  0xe3   :  { %v7389_v33 = vpop.f32.mrf.mxu0 }
  0xe4   :  { %583 = vrot.lane.b32.xlu2 %v7389_v33, %s7262_s1 }
  0xeb   :  { %v7393_v34 = vpop.f32.mrf.mxu0 }
  0xec   :  { %585 = vrot.lane.b32.xlu0 %v7393_v34, %s7262_s1 }
  0xf3   :  { %v7397_v35 = vpop.f32.mrf.mxu0 }
  0xf4   :  { %587 = vrot.lane.b32.xlu1 %v7397_v35, %s7262_s1 }
  0xfb   :  { %v7401_v36 = vpop.f32.mrf.mxu0 }
  0xfc   :  { %4884 = vrot.lane.b32.xlu1 %v7339_v20, %s7263_s5  ;;  %589 = vrot.lane.b32.xlu2 %v7401_v36, %s7262_s1 }
  0xfe   :  { %v562_v38 = vpop.permute.xlu0 %561 }
  0xff   :  { %v609_v39 = vmul.f32 %v562_v38, %v305_v37  ;;  %v610_v43 = vmul.f32 %v562_v38, %v306_v42  ;;  %v611_v46 = vmul.f32 %v562_v38, %v307_v45  ;;  %v612_v49 = vmul.f32 %v562_v38, %v308_v48 }
 0x100   :  { %v613_v52 = vmul.f32 %v562_v38, %v309_v51  ;;  %v614_v55 = vmul.f32 %v562_v38, %v310_v54  ;;  %v615_v58 = vmul.f32 %v562_v38, %v311_v57  ;;  %v616_v62 = vmul.f32 %v562_v38, %v312_v61 }
 0x101   :  { %6357 = vmatmul.msk.f32.vlgmr.msra.gmra.mxu1 %vm739_vm1, %v609_v39  ;;  %v317_v37 = vperm.slane %v203_v31, 0  ;;  %v259_v39 = vrot.slane %v7375_v29, 4  ;;  %v204_v42 = vrot.slane %v7343_v21, 5  ;;  %v383_v57 = vperm.slane %v261_v53, 0 }
 0x102   :  { %v262_v61 = vrot.slane %v7375_v29, 7  ;;  %v209_v53 = vrot.slane %v7347_v22, 3 }
 0x103   :  { %v7410_v41 = vpop.f32.mrf.mxu0  ;;  %v318_v44 = vperm.slane %v204_v42, 0 }
 0x104   :  { %4886 = vrot.lane.b32.xlu2 %v7343_v21, %s7263_s5  ;;  %591 = vrot.lane.b32.xlu0 %v7410_v41, %s7262_s1 }
 0x105   :  { %4890 = vrot.lane.b32.xlu1 %v7351_v23, %s7263_s5 }
 0x106   :  { %v7456_v60 = vpop.permute.xlu0 %563 }
 0x107   :  { %v617_v1 = vmul.f32 %v7456_v60, %v313_v0  ;;  %v618_v7 = vmul.f32 %v7456_v60, %v314_v4  ;;  %v619_v14 = vmul.f32 %v7456_v60, %v315_v11  ;;  %v620_v20 = vmul.f32 %v7456_v60, %v316_v17 }
 0x108   :  { %v621_v40 = vmul.f32 %v7456_v60, %v317_v37  ;;  %v622_v47 = vmul.f32 %v7456_v60, %v318_v44  ;;  %v384_v0 = vperm.slane %v262_v61, 0 }
 0x109   :  { %6358 = vmatmul.msk.f32.gmra.mxu1 %vm739_vm1, %v610_v43  ;;  %v381_v43 = vperm.slane %v259_v39, 0  ;;  %v323_v39 = vperm.slane %v208_v19, 0 }
 0x10c   :  { %4888 = vrot.lane.b32.xlu0 %v7347_v22, %s7263_s5  ;;  %4892 = vrot.lane.b32.xlu2 %v7355_v24, %s7263_s5 }
 0x10d   :  { %4896 = vrot.lane.b32.xlu1 %v7363_v26, %s7263_s5 }
 0x10e   :  { %v7488_v48 = vpop.permute.xlu1 %565 }
 0x111   :  { %6359 = vmatmul.msk.f32.gmra.mxu1 %vm739_vm1, %v611_v46  ;;  %v260_v46 = vrot.slane %v7375_v29, 5 }
 0x113   :  { %v382_v50 = vperm.slane %v260_v46, 0 }
 0x114   :  { %4894 = vrot.lane.b32.xlu0 %v7359_v25, %s7263_s5  ;;  %4898 = vrot.lane.b32.xlu2 %v7367_v27, %s7263_s5 }
 0x115   :  { %4902 = vrot.lane.b32.xlu1 %v7375_v29, %s7263_s5 }
 0x119   :  { %6360 = vmatmul.msk.f32.gmra.mxu1 %vm739_vm1, %v612_v49  ;;  %v205_v49 = vrot.slane %v7343_v21, 6  ;;  %v7510_v21 = vld [vmem:[%s10706_s4] sm:$0xff] }
 0x11b   :  { %v319_v51 = vperm.slane %v205_v49, 0 }
 0x11c   :  { %4900 = vrot.lane.b32.xlu0 %v7371_v28, %s7263_s5  ;;  %4904 = vrot.lane.b32.xlu2 %v7379_v30, %s7263_s5 }
 0x11d   :  { %4908 = vrot.lane.b32.xlu1 %v7393_v34, %s7263_s5  ;;  %v623_v54 = vmul.f32 %v7456_v60, %v319_v51 }
 0x121   :  { %6361 = vmatmul.msk.f32.gmra.mxu1 %vm739_vm1, %v613_v52 }
 0x124   :  { %4906 = vrot.lane.b32.xlu0 %v7389_v33, %s7263_s5  ;;  %4910 = vrot.lane.b32.xlu2 %v7397_v35, %s7263_s5 }
 0x125   :  { %4914 = vrot.lane.b32.xlu1 %v7410_v41, %s7263_s5 }
 0x129   :  { %6362 = vmatmul.msk.f32.gmra.mxu1 %vm739_vm1, %v614_v55  ;;  %v7495_v55 = vpop.permute.xlu1 %567 }
 0x12c   :  { %4912 = vrot.lane.b32.xlu0 %v7401_v36, %s7263_s5 }
 0x12e   :  { %v7459_v63 = vpop.permute.xlu0 %573 }
 0x131   :  { %6363 = vmatmul.msk.f32.gmra.mxu1 %vm739_vm1, %v615_v58  ;;  %v320_v58 = vperm.slane %v206_v56, 0 }
 0x139   :  { %6364 = vmatmul.msk.f32.gmra.mxu1 %vm739_vm1, %v616_v62  ;;  %v624_v62 = vmul.f32 %v7456_v60, %v320_v58  ;;  %v625_v60 = vmul.f32 %v7488_v48, %v321_v2 }
 0x141   :  { %6365 = vmatmul.msk.f32.gmra.mxu1 %vm739_vm1, %v617_v1  ;;  %v7504_v1 = vpop.permute.xlu1 %575 }
 0x146   :  { %v580_v6 = vpop.permute.xlu0 %579 }
 0x147   :  { %v681_v8 = vmul.f32 %v580_v6, %v377_v3  ;;  %v682_v12 = vmul.f32 %v580_v6, %v378_v10  ;;  %v683_v18 = vmul.f32 %v580_v6, %v379_v16  ;;  %v684_v38 = vmul.f32 %v580_v6, %v380_v32 }
 0x148   :  { %v685_v45 = vmul.f32 %v580_v6, %v381_v43  ;;  %v686_v52 = vmul.f32 %v580_v6, %v382_v50  ;;  %v687_v59 = vmul.f32 %v580_v6, %v383_v57  ;;  %v688_v3 = vmul.f32 %v580_v6, %v384_v0  ;;  %v7537_v43 = vld [vmem:[%s10706_s4 + $0x10] sm:$0xff]  ;;  %v4094_v50 = vld [vmem:[%s10708_s6] sm:$0xf] }
 0x149   :  { %6366 = vmatmul.msk.f32.gmra.mxu1 %vm739_vm1, %v618_v7  ;;  %6429 = vmatmul.msk.f32.vlgmr.msra.gmra.mxu3 %vm739_vm1, %v681_v8  ;;  %v385_v8 = vperm.slane %v7379_v30, 0  ;;  %v322_v10 = vperm.slane %v207_v5, 0 }
 0x14a   :  { %6485 = vmatpush.msk.msrb.mxu0 %vm4479_vm3, %v4094_v50  ;;  %6632 = vmatpush.msk.msra.mxu2 %vm4479_vm3, %v4094_v50 }
 0x14e   :  { %v7519_v11 = vpop.permute.xlu1 %581 }
 0x14f   :  { %v689_v13 = vmul.f32 %v7519_v11, %v385_v8 }
 0x151   :  { %6367 = vmatmul.msk.f32.gmra.mxu1 %vm739_vm1, %v619_v14  ;;  %6430 = vmatmul.msk.f32.gmra.mxu3 %vm739_vm1, %v682_v12  ;;  %v7524_v12 = vld [vmem:[%s10706_s4 + $0x8] sm:$0xff]  ;;  %v263_v14 = vrot.slane %v7379_v30, 1 }
 0x153   :  { %v386_v32 = vperm.slane %v263_v14, 0 }
 0x155   :  { %v690_v44 = vmul.f32 %v7519_v11, %v386_v32 }
 0x159   :  { %6368 = vmatmul.msk.f32.gmra.mxu1 %vm739_vm1, %v620_v20  ;;  %6431 = vmatmul.msk.f32.gmra.mxu3 %vm739_vm1, %v683_v18  ;;  %v626_v18 = vmul.f32 %v7488_v48, %v322_v10  ;;  %v210_v10 = vrot.slane %v7347_v22, 4 }
 0x161   :  { %6369 = vmatmul.msk.f32.gmra.mxu1 %vm739_vm1, %v621_v40  ;;  %6432 = vmatmul.msk.f32.gmra.mxu3 %vm739_vm1, %v684_v38 }
 0x169   :  { %6370 = vmatmul.msk.f32.gmra.mxu1 %vm739_vm1, %v622_v47  ;;  %6433 = vmatmul.msk.f32.gmra.mxu3 %vm739_vm1, %v685_v45  ;;  %v264_v45 = vrot.slane %v7379_v30, 2 }
 0x16b   :  { %v387_v58 = vperm.slane %v264_v45, 0 }
 0x171   :  { %6371 = vmatmul.msk.f32.gmra.mxu1 %vm739_vm1, %v623_v54  ;;  %6434 = vmatmul.msk.f32.gmra.mxu3 %vm739_vm1, %v686_v52  ;;  %v627_v52 = vmul.f32 %v7488_v48, %v323_v39  ;;  %v7570_v39 = vld [vmem:[%s10706_s4 + $0x20] sm:$0xff] }
 0x179   :  { %6372 = vmatmul.msk.f32.gmra.mxu1 %vm739_vm1, %v624_v62  ;;  %6435 = vmatmul.msk.f32.gmra.mxu3 %vm739_vm1, %v687_v59  ;;  %v324_v62 = vperm.slane %v209_v53, 0 }
 0x17e   :  { %v1141_v4 = vpop.f32.mrf.mxu1 }
 0x17f   :  { %v1533_v29 = vadd.f32 %v7510_v21, %v1141_v4  ;;  %v691_v4 = vmul.f32 %v7519_v11, %v387_v58 }
 0x181   :  { %v1662_v7 = vsel %vm1661_vm2, %v1533_v29, -inf  ;;  %6373 = vmatmul.msk.f32.gmra.mxu1 %vm739_vm1, %v625_v60  ;;  %6436 = vmatmul.msk.f32.gmra.mxu3 %vm739_vm1, %v688_v3  ;;  %v7553_v3 = vld [vmem:[%s10706_s4 + $0x18] sm:$0xff] }
 0x182   :  { %v1663_v9 = vrot.slane %v1662_v7, 4 }
 0x184   :  { %v1664_v6 = vmax.f32 %v1662_v7, %v1663_v9  ;;  %v628_v9 = vmul.f32 %v7488_v48, %v324_v62 }
 0x186   :  { %v1665_v15 = vrot.slane %v1664_v6, 2  ;;  %v1144_v16 = vpop.f32.mrf.mxu1 }
 0x187   :  { %v1534_v17 = vadd.f32 %v7524_v12, %v1144_v16 }
 0x188   :  { %v1666_v20 = vmax.f32 %v1664_v6, %v1665_v15 }
 0x189   :  { %v1669_v31 = vsel %vm1661_vm2, %v1534_v17, -inf  ;;  %6374 = vmatmul.msk.f32.gmra.mxu1 %vm739_vm1, %v626_v18  ;;  %6437 = vmatmul.msk.f32.gmra.mxu3 %vm739_vm1, %v689_v13 }
 0x18a   :  { %v1667_v37 = vrot.slane %v1666_v20, 1  ;;  %v1670_v38 = vrot.slane %v1669_v31, 4 }
 0x18c   :  { %v1668_v40 = vmax.f32 %v1666_v20, %v1667_v37  ;;  %v1671_v42 = vmax.f32 %v1669_v31, %v1670_v38  ;;  %v325_v31 = vperm.slane %v210_v10, 0 }
 0x18e   :  { %v2558_v46 = vsub.f32 %v1533_v29, %v1668_v40  ;;  %v1672_v47 = vrot.slane %v1671_v42, 2  ;;  %v1147_v49 = vpop.f32.mrf.mxu1  ;;  %v265_v29 = vrot.slane %v7379_v30, 3  ;;  %v629_v50 = vmul.f32 %v7488_v48, %v325_v31 }
 0x18f   :  { %v1535_v51 = vadd.f32 %v7537_v43, %v1147_v49  ;;  %v212_v31 = vrot.slane %v7347_v22, 6 }
 0x190   :  { %v2686_v54 = vmul.f32 1.442695, %v2558_v46  ;;  %v1673_v56 = vmax.f32 %v1671_v42, %v1672_v47  ;;  %v266_v42 = vrot.slane %v7379_v30, 4 }
 0x191   :  { %v1676_v57 = vsel %vm1661_vm2, %v1535_v51, -inf  ;;  %6375 = vmatmul.msk.f32.gmra.mxu1 %vm739_vm1, %v627_v52  ;;  %6438 = vmatmul.msk.f32.gmra.mxu3 %vm739_vm1, %v690_v44  ;;  %v211_v52 = vrot.slane %v7347_v22, 5 }
 0x192   :  { %6640 = vpow2.f32 %v2686_v54  ;;  %v1674_v59 = vrot.slane %v1673_v56, 1  ;;  %v1677_v61 = vrot.slane %v1676_v57, 4 }
 0x194   :  { %v1675_v0 = vmax.f32 %v1673_v56, %v1674_v59  ;;  %v1678_v2 = vmax.f32 %v1676_v57, %v1677_v61  ;;  %v389_v59 = vperm.slane %v266_v42, 0 }
 0x196   :  { %v2559_v60 = vsub.f32 %v1534_v17, %v1675_v0  ;;  %v1679_v5 = vrot.slane %v1678_v2, 2  ;;  %v1150_v7 = vpop.f32.mrf.mxu1  ;;  %v388_v17 = vperm.slane %v265_v29, 0  ;;  %v693_v10 = vmul.f32 %v7519_v11, %v389_v59 }
 0x197   :  { %v1536_v8 = vadd.f32 %v7553_v3, %v1150_v7 }
 0x198   :  { %v7560_v6 = vpop.eup %6640  ;;  %v2688_v13 = vmul.f32 1.442695, %v2559_v60  ;;  %v1680_v14 = vmax.f32 %v1678_v2, %v1679_v5  ;;  %v692_v40 = vmul.f32 %v7519_v11, %v388_v17  ;;  %v7590_v5 = vld [vmem:[%s10706_s4 + $0x28] sm:$0xff] }
 0x199   :  { %v2942_v15 = vsel %vm1661_vm2, %v7560_v6, 0.0  ;;  %v1683_v16 = vsel %vm1661_vm2, %v1536_v8, -inf  ;;  %6376 = vmatmul.msk.f32.gmra.mxu1 %vm739_vm1, %v628_v9  ;;  %6439 = vmatmul.msk.f32.gmra.mxu3 %vm739_vm1, %v691_v4  ;;  %v326_v4 = vperm.slane %v211_v52, 0  ;;  %v327_v52 = vperm.slane %v212_v31, 0 }
 0x19a   :  { %v2943_v18 = vrot.slane %v2942_v15, 4  ;;  %6642 = vpow2.f32 %v2688_v13  ;;  %v1681_v19 = vrot.slane %v1680_v14, 1  ;;  %v1684_v20 = vrot.slane %v1683_v16, 4 }
 0x19b   :  { %v267_v13 = vrot.slane %v7379_v30, 5 }
 0x19c   :  { %v2944_v32 = vadd.f32 %v2943_v18, %v2942_v15  ;;  %v1682_v37 = vmax.f32 %v1680_v14, %v1681_v19  ;;  %v1685_v38 = vmax.f32 %v1683_v16, %v1684_v20  ;;  %v7594_v14 = vpop.permute.xlu2 %569  ;;  %v630_v20 = vmul.f32 %v7488_v48, %v326_v4 }
 0x19e   :  { %v2945_v44 = vrot.slane %v2944_v32, 2  ;;  %v2560_v45 = vsub.f32 %v1535_v51, %v1682_v37  ;;  %v1686_v46 = vrot.slane %v1685_v38, 2  ;;  %v1153_v47 = vpop.f32.mrf.mxu1 }
 0x19f   :  { %v7575_v49 = vadd.f32 %v7570_v39, %v1153_v47 }
 0x1a0   :  { %v7579_v53 = vpop.eup %6642  ;;  %v2946_v54 = vadd.f32 %v2945_v44, %v2944_v32  ;;  %v2690_v56 = vmul.f32 1.442695, %v2560_v45  ;;  %v1687_v57 = vmax.f32 %v1685_v38, %v1686_v46  ;;  %v390_v44 = vperm.slane %v267_v13, 0 }
 0x1a1   :  { %v2949_v58 = vsel %vm1661_vm2, %v7579_v53, 0.0  ;;  %v1690_v51 = vsel %vm1661_vm2, %v7575_v49, -inf  ;;  %6377 = vmatmul.msk.f32.gmra.mxu1 %vm739_vm1, %v629_v50  ;;  %6440 = vmatmul.msk.f32.gmra.mxu3 %vm739_vm1, %v692_v40 }
 0x1a2   :  { %v2947_v61 = vrot.slane %v2946_v54, 1  ;;  %v2950_v62 = vrot.slane %v2949_v58, 4  ;;  %6644 = vpow2.f32 %v2690_v56  ;;  %v1688_v0 = vrot.slane %v1687_v57, 1 }
 0x1a3   :  { %v1691_v2 = vrot.slane %v1690_v51, 4 }
 0x1a4   :  { %v2951_v29 = vadd.f32 %v2950_v62, %v2949_v58  ;;  %v1689_v60 = vmax.f32 %v1687_v57, %v1688_v0  ;;  %v2948_v7 = vadd.f32 %v2947_v61, %v2946_v54  ;;  %v7612_v58 = vld [vmem:[%s10706_s4 + $0x30] sm:$0xff]  ;;  %v694_v62 = vmul.f32 %v7519_v11, %v390_v44  ;;  %v7626_v13 = vpop.permute.xlu2 %571 }
 0x1a5   :  { %v1692_v9 = vmax.f32 %v1690_v51, %v1691_v2  ;;  %v268_v0 = vrot.slane %v7379_v30, 6 }
 0x1a6   :  { %v2952_v15 = vrot.slane %v2951_v29, 2  ;;  %v2561_v16 = vsub.f32 %v1536_v8, %v1689_v60  ;;  %v1156_v17 = vpop.f32.mrf.mxu1  ;;  %6646 = vrcp.f32 %v2948_v7 }
 0x1a7   :  { %v1693_v18 = vrot.slane %v1692_v9, 2  ;;  %v7597_v19 = vadd.f32 %v7590_v5, %v1156_v17 }
 0x1a8   :  { %v7601_v32 = vpop.eup %6644  ;;  %v2692_v37 = vmul.f32 1.442695, %v2561_v16  ;;  %v2953_v38 = vadd.f32 %v2952_v15, %v2951_v29 }
 0x1a9   :  { %v2956_v40 = vsel %vm1661_vm2, %v7601_v32, 0.0  ;;  %v1694_v42 = vmax.f32 %v1692_v9, %v1693_v18  ;;  %v1697_v8 = vsel %vm1661_vm2, %v7597_v19, -inf  ;;  %6378 = vmatmul.msk.f32.gmra.mxu1 %vm739_vm1, %v630_v20  ;;  %6441 = vmatmul.msk.f32.gmra.mxu3 %vm739_vm1, %v693_v10  ;;  %v631_v9 = vmul.f32 %v7488_v48, %v327_v52 }
 0x1aa   :  { %v2957_v45 = vrot.slane %v2956_v40, 4  ;;  %6648 = vpow2.f32 %v2692_v37  ;;  %v1698_v46 = vrot.slane %v1697_v8, 4  ;;  %v2954_v47 = vrot.slane %v2953_v38, 1 }
 0x1ab   :  { %v1695_v50 = vrot.slane %v1694_v42, 1  ;;  %v213_v10 = vrot.slane %v7347_v22, 7  ;;  %v391_v20 = vperm.slane %v268_v0, 0 }
 0x1ac   :  { %v6647_v54 = vpop.eup %6646  ;;  %v2958_v56 = vadd.f32 %v2957_v45, %v2956_v40  ;;  %v1699_v57 = vmax.f32 %v1697_v8, %v1698_v46  ;;  %v2955_v51 = vadd.f32 %v2954_v47, %v2953_v38  ;;  %v7637_v46 = vld [vmem:[%s10706_s4 + $0x38] sm:$0xff] }
 0x1ad   :  { %v1696_v59 = vmax.f32 %v1694_v42, %v1695_v50  ;;  %v3966_v61 = vmul.f32 %v6647_v54, %v7560_v6  ;;  %v328_v40 = vperm.slane %v213_v10, 0  ;;  %v695_v52 = vmul.f32 %v7519_v11, %v391_v20 }
 0x1ae   :  { %v2959_v2 = vrot.slane %v2958_v56, 2  ;;  %v1700_v4 = vrot.slane %v1699_v57, 2  ;;  %v1159_v29 = vpop.f32.mrf.mxu1  ;;  %6650 = vrcp.f32 %v2955_v51  ;;  %v269_v54 = vrot.slane %v7379_v30, 7 }
 0x1af   :  { %v2562_v60 = vsub.f32 %v7575_v49, %v1696_v59  ;;  %v7619_v7 = vadd.f32 %v7612_v58, %v1159_v29  ;;  %6486 = vmatmul.msk.f32.vlgmr.msrb.gmra.mxu0 %vm1661_vm2, %v3966_v61  ;;  %v7654_v29 = vpop.permute.xlu2 %577 }
 0x1b0   :  { %v7624_v6 = vpop.eup %6648  ;;  %v1701_v15 = vmax.f32 %v1699_v57, %v1700_v4  ;;  %v2960_v16 = vadd.f32 %v2959_v2, %v2958_v56 }
 0x1b1   :  { %v2963_v17 = vsel %vm1661_vm2, %v7624_v6, 0.0  ;;  %v2694_v18 = vmul.f32 1.442695, %v2562_v60  ;;  %v1704_v49 = vsel %vm1661_vm2, %v7619_v7, -inf  ;;  %6379 = vmatmul.msk.f32.gmra.mxu1 %vm739_vm1, %v631_v9  ;;  %6442 = vmatmul.msk.f32.gmra.mxu3 %vm739_vm1, %v694_v62  ;;  %v632_v62 = vmul.f32 %v7488_v48, %v328_v40 }
 0x1b2   :  { %v2964_v31 = vrot.slane %v2963_v17, 4  ;;  %v1702_v22 = vrot.slane %v1701_v15, 1  ;;  %v1705_v37 = vrot.slane %v1704_v49, 4  ;;  %v2961_v38 = vrot.slane %v2960_v16, 1 }
 0x1b3   :  { %6652 = vpow2.f32 %v2694_v18 }
 0x1b4   :  { %v6651_v42 = vpop.eup %6650  ;;  %v2965_v8 = vadd.f32 %v2964_v31, %v2963_v17  ;;  %v1703_v44 = vmax.f32 %v1701_v15, %v1702_v22  ;;  %v1706_v45 = vmax.f32 %v1704_v49, %v1705_v37  ;;  %v2962_v47 = vadd.f32 %v2961_v38, %v2960_v16 }
 0x1b5   :  { %v3967_v50 = vmul.f32 %v6651_v42, %v7579_v53  ;;  %v329_v15 = vperm.slane %v7351_v23, 0 }
 0x1b6   :  { %v2966_v56 = vrot.slane %v2965_v8, 2  ;;  %v2563_v57 = vsub.f32 %v7597_v19, %v1703_v44  ;;  %v1707_v51 = vrot.slane %v1706_v45, 2  ;;  %v1162_v59 = vpop.f32.mrf.mxu1  ;;  %6654 = vrcp.f32 %v2962_v47 }
 0x1b7   :  { %v7644_v61 = vadd.f32 %v7637_v46, %v1162_v59  ;;  %6487 = vmatmul.msk.f32.gmra.mxu0 %vm1661_vm2, %v3967_v50  ;;  %v392_v19 = vperm.slane %v269_v54, 0  ;;  %v633_v47 = vmul.f32 %v7495_v55, %v329_v15  ;;  %v393_v54 = vperm.slane %v7389_v33, 0 }
 0x1b8   :  { %v2696_v0 = vmul.f32 1.442695, %v2563_v57  ;;  %v1708_v2 = vmax.f32 %v1706_v45, %v1707_v51  ;;  %v2967_v53 = vadd.f32 %v2966_v56, %v2965_v8  ;;  %v214_v8 = vrot.slane %v7351_v23, 1 }
 0x1b9   :  { %v7648_v4 = vpop.eup %6652  ;;  %v1711_v30 = vsel %vm1661_vm2, %v7644_v61, -inf  ;;  %6380 = vmatmul.msk.f32.gmra.mxu1 %vm739_vm1, %v632_v62  ;;  %6443 = vmatmul.msk.f32.gmra.mxu3 %vm739_vm1, %v695_v52  ;;  %v696_v22 = vmul.f32 %v7519_v11, %v392_v19 }
 0x1ba   :  { %v2970_v60 = vsel %vm1661_vm2, %v7648_v4, 0.0  ;;  %6656 = vpow2.f32 %v2696_v0  ;;  %v1709_v48 = vrot.slane %v1708_v2, 1  ;;  %v1712_v9 = vrot.slane %v1711_v30, 4 }
 0x1bb   :  { %v2971_v10 = vrot.slane %v2970_v60, 4  ;;  %v2968_v16 = vrot.slane %v2967_v53, 1  ;;  %v330_v62 = vperm.slane %v214_v8, 0 }
 0x1bc   :  { %v6655_v17 = vpop.eup %6654  ;;  %v1710_v18 = vmax.f32 %v1708_v2, %v1709_v48  ;;  %v1713_v49 = vmax.f32 %v1711_v30, %v1712_v9  ;;  %v7677_v2 = vpop.permute.xlu2 %583 }
 0x1bd   :  { %v2972_v20 = vadd.f32 %v2971_v10, %v2970_v60  ;;  %v3968_v31 = vmul.f32 %v6655_v17, %v7601_v32  ;;  %v2969_v37 = vadd.f32 %v2968_v16, %v2967_v53  ;;  %v697_v48 = vmul.f32 %v7677_v2, %v393_v54 }
 0x1be   :  { %v2564_v38 = vsub.f32 %v7619_v7, %v1710_v18  ;;  %v1714_v40 = vrot.slane %v1713_v49, 2  ;;  %v1165_v42 = vpop.f32.mrf.mxu1  ;;  %v270_v10 = vrot.slane %v7389_v33, 1 }
 0x1bf   :  { %v2973_v44 = vrot.slane %v2972_v20, 2  ;;  %v7664_v45 = vadd.f32 %v7510_v21, %v1165_v42  ;;  %6488 = vmatmul.msk.f32.gmra.mxu0 %vm1661_vm2, %v3968_v31  ;;  %6658 = vrcp.f32 %v2969_v37  ;;  %v634_v31 = vmul.f32 %v7495_v55, %v330_v62 }
 0x1c0   :  { %v7668_v50 = vpop.eup %6656  ;;  %v2698_v32 = vmul.f32 1.442695, %v2564_v38  ;;  %v1715_v11 = vmax.f32 %v1713_v49, %v1714_v40  ;;  %v394_v8 = vperm.slane %v270_v10, 0  ;;  %v271_v62 = vrot.slane %v7389_v33, 2 }
 0x1c1   :  { %v2977_v7 = vsel %vm1661_vm2, %v7668_v50, 0.0  ;;  %v1718_v52 = vsel %vm1661_vm2, %v7664_v45, -inf  ;;  %6381 = vmatmul.msk.f32.gmra.mxu1 %vm739_vm1, %v633_v47  ;;  %6444 = vmatmul.msk.f32.gmra.mxu3 %vm739_vm1, %v696_v22  ;;  %v2974_v56 = vadd.f32 %v2973_v44, %v2972_v20  ;;  %v215_v22 = vrot.slane %v7351_v23, 2 }
 0x1c2   :  { %v2978_v57 = vrot.slane %v2977_v7, 4  ;;  %6660 = vpow2.f32 %v2698_v32  ;;  %v1716_v51 = vrot.slane %v1715_v11, 1  ;;  %v1719_v59 = vrot.slane %v1718_v52, 4 }
 0x1c3   :  { %v2975_v0 = vrot.slane %v2974_v56, 1  ;;  %v216_v10 = vrot.slane %v7351_v23, 3 }
 0x1c4   :  { %v2979_v53 = vadd.f32 %v2978_v57, %v2977_v7  ;;  %v1717_v30 = vmax.f32 %v1715_v11, %v1716_v51  ;;  %v1720_v19 = vmax.f32 %v1718_v52, %v1719_v59  ;;  %v331_v11 = vperm.slane %v215_v22, 0 }
 0x1c5   :  { %v6659_v60 = vpop.eup %6658  ;;  %v2976_v9 = vadd.f32 %v2975_v0, %v2974_v56  ;;  %v698_v51 = vmul.f32 %v7677_v2, %v394_v8 }
 0x1c6   :  { %v2980_v15 = vrot.slane %v2979_v53, 2  ;;  %v2565_v16 = vsub.f32 %v7644_v61, %v1717_v30  ;;  %v1721_v17 = vrot.slane %v1720_v19, 2  ;;  %v1168_v18 = vpop.f32.mrf.mxu1  ;;  %v3969_v49 = vmul.f32 %v6659_v60, %v7624_v6 }
 0x1c7   :  { %v7684_v20 = vadd.f32 %v7524_v12, %v1168_v18  ;;  %6662 = vrcp.f32 %v2976_v9  ;;  %v635_v9 = vmul.f32 %v7495_v55, %v331_v11  ;;  %v272_v11 = vrot.slane %v7389_v33, 3 }
 0x1c8   :  { %v7688_v37 = vpop.eup %6660  ;;  %v2700_v38 = vmul.f32 1.442695, %v2565_v16  ;;  %v1722_v40 = vmax.f32 %v1720_v19, %v1721_v17  ;;  %6489 = vmatmul.msk.f32.gmra.mxu0 %vm1661_vm2, %v3969_v49  ;;  %v2981_v42 = vadd.f32 %v2980_v15, %v2979_v53  ;;  %v395_v49 = vperm.slane %v271_v62, 0 }
 0x1c9   :  { %v2984_v61 = vsel %vm1661_vm2, %v7688_v37, 0.0  ;;  %v1725_v6 = vsel %vm1661_vm2, %v7684_v20, -inf  ;;  %6382 = vmatmul.msk.f32.gmra.mxu1 %vm739_vm1, %v634_v31  ;;  %6445 = vmatmul.msk.f32.gmra.mxu3 %vm739_vm1, %v697_v48 }
 0x1ca   :  { %v2985_v44 = vrot.slane %v2984_v61, 4  ;;  %6664 = vpow2.f32 %v2700_v38  ;;  %v1723_v47 = vrot.slane %v1722_v40, 1  ;;  %v1726_v32 = vrot.slane %v1725_v6, 4 }
 0x1cb   :  { %v2982_v7 = vrot.slane %v2981_v42, 1 }
 0x1cc   :  { %v2986_v52 = vadd.f32 %v2985_v44, %v2984_v61  ;;  %v1724_v54 = vmax.f32 %v1722_v40, %v1723_v47  ;;  %v1727_v56 = vmax.f32 %v1725_v6, %v1726_v32  ;;  %v332_v40 = vperm.slane %v216_v10, 0 }
 0x1cd   :  { %v6663_v57 = vpop.eup %6662  ;;  %v2983_v59 = vadd.f32 %v2982_v7, %v2981_v42  ;;  %v699_v47 = vmul.f32 %v7677_v2, %v395_v49 }
 0x1ce   :  { %v2987_v0 = vrot.slane %v2986_v52, 2  ;;  %v2566_v53 = vsub.f32 %v7664_v45, %v1724_v54  ;;  %v1728_v30 = vrot.slane %v1727_v56, 2  ;;  %v1171_v19 = vpop.f32.mrf.mxu1  ;;  %v3970_v60 = vmul.f32 %v6663_v57, %v7648_v4 }
 0x1cf   :  { %v7702_v48 = vadd.f32 %v7537_v43, %v1171_v19  ;;  %6666 = vrcp.f32 %v2983_v59  ;;  %v217_v57 = vrot.slane %v7351_v23, 4  ;;  %v636_v62 = vmul.f32 %v7495_v55, %v332_v40 }
 0x1d0   :  { %v7706_v15 = vpop.eup %6664  ;;  %v2702_v16 = vmul.f32 1.442695, %v2566_v53  ;;  %v1729_v17 = vmax.f32 %v1727_v56, %v1728_v30  ;;  %6490 = vmatmul.msk.f32.gmra.mxu0 %vm1661_vm2, %v3970_v60  ;;  %v2988_v18 = vadd.f32 %v2987_v0, %v2986_v52  ;;  %v396_v60 = vperm.slane %v272_v11, 0 }
 0x1d1   :  { %v2991_v45 = vsel %vm1661_vm2, %v7706_v15, 0.0  ;;  %v1732_v4 = vsel %vm1661_vm2, %v7702_v48, -inf  ;;  %6383 = vmatmul.msk.f32.gmra.mxu1 %vm739_vm1, %v635_v9  ;;  %6446 = vmatmul.msk.f32.gmra.mxu3 %vm739_vm1, %v698_v51  ;;  %v333_v10 = vperm.slane %v217_v57, 0 }
 0x1d2   :  { %v2992_v31 = vrot.slane %v2991_v45, 4  ;;  %6668 = vpow2.f32 %v2702_v16  ;;  %v1730_v22 = vrot.slane %v1729_v17, 1  ;;  %v1733_v38 = vrot.slane %v1732_v4, 4 }
 0x1d3   :  { %v2989_v42 = vrot.slane %v2988_v18, 1 }
 0x1d4   :  { %v2993_v61 = vadd.f32 %v2992_v31, %v2991_v45  ;;  %v1731_v6 = vmax.f32 %v1729_v17, %v1730_v22  ;;  %v1734_v44 = vmax.f32 %v1732_v4, %v1733_v38  ;;  %v273_v4 = vrot.slane %v7389_v33, 4 }
 0x1d5   :  { %v6667_v8 = vpop.eup %6666  ;;  %v2990_v32 = vadd.f32 %v2989_v42, %v2988_v18  ;;  %v700_v38 = vmul.f32 %v7677_v2, %v396_v60  ;;  %v274_v60 = vrot.slane %v7389_v33, 5 }
 0x1d6   :  { %v2994_v7 = vrot.slane %v2993_v61, 2  ;;  %v2567_v52 = vsub.f32 %v7684_v20, %v1731_v6  ;;  %v1174_v54 = vpop.f32.mrf.mxu1  ;;  %v3971_v56 = vmul.f32 %v6667_v8, %v7668_v50  ;;  %v1735_v51 = vrot.slane %v1734_v44, 2 }
 0x1d7   :  { %v7721_v59 = vadd.f32 %v7553_v3, %v1174_v54  ;;  %6670 = vrcp.f32 %v2990_v32  ;;  %v637_v6 = vmul.f32 %v7495_v55, %v333_v10  ;;  %v218_v32 = vrot.slane %v7351_v23, 5 }
 0x1d8   :  { %v7724_v0 = vpop.eup %6668  ;;  %v2704_v53 = vmul.f32 1.442695, %v2567_v52  ;;  %6491 = vmatmul.msk.f32.gmra.mxu0 %vm1661_vm2, %v3971_v56  ;;  %v2995_v30 = vadd.f32 %v2994_v7, %v2993_v61  ;;  %v1736_v19 = vmax.f32 %v1734_v44, %v1735_v51  ;;  %v397_v52 = vperm.slane %v273_v4, 0 }
 0x1d9   :  { %v2998_v20 = vsel %vm1661_vm2, %v7724_v0, 0.0  ;;  %v1739_v50 = vsel %vm1661_vm2, %v7721_v59, -inf  ;;  %6384 = vmatmul.msk.f32.gmra.mxu1 %vm739_vm1, %v636_v62  ;;  %6447 = vmatmul.msk.f32.gmra.mxu3 %vm739_vm1, %v699_v47 }
 0x1da   :  { %v2999_v9 = vrot.slane %v2998_v20, 4  ;;  %6672 = vpow2.f32 %v2704_v53  ;;  %v1737_v16 = vrot.slane %v1736_v19, 1  ;;  %v1740_v17 = vrot.slane %v1739_v50, 4 }
 0x1db   :  { %v2996_v45 = vrot.slane %v2995_v30, 1  ;;  %v334_v53 = vperm.slane %v218_v32, 0 }
 0x1dc   :  { %v3000_v18 = vadd.f32 %v2999_v9, %v2998_v20  ;;  %v1738_v31 = vmax.f32 %v1736_v19, %v1737_v16  ;;  %v1741_v22 = vmax.f32 %v1739_v50, %v1740_v17  ;;  %v701_v50 = vmul.f32 %v7677_v2, %v397_v52 }
 0x1dd   :  { %v6671_v49 = vpop.eup %6670  ;;  %v2997_v7 = vadd.f32 %v2996_v45, %v2995_v30  ;;  %v638_v45 = vmul.f32 %v7495_v55, %v334_v53 }
 0x1de   :  { %v3001_v40 = vrot.slane %v3000_v18, 2  ;;  %v1177_v42 = vpop.f32.mrf.mxu1  ;;  %v3972_v61 = vmul.f32 %v6671_v49, %v7688_v37  ;;  %v2568_v8 = vsub.f32 %v7702_v48, %v1738_v31  ;;  %v1742_v44 = vrot.slane %v1741_v22, 2 }
 0x1df   :  { %v1545_v47 = vadd.f32 %v7570_v39, %v1177_v42 }
 0x1e0   :  { %v7740_v11 = vpop.eup %6672  ;;  %6492 = vmatmul.msk.f32.gmra.mxu0 %vm1661_vm2, %v3972_v61  ;;  %v2706_v56 = vmul.f32 1.442695, %v2568_v8  ;;  %v1743_v37 = vmax.f32 %v1741_v22, %v1742_v44  ;;  %v3002_v39 = vadd.f32 %v3001_v40, %v3000_v18  ;;  %v219_v18 = vrot.slane %v7351_v23, 6 }
 0x1e1   :  { %v3005_v54 = vsel %vm1661_vm2, %v7740_v11, 0.0  ;;  %v1746_v57 = vsel %vm1661_vm2, %v1545_v47, -inf  ;;  %6385 = vmatmul.msk.f32.gmra.mxu1 %vm739_vm1, %v637_v6  ;;  %6448 = vmatmul.msk.f32.gmra.mxu3 %vm739_vm1, %v700_v38  ;;  %v398_v38 = vperm.slane %v274_v60, 0 }
 0x1e2   :  { %v3006_v48 = vrot.slane %v3005_v54, 4  ;;  %6674 = vpow2.f32 %v2706_v56  ;;  %v1744_v51 = vrot.slane %v1743_v37, 1  ;;  %v1747_v62 = vrot.slane %v1746_v57, 4 }
 0x1e3   :  { %6676 = vrcp.f32 %v2997_v7  ;;  %v3003_v9 = vrot.slane %v3002_v39, 1  ;;  %v335_v44 = vperm.slane %v219_v18, 0  ;;  %v702_v56 = vmul.f32 %v7677_v2, %v398_v38 }
 0x1e4   :  { %v3007_v20 = vadd.f32 %v3006_v48, %v3005_v54  ;;  %v1745_v30 = vmax.f32 %v1743_v37, %v1744_v51  ;;  %v1748_v19 = vmax.f32 %v1746_v57, %v1747_v62  ;;  %v275_v37 = vrot.slane %v7389_v33, 6 }
 0x1e5   :  { %v3004_v6 = vadd.f32 %v3003_v9, %v3002_v39  ;;  %v639_v51 = vmul.f32 %v7495_v55, %v335_v44  ;;  %v220_v62 = vrot.slane %v7351_v23, 7  ;;  %v337_v44 = vperm.slane %v7355_v24, 0 }
 0x1e6   :  { %v3008_v10 = vrot.slane %v3007_v20, 2  ;;  %v1180_v16 = vpop.f32.mrf.mxu1  ;;  %v1749_v17 = vrot.slane %v1748_v19, 2  ;;  %v2569_v4 = vsub.f32 %v7721_v59, %v1745_v30  ;;  %v399_v30 = vperm.slane %v275_v37, 0 }
 0x1e7   :  { %v7756_v22 = vadd.f32 %v7590_v5, %v1180_v16  ;;  %6678 = vrcp.f32 %v3004_v6  ;;  %v336_v9 = vperm.slane %v220_v62, 0 }
 0x1e8   :  { %v7753_v49 = vpop.eup %6674  ;;  %v1750_v31 = vmax.f32 %v1748_v19, %v1749_v17  ;;  %v3009_v42 = vadd.f32 %v3008_v10, %v3007_v20  ;;  %v2708_v32 = vmul.f32 1.442695, %v2569_v4  ;;  %v703_v18 = vmul.f32 %v7677_v2, %v399_v30 }
 0x1e9   :  { %6386 = vmatmul.msk.f32.gmra.mxu1 %vm739_vm1, %v638_v45  ;;  %6449 = vmatmul.msk.f32.gmra.mxu3 %vm739_vm1, %v701_v50  ;;  %v6677_v40 = vpop.eup %6676  ;;  %v3012_v61 = vsel %vm1661_vm2, %v7753_v49, 0.0  ;;  %v1753_v7 = vsel %vm1661_vm2, %v7756_v22, -inf }
 0x1ea   :  { %v1751_v8 = vrot.slane %v1750_v31, 1  ;;  %v3013_v59 = vrot.slane %v3012_v61, 4  ;;  %v3973_v5 = vmul.f32 %v6677_v40, %v7706_v15  ;;  %v1754_v54 = vrot.slane %v1753_v7, 4 }
 0x1eb   :  { %v3010_v57 = vrot.slane %v3009_v42, 1  ;;  %6680 = vpow2.f32 %v2708_v32 }
 0x1ec   :  { %v1752_v52 = vmax.f32 %v1750_v31, %v1751_v8  ;;  %6493 = vmatmul.msk.f32.gmra.mxu0 %vm1661_vm2, %v3973_v5  ;;  %v3014_v53 = vadd.f32 %v3013_v59, %v3012_v61  ;;  %v1755_v20 = vmax.f32 %v1753_v7, %v1754_v54 }
 0x1ed   :  { %v3011_v60 = vadd.f32 %v3010_v57, %v3009_v42  ;;  %v6679_v10 = vpop.eup %6678 }
 0x1ee   :  { %v1183_v48 = vpop.f32.mrf.mxu1  ;;  %v2570_v39 = vsub.f32 %v1545_v47, %v1752_v52  ;;  %v1756_v19 = vrot.slane %v1755_v20, 2  ;;  %v3015_v47 = vrot.slane %v3014_v53, 2  ;;  %v3974_v45 = vmul.f32 %v6679_v10, %v7724_v0 }
 0x1ef   :  { %v1547_v50 = vadd.f32 %v7612_v58, %v1183_v48  ;;  %v640_v58 = vmul.f32 %v7495_v55, %v336_v9 }
 0x1f0   :  { %v2710_v15 = vmul.f32 1.442695, %v2570_v39  ;;  %v1757_v16 = vmax.f32 %v1755_v20, %v1756_v19  ;;  %v3016_v42 = vadd.f32 %v3015_v47, %v3014_v53 }
 0x1f1   :  { %6387 = vmatmul.msk.f32.gmra.mxu1 %vm739_vm1, %v639_v51  ;;  %6450 = vmatmul.msk.f32.gmra.mxu3 %vm739_vm1, %v702_v56  ;;  %v1760_v17 = vsel %vm1661_vm2, %v1547_v50, -inf  ;;  %v7776_v4 = vpop.eup %6680 }
 0x1f2   :  { %6682 = vpow2.f32 %v2710_v15  ;;  %v1761_v23 = vrot.slane %v1760_v17, 4  ;;  %v1758_v31 = vrot.slane %v1757_v16, 1  ;;  %v3019_v6 = vsel %vm1661_vm2, %v7776_v4, 0.0 }
 0x1f3   :  { %6684 = vrcp.f32 %v3011_v60  ;;  %v3017_v5 = vrot.slane %v3016_v42, 1  ;;  %v3020_v55 = vrot.slane %v3019_v6, 4 }
 0x1f4   :  { %v1762_v40 = vmax.f32 %v1760_v17, %v1761_v23  ;;  %6494 = vmatmul.msk.f32.gmra.mxu0 %vm1661_vm2, %v3974_v45  ;;  %v1759_v61 = vmax.f32 %v1757_v16, %v1758_v31  ;;  %v222_v17 = vrot.slane %v7355_v24, 2 }
 0x1f5   :  { %v3021_v53 = vadd.f32 %v3020_v55, %v3019_v6 }
 0x1f6   :  { %v1186_v38 = vpop.f32.mrf.mxu1  ;;  %v1763_v8 = vrot.slane %v1762_v40, 2  ;;  %v2571_v0 = vsub.f32 %v7756_v22, %v1759_v61  ;;  %v641_v22 = vmul.f32 %v7594_v14, %v337_v44  ;;  %v339_v6 = vperm.slane %v222_v17, 0 }
 0x1f7   :  { %v7789_v52 = vadd.f32 %v7637_v46, %v1186_v38  ;;  %v221_v46 = vrot.slane %v7355_v24, 1  ;;  %v3022_v10 = vrot.slane %v3021_v53, 2  ;;  %v276_v38 = vrot.slane %v7389_v33, 7 }
 0x1f8   :  { %v7786_v59 = vpop.eup %6682  ;;  %v1764_v32 = vmax.f32 %v1762_v40, %v1763_v8  ;;  %v2712_v54 = vmul.f32 1.442695, %v2571_v0 }
 0x1f9   :  { %6388 = vmatmul.msk.f32.gmra.mxu1 %vm739_vm1, %v640_v58  ;;  %6451 = vmatmul.msk.f32.gmra.mxu3 %vm739_vm1, %v703_v18  ;;  %v6685_v7 = vpop.eup %6684  ;;  %v1767_v57 = vsel %vm1661_vm2, %v7789_v52, -inf  ;;  %v3026_v39 = vsel %vm1661_vm2, %v7786_v59, 0.0  ;;  %v338_v9 = vperm.slane %v221_v46, 0  ;;  %v400_v61 = vperm.slane %v276_v38, 0 }
 0x1fa   :  { %v1765_v56 = vrot.slane %v1764_v32, 1  ;;  %v3975_v37 = vmul.f32 %v6685_v7, %v7740_v11  ;;  %v1768_v62 = vrot.slane %v1767_v57, 4  ;;  %v3018_v11 = vadd.f32 %v3017_v5, %v3016_v42 }
 0x1fb   :  { %6686 = vpow2.f32 %v2712_v54  ;;  %v3027_v15 = vrot.slane %v3026_v39, 4  ;;  %v642_v58 = vmul.f32 %v7594_v14, %v338_v9  ;;  %v3023_v42 = vadd.f32 %v3022_v10, %v3021_v53  ;;  %v7829_v53 = vpop.permute.xlu0 %585 }
 0x1fc   :  { %v1766_v51 = vmax.f32 %v1764_v32, %v1765_v56  ;;  %6495 = vmatmul.msk.f32.gmra.mxu0 %vm1661_vm2, %v3975_v37  ;;  %v1769_v30 = vmax.f32 %v1767_v57, %v1768_v62  ;;  %6688 = vrcp.f32 %v3018_v11  ;;  %v704_v55 = vmul.f32 %v7677_v2, %v400_v61 }
 0x1fd   :  { %v3028_v23 = vadd.f32 %v3027_v15, %v3026_v39  ;;  %v3024_v54 = vrot.slane %v3023_v42, 1  ;;  %v223_v39 = vrot.slane %v7355_v24, 3 }
 0x1fe   :  { %v1189_v48 = vpop.f32.mrf.mxu1  ;;  %v2572_v60 = vsub.f32 %v1547_v50, %v1766_v51  ;;  %v1770_v47 = vrot.slane %v1769_v30, 2 }
 0x1ff   :  { %v7800_v20 = vadd.f32 %v7510_v21, %v1189_v48  ;;  %v3029_v0 = vrot.slane %v3028_v23, 2 }
 0x200   :  { %v1771_v21 = vmax.f32 %v1769_v30, %v1770_v47  ;;  %v2714_v18 = vmul.f32 1.442695, %v2572_v60  ;;  %v7834_v47 = vpop.f32.mrf.mxu3 }
 0x201   :  { %6389 = vmatmul.msk.f32.gmra.mxu1 %vm739_vm1, %v641_v22  ;;  %v1774_v19 = vsel %vm1661_vm2, %v7800_v20, -inf  ;;  %v7806_v45 = vpop.eup %6686  ;;  %6452 = vmatmul.msk.f32.gmra.mxu3 %vm739_vm1, %v704_v55  ;;  %v3030_v48 = vadd.f32 %v3029_v0, %v3028_v23  ;;  %v643_v22 = vmul.f32 %v7594_v14, %v339_v6  ;;  %10722 = vst [vmem:[#allocation8_spill] sm:$0xff] %v7834_v47  ;;  %v224_v23 = vrot.slane %v7355_v24, 4 }
 0x202   :  { %v1775_v16 = vrot.slane %v1774_v19, 4  ;;  %v1772_v50 = vrot.slane %v1771_v21, 1  ;;  %v6689_v8 = vpop.eup %6688  ;;  %v3033_v44 = vsel %vm1661_vm2, %v7806_v45, 0.0  ;;  %6690 = vpow2.f32 %v2714_v18 }
 0x203   :  { %v3976_v5 = vmul.f32 %v6689_v8, %v7753_v49  ;;  %v3034_v56 = vrot.slane %v3033_v44, 4  ;;  %v3025_v49 = vadd.f32 %v3024_v54, %v3023_v42  ;;  %v3031_v11 = vrot.slane %v3030_v48, 1 }
 0x204   :  { %v1776_v31 = vmax.f32 %v1774_v19, %v1775_v16  ;;  %v1773_v32 = vmax.f32 %v1771_v21, %v1772_v50  ;;  %v340_v19 = vperm.slane %v223_v39, 0  ;;  %v277_v50 = vrot.slane %v7393_v34, 1 }
 0x205   :  { %6496 = vmatmul.msk.f32.gmra.mxu0 %vm1661_vm2, %v3976_v5  ;;  %v3035_v62 = vadd.f32 %v3034_v56, %v3033_v44  ;;  %6692 = vrcp.f32 %v3025_v49  ;;  %v341_v6 = vperm.slane %v224_v23, 0  ;;  %v226_v23 = vrot.slane %v7355_v24, 6 }
 0x206   :  { %v1192_v40 = vpop.f32.mrf.mxu1  ;;  %v1777_v33 = vrot.slane %v1776_v31, 2  ;;  %v2573_v37 = vsub.f32 %v7789_v52, %v1773_v32  ;;  %v401_v52 = vperm.slane %v7393_v34, 0  ;;  %v644_v38 = vmul.f32 %v7594_v14, %v340_v19 }
 0x207   :  { %v7814_v7 = vadd.f32 %v7524_v12, %v1192_v40  ;;  %v3036_v16 = vrot.slane %v3035_v62, 2  ;;  %v402_v44 = vperm.slane %v277_v50, 0  ;;  %v645_v54 = vmul.f32 %v7594_v14, %v341_v6 }
 0x208   :  { %v1778_v12 = vmax.f32 %v1776_v31, %v1777_v33  ;;  %v7825_v51 = vpop.eup %6690  ;;  %v2716_v46 = vmul.f32 1.442695, %v2573_v37  ;;  %v705_v9 = vmul.f32 %v7829_v53, %v401_v52  ;;  %v3032_v31 = vadd.f32 %v3031_v11, %v3030_v48 }
 0x209   :  { %6390 = vmatmul.msk.f32.gmra.mxu1 %vm739_vm1, %v642_v58  ;;  %v1781_v57 = vsel %vm1661_vm2, %v7814_v7, -inf  ;;  %v3040_v60 = vsel %vm1661_vm2, %v7825_v51, 0.0  ;;  %v3037_v61 = vadd.f32 %v3036_v16, %v3035_v62  ;;  %v706_v55 = vmul.f32 %v7829_v53, %v402_v44 }
 0x20a   :  { %v1782_v2 = vrot.slane %v1781_v57, 4  ;;  %v1779_v15 = vrot.slane %v1778_v12, 1  ;;  %6694 = vpow2.f32 %v2716_v46  ;;  %6453 = vmatmul.msk.f32.gmra.mxu3 %vm739_vm1, %v705_v9  ;;  %v3041_v21 = vrot.slane %v3040_v60, 4 }
 0x20b   :  { %v6693_v40 = vpop.eup %6692  ;;  %6696 = vrcp.f32 %v3032_v31  ;;  %v3038_v5 = vrot.slane %v3037_v61, 1  ;;  %v278_v52 = vrot.slane %v7393_v34, 2  ;;  %v279_v44 = vrot.slane %v7393_v34, 3 }
 0x20c   :  { %v1783_v10 = vmax.f32 %v1781_v57, %v1782_v2  ;;  %v1780_v18 = vmax.f32 %v1778_v12, %v1779_v15  ;;  %v3977_v42 = vmul.f32 %v6693_v40, %v7776_v4  ;;  %v3042_v8 = vadd.f32 %v3041_v21, %v3040_v60  ;;  %v7856_v12 = vpop.f32.mrf.mxu3 }
 0x20d   :  { %10723 = vst [vmem:[#allocation9_spill] sm:$0xff] %v7856_v12  ;;  %v3039_v46 = vadd.f32 %v3038_v5, %v3037_v61  ;;  %v403_v60 = vperm.slane %v278_v52, 0 }
 0x20e   :  { %v1195_v30 = vpop.f32.mrf.mxu1  ;;  %v1784_v58 = vrot.slane %v1783_v10, 2  ;;  %v2574_v0 = vsub.f32 %v7800_v20, %v1780_v18  ;;  %6497 = vmatmul.msk.f32.gmra.mxu0 %vm1661_vm2, %v3977_v42  ;;  %v3043_v37 = vrot.slane %v3042_v8, 2  ;;  %v225_v20 = vrot.slane %v7355_v24, 5 }
 0x20f   :  { %v7838_v17 = vadd.f32 %v7537_v43, %v1195_v30  ;;  %v707_v21 = vmul.f32 %v7829_v53, %v403_v60 }
 0x210   :  { %v7849_v32 = vpop.eup %6694  ;;  %v1785_v33 = vmax.f32 %v1783_v10, %v1784_v58  ;;  %v2718_v48 = vmul.f32 1.442695, %v2574_v0  ;;  %v3044_v11 = vadd.f32 %v3043_v37, %v3042_v8  ;;  %v342_v15 = vperm.slane %v225_v20, 0 }
 0x211   :  { %6391 = vmatmul.msk.f32.gmra.mxu1 %vm739_vm1, %v643_v22  ;;  %v1788_v43 = vsel %vm1661_vm2, %v7838_v17, -inf  ;;  %v6697_v56 = vpop.eup %6696  ;;  %v3047_v57 = vsel %vm1661_vm2, %v7849_v32, 0.0 }
 0x212   :  { %v1789_v4 = vrot.slane %v1788_v43, 4  ;;  %v3978_v22 = vmul.f32 %v6697_v56, %v7786_v59  ;;  %6454 = vmatmul.msk.f32.gmra.mxu3 %vm739_vm1, %v706_v55  ;;  %v1786_v39 = vrot.slane %v1785_v33, 1  ;;  %v3048_v2 = vrot.slane %v3047_v57, 4 }
 0x213   :  { %6698 = vpow2.f32 %v2718_v48  ;;  %v3045_v10 = vrot.slane %v3044_v11, 1  ;;  %v646_v16 = vmul.f32 %v7594_v14, %v342_v15  ;;  %v404_v55 = vperm.slane %v279_v44, 0 }
 0x214   :  { %v1790_v49 = vmax.f32 %v1788_v43, %v1789_v4  ;;  %6700 = vrcp.f32 %v3039_v46  ;;  %v1787_v30 = vmax.f32 %v1785_v33, %v1786_v39  ;;  %v3049_v9 = vadd.f32 %v3048_v2, %v3047_v57  ;;  %v7875_v58 = vpop.f32.mrf.mxu3  ;;  %v7888_v57 = vld [vmem:[%s10706_s4 + $0x20] sm:$0xff] }
 0x215   :  { %10724 = vst [vmem:[#allocation10_spill] sm:$0xff] %v7875_v58  ;;  %v3046_v61 = vadd.f32 %v3045_v10, %v3044_v11  ;;  %v343_v43 = vperm.slane %v226_v23, 0 }
 0x216   :  { %v1198_v62 = vpop.f32.mrf.mxu1  ;;  %6498 = vmatmul.msk.f32.gmra.mxu0 %vm1661_vm2, %v3978_v22  ;;  %v1791_v19 = vrot.slane %v1790_v49, 2  ;;  %v2575_v31 = vsub.f32 %v7814_v7, %v1787_v30  ;;  %v3050_v42 = vrot.slane %v3049_v9, 2  ;;  %v708_v22 = vmul.f32 %v7829_v53, %v404_v55 }
 0x217   :  { %v7864_v59 = vadd.f32 %v7553_v3, %v1198_v62  ;;  %6702 = vrcp.f32 %v3046_v61  ;;  %v280_v30 = vrot.slane %v7393_v34, 4 }
 0x218   :  { %v2720_v8 = vmul.f32 1.442695, %v2575_v31  ;;  %v3051_v33 = vadd.f32 %v3050_v42, %v3049_v9 }
 0x219   :  { %6392 = vmatmul.msk.f32.gmra.mxu1 %vm739_vm1, %v644_v38  ;;  %v7869_v18 = vpop.eup %6698  ;;  %v1792_v38 = vmax.f32 %v1790_v49, %v1791_v19  ;;  %v1795_v40 = vsel %vm1661_vm2, %v7864_v59, -inf  ;;  %v405_v23 = vperm.slane %v280_v30, 0 }
 0x21a   :  { %v6701_v3 = vpop.eup %6700  ;;  %6455 = vmatmul.msk.f32.gmra.mxu3 %vm739_vm1, %v707_v21  ;;  %v3054_v6 = vsel %vm1661_vm2, %v7869_v18, 0.0  ;;  %v1796_v7 = vrot.slane %v1795_v40, 4  ;;  %6704 = vpow2.f32 %v2720_v8  ;;  %v3052_v20 = vrot.slane %v3051_v33, 1  ;;  %v7918_v8 = vld [vmem:[%s10706_s4 + $0x28] sm:$0xff] }
 0x21b   :  { %v3979_v50 = vmul.f32 %v6701_v3, %v7806_v45  ;;  %v1793_v0 = vrot.slane %v1792_v38, 1  ;;  %v3055_v5 = vrot.slane %v3054_v6, 4  ;;  %v227_v45 = vrot.slane %v7355_v24, 7 }
 0x21c   :  { %v1797_v56 = vmax.f32 %v1795_v40, %v1796_v7  ;;  %v7895_v24 = vpop.f32.mrf.mxu3  ;;  %v3053_v15 = vadd.f32 %v3052_v20, %v3051_v33  ;;  %v709_v40 = vmul.f32 %v7829_v53, %v405_v23 }
 0x21d   :  { %v1794_v37 = vmax.f32 %v1792_v38, %v1793_v0  ;;  %v6703_v39 = vpop.eup %6702  ;;  %v3056_v49 = vadd.f32 %v3055_v5, %v3054_v6  ;;  %v344_v2 = vperm.slane %v227_v45, 0  ;;  %10725 = vst [vmem:[#allocation11_spill] sm:$0xff] %v7895_v24 }
 0x21e   :  { %6499 = vmatmul.msk.f32.gmra.mxu0 %vm1661_vm2, %v3979_v50  ;;  %v1201_v4 = vpop.f32.mrf.mxu1  ;;  %v1798_v62 = vrot.slane %v1797_v56, 2  ;;  %v3980_v46 = vmul.f32 %v6703_v39, %v7825_v51  ;;  %6706 = vrcp.f32 %v3053_v15 }
 0x21f   :  { %v7891_v48 = vadd.f32 %v7888_v57, %v1201_v4  ;;  %v2576_v52 = vsub.f32 %v7838_v17, %v1794_v37  ;;  %v3057_v60 = vrot.slane %v3056_v49, 2  ;;  %v648_v9 = vmul.f32 %v7594_v14, %v344_v2 }
 0x220   :  { %v7904_v19 = vpop.eup %6704  ;;  %v1799_v10 = vmax.f32 %v1797_v56, %v1798_v62  ;;  %v281_v37 = vrot.slane %v7393_v34, 5 }
 0x221   :  { %6393 = vmatmul.msk.f32.gmra.mxu1 %vm739_vm1, %v645_v54  ;;  %v647_v54 = vmul.f32 %v7594_v14, %v343_v43  ;;  %v1802_v11 = vsel %vm1661_vm2, %v7891_v48, -inf  ;;  %v2722_v51 = vmul.f32 1.442695, %v2576_v52  ;;  %v3061_v17 = vsel %vm1661_vm2, %v7904_v19, 0.0 }
 0x222   :  { %6456 = vmatmul.msk.f32.gmra.mxu3 %vm739_vm1, %v708_v22  ;;  %v3058_v21 = vadd.f32 %v3057_v60, %v3056_v49  ;;  %v1800_v31 = vrot.slane %v1799_v10, 1  ;;  %v3062_v3 = vrot.slane %v3061_v17, 4  ;;  %v406_v62 = vperm.slane %v281_v37, 0 }
 0x223   :  { %6708 = vpow2.f32 %v2722_v51 }
 0x224   :  { %v6707_v50 = vpop.eup %6706  ;;  %v7911_v14 = vpop.f32.mrf.mxu3  ;;  %v3059_v61 = vrot.slane %v3058_v21, 1  ;;  %v1801_v6 = vmax.f32 %v1799_v10, %v1800_v31  ;;  %v3063_v44 = vadd.f32 %v3062_v3, %v3061_v17 }
 0x225   :  { %10726 = vst [vmem:[#allocation12_spill] sm:$0xff] %v7911_v14  ;;  %v3981_v43 = vmul.f32 %v6707_v50, %v7849_v32 }
 0x226   :  { %6500 = vmatmul.msk.f32.gmra.mxu0 %vm1661_vm2, %v3980_v46  ;;  %v1204_v42 = vpop.f32.mrf.mxu1  ;;  %v3060_v4 = vadd.f32 %v3059_v61, %v3058_v21  ;;  %v2577_v5 = vsub.f32 %v7864_v59, %v1801_v6  ;;  %v7935_v59 = vld [vmem:[%s10706_s4 + $0x30] sm:$0xff] }
 0x227   :  { %v7921_v0 = vadd.f32 %v7918_v8, %v1204_v42 }
 0x228   :  { %6710 = vrcp.f32 %v3060_v4  ;;  %v2724_v20 = vmul.f32 1.442695, %v2577_v5 }
 0x229   :  { %6394 = vmatmul.msk.f32.gmra.mxu1 %vm739_vm1, %v646_v16  ;;  %v1803_v16 = vrot.slane %v1802_v11, 4  ;;  %v7924_v33 = vpop.eup %6708  ;;  %v1809_v32 = vsel %vm1661_vm2, %v7921_v0, -inf }
 0x22a   :  { %6457 = vmatmul.msk.f32.gmra.mxu3 %vm739_vm1, %v709_v40  ;;  %v3068_v45 = vsel %vm1661_vm2, %v7924_v33, 0.0  ;;  %v1810_v56 = vrot.slane %v1809_v32, 4  ;;  %6712 = vpow2.f32 %v2724_v20 }
 0x22b   :  { %v1804_v38 = vmax.f32 %v1802_v11, %v1803_v16  ;;  %v3069_v2 = vrot.slane %v3068_v45, 4  ;;  %v710_v11 = vmul.f32 %v7829_v53, %v406_v62 }
 0x22c   :  { %v1811_v46 = vmax.f32 %v1809_v32, %v1810_v56  ;;  %v7941_v60 = vpop.f32.mrf.mxu3 }
 0x22d   :  { %v1805_v7 = vrot.slane %v1804_v38, 2  ;;  %10727 = vst [vmem:[#allocation13_spill] sm:$0xff] %v7941_v60  ;;  %v3070_v10 = vadd.f32 %v3069_v2, %v3068_v45 }
 0x22e   :  { %6501 = vmatmul.msk.f32.gmra.mxu0 %vm1661_vm2, %v3981_v43  ;;  %v1207_v39 = vpop.f32.mrf.mxu1  ;;  %v6711_v15 = vpop.eup %6710  ;;  %v1812_v51 = vrot.slane %v1811_v46, 2 }
 0x22f   :  { %v1806_v55 = vmax.f32 %v1804_v38, %v1805_v7  ;;  %v7938_v52 = vadd.f32 %v7935_v59, %v1207_v39  ;;  %v3982_v16 = vmul.f32 %v6711_v15, %v7869_v18  ;;  %v3071_v21 = vrot.slane %v3070_v10, 2 }
 0x230   :  { %v282_v38 = vrot.slane %v7393_v34, 6  ;;  %v7950_v40 = vpop.eup %6712  ;;  %v1813_v42 = vmax.f32 %v1811_v46, %v1812_v51  ;;  %v345_v15 = vperm.slane %v7359_v25, 0 }
 0x231   :  { %6395 = vmatmul.msk.f32.gmra.mxu1 %vm739_vm1, %v647_v54  ;;  %v3064_v54 = vrot.slane %v3063_v44, 2  ;;  %v1807_v22 = vrot.slane %v1806_v55, 1  ;;  %v1816_v17 = vsel %vm1661_vm2, %v7938_v52, -inf  ;;  %v3072_v43 = vadd.f32 %v3071_v21, %v3070_v10 }
 0x232   :  { %6458 = vmatmul.msk.f32.gmra.mxu3 %vm739_vm1, %v710_v11  ;;  %v1817_v3 = vrot.slane %v1816_v17, 4  ;;  %v407_v61 = vperm.slane %v282_v38, 0  ;;  %v3075_v6 = vsel %vm1661_vm2, %v7950_v40, 0.0  ;;  %v1814_v5 = vrot.slane %v1813_v42, 1 }
 0x233   :  { %v3065_v49 = vadd.f32 %v3064_v54, %v3063_v44  ;;  %v1808_v30 = vmax.f32 %v1806_v55, %v1807_v22  ;;  %v3076_v32 = vrot.slane %v3075_v6, 4  ;;  %v3073_v45 = vrot.slane %v3072_v43, 1 }
 0x234   :  { %v1818_v7 = vmax.f32 %v1816_v17, %v1817_v3  ;;  %v711_v4 = vmul.f32 %v7829_v53, %v407_v61  ;;  %v7963_v55 = vpop.f32.mrf.mxu3  ;;  %v1815_v22 = vmax.f32 %v1813_v42, %v1814_v5  ;;  %v649_v51 = vmul.f32 %v7626_v13, %v345_v15 }
 0x235   :  { %v2578_v23 = vsub.f32 %v7891_v48, %v1808_v30  ;;  %v7957_v48 = vld [vmem:[%s10706_s4 + $0x38] sm:$0xff]  ;;  %10728 = vst [vmem:[#allocation14_spill] sm:$0xff] %v7963_v55  ;;  %v3077_v39 = vadd.f32 %v3076_v32, %v3075_v6  ;;  %v3074_v2 = vadd.f32 %v3073_v45, %v3072_v43  ;;  %v283_v30 = vrot.slane %v7393_v34, 7  ;;  %v7983_v34 = vld [vmem:[%s10706_s4] sm:$0xff] }
 0x236   :  { %6502 = vmatmul.msk.f32.gmra.mxu0 %vm1661_vm2, %v3982_v16  ;;  %v1210_v50 = vpop.f32.mrf.mxu1  ;;  %v1819_v56 = vrot.slane %v1818_v7, 2  ;;  %v2579_v11 = vsub.f32 %v7921_v0, %v1815_v22 }
 0x237   :  { %v2726_v18 = vmul.f32 1.442695, %v2578_v23  ;;  %v7960_v44 = vadd.f32 %v7957_v48, %v1210_v50  ;;  %v408_v17 = vperm.slane %v283_v30, 0 }
 0x238   :  { %v1820_v46 = vmax.f32 %v1818_v7, %v1819_v56  ;;  %v2728_v21 = vmul.f32 1.442695, %v2579_v11 }
 0x239   :  { %6396 = vmatmul.msk.f32.gmra.mxu1 %vm739_vm1, %v648_v9  ;;  %v3066_v9 = vrot.slane %v3065_v49, 1  ;;  %v1823_v37 = vsel %vm1661_vm2, %v7960_v44, -inf  ;;  %v712_v0 = vmul.f32 %v7829_v53, %v408_v17 }
 0x23a   :  { %6459 = vmatmul.msk.f32.gmra.mxu3 %vm739_vm1, %v711_v4  ;;  %v1821_v23 = vrot.slane %v1820_v46, 1 }
 0x23b   :  { %v3067_v31 = vadd.f32 %v3066_v9, %v3065_v49  ;;  %v1824_v49 = vrot.slane %v1823_v37, 4  ;;  %v3078_v9 = vrot.slane %v3077_v39, 2 }
 0x23c   :  { %v7988_v50 = vpop.f32.mrf.mxu3  ;;  %v1822_v43 = vmax.f32 %v1820_v46, %v1821_v23 }
 0x23d   :  { %6714 = vrcp.f32 %v3067_v31  ;;  %v1825_v10 = vmax.f32 %v1823_v37, %v1824_v49  ;;  %v3079_v31 = vadd.f32 %v3078_v9, %v3077_v39  ;;  %10729 = vst [vmem:[#allocation15_spill] sm:$0xff] %v7988_v50  ;;  %v409_v49 = vperm.slane %v7397_v35, 0  ;;  %v8449_v50 = vld [vmem:[%s10706_s4 + $0x10] sm:$0xff] }
 0x23e   :  { %6716 = vpow2.f32 %v2726_v18  ;;  %v1213_v16 = vpop.f32.mrf.mxu1  ;;  %v228_v18 = vrot.slane %v7359_v25, 1  ;;  %10752 = vst [vmem:[#allocation38_spill] sm:$0xff] %v8449_v50 }
 0x23f   :  { %6718 = vrcp.f32 %v3074_v2  ;;  %v7986_v3 = vadd.f32 %v7983_v34, %v1213_v16  ;;  %v1826_v61 = vrot.slane %v1825_v10, 2  ;;  %v3080_v6 = vrot.slane %v3079_v31, 1  ;;  %v8002_v2 = vpop.permute.xlu1 %587  ;;  %v8013_v16 = vld [vmem:[%s10706_s4 + $0x8] sm:$0xff] }
 0x240   :  { %6720 = vpow2.f32 %v2728_v21  ;;  %v346_v5 = vperm.slane %v228_v18, 0  ;;  %v713_v30 = vmul.f32 %v8002_v2, %v409_v49 }
 0x241   :  { %6397 = vmatmul.msk.f32.gmra.mxu1 %vm739_vm1, %v649_v51  ;;  %v1830_v4 = vsel %vm1661_vm2, %v7986_v3, -inf  ;;  %v1827_v32 = vmax.f32 %v1825_v10, %v1826_v61  ;;  %v3081_v37 = vadd.f32 %v3080_v6, %v3079_v31 }
 0x242   :  { %6460 = vmatmul.msk.f32.gmra.mxu3 %vm739_vm1, %v712_v0  ;;  %v1831_v45 = vrot.slane %v1830_v4, 4 }
 0x243   :  { %v6715_v54 = vpop.eup %6714  ;;  %6722 = vrcp.f32 %v3081_v37 }
 0x244   :  { %v3983_v20 = vmul.f32 %v6715_v54, %v7904_v19  ;;  %v7970_v62 = vpop.eup %6716  ;;  %v2580_v54 = vsub.f32 %v7938_v52, %v1822_v43  ;;  %v1832_v46 = vmax.f32 %v1830_v4, %v1831_v45  ;;  %v8008_v10 = vpop.f32.mrf.mxu3 }
 0x245   :  { %v3082_v19 = vsel %vm1661_vm2, %v7970_v62, 0.0  ;;  %v6719_v42 = vpop.eup %6718  ;;  %10730 = vst [vmem:[#allocation16_spill] sm:$0xff] %v8008_v10 }
 0x246   :  { %6503 = vmatmul.msk.f32.gmra.mxu0 %vm1661_vm2, %v3983_v20  ;;  %v3083_v38 = vrot.slane %v3082_v19, 4  ;;  %v3984_v53 = vmul.f32 %v6719_v42, %v7924_v33  ;;  %v650_v20 = vmul.f32 %v7626_v13, %v346_v5  ;;  %v7998_v22 = vpop.eup %6720  ;;  %v1828_v33 = vrot.slane %v1827_v32, 1  ;;  %v1216_v11 = vpop.f32.mrf.mxu1 }
 0x247   :  { %v2730_v39 = vmul.f32 1.442695, %v2580_v54  ;;  %v3089_v52 = vsel %vm1661_vm2, %v7998_v22, 0.0  ;;  %v8016_v51 = vadd.f32 %v8013_v16, %v1216_v11  ;;  %v1833_v23 = vrot.slane %v1832_v46, 2 }
 0x248   :  { %v3084_v7 = vadd.f32 %v3083_v38, %v3082_v19  ;;  %v1829_v9 = vmax.f32 %v1827_v32, %v1828_v33  ;;  %v229_v19 = vrot.slane %v7359_v25, 2  ;;  %v3090_v17 = vrot.slane %v3089_v52, 4 }
 0x249   :  { %6398 = vmatmul.msk.f32.gmra.mxu1 %vm739_vm1, %v650_v20  ;;  %6724 = vpow2.f32 %v2730_v39  ;;  %v6723_v21 = vpop.eup %6722  ;;  %v1837_v61 = vsel %vm1661_vm2, %v8016_v51, -inf  ;;  %v1834_v43 = vmax.f32 %v1832_v46, %v1833_v23  ;;  %v284_v54 = vrot.slane %v7397_v35, 1  ;;  %v8035_v46 = vld [vmem:[%s10706_s4 + $0x10] sm:$0xff] }
 0x24a   :  { %v3085_v56 = vrot.slane %v3084_v7, 2  ;;  %6461 = vmatmul.msk.f32.gmra.mxu3 %vm739_vm1, %v713_v30  ;;  %v2581_v31 = vsub.f32 %v7960_v44, %v1829_v9  ;;  %v3985_v38 = vmul.f32 %v6723_v21, %v7950_v40  ;;  %v347_v42 = vperm.slane %v229_v19, 0 }
 0x24b   :  { %v3091_v18 = vadd.f32 %v3090_v17, %v3089_v52  ;;  %v1838_v4 = vrot.slane %v1837_v61, 4  ;;  %v1835_v44 = vrot.slane %v1834_v43, 1  ;;  %v410_v37 = vperm.slane %v284_v54, 0 }
 0x24c   :  { %v3086_v15 = vadd.f32 %v3085_v56, %v3084_v7  ;;  %v2732_v7 = vmul.f32 1.442695, %v2581_v31  ;;  %v651_v5 = vmul.f32 %v7626_v13, %v347_v42  ;;  %v230_v33 = vrot.slane %v7359_v25, 3  ;;  %v8041_v9 = vpop.f32.mrf.mxu3 }
 0x24d   :  { %v3092_v32 = vrot.slane %v3091_v18, 2  ;;  %v1839_v56 = vmax.f32 %v1837_v61, %v1838_v4  ;;  %v1836_v49 = vmax.f32 %v1834_v43, %v1835_v44  ;;  %10731 = vst [vmem:[#allocation17_spill] sm:$0xff] %v8041_v9  ;;  %v285_v4 = vrot.slane %v7397_v35, 2 }
 0x24e   :  { %6504 = vmatmul.msk.f32.gmra.mxu0 %vm1661_vm2, %v3984_v53  ;;  %v3087_v0 = vrot.slane %v3086_v15, 1  ;;  %v1219_v45 = vpop.f32.mrf.mxu1  ;;  %v348_v30 = vperm.slane %v230_v33, 0 }
 0x24f   :  { %v8024_v53 = vpop.eup %6724  ;;  %v3093_v39 = vadd.f32 %v3092_v32, %v3091_v18  ;;  %v8038_v11 = vadd.f32 %v8035_v46, %v1219_v45  ;;  %v1840_v19 = vrot.slane %v1839_v56, 2  ;;  %v2582_v31 = vsub.f32 %v7986_v3, %v1836_v49 }
 0x250   :  { %v3088_v6 = vadd.f32 %v3087_v0, %v3086_v15  ;;  %v3096_v40 = vsel %vm1661_vm2, %v8024_v53, 0.0  ;;  %v714_v15 = vmul.f32 %v8002_v2, %v410_v37  ;;  %v652_v42 = vmul.f32 %v7626_v13, %v348_v30 }
 0x251   :  { %6399 = vmatmul.msk.f32.gmra.mxu1 %vm739_vm1, %v651_v5  ;;  %v3097_v20 = vrot.slane %v3096_v40, 4  ;;  %v3094_v0 = vrot.slane %v3093_v39, 1  ;;  %v1841_v61 = vmax.f32 %v1839_v56, %v1840_v19  ;;  %v231_v3 = vrot.slane %v7359_v25, 4 }
 0x252   :  { %6726 = vrcp.f32 %v3088_v6  ;;  %6462 = vmatmul.msk.f32.gmra.mxu3 %vm739_vm1, %v714_v15  ;;  %v2734_v6 = vmul.f32 1.442695, %v2582_v31  ;;  %v411_v32 = vperm.slane %v285_v4, 0 }
 0x253   :  { %6728 = vpow2.f32 %v2732_v7  ;;  %v3098_v23 = vadd.f32 %v3097_v20, %v3096_v40  ;;  %v3095_v7 = vadd.f32 %v3094_v0, %v3093_v39  ;;  %v1842_v5 = vrot.slane %v1841_v61, 1  ;;  %v8063_v39 = vld [vmem:[%s10706_s4 + $0x18] sm:$0xff] }
 0x254   :  { %v715_v56 = vmul.f32 %v8002_v2, %v411_v32  ;;  %v349_v37 = vperm.slane %v231_v3, 0  ;;  %v8058_v20 = vpop.f32.mrf.mxu3 }
 0x255   :  { %v3099_v18 = vrot.slane %v3098_v23, 2  ;;  %6730 = vrcp.f32 %v3095_v7  ;;  %10732 = vst [vmem:[#allocation18_spill] sm:$0xff] %v8058_v20  ;;  %v1843_v33 = vmax.f32 %v1841_v61, %v1842_v5 }
 0x256   :  { %6505 = vmatmul.msk.f32.gmra.mxu0 %vm1661_vm2, %v3985_v38  ;;  %v1844_v38 = vsel %vm1661_vm2, %v8038_v11, -inf  ;;  %v1222_v54 = vpop.f32.mrf.mxu1  ;;  %6732 = vpow2.f32 %v2734_v6  ;;  %v653_v15 = vmul.f32 %v7626_v13, %v349_v37 }
 0x257   :  { %v1845_v43 = vrot.slane %v1844_v38, 4  ;;  %v3100_v45 = vadd.f32 %v3099_v18, %v3098_v23  ;;  %v8066_v49 = vadd.f32 %v8063_v39, %v1222_v54  ;;  %v2583_v0 = vsub.f32 %v8016_v51, %v1843_v33  ;;  %v8089_v33 = vpop.f32.mrf.mxu0 }
 0x258   :  { %v6727_v52 = vpop.eup %6726 }
 0x259   :  { %v3986_v17 = vmul.f32 %v6727_v52, %v7970_v62  ;;  %v8045_v21 = vpop.eup %6728  ;;  %6400 = vmatmul.msk.f32.gmra.mxu1 %vm739_vm1, %v652_v42  ;;  %v1846_v44 = vmax.f32 %v1844_v38, %v1845_v43  ;;  %v1851_v31 = vsel %vm1661_vm2, %v8066_v49, -inf  ;;  %v2736_v4 = vmul.f32 1.442695, %v2583_v0 }
 0x25a   :  { %v3103_v62 = vsel %vm1661_vm2, %v8045_v21, 0.0  ;;  %6463 = vmatmul.msk.f32.gmra.mxu3 %vm739_vm1, %v715_v56  ;;  %v1852_v6 = vrot.slane %v1851_v31, 4 }
 0x25b   :  { %v3104_v40 = vrot.slane %v3103_v62, 4  ;;  %v1847_v30 = vrot.slane %v1846_v44, 2  ;;  %v6731_v19 = vpop.eup %6730 }
 0x25c   :  { %v8071_v23 = vpop.eup %6732  ;;  %v3987_v38 = vmul.f32 %v6731_v19, %v7998_v22  ;;  %v1853_v54 = vmax.f32 %v1851_v31, %v1852_v6  ;;  %v233_v6 = vrot.slane %v7359_v25, 6 }
 0x25d   :  { %v3105_v52 = vadd.f32 %v3104_v40, %v3103_v62  ;;  %v1848_v61 = vmax.f32 %v1846_v44, %v1847_v30  ;;  %v286_v62 = vrot.slane %v7397_v35, 3  ;;  %v3110_v43 = vsel %vm1661_vm2, %v8071_v23, 0.0 }
 0x25e   :  { %6506 = vmatmul.msk.f32.gmra.mxu0 %vm1661_vm2, %v3986_v17  ;;  %v3101_v17 = vrot.slane %v3100_v45, 1  ;;  %v1225_v7 = vpop.f32.mrf.mxu1  ;;  %v3111_v32 = vrot.slane %v3110_v43, 4  ;;  %v232_v44 = vrot.slane %v7359_v25, 5  ;;  %v1854_v19 = vrot.slane %v1853_v54, 2 }
 0x25f   :  { %v3106_v42 = vrot.slane %v3105_v52, 2  ;;  %v412_v51 = vperm.slane %v286_v62, 0  ;;  %v1849_v5 = vrot.slane %v1848_v61, 1  ;;  %v8082_v22 = vadd.f32 %v7888_v57, %v1225_v7 }
 0x260   :  { %v3102_v18 = vadd.f32 %v3101_v17, %v3100_v45  ;;  %v8086_v45 = vpop.f32.mrf.mxu3  ;;  %v350_v30 = vperm.slane %v232_v44, 0  ;;  %v1855_v62 = vmax.f32 %v1853_v54, %v1854_v19 }
 0x261   :  { %6401 = vmatmul.msk.f32.gmra.mxu1 %vm739_vm1, %v653_v15  ;;  %v3107_v3 = vadd.f32 %v3106_v42, %v3105_v52  ;;  %v716_v40 = vmul.f32 %v8002_v2, %v412_v51  ;;  %10733 = vst [vmem:[#allocation19_spill] sm:$0xff] %v8086_v45  ;;  %v1850_v56 = vmax.f32 %v1848_v61, %v1849_v5  ;;  %v1858_v57 = vsel %vm1661_vm2, %v8082_v22, -inf }
 0x262   :  { %6734 = vrcp.f32 %v3102_v18  ;;  %v3112_v52 = vadd.f32 %v3111_v32, %v3110_v43  ;;  %v1859_v31 = vrot.slane %v1858_v57, 4  ;;  %v654_v18 = vmul.f32 %v7626_v13, %v350_v30 }
 0x263   :  { %6736 = vpow2.f32 %v2736_v4  ;;  %6464 = vmatmul.msk.f32.gmra.mxu3 %vm739_vm1, %v716_v40  ;;  %v3108_v15 = vrot.slane %v3107_v3, 1  ;;  %v2584_v0 = vsub.f32 %v8038_v11, %v1850_v56  ;;  %v287_v43 = vrot.slane %v7397_v35, 4 }
 0x264   :  { %v3113_v42 = vrot.slane %v3112_v52, 2  ;;  %v1860_v7 = vmax.f32 %v1858_v57, %v1859_v31  ;;  %v1856_v32 = vrot.slane %v1855_v62, 1  ;;  %v351_v56 = vperm.slane %v233_v6, 0 }
 0x265   :  { %v3109_v61 = vadd.f32 %v3108_v15, %v3107_v3  ;;  %v2738_v11 = vmul.f32 1.442695, %v2584_v0  ;;  %v413_v5 = vperm.slane %v287_v43, 0  ;;  %v8104_v3 = vpop.f32.mrf.mxu0 }
 0x266   :  { %6507 = vmatmul.msk.f32.gmra.mxu0 %vm1661_vm2, %v3987_v38  ;;  %v1228_v4 = vpop.f32.mrf.mxu1  ;;  %v3114_v51 = vadd.f32 %v3113_v42, %v3112_v52  ;;  %v1857_v52 = vmax.f32 %v1855_v62, %v1856_v32  ;;  %v288_v62 = vrot.slane %v7397_v35, 5 }
 0x267   :  { %6738 = vrcp.f32 %v3109_v61  ;;  %v8107_v44 = vadd.f32 %v7918_v8, %v1228_v4  ;;  %v717_v54 = vmul.f32 %v8002_v2, %v413_v5  ;;  %v655_v8 = vmul.f32 %v7626_v13, %v351_v56 }
 0x268   :  { %v6735_v37 = vpop.eup %6734  ;;  %6740 = vpow2.f32 %v2738_v11  ;;  %v8110_v30 = vpop.f32.mrf.mxu3  ;;  %v3115_v19 = vrot.slane %v3114_v51, 1 }
 0x269   :  { %v3988_v17 = vmul.f32 %v6735_v37, %v8024_v53  ;;  %v8096_v38 = vpop.eup %6736  ;;  %6402 = vmatmul.msk.f32.gmra.mxu1 %vm739_vm1, %v654_v18  ;;  %v1861_v37 = vrot.slane %v1860_v7, 2  ;;  %10734 = vst [vmem:[#allocation20_spill] sm:$0xff] %v8110_v30  ;;  %v1865_v0 = vsel %vm1661_vm2, %v8107_v44, -inf  ;;  %v2585_v18 = vsub.f32 %v8066_v49, %v1857_v52 }
 0x26a   :  { %v3117_v53 = vsel %vm1661_vm2, %v8096_v38, 0.0  ;;  %v3116_v42 = vadd.f32 %v3115_v19, %v3114_v51  ;;  %v1866_v43 = vrot.slane %v1865_v0, 4  ;;  %v234_v49 = vrot.slane %v7359_v25, 7 }
 0x26b   :  { %v3118_v40 = vrot.slane %v3117_v53, 4  ;;  %6465 = vmatmul.msk.f32.gmra.mxu3 %vm739_vm1, %v717_v54  ;;  %v1862_v31 = vmax.f32 %v1860_v7, %v1861_v37  ;;  %v2740_v51 = vmul.f32 1.442695, %v2585_v18  ;;  %v361_v30 = vperm.slane %v7367_v27, 0 }
 0x26c   :  { %6742 = vrcp.f32 %v3116_v42  ;;  %v1867_v5 = vmax.f32 %v1865_v0, %v1866_v43  ;;  %v352_v52 = vperm.slane %v234_v49, 0 }
 0x26d   :  { %v6739_v15 = vpop.eup %6738  ;;  %v1863_v6 = vrot.slane %v1862_v31, 1  ;;  %v8123_v11 = vpop.f32.mrf.mxu0  ;;  %6744 = vpow2.f32 %v2740_v51 }
 0x26e   :  { %6508 = vmatmul.msk.f32.gmra.mxu0 %vm1661_vm2, %v3988_v17  ;;  %v3989_v57 = vmul.f32 %v6739_v15, %v8045_v21  ;;  %v3119_v17 = vadd.f32 %v3118_v40, %v3117_v53  ;;  %v8119_v61 = vpop.eup %6740  ;;  %v414_v53 = vperm.slane %v288_v62, 0  ;;  %v1231_v4 = vpop.f32.mrf.mxu1 }
 0x26f   :  { %v3124_v7 = vsel %vm1661_vm2, %v8119_v61, 0.0  ;;  %v1864_v37 = vmax.f32 %v1862_v31, %v1863_v6  ;;  %v8132_v15 = vadd.f32 %v7935_v59, %v1231_v4  ;;  %v656_v59 = vmul.f32 %v7626_v13, %v352_v52 }
 0x270   :  { %v3120_v21 = vrot.slane %v3119_v17, 2  ;;  %v718_v32 = vmul.f32 %v8002_v2, %v414_v53  ;;  %v8129_v54 = vpop.f32.mrf.mxu3  ;;  %v3125_v56 = vrot.slane %v3124_v7, 4 }
 0x271   :  { %6403 = vmatmul.msk.f32.gmra.mxu1 %vm739_vm1, %v655_v8  ;;  %10735 = vst [vmem:[#allocation21_spill] sm:$0xff] %v8129_v54  ;;  %v1872_v25 = vsel %vm1661_vm2, %v8132_v15, -inf }
 0x272   :  { %v3121_v40 = vadd.f32 %v3120_v21, %v3119_v17  ;;  %v6743_v19 = vpop.eup %6742  ;;  %v3126_v42 = vadd.f32 %v3125_v56, %v3124_v7  ;;  %v2586_v17 = vsub.f32 %v8082_v22, %v1864_v37  ;;  %v1873_v43 = vrot.slane %v1872_v25, 4 }
 0x273   :  { %6466 = vmatmul.msk.f32.gmra.mxu3 %vm739_vm1, %v718_v32  ;;  %v3990_v0 = vmul.f32 %v6743_v19, %v8071_v23  ;;  %v8144_v21 = vpop.eup %6744  ;;  %v289_v22 = vrot.slane %v7397_v35, 6  ;;  %v353_v7 = vperm.slane %v7363_v26, 0 }
 0x274   :  { %v3122_v8 = vrot.slane %v3121_v40, 1  ;;  %v3127_v23 = vrot.slane %v3126_v42, 2  ;;  %v2742_v6 = vmul.f32 1.442695, %v2586_v17  ;;  %v3131_v13 = vsel %vm1661_vm2, %v8144_v21, 0.0 }
 0x275   :  { %v8141_v18 = vpop.f32.mrf.mxu0  ;;  %v415_v51 = vperm.slane %v289_v22, 0  ;;  %v657_v37 = vmul.f32 %v7459_v63, %v353_v7  ;;  %v3132_v19 = vrot.slane %v3131_v13, 4  ;;  %v290_v22 = vrot.slane %v7397_v35, 7 }
 0x276   :  { %6509 = vmatmul.msk.f32.gmra.mxu0 %vm1661_vm2, %v3989_v57  ;;  %v1868_v57 = vrot.slane %v1867_v5, 2  ;;  %v3123_v62 = vadd.f32 %v3122_v8, %v3121_v40  ;;  %v1234_v53 = vpop.f32.mrf.mxu1  ;;  %v3128_v32 = vadd.f32 %v3127_v23, %v3126_v42 }
 0x277   :  { %v8151_v40 = vadd.f32 %v7957_v48, %v1234_v53  ;;  %v719_v49 = vmul.f32 %v8002_v2, %v415_v51 }
 0x278   :  { %v1869_v31 = vmax.f32 %v1867_v5, %v1868_v57  ;;  %6746 = vrcp.f32 %v3123_v62  ;;  %v1874_v5 = vmax.f32 %v1872_v25, %v1873_v43  ;;  %v8154_v56 = vpop.f32.mrf.mxu3  ;;  %v3129_v8 = vrot.slane %v3128_v32, 1 }
 0x279   :  { %6404 = vmatmul.msk.f32.gmra.mxu1 %vm739_vm1, %v656_v59  ;;  %6748 = vpow2.f32 %v2742_v6  ;;  %10736 = vst [vmem:[#allocation22_spill] sm:$0xff] %v8154_v56  ;;  %v1879_v42 = vsel %vm1661_vm2, %v8151_v40, -inf  ;;  %v3133_v59 = vadd.f32 %v3132_v19, %v3131_v13 }
 0x27a   :  { %v1870_v4 = vrot.slane %v1869_v31, 1  ;;  %v1875_v57 = vrot.slane %v1874_v5, 2  ;;  %v1880_v62 = vrot.slane %v1879_v42, 4  ;;  %v3130_v23 = vadd.f32 %v3129_v8, %v3128_v32 }
 0x27b   :  { %6467 = vmatmul.msk.f32.gmra.mxu3 %vm739_vm1, %v719_v49  ;;  %v3134_v53 = vrot.slane %v3133_v59, 2 }
 0x27c   :  { %v1871_v52 = vmax.f32 %v1869_v31, %v1870_v4  ;;  %v1876_v31 = vmax.f32 %v1874_v5, %v1875_v57  ;;  %6750 = vrcp.f32 %v3130_v23  ;;  %v416_v5 = vperm.slane %v290_v22, 0 }
 0x27d   :  { %v8161_v48 = vpop.f32.mrf.mxu0  ;;  %v3135_v19 = vadd.f32 %v3134_v53, %v3133_v59 }
 0x27e   :  { %6510 = vmatmul.msk.f32.gmra.mxu0 %vm1661_vm2, %v3990_v0  ;;  %v6747_v0 = vpop.eup %6746  ;;  %v2587_v43 = vsub.f32 %v8107_v44, %v1871_v52  ;;  %v1237_v4 = vpop.f32.mrf.mxu1  ;;  %v1877_v13 = vrot.slane %v1876_v31, 1  ;;  %v1881_v44 = vmax.f32 %v1879_v42, %v1880_v62  ;;  %v720_v32 = vmul.f32 %v8002_v2, %v416_v5 }
 0x27f   :  { %v3991_v17 = vmul.f32 %v6747_v0, %v8096_v38  ;;  %v8164_v25 = vpop.eup %6748  ;;  %v235_v38 = vrot.slane %v7363_v26, 1  ;;  %v3136_v59 = vrot.slane %v3135_v19, 1 }
 0x280   :  { %v3138_v6 = vsel %vm1661_vm2, %v8164_v25, 0.0  ;;  %v2744_v7 = vmul.f32 1.442695, %v2587_v43  ;;  %v8172_v51 = vpop.f32.mrf.mxu3  ;;  %v1878_v57 = vmax.f32 %v1876_v31, %v1877_v13  ;;  %v1882_v0 = vrot.slane %v1881_v44, 2  ;;  %v8194_v13 = vpop.permute.xlu2 %589 }
 0x281   :  { %6405 = vmatmul.msk.f32.gmra.mxu1 %vm739_vm1, %v657_v37  ;;  %10737 = vst [vmem:[#allocation23_spill] sm:$0xff] %v8172_v51  ;;  %v3139_v49 = vrot.slane %v3138_v6, 4  ;;  %v8175_v37 = vadd.f32 %v7983_v34, %v1237_v4  ;;  %v354_v35 = vperm.slane %v235_v38, 0  ;;  %v236_v43 = vrot.slane %v7363_v26, 2 }
 0x282   :  { %6752 = vpow2.f32 %v2744_v7  ;;  %v6751_v8 = vpop.eup %6750  ;;  %v2588_v62 = vsub.f32 %v8132_v15, %v1878_v57  ;;  %v1883_v31 = vmax.f32 %v1881_v44, %v1882_v0  ;;  %v3137_v4 = vadd.f32 %v3136_v59, %v3135_v19 }
 0x283   :  { %6468 = vmatmul.msk.f32.gmra.mxu3 %vm739_vm1, %v720_v32  ;;  %v658_v42 = vmul.f32 %v7459_v63, %v354_v35  ;;  %v1886_v34 = vsel %vm1661_vm2, %v8175_v37, -inf  ;;  %v3992_v2 = vmul.f32 %v6751_v8, %v8119_v61  ;;  %v355_v53 = vperm.slane %v236_v43, 0 }
 0x284   :  { %v1887_v22 = vrot.slane %v1886_v34, 4  ;;  %v417_v38 = vperm.slane %v7401_v36, 0  ;;  %v2746_v5 = vmul.f32 1.442695, %v2588_v62  ;;  %v1884_v15 = vrot.slane %v1883_v31, 1 }
 0x285   :  { %v8178_v52 = vpop.f32.mrf.mxu0  ;;  %v659_v57 = vmul.f32 %v7459_v63, %v355_v53  ;;  %6754 = vrcp.f32 %v3137_v4  ;;  %v237_v4 = vrot.slane %v7363_v26, 3 }
 0x286   :  { %6511 = vmatmul.msk.f32.gmra.mxu0 %vm1661_vm2, %v3991_v17  ;;  %v3140_v17 = vadd.f32 %v3139_v49, %v3138_v6  ;;  %v1888_v49 = vmax.f32 %v1886_v34, %v1887_v22  ;;  %v1240_v32 = vpop.f32.mrf.mxu1  ;;  %v721_v35 = vmul.f32 %v8194_v13, %v417_v38  ;;  %6756 = vpow2.f32 %v2746_v5 }
 0x287   :  { %v1885_v19 = vmax.f32 %v1883_v31, %v1884_v15 }
 0x288   :  { %v8189_v23 = vpop.eup %6752  ;;  %v3141_v6 = vrot.slane %v3140_v17, 2  ;;  %v8191_v7 = vpop.f32.mrf.mxu3  ;;  %v1889_v43 = vrot.slane %v1888_v49, 2 }
 0x289   :  { %6406 = vmatmul.msk.f32.gmra.mxu1 %vm739_vm1, %v658_v42  ;;  %10738 = vst [vmem:[#allocation24_spill] sm:$0xff] %v8191_v7  ;;  %v3145_v61 = vsel %vm1661_vm2, %v8189_v23, 0.0  ;;  %v8205_v42 = vadd.f32 %v8013_v16, %v1240_v32  ;;  %v2589_v59 = vsub.f32 %v8151_v40, %v1885_v19  ;;  %v291_v40 = vrot.slane %v7401_v36, 1 }
 0x28a   :  { %v3142_v44 = vadd.f32 %v3141_v6, %v3140_v17  ;;  %v3146_v8 = vrot.slane %v3145_v61, 4  ;;  %v1890_v22 = vmax.f32 %v1888_v49, %v1889_v43 }
 0x28b   :  { %6469 = vmatmul.msk.f32.gmra.mxu3 %vm739_vm1, %v721_v35  ;;  %v1893_v62 = vsel %vm1661_vm2, %v8205_v42, -inf  ;;  %v6755_v6 = vpop.eup %6754  ;;  %v2748_v15 = vmul.f32 1.442695, %v2589_v59  ;;  %v356_v35 = vperm.slane %v237_v4, 0  ;;  %v418_v19 = vperm.slane %v291_v40, 0 }
 0x28c   :  { %v3143_v17 = vrot.slane %v3142_v44, 1  ;;  %v3147_v34 = vadd.f32 %v3146_v8, %v3145_v61  ;;  %v8213_v38 = vpop.eup %6756  ;;  %v3993_v16 = vmul.f32 %v6755_v6, %v8144_v21  ;;  %v1894_v5 = vrot.slane %v1893_v62, 4 }
 0x28d   :  { %v8200_v0 = vpop.f32.mrf.mxu0  ;;  %v3152_v49 = vsel %vm1661_vm2, %v8213_v38, 0.0  ;;  %v660_v43 = vmul.f32 %v7459_v63, %v356_v35  ;;  %v292_v35 = vrot.slane %v7401_v36, 2 }
 0x28e   :  { %6512 = vmatmul.msk.f32.gmra.mxu0 %vm1661_vm2, %v3992_v2  ;;  %v3144_v53 = vadd.f32 %v3143_v17, %v3142_v44  ;;  %v3148_v31 = vrot.slane %v3147_v34, 2  ;;  %v1891_v44 = vrot.slane %v1890_v22, 1  ;;  %v1243_v32 = vpop.f32.mrf.mxu1  ;;  %v1895_v8 = vmax.f32 %v1893_v62, %v1894_v5 }
 0x28f   :  { %v3153_v21 = vrot.slane %v3152_v49, 4  ;;  %v8223_v17 = vadd.f32 %v8035_v46, %v1243_v32 }
 0x290   :  { %v8207_v2 = vpop.f32.mrf.mxu3  ;;  %6758 = vrcp.f32 %v3144_v53  ;;  %v1892_v6 = vmax.f32 %v1890_v22, %v1891_v44  ;;  %v722_v53 = vmul.f32 %v8194_v13, %v418_v19  ;;  %v1896_v62 = vrot.slane %v1895_v8, 2 }
 0x291   :  { %6407 = vmatmul.msk.f32.gmra.mxu1 %vm739_vm1, %v659_v57  ;;  %10739 = vst [vmem:[#allocation25_spill] sm:$0xff] %v8207_v2  ;;  %v3149_v57 = vadd.f32 %v3148_v31, %v3147_v34  ;;  %6760 = vpow2.f32 %v2748_v15  ;;  %v3154_v4 = vadd.f32 %v3153_v21, %v3152_v49  ;;  %v1900_v46 = vsel %vm1661_vm2, %v8223_v17, -inf }
 0x292   :  { %v2590_v22 = vsub.f32 %v8175_v37, %v1892_v6  ;;  %v238_v31 = vrot.slane %v7363_v26, 4  ;;  %v1901_v40 = vrot.slane %v1900_v46, 4 }
 0x293   :  { %v3150_v34 = vrot.slane %v3149_v57, 1  ;;  %6470 = vmatmul.msk.f32.gmra.mxu3 %vm739_vm1, %v722_v53  ;;  %v3155_v32 = vrot.slane %v3154_v4, 2 }
 0x294   :  { %v2750_v19 = vmul.f32 1.442695, %v2590_v22  ;;  %v357_v21 = vperm.slane %v238_v31, 0 }
 0x295   :  { %v8216_v61 = vpop.f32.mrf.mxu0  ;;  %v3151_v44 = vadd.f32 %v3150_v34, %v3149_v57  ;;  %v3156_v53 = vadd.f32 %v3155_v32, %v3154_v4 }
 0x296   :  { %6513 = vmatmul.msk.f32.gmra.mxu0 %vm1661_vm2, %v3993_v16  ;;  %v6759_v59 = vpop.eup %6758  ;;  %v661_v34 = vmul.f32 %v7459_v63, %v357_v21 }
 0x297   :  { %v3994_v2 = vmul.f32 %v6759_v59, %v8164_v25  ;;  %v8237_v5 = vpop.eup %6760  ;;  %v1897_v25 = vmax.f32 %v1895_v8, %v1896_v62  ;;  %6762 = vrcp.f32 %v3151_v44  ;;  %v419_v59 = vperm.slane %v292_v35, 0 }
 0x298   :  { %v8227_v16 = vpop.f32.mrf.mxu3  ;;  %v3159_v49 = vsel %vm1661_vm2, %v8237_v5, 0.0  ;;  %6764 = vpow2.f32 %v2750_v19  ;;  %v3157_v31 = vrot.slane %v3156_v53, 1 }
 0x299   :  { %10740 = vst [vmem:[#allocation26_spill] sm:$0xff] %v8227_v16  ;;  %6408 = vmatmul.msk.f32.gmra.mxu1 %vm739_vm1, %v660_v43  ;;  %v1898_v37 = vrot.slane %v1897_v25, 1  ;;  %v1902_v43 = vmax.f32 %v1900_v46, %v1901_v40  ;;  %v3160_v16 = vrot.slane %v3159_v49, 4  ;;  %v723_v8 = vmul.f32 %v8194_v13, %v419_v59 }
 0x29a   :  { %v3158_v21 = vadd.f32 %v3157_v31, %v3156_v53 }
 0x29b   :  { %v1899_v62 = vmax.f32 %v1897_v25, %v1898_v37  ;;  %v1903_v22 = vrot.slane %v1902_v43, 2  ;;  %6471 = vmatmul.msk.f32.gmra.mxu3 %vm739_vm1, %v723_v8  ;;  %v3161_v4 = vadd.f32 %v3160_v16, %v3159_v49  ;;  %v239_v37 = vrot.slane %v7363_v26, 5 }
 0x29c   :  { %6766 = vrcp.f32 %v3158_v21 }
 0x29d   :  { %v8239_v15 = vpop.f32.mrf.mxu0  ;;  %v6763_v46 = vpop.eup %6762  ;;  %v2591_v35 = vsub.f32 %v8205_v42, %v1899_v62  ;;  %v1904_v25 = vmax.f32 %v1902_v43, %v1903_v22  ;;  %v3162_v59 = vrot.slane %v3161_v4, 2  ;;  %v358_v22 = vperm.slane %v239_v37, 0 }
 0x29e   :  { %6514 = vmatmul.msk.f32.gmra.mxu0 %vm1661_vm2, %v3994_v2  ;;  %v1246_v2 = vpop.f32.mrf.mxu1  ;;  %v8258_v32 = vpop.eup %6764 }
 0x29f   :  { %v8247_v57 = vadd.f32 %v8063_v39, %v1246_v2  ;;  %v3995_v39 = vmul.f32 %v6763_v46, %v8189_v23  ;;  %v293_v2 = vrot.slane %v7401_v36, 3  ;;  %v3166_v49 = vsel %vm1661_vm2, %v8258_v32, 0.0 }
 0x2a0   :  { %v8244_v6 = vpop.f32.mrf.mxu3  ;;  %v2752_v8 = vmul.f32 1.442695, %v2591_v35  ;;  %v3163_v53 = vadd.f32 %v3162_v59, %v3161_v4  ;;  %v3167_v46 = vrot.slane %v3166_v49, 4  ;;  %v8276_v35 = vld [vmem:[%s10706_s4 + $0x20] sm:$0xff]  ;;  %v240_v59 = vrot.slane %v7363_v26, 6 }
 0x2a1   :  { %10741 = vst [vmem:[#allocation27_spill] sm:$0xff] %v8244_v6  ;;  %6409 = vmatmul.msk.f32.gmra.mxu1 %vm739_vm1, %v661_v34  ;;  %v1907_v44 = vsel %vm1661_vm2, %v8247_v57, -inf  ;;  %v420_v23 = vperm.slane %v293_v2, 0  ;;  %v1905_v34 = vrot.slane %v1904_v25, 1 }
 0x2a2   :  { %v1908_v19 = vrot.slane %v1907_v44, 4  ;;  %6768 = vpow2.f32 %v2752_v8  ;;  %v3164_v4 = vrot.slane %v3163_v53, 1  ;;  %v3168_v2 = vadd.f32 %v3167_v46, %v3166_v49 }
 0x2a3   :  { %v724_v62 = vmul.f32 %v8194_v13, %v420_v23  ;;  %v294_v49 = vrot.slane %v7401_v36, 4 }
 0x2a4   :  { %v1909_v42 = vmax.f32 %v1907_v44, %v1908_v19  ;;  %v6767_v19 = vpop.eup %6766 }
 0x2a5   :  { %v8253_v40 = vpop.f32.mrf.mxu0  ;;  %6472 = vmatmul.msk.f32.gmra.mxu3 %vm739_vm1, %v724_v62  ;;  %v3996_v37 = vmul.f32 %v6767_v19, %v8213_v38  ;;  %v3169_v62 = vrot.slane %v3168_v2, 2  ;;  %v359_v38 = vperm.slane %v240_v59, 0  ;;  %v421_v19 = vperm.slane %v294_v49, 0 }
 0x2a6   :  { %6515 = vmatmul.msk.f32.gmra.mxu0 %vm1661_vm2, %v3995_v39  ;;  %v1249_v43 = vpop.f32.mrf.mxu1  ;;  %v662_v39 = vmul.f32 %v7459_v63, %v358_v22  ;;  %v1910_v21 = vrot.slane %v1909_v42, 2  ;;  %v3165_v22 = vadd.f32 %v3164_v4, %v3163_v53  ;;  %v241_v59 = vrot.slane %v7363_v26, 7 }
 0x2a7   :  { %v8279_v44 = vadd.f32 %v8276_v35, %v1249_v43  ;;  %v3170_v6 = vadd.f32 %v3169_v62, %v3168_v2  ;;  %v663_v53 = vmul.f32 %v7459_v63, %v359_v38 }
 0x2a8   :  { %v8264_v16 = vpop.f32.mrf.mxu3  ;;  %v8290_v43 = vpop.eup %6768  ;;  %6770 = vrcp.f32 %v3165_v22  ;;  %v360_v38 = vperm.slane %v241_v59, 0 }
 0x2a9   :  { %10742 = vst [vmem:[#allocation28_spill] sm:$0xff] %v8264_v16  ;;  %v1906_v16 = vmax.f32 %v1904_v25, %v1905_v34  ;;  %6410 = vmatmul.msk.f32.gmra.mxu1 %vm739_vm1, %v662_v39  ;;  %v1914_v23 = vsel %vm1661_vm2, %v8279_v44, -inf  ;;  %v1911_v34 = vmax.f32 %v1909_v42, %v1910_v21  ;;  %v725_v42 = vmul.f32 %v8194_v13, %v421_v19 }
 0x2aa   :  { %v1915_v46 = vrot.slane %v1914_v23, 4  ;;  %v3171_v49 = vrot.slane %v3170_v6, 1 }
 0x2ab   :  { %v2592_v25 = vsub.f32 %v8223_v17, %v1906_v16  ;;  %v3173_v16 = vsel %vm1661_vm2, %v8290_v43, 0.0 }
 0x2ac   :  { %v1916_v21 = vmax.f32 %v1914_v23, %v1915_v46  ;;  %v3174_v4 = vrot.slane %v3173_v16, 4  ;;  %v8307_v23 = vld [vmem:[%s10706_s4 + $0x28] sm:$0xff] }
 0x2ad   :  { %v8269_v31 = vpop.f32.mrf.mxu0  ;;  %v2754_v39 = vmul.f32 1.442695, %v2592_v25  ;;  %6473 = vmatmul.msk.f32.gmra.mxu3 %vm739_vm1, %v725_v42 }
 0x2ae   :  { %6516 = vmatmul.msk.f32.gmra.mxu0 %vm1661_vm2, %v3996_v37  ;;  %v1912_v37 = vrot.slane %v1911_v34, 1  ;;  %v6771_v22 = vpop.eup %6770  ;;  %v1917_v2 = vrot.slane %v1916_v21, 2  ;;  %v3175_v26 = vadd.f32 %v3174_v4, %v3173_v16 }
 0x2af   :  { %6772 = vpow2.f32 %v2754_v39  ;;  %v3997_v46 = vmul.f32 %v6771_v22, %v8237_v5  ;;  %v295_v5 = vrot.slane %v7401_v36, 5 }
 0x2b0   :  { %v8288_v8 = vpop.f32.mrf.mxu3  ;;  %v1913_v25 = vmax.f32 %v1911_v34, %v1912_v37  ;;  %v1918_v37 = vmax.f32 %v1916_v21, %v1917_v2 }
 0x2b1   :  { %10743 = vst [vmem:[#allocation29_spill] sm:$0xff] %v8288_v8  ;;  %v1252_v8 = vpop.f32.mrf.mxu1  ;;  %6411 = vmatmul.msk.f32.gmra.mxu1 %vm739_vm1, %v663_v53  ;;  %v3172_v53 = vadd.f32 %v3171_v49, %v3170_v6  ;;  %v422_v21 = vperm.slane %v295_v5, 0 }
 0x2b2   :  { %v8310_v62 = vadd.f32 %v8307_v23, %v1252_v8  ;;  %v2593_v34 = vsub.f32 %v8247_v57, %v1913_v25  ;;  %v664_v8 = vmul.f32 %v7459_v63, %v360_v38  ;;  %v1919_v25 = vrot.slane %v1918_v37, 1  ;;  %v8329_v63 = vld [vmem:[%s10706_s4 + $0x30] sm:$0xff] }
 0x2b3   :  { %6774 = vrcp.f32 %v3172_v53 }
 0x2b4   :  { %v1921_v42 = vsel %vm1661_vm2, %v8310_v62, -inf  ;;  %v2756_v57 = vmul.f32 1.442695, %v2593_v34  ;;  %v1920_v34 = vmax.f32 %v1918_v37, %v1919_v25 }
 0x2b5   :  { %v8293_v17 = vpop.f32.mrf.mxu0  ;;  %v8315_v39 = vpop.eup %6772  ;;  %v1922_v59 = vrot.slane %v1921_v42, 4 }
 0x2b6   :  { %6517 = vmatmul.msk.f32.gmra.mxu0 %vm1661_vm2, %v3997_v46  ;;  %v3180_v16 = vsel %vm1661_vm2, %v8315_v39, 0.0  ;;  %6776 = vpow2.f32 %v2756_v57  ;;  %v726_v46 = vmul.f32 %v8194_v13, %v422_v21  ;;  %v2594_v57 = vsub.f32 %v8279_v44, %v1920_v34 }
 0x2b7   :  { %v3181_v2 = vrot.slane %v3180_v16, 4  ;;  %v1923_v38 = vmax.f32 %v1921_v42, %v1922_v59  ;;  %v296_v59 = vrot.slane %v7401_v36, 6 }
 0x2b8   :  { %v8302_v7 = vpop.f32.mrf.mxu3  ;;  %6474 = vmatmul.msk.f32.gmra.mxu3 %vm739_vm1, %v726_v46 }
 0x2b9   :  { %10744 = vst [vmem:[#allocation30_spill] sm:$0xff] %v8302_v7  ;;  %v3176_v7 = vrot.slane %v3175_v26, 2  ;;  %v1255_v4 = vpop.f32.mrf.mxu1  ;;  %6412 = vmatmul.msk.f32.gmra.mxu1 %vm739_vm1, %v664_v8  ;;  %v6775_v53 = vpop.eup %6774  ;;  %v1924_v51 = vrot.slane %v1923_v38, 2  ;;  %v423_v46 = vperm.slane %v296_v59, 0 }
 0x2ba   :  { %v8332_v6 = vadd.f32 %v8329_v63, %v1255_v4  ;;  %v3998_v4 = vmul.f32 %v6775_v53, %v8258_v32  ;;  %v2758_v53 = vmul.f32 1.442695, %v2594_v57 }
 0x2bb   :  { %v3177_v22 = vadd.f32 %v3176_v7, %v3175_v26  ;;  %v3182_v26 = vadd.f32 %v3181_v2, %v3180_v16  ;;  %v1925_v25 = vmax.f32 %v1923_v38, %v1924_v51  ;;  %v727_v44 = vmul.f32 %v8194_v13, %v423_v46 }
 0x2bc   :  { %v1928_v8 = vsel %vm1661_vm2, %v8332_v6, -inf  ;;  %v8343_v56 = vpop.eup %6776 }
 0x2bd   :  { %v8317_v19 = vpop.f32.mrf.mxu0  ;;  %v3178_v7 = vrot.slane %v3177_v22, 1  ;;  %v1929_v21 = vrot.slane %v1928_v8, 4  ;;  %v3183_v37 = vrot.slane %v3182_v26, 2  ;;  %v3187_v16 = vsel %vm1661_vm2, %v8343_v56, 0.0 }
 0x2be   :  { %6518 = vmatmul.msk.f32.gmra.mxu0 %vm1661_vm2, %v3998_v4  ;;  %v3188_v34 = vrot.slane %v3187_v16, 4  ;;  %v1926_v51 = vrot.slane %v1925_v25, 1 }
 0x2bf   :  { %v3179_v42 = vadd.f32 %v3178_v7, %v3177_v22  ;;  %v3184_v54 = vadd.f32 %v3183_v37, %v3182_v26  ;;  %v8356_v22 = vld [vmem:[%s10706_s4 + $0x38] sm:$0xff] }
 0x2c0   :  { %v8334_v49 = vpop.f32.mrf.mxu3  ;;  %6475 = vmatmul.msk.f32.gmra.mxu3 %vm739_vm1, %v727_v44  ;;  %v3189_v57 = vadd.f32 %v3188_v34, %v3187_v16 }
 0x2c1   :  { %10745 = vst [vmem:[#allocation31_spill] sm:$0xff] %v8334_v49  ;;  %v1258_v2 = vpop.f32.mrf.mxu1  ;;  %6778 = vrcp.f32 %v3179_v42  ;;  %v1930_v49 = vmax.f32 %v1928_v8, %v1929_v21  ;;  %v3185_v26 = vrot.slane %v3184_v54, 1  ;;  %v1927_v42 = vmax.f32 %v1925_v25, %v1926_v51 }
 0x2c2   :  { %v8359_v7 = vadd.f32 %v8356_v22, %v1258_v2  ;;  %6780 = vpow2.f32 %v2758_v53  ;;  %v3190_v53 = vrot.slane %v3189_v57, 2 }
 0x2c3   :  { %v1931_v4 = vrot.slane %v1930_v49, 2  ;;  %v3186_v46 = vadd.f32 %v3185_v26, %v3184_v54  ;;  %v2595_v16 = vsub.f32 %v8310_v62, %v1927_v42  ;;  %v297_v54 = vrot.slane %v7401_v36, 7  ;;  %v8384_v62 = vld [vmem:[%s10706_s4] sm:$0xff] }
 0x2c4   :  { %v1935_v21 = vsel %vm1661_vm2, %v8359_v7, -inf  ;;  %v3191_v51 = vadd.f32 %v3190_v53, %v3189_v57 }
 0x2c5   :  { %v8340_v5 = vpop.f32.mrf.mxu0  ;;  %v1932_v59 = vmax.f32 %v1930_v49, %v1931_v4  ;;  %v1936_v2 = vrot.slane %v1935_v21, 4  ;;  %6782 = vrcp.f32 %v3186_v46 }
 0x2c6   :  { %v3192_v57 = vrot.slane %v3191_v51, 1 }
 0x2c7   :  { %v6779_v8 = vpop.eup %6778  ;;  %v1933_v34 = vrot.slane %v1932_v59, 1  ;;  %v1937_v25 = vmax.f32 %v1935_v21, %v1936_v2 }
 0x2c8   :  { %v8350_v32 = vpop.f32.mrf.mxu3  ;;  %v3999_v37 = vmul.f32 %v6779_v8, %v8290_v43  ;;  %v665_v43 = vmul.f32 %v7504_v1, %v361_v30  ;;  %v2760_v8 = vmul.f32 1.442695, %v2595_v16  ;;  %v424_v30 = vperm.slane %v297_v54, 0 }
 0x2c9   :  { %10746 = vst [vmem:[#allocation32_spill] sm:$0xff] %v8350_v32  ;;  %v8368_v32 = vpop.eup %6780  ;;  %v1261_v45 = vpop.f32.mrf.mxu1  ;;  %v1934_v42 = vmax.f32 %v1932_v59, %v1933_v34  ;;  %v1938_v2 = vrot.slane %v1937_v25, 2  ;;  %v3193_v54 = vadd.f32 %v3192_v57, %v3191_v51  ;;  %v8412_v57 = vld [vmem:[%s10706_s4 + $0x8] sm:$0xff] }
 0x2ca   :  { %6519 = vmatmul.msk.f32.gmra.mxu0 %vm1661_vm2, %v3999_v37  ;;  %v3194_v49 = vsel %vm1661_vm2, %v8368_v32, 0.0  ;;  %6413 = vmatmul.msk.f32.gmra.mxu1 %vm739_vm1, %v665_v43  ;;  %v8387_v26 = vadd.f32 %v8384_v62, %v1261_v45  ;;  %v728_v36 = vmul.f32 %v8194_v13, %v424_v30  ;;  %6784 = vpow2.f32 %v2760_v8  ;;  %10749 = vst [vmem:[#allocation35_spill] sm:$0xff] %v8412_v57 }
 0x2cb   :  { %v3195_v37 = vrot.slane %v3194_v49, 4  ;;  %v6783_v21 = vpop.eup %6782  ;;  %v2596_v43 = vsub.f32 %v8332_v6, %v1934_v42  ;;  %v1939_v59 = vmax.f32 %v1937_v25, %v1938_v2  ;;  %v242_v13 = vrot.slane %v7367_v27, 1  ;;  %v8405_v25 = vpop.permute.xlu0 %591 }
 0x2cc   :  { %v4000_v46 = vmul.f32 %v6783_v21, %v8315_v39  ;;  %v1942_v53 = vsel %vm1661_vm2, %v8387_v26, -inf  ;;  %6476 = vmatmul.msk.f32.gmra.mxu3 %vm739_vm1, %v728_v36  ;;  %6786 = vrcp.f32 %v3193_v54 }
 0x2cd   :  { %v8362_v38 = vpop.f32.mrf.mxu0  ;;  %v3196_v45 = vadd.f32 %v3195_v37, %v3194_v49  ;;  %v1943_v34 = vrot.slane %v1942_v53, 4  ;;  %v2762_v8 = vmul.f32 1.442695, %v2596_v43  ;;  %v1940_v36 = vrot.slane %v1939_v59, 1 }
 0x2ce   :  { %v425_v37 = vperm.slane %v7410_v41, 0 }
 0x2cf   :  { %v3197_v30 = vrot.slane %v3196_v45, 2  ;;  %6788 = vpow2.f32 %v2762_v8  ;;  %v1941_v2 = vmax.f32 %v1939_v59, %v1940_v36 }
 0x2d0   :  { %v8370_v44 = vpop.f32.mrf.mxu3  ;;  %v8401_v21 = vpop.eup %6784 }
 0x2d1   :  { %10747 = vst [vmem:[#allocation33_spill] sm:$0xff] %v8370_v44  ;;  %v362_v44 = vperm.slane %v242_v13, 0  ;;  %v1264_v49 = vpop.f32.mrf.mxu1  ;;  %v3198_v51 = vadd.f32 %v3197_v30, %v3196_v45  ;;  %v3201_v42 = vsel %vm1661_vm2, %v8401_v21, 0.0  ;;  %v2597_v8 = vsub.f32 %v8359_v7, %v1941_v2  ;;  %v8436_v2 = vpop.permute.xlu1 %4884 }
 0x2d2   :  { %6520 = vmatmul.msk.f32.gmra.mxu0 %vm1661_vm2, %v4000_v46  ;;  %v8415_v46 = vadd.f32 %v8412_v57, %v1264_v49  ;;  %v6787_v45 = vpop.eup %6786  ;;  %v3202_v54 = vrot.slane %v3201_v42, 4  ;;  %v298_v7 = vrot.slane %v7410_v41, 1 }
 0x2d3   :  { %v666_v6 = vmul.f32 %v7504_v1, %v362_v44  ;;  %v729_v44 = vmul.f32 %v8405_v25, %v425_v37  ;;  %v4001_v59 = vmul.f32 %v6787_v45, %v8343_v56  ;;  %v3199_v30 = vrot.slane %v3198_v51, 1 }
 0x2d4   :  { %v1949_v36 = vsel %vm1661_vm2, %v8415_v46, -inf  ;;  %v244_v56 = vrot.slane %v7367_v27, 3  ;;  %v2764_v45 = vmul.f32 1.442695, %v2597_v8 }
 0x2d5   :  { %v8378_v4 = vpop.f32.mrf.mxu0  ;;  %6414 = vmatmul.msk.f32.gmra.mxu1 %vm739_vm1, %v666_v6  ;;  %6477 = vmatmul.msk.f32.gmra.mxu3 %vm739_vm1, %v729_v44  ;;  %v8428_v49 = vpop.eup %6788  ;;  %v1950_v44 = vrot.slane %v1949_v36, 4 }
 0x2d8   :  { %v8394_v16 = vpop.f32.mrf.mxu3 }
 0x2d9   :  { %10748 = vst [vmem:[#allocation34_spill] sm:$0xff] %v8394_v16  ;;  %v1944_v16 = vmax.f32 %v1942_v53, %v1943_v34  ;;  %v243_v53 = vrot.slane %v7367_v27, 2 }
 0x2da   :  { %6521 = vmatmul.msk.f32.gmra.mxu0 %vm1661_vm2, %v4001_v59  ;;  %v3208_v59 = vsel %vm1661_vm2, %v8428_v49, 0.0 }
 0x2db   :  { %v1945_v34 = vrot.slane %v1944_v16, 2  ;;  %v363_v13 = vperm.slane %v243_v53, 0  ;;  %v3200_v53 = vadd.f32 %v3199_v30, %v3198_v51  ;;  %v1951_v51 = vmax.f32 %v1949_v36, %v1950_v44 }
 0x2dc   :  { %v426_v30 = vperm.slane %v298_v7, 0  ;;  %v3209_v8 = vrot.slane %v3208_v59, 4 }
 0x2dd   :  { %v8399_v39 = vpop.f32.mrf.mxu0  ;;  %v1946_v37 = vmax.f32 %v1944_v16, %v1945_v34  ;;  %v667_v20 = vmul.f32 %v7504_v1, %v363_v13  ;;  %v4932_v16 = vmul.f32 %v8436_v2, %v8089_v33  ;;  %v1267_v34 = vpop.f32.mrf.mxu1  ;;  %6790 = vrcp.f32 %v3200_v53 }
 0x2de   :  { %6792 = vpow2.f32 %v2764_v45  ;;  %v8452_v33 = vadd.f32 %v8449_v50, %v1267_v34 }
 0x2df   :  { %6415 = vmatmul.msk.f32.gmra.mxu1 %vm739_vm1, %v667_v20  ;;  %v1947_v9 = vrot.slane %v1946_v37, 1  ;;  %v4933_v20 = vmul.f32 %v8436_v2, %v8104_v3  ;;  %v5060_v53 = vsel %vm739_vm1, %v4932_v16, 0.0  ;;  %v245_v3 = vrot.slane %v7367_v27, 4 }
 0x2e0   :  { %v8420_v43 = vpop.f32.mrf.mxu3  ;;  %v5061_v34 = vrot.slane %v5060_v53, 4 }
 0x2e1   :  { %10750 = vst [vmem:[#allocation36_spill] sm:$0xff] %v8420_v43  ;;  %v3203_v43 = vadd.f32 %v3202_v54, %v3201_v42  ;;  %v364_v54 = vperm.slane %v244_v56, 0  ;;  %v1948_v10 = vmax.f32 %v1946_v37, %v1947_v9  ;;  %v730_v56 = vmul.f32 %v8405_v25, %v426_v30 }
 0x2e2   :  { %v1952_v9 = vrot.slane %v1951_v51, 2  ;;  %v5067_v45 = vsel %vm739_vm1, %v4933_v20, 0.0  ;;  %v365_v55 = vperm.slane %v245_v3, 0  ;;  %v4934_v20 = vmul.f32 %v8436_v2, %v8123_v11 }
 0x2e3   :  { %v3204_v42 = vrot.slane %v3203_v43, 2  ;;  %v668_v44 = vmul.f32 %v7504_v1, %v364_v54  ;;  %6478 = vmatmul.msk.f32.gmra.mxu3 %vm739_vm1, %v730_v56  ;;  %v6791_v37 = vpop.eup %6790  ;;  %v2598_v30 = vsub.f32 %v8387_v26, %v1948_v10  ;;  %v5068_v60 = vrot.slane %v5067_v45, 4 }
 0x2e4   :  { %v8466_v16 = vpop.eup %6792  ;;  %v4002_v54 = vmul.f32 %v6791_v37, %v8368_v32  ;;  %v1953_v56 = vmax.f32 %v1951_v51, %v1952_v9  ;;  %v299_v32 = vrot.slane %v7410_v41, 2  ;;  %v669_v3 = vmul.f32 %v7504_v1, %v365_v55 }
 0x2e5   :  { %v8430_v6 = vpop.f32.mrf.mxu0  ;;  %v3205_v36 = vadd.f32 %v3204_v42, %v3203_v43  ;;  %v1956_v43 = vsel %vm1661_vm2, %v8452_v33, -inf  ;;  %v3215_v26 = vsel %vm1661_vm2, %v8466_v16, 0.0  ;;  %v246_v51 = vrot.slane %v7367_v27, 5 }
 0x2e6   :  { %v1957_v24 = vrot.slane %v1956_v43, 4  ;;  %6522 = vmatmul.msk.f32.gmra.mxu0 %vm1661_vm2, %v4002_v54  ;;  %v5069_v9 = vadd.f32 %v5068_v60, %v5067_v45  ;;  %v1954_v37 = vrot.slane %v1953_v56, 1  ;;  %v8488_v60 = vld [vmem:[%s10706_s4 + $0x18] sm:$0xff] }
 0x2e7   :  { %6416 = vmatmul.msk.f32.gmra.mxu1 %vm739_vm1, %v668_v44  ;;  %v3206_v42 = vrot.slane %v3205_v36, 1  ;;  %10754 = vst [vmem:[#allocation40_spill] sm:$0xff] %v8488_v60 }
 0x2e8   :  { %v8442_v13 = vpop.f32.mrf.mxu3  ;;  %v1958_v54 = vmax.f32 %v1956_v43, %v1957_v24  ;;  %v1955_v45 = vmax.f32 %v1953_v56, %v1954_v37 }
 0x2e9   :  { %10751 = vst [vmem:[#allocation37_spill] sm:$0xff] %v8442_v13  ;;  %v3210_v13 = vadd.f32 %v3209_v8, %v3208_v59  ;;  %v5062_v59 = vadd.f32 %v5061_v34, %v5060_v53  ;;  %v2766_v8 = vmul.f32 1.442695, %v2598_v30  ;;  %v3207_v44 = vadd.f32 %v3206_v42, %v3205_v36  ;;  %v1270_v34 = vpop.f32.mrf.mxu1 }
 0x2ea   :  { %v4935_v53 = vmul.f32 %v8436_v2, %v8141_v18  ;;  %v5074_v36 = vsel %vm739_vm1, %v4934_v20, 0.0  ;;  %v3216_v42 = vrot.slane %v3215_v26, 4  ;;  %v8491_v55 = vadd.f32 %v8488_v60, %v1270_v34 }
 0x2eb   :  { %v3211_v14 = vrot.slane %v3210_v13, 2  ;;  %6794 = vrcp.f32 %v3207_v44  ;;  %v5063_v30 = vrot.slane %v5062_v59, 2  ;;  %v5070_v18 = vrot.slane %v5069_v9, 2 }
 0x2ec   :  { %6796 = vpow2.f32 %v2766_v8  ;;  %v1959_v20 = vrot.slane %v1958_v54, 2  ;;  %v5075_v8 = vrot.slane %v5074_v36, 4  ;;  %v3217_v44 = vadd.f32 %v3216_v42, %v3215_v26 }
 0x2ed   :  { %v8458_v7 = vpop.f32.mrf.mxu0  ;;  %v3212_v11 = vadd.f32 %v3211_v14, %v3210_v13  ;;  %v366_v14 = vperm.slane %v246_v51, 0  ;;  %v5081_v13 = vsel %vm739_vm1, %v4935_v53, 0.0  ;;  %v1963_v34 = vsel %vm1661_vm2, %v8491_v55, -inf }
 0x2ee   :  { %v5082_v12 = vrot.slane %v5081_v13, 4  ;;  %v2599_v53 = vsub.f32 %v8415_v46, %v1955_v45  ;;  %v4936_v26 = vmul.f32 %v8436_v2, %v8161_v48  ;;  %v1960_v42 = vmax.f32 %v1958_v54, %v1959_v20 }
 0x2ef   :  { %6417 = vmatmul.msk.f32.gmra.mxu1 %vm739_vm1, %v669_v3  ;;  %v3213_v43 = vrot.slane %v3212_v11, 1  ;;  %v5064_v3 = vadd.f32 %v5063_v30, %v5062_v59  ;;  %v670_v47 = vmul.f32 %v7504_v1, %v366_v14  ;;  %v5076_v30 = vadd.f32 %v5075_v8, %v5074_v36 }
 0x2f0   :  { %v8472_v10 = vpop.f32.mrf.mxu3  ;;  %v1964_v60 = vrot.slane %v1963_v34, 4  ;;  %v5083_v46 = vadd.f32 %v5082_v12, %v5081_v13  ;;  %v2768_v45 = vmul.f32 1.442695, %v2599_v53  ;;  %v4937_v36 = vmul.f32 %v8436_v2, %v8178_v52 }
 0x2f1   :  { %10753 = vst [vmem:[#allocation39_spill] sm:$0xff] %v8472_v10  ;;  %v427_v10 = vperm.slane %v299_v32, 0  ;;  %v6795_v32 = vpop.eup %6794  ;;  %v3214_v59 = vadd.f32 %v3213_v43, %v3212_v11  ;;  %v5065_v14 = vrot.slane %v5064_v3, 1  ;;  %v1273_v11 = vpop.f32.mrf.mxu1  ;;  %v1961_v43 = vrot.slane %v1960_v42, 1 }
 0x2f2   :  { %v4003_v56 = vmul.f32 %v6795_v32, %v8401_v21  ;;  %v8503_v37 = vpop.eup %6796  ;;  %v247_v20 = vrot.slane %v7367_v27, 6  ;;  %v5077_v8 = vrot.slane %v5076_v30, 2  ;;  %v1965_v13 = vmax.f32 %v1963_v34, %v1964_v60 }
 0x2f3   :  { %v731_v24 = vmul.f32 %v8405_v25, %v427_v10  ;;  %v5071_v10 = vadd.f32 %v5070_v18, %v5069_v9  ;;  %v300_v9 = vrot.slane %v7410_v41, 3  ;;  %6798 = vrcp.f32 %v3214_v59 }
 0x2f4   :  { %6523 = vmatmul.msk.f32.gmra.mxu0 %vm1661_vm2, %v4003_v56  ;;  %v3222_v18 = vsel %vm1661_vm2, %v8503_v37, 0.0  ;;  %v5084_v32 = vrot.slane %v5083_v46, 2  ;;  %v8519_v59 = vadd.f32 %v8276_v35, %v1273_v11  ;;  %6800 = vpow2.f32 %v2768_v45 }
 0x2f5   :  { %v8483_v58 = vpop.f32.mrf.mxu0  ;;  %6479 = vmatmul.msk.f32.gmra.mxu3 %vm739_vm1, %v731_v24  ;;  %v3218_v24 = vrot.slane %v3217_v44, 2  ;;  %v5072_v21 = vrot.slane %v5071_v10, 1  ;;  %v428_v54 = vperm.slane %v300_v9, 0  ;;  %v3223_v56 = vrot.slane %v3222_v18, 4 }
 0x2f6   :  { %v367_v9 = vperm.slane %v247_v20, 0  ;;  %v5066_v50 = vadd.f32 %v5065_v14, %v5064_v3  ;;  %v5095_v52 = vsel %vm739_vm1, %v4937_v36, 0.0  ;;  %v1966_v34 = vrot.slane %v1965_v13, 2 }
 0x2f7   :  { %6418 = vmatmul.msk.f32.gmra.mxu1 %vm739_vm1, %v670_v47  ;;  %v5088_v47 = vsel %vm739_vm1, %v4936_v26, 0.0  ;;  %v3219_v12 = vadd.f32 %v3218_v24, %v3217_v44  ;;  %v732_v53 = vmul.f32 %v8405_v25, %v428_v54  ;;  %v5073_v57 = vadd.f32 %v5072_v21, %v5071_v10  ;;  %v8533_v21 = vpop.permute.xlu2 %4886 }
 0x2f8   :  { %v8499_v51 = vpop.f32.mrf.mxu3  ;;  %v5078_v24 = vadd.f32 %v5077_v8, %v5076_v30  ;;  %v5085_v11 = vadd.f32 %v5084_v32, %v5083_v46  ;;  %v3224_v54 = vadd.f32 %v3223_v56, %v3222_v18  ;;  %v1970_v45 = vsel %vm1661_vm2, %v8519_v59, -inf }
 0x2f9   :  { %10755 = vst [vmem:[#allocation41_spill] sm:$0xff] %v8499_v51  ;;  %v5089_v51 = vrot.slane %v5088_v47, 4  ;;  %v6799_v26 = vpop.eup %6798  ;;  %v3220_v60 = vrot.slane %v3219_v12, 1  ;;  %v5096_v10 = vrot.slane %v5095_v52, 4  ;;  %v671_v14 = vmul.f32 %v7504_v1, %v367_v9 }
 0x2fa   :  { %v4004_v35 = vmul.f32 %v6799_v26, %v8428_v49  ;;  %v6091_v36 = vsel %vm6090_vm4, %v5073_v57, %v5066_v50  ;;  %v8537_v30 = vpop.eup %6800  ;;  %v1967_v18 = vmax.f32 %v1965_v13, %v1966_v34  ;;  %v5086_v20 = vrot.slane %v5085_v11, 1 }
 0x2fb   :  { %v5090_v3 = vadd.f32 %v5089_v51, %v5088_v47  ;;  %v4940_v51 = vmul.f32 %v8533_v21, %v8239_v15  ;;  %v3221_v47 = vadd.f32 %v3220_v60, %v3219_v12  ;;  %v3225_v8 = vrot.slane %v3224_v54, 2 }
 0x2fc   :  { %6524 = vmatmul.msk.f32.gmra.mxu0 %vm1661_vm2, %v4004_v35  ;;  %v301_v50 = vrot.slane %v7410_v41, 4  ;;  %v5097_v32 = vadd.f32 %v5096_v10, %v5095_v52  ;;  %v4939_v15 = vmul.f32 %v8436_v2, %v8216_v61  ;;  %v1968_v9 = vrot.slane %v1967_v18, 1 }
 0x2fd   :  { %v8512_v48 = vpop.f32.mrf.mxu0  ;;  %6480 = vmatmul.msk.f32.gmra.mxu3 %vm739_vm1, %v732_v53  ;;  %v5091_v57 = vrot.slane %v5090_v3, 2  ;;  %6802 = vrcp.f32 %v3221_v47  ;;  %v5116_v56 = vsel %vm739_vm1, %v4940_v51, 0.0  ;;  %v4941_v53 = vmul.f32 %v8533_v21, %v8253_v40  ;;  %v1276_v47 = vpop.f32.mrf.mxu1 }
 0x2fe   :  { %10756 = vst [vmem:[#allocation42_spill] sm:$0xff] %v8512_v48  ;;  %v1962_v48 = vmax.f32 %v1960_v42, %v1961_v43  ;;  %v4938_v42 = vmul.f32 %v8436_v2, %v8200_v0  ;;  %v1971_v0 = vrot.slane %v1970_v45, 4  ;;  %v5079_v43 = vrot.slane %v5078_v24, 1 }
 0x2ff   :  { %6419 = vmatmul.msk.f32.gmra.mxu1 %vm739_vm1, %v671_v14  ;;  %v429_v12 = vperm.slane %v301_v50, 0  ;;  %v3226_v52 = vadd.f32 %v3225_v8, %v3224_v54  ;;  %v5087_v35 = vadd.f32 %v5086_v20, %v5085_v11  ;;  %v5092_v10 = vadd.f32 %v5091_v57, %v5090_v3 }
 0x300   :  { %v8524_v44 = vpop.f32.mrf.mxu3  ;;  %v2600_v49 = vsub.f32 %v8452_v33, %v1962_v48  ;;  %v5102_v33 = vsel %vm739_vm1, %v4938_v42, 0.0  ;;  %v3229_v48 = vsel %vm1661_vm2, %v8537_v30, 0.0  ;;  %v1972_v26 = vmax.f32 %v1970_v45, %v1971_v0 }
 0x301   :  { %10757 = vst [vmem:[#allocation43_spill] sm:$0xff] %v8524_v44  ;;  %v5080_v60 = vadd.f32 %v5079_v43, %v5078_v24  ;;  %v733_v34 = vmul.f32 %v8405_v25, %v429_v12  ;;  %v5103_v61 = vrot.slane %v5102_v33, 4  ;;  %v3230_v2 = vrot.slane %v3229_v48, 4 }
 0x302   :  { %v2770_v13 = vmul.f32 1.442695, %v2600_v49  ;;  %v5098_v14 = vrot.slane %v5097_v32, 2  ;;  %v5109_v49 = vsel %vm739_vm1, %v4939_v15, 0.0  ;;  %v5117_v51 = vrot.slane %v5116_v56, 4 }
 0x303   :  { %v6803_v40 = vpop.eup %6802  ;;  %v5123_v24 = vsel %vm739_vm1, %v4941_v53, 0.0  ;;  %v4942_v54 = vmul.f32 %v8533_v21, %v8269_v31  ;;  %v1969_v11 = vmax.f32 %v1967_v18, %v1968_v9  ;;  %v1973_v45 = vrot.slane %v1972_v26, 2 }
 0x304   :  { %6804 = vpow2.f32 %v2770_v13  ;;  %v6093_v3 = vsel %vm6092_vm5, %v5080_v60, %v6091_v36  ;;  %v3227_v0 = vrot.slane %v3226_v52, 1  ;;  %v4005_v43 = vmul.f32 %v6803_v40, %v8466_v16 }
 0x305   :  { %v8541_v46 = vpop.f32.mrf.mxu0  ;;  %6481 = vmatmul.msk.f32.gmra.mxu3 %vm739_vm1, %v733_v34  ;;  %v5104_v20 = vadd.f32 %v5103_v61, %v5102_v33  ;;  %v5110_v8 = vrot.slane %v5109_v49, 4  ;;  %v3231_v50 = vadd.f32 %v3230_v2, %v3229_v48  ;;  %v8566_v15 = vadd.f32 %v8307_v23, %v1276_v47 }
 0x306   :  { %v8569_v13 = vsel %vm6094_vm6, %v5087_v35, %v6093_v3  ;;  %v5093_v12 = vrot.slane %v5092_v10, 1  ;;  %v5118_v31 = vadd.f32 %v5117_v51, %v5116_v56  ;;  %v5124_v18 = vrot.slane %v5123_v24, 4  ;;  %6525 = vmatmul.msk.f32.gmra.mxu0 %vm1661_vm2, %v4005_v43 }
 0x307   :  { %v5099_v36 = vadd.f32 %v5098_v14, %v5097_v32  ;;  %v5130_v53 = vsel %vm739_vm1, %v4942_v54, 0.0  ;;  %v2601_v16 = vsub.f32 %v8491_v55, %v1969_v11  ;;  %v1974_v33 = vmax.f32 %v1972_v26, %v1973_v45 }
 0x308   :  { %v8554_v42 = vpop.f32.mrf.mxu3  ;;  %v4943_v23 = vmul.f32 %v8533_v21, %v8293_v17  ;;  %v3228_v9 = vadd.f32 %v3227_v0, %v3226_v52  ;;  %v302_v60 = vrot.slane %v7410_v41, 5  ;;  %v248_v34 = vrot.slane %v7367_v27, 7 }
 0x309   :  { %10758 = vst [vmem:[#allocation44_spill] sm:$0xff] %v8554_v42  ;;  %v5105_v56 = vrot.slane %v5104_v20, 2  ;;  %v5111_v35 = vadd.f32 %v5110_v8, %v5109_v49  ;;  %v3232_v61 = vrot.slane %v3231_v50, 2  ;;  %v1977_v32 = vsel %vm1661_vm2, %v8566_v15, -inf }
 0x30a   :  { %v8574_v48 = vpop.eup %6804  ;;  %v5119_v2 = vrot.slane %v5118_v31, 2  ;;  %v5125_v14 = vadd.f32 %v5124_v18, %v5123_v24  ;;  %6806 = vrcp.f32 %v3228_v9  ;;  %v430_v55 = vperm.slane %v302_v60, 0 }
 0x30b   :  { %v5131_v26 = vrot.slane %v5130_v53, 4  ;;  %v3236_v51 = vsel %vm1661_vm2, %v8574_v48, 0.0  ;;  %v2772_v52 = vmul.f32 1.442695, %v2601_v16  ;;  %v1975_v47 = vrot.slane %v1974_v33, 1 }
 0x30c   :  { %v5137_v27 = vsel %vm739_vm1, %v4943_v23, 0.0  ;;  %v1978_v40 = vrot.slane %v1977_v32, 4  ;;  %v734_v49 = vmul.f32 %v8405_v25, %v430_v55  ;;  %v368_v54 = vperm.slane %v248_v34, 0 }
 0x30d   :  { %v8563_v57 = vpop.f32.mrf.mxu0  ;;  %v8588_v11 = vadd.f32 %v5093_v12, %v5092_v10  ;;  %v4944_v24 = vmul.f32 %v8533_v21, %v8317_v19  ;;  %v4945_v45 = vmul.f32 %v8533_v21, %v8340_v5  ;;  %v3233_v3 = vadd.f32 %v3232_v61, %v3231_v50  ;;  %v1279_v12 = vpop.f32.mrf.mxu1 }
 0x30e   :  { %v5100_v0 = vrot.slane %v5099_v36, 1  ;;  %v5126_v43 = vrot.slane %v5125_v14, 2  ;;  %v3237_v8 = vrot.slane %v3236_v51, 4  ;;  %6482 = vmatmul.msk.f32.gmra.mxu3 %vm739_vm1, %v734_v49  ;;  %v672_v18 = vmul.f32 %v7504_v1, %v368_v54 }
 0x30f   :  { %v5132_v16 = vadd.f32 %v5131_v26, %v5130_v53  ;;  %v5138_v23 = vrot.slane %v5137_v27, 4  ;;  %6808 = vpow2.f32 %v2772_v52  ;;  %v1976_v9 = vmax.f32 %v1974_v33, %v1975_v47 }
 0x310   :  { %v8584_v17 = vpop.f32.mrf.mxu3  ;;  %v6807_v60 = vpop.eup %6806  ;;  %v5106_v19 = vadd.f32 %v5105_v56, %v5104_v20  ;;  %v5112_v34 = vrot.slane %v5111_v35, 2  ;;  %v5120_v55 = vadd.f32 %v5119_v2, %v5118_v31  ;;  %v1979_v5 = vmax.f32 %v1977_v32, %v1978_v40  ;;  %6420 = vmatmul.msk.f32.gmra.mxu1 %vm739_vm1, %v672_v18 }
 0x311   :  { %10759 = vst [vmem:[#allocation45_spill] sm:$0xff] %v8584_v17  ;;  %v5144_v50 = vsel %vm739_vm1, %v4944_v24, 0.0  ;;  %v5151_v61 = vsel %vm739_vm1, %v4945_v45, 0.0  ;;  %v3234_v49 = vrot.slane %v3233_v3, 1  ;;  %v4006_v1 = vmul.f32 %v6807_v60, %v8503_v37 }
 0x312   :  { %v5127_v53 = vadd.f32 %v5126_v43, %v5125_v14  ;;  %v4946_v33 = vmul.f32 %v8533_v21, %v8362_v38  ;;  %v3238_v26 = vadd.f32 %v3237_v8, %v3236_v51  ;;  %v8605_v52 = vadd.f32 %v8329_v63, %v1279_v12 }
 0x313   :  { %v8607_v20 = vadd.f32 %v5100_v0, %v5099_v36  ;;  %v5133_v31 = vrot.slane %v5132_v16, 2  ;;  %v5139_v56 = vadd.f32 %v5138_v23, %v5137_v27  ;;  %v2602_v32 = vsub.f32 %v8519_v59, %v1976_v9  ;;  %6526 = vmatmul.msk.f32.gmra.mxu0 %vm1661_vm2, %v4006_v1 }
 0x314   :  { %v5107_v2 = vrot.slane %v5106_v19, 1  ;;  %v5145_v47 = vrot.slane %v5144_v50, 4  ;;  %v5152_v40 = vrot.slane %v5151_v61, 4  ;;  %v1980_v37 = vrot.slane %v1979_v5, 2 }
 0x315   :  { %v8596_v10 = vpop.f32.mrf.mxu0  ;;  %v8611_v14 = vpop.eup %6808  ;;  %v5113_v54 = vadd.f32 %v5112_v34, %v5111_v35  ;;  %v5121_v38 = vrot.slane %v5120_v55, 1  ;;  %v3235_v63 = vadd.f32 %v3234_v49, %v3233_v3  ;;  %v303_v36 = vrot.slane %v7410_v41, 6 }
 0x316   :  { %v5128_v24 = vrot.slane %v5127_v53, 1  ;;  %v5158_v27 = vsel %vm739_vm1, %v4946_v33, 0.0  ;;  %v3239_v45 = vrot.slane %v3238_v26, 2  ;;  %v1984_v59 = vsel %vm1661_vm2, %v8605_v52, -inf }
 0x317   :  { %v5134_v0 = vadd.f32 %v5133_v31, %v5132_v16  ;;  %v5140_v43 = vrot.slane %v5139_v56, 2  ;;  %v2774_v8 = vmul.f32 1.442695, %v2602_v32  ;;  %v431_v18 = vperm.slane %v303_v36, 0  ;;  %v1282_v32 = vpop.f32.mrf.mxu1 }
 0x318   :  { %v8613_v51 = vpop.f32.mrf.mxu3  ;;  %v5146_v23 = vadd.f32 %v5145_v47, %v5144_v50  ;;  %v5153_v9 = vadd.f32 %v5152_v40, %v5151_v61  ;;  %v3243_v35 = vsel %vm1661_vm2, %v8611_v14, 0.0  ;;  %v1981_v12 = vmax.f32 %v1979_v5, %v1980_v37 }
 0x319   :  { %10760 = vst [vmem:[#allocation46_spill] sm:$0xff] %v8613_v51  ;;  %v5159_v3 = vrot.slane %v5158_v27, 4  ;;  %v1985_v34 = vrot.slane %v1984_v59, 4  ;;  %6810 = vrcp.f32 %v3235_v63  ;;  %v735_v49 = vmul.f32 %v8405_v25, %v431_v18  ;;  %v8631_v63 = vpop.permute.xlu0 %4888 }
 0x31a   :  { %v8624_v1 = vadd.f32 %v5107_v2, %v5106_v19  ;;  %v5114_v33 = vrot.slane %v5113_v54, 1  ;;  %v5129_v16 = vadd.f32 %v5128_v24, %v5127_v53  ;;  %v3240_v31 = vadd.f32 %v3239_v45, %v3238_v26 }
 0x31b   :  { %v5135_v36 = vrot.slane %v5134_v0, 1  ;;  %v8626_v50 = vadd.f32 %v5140_v43, %v5139_v56  ;;  %v3244_v61 = vrot.slane %v3243_v35, 4  ;;  %6812 = vpow2.f32 %v2774_v8  ;;  %6483 = vmatmul.msk.f32.gmra.mxu3 %vm739_vm1, %v735_v49 }
 0x31c   :  { %v5122_v5 = vadd.f32 %v5121_v38, %v5120_v55  ;;  %v5147_v47 = vrot.slane %v5146_v23, 2  ;;  %v4947_v40 = vmul.f32 %v8533_v21, %v8378_v4  ;;  %v1982_v37 = vrot.slane %v1981_v12, 1 }
 0x31d   :  { %v8621_v60 = vpop.f32.mrf.mxu0  ;;  %v5154_v19 = vrot.slane %v5153_v9, 2  ;;  %v5160_v2 = vadd.f32 %v5159_v3, %v5158_v27  ;;  %v1986_v53 = vmax.f32 %v1984_v59, %v1985_v34  ;;  %v8634_v26 = vadd.f32 %v8356_v22, %v1282_v32 }
 0x31e   :  { %v8636_v56 = vadd.f32 %v5114_v33, %v5113_v54  ;;  %v4948_v24 = vmul.f32 %v8631_v63, %v8399_v39  ;;  %v4949_v55 = vmul.f32 %v8631_v63, %v8430_v6  ;;  %v3241_v38 = vrot.slane %v3240_v31, 1 }
 0x31f   :  { %v6811_v45 = vpop.eup %6810  ;;  %v6104_v4 = vsel %vm6090_vm4, %v5129_v16, %v5122_v5  ;;  %v5136_v21 = vadd.f32 %v5135_v36, %v5134_v0  ;;  %v5142_v43 = vrot.slane %v8626_v50, 1  ;;  %v3245_v27 = vadd.f32 %v3244_v61, %v3243_v35 }
 0x320   :  { %v8644_v59 = vpop.f32.mrf.mxu3  ;;  %v5148_v22 = vadd.f32 %v5147_v47, %v5146_v23  ;;  %v5165_v54 = vsel %vm739_vm1, %v4947_v40, 0.0  ;;  %v1983_v8 = vmax.f32 %v1981_v12, %v1982_v37  ;;  %v4007_v18 = vmul.f32 %v6811_v45, %v8537_v30 }
 0x321   :  { %10761 = vst [vmem:[#allocation47_spill] sm:$0xff] %v8644_v59  ;;  %v8648_v39 = vpop.eup %6812  ;;  %v5155_v3 = vadd.f32 %v5154_v19, %v5153_v9  ;;  %v5161_v6 = vrot.slane %v5160_v2, 2  ;;  %v1987_v34 = vrot.slane %v1986_v53, 2  ;;  %v1991_v49 = vsel %vm1661_vm2, %v8634_v26, -inf }
 0x322   :  { %v5172_v0 = vsel %vm739_vm1, %v4948_v24, 0.0  ;;  %v5179_v35 = vsel %vm739_vm1, %v4949_v55, 0.0  ;;  %6527 = vmatmul.msk.f32.gmra.mxu0 %vm1661_vm2, %v4007_v18  ;;  %v3242_v23 = vadd.f32 %v3241_v38, %v3240_v31  ;;  %v369_v33 = vperm.slane %v7371_v28, 0  ;;  %v1285_v24 = vpop.f32.mrf.mxu1 }
 0x323   :  { %v5166_v12 = vrot.slane %v5165_v54, 4  ;;  %v4950_v30 = vmul.f32 %v8631_v63, %v8458_v7  ;;  %v3246_v16 = vrot.slane %v3245_v27, 2  ;;  %v304_v32 = vrot.slane %v7410_v41, 7 }
 0x324   :  { %v3250_v36 = vsel %vm1661_vm2, %v8648_v39, 0.0  ;;  %v2603_v61 = vsub.f32 %v8566_v15, %v1983_v8  ;;  %v1992_v5 = vrot.slane %v1991_v49, 4  ;;  %v673_v47 = vmul.f32 %v7654_v29, %v369_v33 }
 0x325   :  { %v8658_v9 = vpop.f32.mrf.mxu0  ;;  %v5149_v31 = vrot.slane %v5148_v22, 1  ;;  %v5173_v40 = vrot.slane %v5172_v0, 4  ;;  %v5180_v37 = vrot.slane %v5179_v35, 4  ;;  %v1988_v19 = vmax.f32 %v1986_v53, %v1987_v34 }
 0x326   :  { %v5156_v55 = vrot.slane %v5155_v3, 1  ;;  %v8665_v7 = vadd.f32 %v5161_v6, %v5160_v2  ;;  %6814 = vrcp.f32 %v3242_v23  ;;  %6421 = vmatmul.msk.f32.gmra.mxu1 %vm739_vm1, %v673_v47  ;;  %v432_v41 = vperm.slane %v304_v32, 0  ;;  %v10763_v47 = vld [vmem:[#allocation42_spill] sm:$0xff] }
 0x327   :  { %v8668_v38 = vadd.f32 %v5166_v12, %v5165_v54  ;;  %v5186_v45 = vsel %vm739_vm1, %v4950_v30, 0.0  ;;  %v3247_v15 = vadd.f32 %v3246_v16, %v3245_v27  ;;  %v3251_v8 = vrot.slane %v3250_v36, 4 }
 0x328   :  { %v2776_v18 = vmul.f32 1.442695, %v2603_v61  ;;  %v1993_v33 = vmax.f32 %v1991_v49, %v1992_v5  ;;  %v8672_v59 = vadd.f32 %v8384_v62, %v1285_v24  ;;  %v736_v53 = vmul.f32 %v8405_v25, %v432_v41  ;;  %v8682_v54 = vpop.f32.mrf.mxu3 }
 0x329   :  { %v8676_v2 = vsel %vm6092_vm5, %v5136_v21, %v6104_v4  ;;  %v8678_v6 = vadd.f32 %v5173_v40, %v5172_v0  ;;  %v8680_v34 = vadd.f32 %v5180_v37, %v5179_v35  ;;  %10762 = vst [vmem:[#allocation48_spill] sm:$0xff] %v8682_v54  ;;  %v1989_v23 = vrot.slane %v1988_v19, 1  ;;  %v5956_v40 = vld [vmem:[%s10704_s2] sm:$0xff] }
 0x32a   :  { %v8685_v27 = vadd.f32 %v5142_v43, %v8626_v50  ;;  %v8687_v12 = vadd.f32 %v5149_v31, %v5148_v22  ;;  %v5187_v49 = vrot.slane %v5186_v45, 4  ;;  %v4951_v62 = vmul.f32 %v8631_v63, %v8483_v58  ;;  %6484 = vmatmul.msk.f32.gmra.mxu3 %vm739_vm1, %v736_v53  ;;  %v5957_v31 = vld [vmem:[%s10704_s2 + $0x8] sm:$0xff] }
 0x32b   :  { %v8692_v25 = vadd.f32 %v5156_v55, %v5155_v3  ;;  %v5163_v4 = vrot.slane %v8665_v7, 1  ;;  %v5168_v21 = vrot.slane %v8668_v38, 2  ;;  %v3248_v0 = vrot.slane %v3247_v15, 1  ;;  %6255 = vmatpush.msrb.mxu3 %v5957_v31 }
 0x32c   :  { %v6815_v35 = vpop.eup %6814  ;;  %v3252_v30 = vadd.f32 %v3251_v8, %v3250_v36  ;;  %6816 = vpow2.f32 %v2776_v18  ;;  %v1994_v50 = vrot.slane %v1993_v33, 2  ;;  %v1998_v43 = vsel %vm1661_vm2, %v8672_v59, -inf  ;;  %v1288_v8 = vpop.f32.mrf.mxu1 }
 0x32d   :  { %v5175_v22 = vrot.slane %v8678_v6, 2  ;;  %v5182_v58 = vrot.slane %v8680_v34, 2  ;;  %v1990_v16 = vmax.f32 %v1988_v19, %v1989_v23  ;;  %v8700_v32 = vpop.f32.mrf.mxu0  ;;  %v4008_v3 = vmul.f32 %v6815_v35, %v8574_v48  ;;  %6256 = vmatpush.msrb.mxu3 %v5956_v40 }
 0x32e   :  { %v8703_v61 = vadd.f32 %v5187_v49, %v5186_v45  ;;  %v5193_v5 = vsel %vm739_vm1, %v4951_v62, 0.0  ;;  %v4952_v36 = vmul.f32 %v8631_v63, %v10763_v47  ;;  %v1999_v37 = vrot.slane %v1998_v43, 4 }
 0x32f   :  { %6528 = vmatmul.msk.f32.gmra.mxu0 %vm1661_vm2, %v4008_v3  ;;  %v3249_v48 = vadd.f32 %v3248_v0, %v3247_v15  ;;  %v249_v19 = vrot.slane %v7371_v28, 1  ;;  %v4953_v24 = vmul.f32 %v8631_v63, %v8541_v46  ;;  %v3253_v55 = vrot.slane %v3252_v30, 2 }
 0x330   :  { %v1995_v41 = vmax.f32 %v1993_v33, %v1994_v50  ;;  %v2604_v45 = vsub.f32 %v8605_v52, %v1990_v16  ;;  %v6097_v53 = vsel %vm6096_vm7, %v8588_v11, %v8569_v13  ;;  %v5200_v23 = vsel %vm739_vm1, %v4952_v36, 0.0  ;;  %v8731_v49 = vpop.f32.mrf.mxu3  ;;  %v10765_v50 = vld [vmem:[#allocation35_spill] sm:$0xff] }
 0x331   :  { %v370_v18 = vperm.slane %v249_v19, 0  ;;  %v4954_v46 = vmul.f32 %v8631_v63, %v8563_v57  ;;  %v4955_v33 = vmul.f32 %v8631_v63, %v8596_v10  ;;  %v6099_v52 = vsel %vm6098_vm8, %v8607_v20, %v6097_v53  ;;  %10764 = vst [vmem:[#allocation42_spill] sm:$0xff] %v8731_v49 }
 0x332   :  { %v8722_v15 = vpop.eup %6816  ;;  %v2000_v62 = vmax.f32 %v1998_v43, %v1999_v37  ;;  %6818 = vrcp.f32 %v3249_v48  ;;  %v6101_v11 = vsel %vm6100_vm9, %v8624_v1, %v6099_v52  ;;  %v5194_v0 = vrot.slane %v5193_v5, 4 }
 0x333   :  { %v674_v13 = vmul.f32 %v7654_v29, %v370_v18  ;;  %v1996_v35 = vrot.slane %v1995_v41, 1  ;;  %v8737_v16 = vadd.f32 %v10765_v50, %v1288_v8  ;;  %v6103_v57 = vsel %vm6102_vm10, %v8636_v56, %v6101_v11 }
 0x334   :  { %v5207_v10 = vsel %vm739_vm1, %v4953_v24, 0.0  ;;  %v3254_v20 = vadd.f32 %v3253_v55, %v3252_v30  ;;  %v3257_v63 = vsel %vm1661_vm2, %v8722_v15, 0.0  ;;  %v2778_v43 = vmul.f32 1.442695, %v2604_v45  ;;  %6614 = vmatmul.msk.f32.vlgmr.msrb.gmra.mxu3 %vm739_vm1, %v6103_v57 }
 0x335   :  { %6422 = vmatmul.msk.f32.gmra.mxu1 %vm739_vm1, %v674_v13  ;;  %v5169_v1 = vadd.f32 %v5168_v21, %v8668_v38  ;;  %v5176_v3 = vadd.f32 %v5175_v22, %v8678_v6  ;;  %v5201_v47 = vrot.slane %v5200_v23, 4  ;;  %v5214_v36 = vsel %vm739_vm1, %v4954_v46, 0.0  ;;  %v8752_v37 = vpop.f32.mrf.mxu0 }
 0x336   :  { %v5183_v56 = vadd.f32 %v5182_v58, %v8680_v34  ;;  %v5189_v31 = vrot.slane %v8703_v61, 2  ;;  %v5221_v30 = vsel %vm739_vm1, %v4955_v33, 0.0  ;;  %v2001_v40 = vrot.slane %v2000_v62, 2 }
 0x337   :  { %v5208_v48 = vrot.slane %v5207_v10, 4  ;;  %v3258_v19 = vrot.slane %v3257_v63, 4  ;;  %v1997_v24 = vmax.f32 %v1995_v41, %v1996_v35  ;;  %v2005_v38 = vsel %vm1661_vm2, %v8737_v16, -inf }
 0x338   :  { %v6819_v21 = vpop.eup %6818  ;;  %v5195_v6 = vadd.f32 %v5194_v0, %v5193_v5  ;;  %v5215_v22 = vrot.slane %v5214_v36, 4  ;;  %v3255_v55 = vrot.slane %v3254_v20, 1  ;;  %6820 = vpow2.f32 %v2778_v43  ;;  %v8763_v0 = vpop.f32.mrf.mxu3 }
 0x339   :  { %v5177_v45 = vrot.slane %v5176_v3, 1  ;;  %v5202_v34 = vadd.f32 %v5201_v47, %v5200_v23  ;;  %v5222_v58 = vrot.slane %v5221_v30, 4  ;;  %v4009_v8 = vmul.f32 %v6819_v21, %v8611_v14  ;;  %10766 = vst [vmem:[#allocation35_spill] sm:$0xff] %v8763_v0 }
 0x33a   :  { %v5164_v18 = vadd.f32 %v5163_v4, %v8665_v7  ;;  %v5184_v53 = vrot.slane %v5183_v56, 1  ;;  %v2002_v46 = vmax.f32 %v2000_v62, %v2001_v40  ;;  %v2006_v41 = vrot.slane %v2005_v38, 4 }
 0x33b   :  { %v5190_v33 = vadd.f32 %v5189_v31, %v8703_v61  ;;  %v5209_v52 = vadd.f32 %v5208_v48, %v5207_v10  ;;  %v3259_v13 = vadd.f32 %v3258_v19, %v3257_v63  ;;  %v2605_v5 = vsub.f32 %v8634_v26, %v1997_v24  ;;  %6529 = vmatmul.msk.f32.gmra.mxu0 %vm1661_vm2, %v4009_v8  ;;  %v1291_v63 = vpop.f32.mrf.mxu1 }
 0x33c   :  { %v5196_v11 = vrot.slane %v5195_v6, 2  ;;  %v5216_v23 = vadd.f32 %v5215_v22, %v5214_v36  ;;  %v3256_v14 = vadd.f32 %v3255_v55, %v3254_v20  ;;  %v250_v35 = vrot.slane %v7371_v28, 2 }
 0x33d   :  { %v5170_v50 = vrot.slane %v5169_v1, 1  ;;  %v5178_v7 = vadd.f32 %v5177_v45, %v5176_v3  ;;  %v5203_v4 = vrot.slane %v5202_v34, 2  ;;  %v5223_v62 = vadd.f32 %v5222_v58, %v5221_v30  ;;  %v8768_v19 = vpop.f32.mrf.mxu0 }
 0x33e   :  { %v8766_v57 = vpop.eup %6820  ;;  %v2003_v61 = vrot.slane %v2002_v46, 1  ;;  %v2007_v10 = vmax.f32 %v2005_v38, %v2006_v41  ;;  %6822 = vrcp.f32 %v3256_v14  ;;  %v371_v26 = vperm.slane %v250_v35, 0  ;;  %v10767_v38 = vld [vmem:[#allocation38_spill] sm:$0xff] }
 0x33f   :  { %v5185_v43 = vadd.f32 %v5184_v53, %v5183_v56  ;;  %v5210_v47 = vrot.slane %v5209_v52, 2  ;;  %v3260_v31 = vrot.slane %v3259_v13, 2  ;;  %v2780_v36 = vmul.f32 1.442695, %v2605_v5 }
 0x340   :  { %v5191_v40 = vrot.slane %v5190_v33, 1  ;;  %v5197_v48 = vadd.f32 %v5196_v11, %v5195_v6  ;;  %v5217_v20 = vrot.slane %v5216_v23, 2  ;;  %v675_v3 = vmul.f32 %v7654_v29, %v371_v26 }
 0x341   :  { %v5204_v24 = vadd.f32 %v5203_v4, %v5202_v34  ;;  %v5224_v30 = vrot.slane %v5223_v62, 2  ;;  %v3264_v21 = vsel %vm1661_vm2, %v8766_v57, 0.0  ;;  %v8774_v22 = vadd.f32 %v10767_v38, %v1291_v63 }
 0x342   :  { %v2004_v55 = vmax.f32 %v2002_v46, %v2003_v61  ;;  %v2008_v56 = vrot.slane %v2007_v10, 2  ;;  %6423 = vmatmul.msk.f32.gmra.mxu1 %vm739_vm1, %v675_v3  ;;  %v5171_v45 = vadd.f32 %v5170_v50, %v5169_v1  ;;  %v6106_v6 = vsel %vm6094_vm6, %v8685_v27, %v8676_v2 }
 0x343   :  { %v5211_v58 = vadd.f32 %v5210_v47, %v5209_v52  ;;  %v3261_v8 = vadd.f32 %v3260_v31, %v3259_v13  ;;  %6824 = vpow2.f32 %v2780_v36  ;;  %v6107_v34 = vsel %vm6096_vm7, %v8687_v12, %v6106_v6  ;;  %v8788_v52 = vpop.f32.mrf.mxu3 }
 0x344   :  { %v6823_v53 = vpop.eup %6822  ;;  %v5192_v41 = vadd.f32 %v5191_v40, %v5190_v33  ;;  %v5218_v5 = vadd.f32 %v5217_v20, %v5216_v23  ;;  %v3265_v11 = vrot.slane %v3264_v21, 4  ;;  %v6108_v46 = vsel %vm6098_vm8, %v8692_v25, %v6107_v34  ;;  %10768 = vst [vmem:[#allocation38_spill] sm:$0xff] %v8788_v52 }
 0x345   :  { %v5198_v14 = vrot.slane %v5197_v48, 1  ;;  %v5225_v35 = vadd.f32 %v5224_v30, %v5223_v62  ;;  %v2012_v1 = vsel %vm1661_vm2, %v8774_v22, -inf  ;;  %v6109_v2 = vsel %vm6100_vm9, %v5164_v18, %v6108_v46  ;;  %v8799_v31 = vpop.f32.mrf.mxu0 }
 0x346   :  { %v2606_v27 = vsub.f32 %v8672_v59, %v2004_v55  ;;  %v2009_v13 = vmax.f32 %v2007_v10, %v2008_v56  ;;  %v4010_v12 = vmul.f32 %v6823_v53, %v8648_v39  ;;  %v6110_v33 = vsel %vm6102_vm10, %v5171_v45, %v6109_v2  ;;  %v1294_v10 = vpop.f32.mrf.mxu1  ;;  %v10769_v56 = vld [vmem:[#allocation40_spill] sm:$0xff] }
 0x347   :  { %v6111_v23 = vsel %vm6090_vm4, %v5185_v43, %v5178_v7  ;;  %v5205_v50 = vrot.slane %v5204_v24, 1  ;;  %v5212_v25 = vrot.slane %v5211_v58, 1  ;;  %v3262_v4 = vrot.slane %v3261_v8, 1  ;;  %6615 = vmatmul.msk.f32.gmra.mxu3 %vm739_vm1, %v6110_v33 }
 0x348   :  { %v5219_v62 = vrot.slane %v5218_v5, 1  ;;  %v3266_v61 = vadd.f32 %v3265_v11, %v3264_v21  ;;  %v2013_v63 = vrot.slane %v2012_v1, 4  ;;  %6530 = vmatmul.msk.f32.gmra.mxu0 %vm1661_vm2, %v4010_v12  ;;  %v251_v59 = vrot.slane %v7371_v28, 3 }
 0x349   :  { %v8796_v18 = vpop.eup %6824  ;;  %v6112_v39 = vsel %vm6092_vm5, %v5192_v41, %v6111_v23  ;;  %v5199_v26 = vadd.f32 %v5198_v14, %v5197_v48  ;;  %v5226_v47 = vrot.slane %v5225_v35, 1  ;;  %v2782_v7 = vmul.f32 1.442695, %v2606_v27 }
 0x34a   :  { %v2010_v43 = vrot.slane %v2009_v13, 1  ;;  %v5206_v36 = vadd.f32 %v5205_v50, %v5204_v24  ;;  %v5213_v40 = vadd.f32 %v5212_v25, %v5211_v58  ;;  %v3263_v20 = vadd.f32 %v3262_v4, %v3261_v8 }
 0x34b   :  { %v372_v3 = vperm.slane %v251_v59, 0  ;;  %v5220_v30 = vadd.f32 %v5219_v62, %v5218_v5  ;;  %v3267_v21 = vrot.slane %v3266_v61, 2  ;;  %v3271_v38 = vsel %vm1661_vm2, %v8796_v18, 0.0  ;;  %v8811_v41 = vpop.f32.mrf.mxu3 }
 0x34c   :  { %v2014_v55 = vmax.f32 %v2012_v1, %v2013_v63  ;;  %v8804_v45 = vadd.f32 %v10769_v56, %v1294_v10  ;;  %6826 = vrcp.f32 %v3263_v20  ;;  %v252_v6 = vrot.slane %v7371_v28, 4  ;;  %10770 = vst [vmem:[#allocation40_spill] sm:$0xff] %v8811_v41 }
 0x34d   :  { %v676_v48 = vmul.f32 %v7654_v29, %v372_v3  ;;  %6828 = vpow2.f32 %v2782_v7  ;;  %v2011_v34 = vmax.f32 %v2009_v13, %v2010_v43  ;;  %v5227_v24 = vadd.f32 %v5226_v47, %v5225_v35  ;;  %v4891_v35 = vpop.permute.xlu1 %4890  ;;  %v4590_v59 = vpop.f32.mrf.mxu0 }
 0x34e   :  { %v6113_v58 = vsel %vm6094_vm6, %v5199_v26, %v6112_v39  ;;  %v3272_v53 = vrot.slane %v3271_v38, 4  ;;  %v2015_v5 = vrot.slane %v2014_v55, 2  ;;  %v3268_v46 = vadd.f32 %v3267_v21, %v3266_v61  ;;  %v1297_v50 = vpop.f32.mrf.mxu1 }
 0x34f   :  { %6424 = vmatmul.msk.f32.gmra.mxu1 %vm739_vm1, %v676_v48  ;;  %v6114_v8 = vsel %vm6096_vm7, %v5206_v36, %v6113_v58  ;;  %v2019_v14 = vsel %vm1661_vm2, %v8804_v45, -inf  ;;  %v373_v2 = vperm.slane %v252_v6, 0  ;;  %v2607_v27 = vsub.f32 %v8737_v16, %v2011_v34 }
 0x350   :  { %v6115_v11 = vsel %vm6098_vm8, %v5213_v40, %v6114_v8  ;;  %v4956_v33 = vmul.f32 %v4891_v35, %v8621_v60  ;;  %v4957_v23 = vmul.f32 %v4891_v35, %v8658_v9  ;;  %v3273_v4 = vadd.f32 %v3272_v53, %v3271_v38  ;;  %v8831_v60 = vld [vmem:[%s10706_s4 + $0x20] sm:$0xff] }
 0x351   :  { %v6116_v1 = vsel %vm6100_vm9, %v5220_v30, %v6115_v11  ;;  %v2016_v62 = vmax.f32 %v2014_v55, %v2015_v5  ;;  %v2020_v61 = vrot.slane %v2019_v14, 4  ;;  %v3269_v39 = vrot.slane %v3268_v46, 1 }
 0x352   :  { %v6117_v13 = vsel %vm6102_vm10, %v5227_v24, %v6116_v1  ;;  %v6827_v12 = vpop.eup %6826  ;;  %v677_v16 = vmul.f32 %v7654_v29, %v373_v2  ;;  %v253_v10 = vrot.slane %v7371_v28, 5  ;;  %v2784_v26 = vmul.f32 1.442695, %v2607_v27 }
 0x353   :  { %6616 = vmatmul.msk.f32.gmra.mxu3 %vm739_vm1, %v6117_v13  ;;  %v8822_v25 = vpop.eup %6828  ;;  %v4011_v63 = vmul.f32 %v6827_v12, %v8722_v15  ;;  %v8834_v9 = vadd.f32 %v8831_v60, %v1297_v50  ;;  %v5228_v47 = vsel %vm739_vm1, %v4956_v33, 0.0  ;;  %v4958_v15 = vmul.f32 %v4891_v35, %v8700_v32  ;;  %v8842_v55 = vpop.f32.mrf.mxu3 }
 0x354   :  { %v3278_v7 = vsel %vm1661_vm2, %v8822_v25, 0.0  ;;  %v5235_v43 = vsel %vm739_vm1, %v4957_v23, 0.0  ;;  %v3274_v36 = vrot.slane %v3273_v4, 2  ;;  %v2017_v40 = vrot.slane %v2016_v62, 1  ;;  %10771 = vst [vmem:[#allocation49_spill] sm:$0xff] %v8842_v55 }
 0x355   :  { %6531 = vmatmul.msk.f32.gmra.mxu0 %vm1661_vm2, %v4011_v63  ;;  %v2021_v20 = vmax.f32 %v2019_v14, %v2020_v61  ;;  %v3270_v3 = vadd.f32 %v3269_v39, %v3268_v46  ;;  %v374_v30 = vperm.slane %v253_v10, 0  ;;  %v5229_v21 = vrot.slane %v5228_v47, 4  ;;  %v4593_v2 = vpop.f32.mrf.mxu0 }
 0x356   :  { %v3279_v38 = vrot.slane %v3278_v7, 4  ;;  %6830 = vpow2.f32 %v2784_v26  ;;  %v2026_v32 = vsel %vm1661_vm2, %v8834_v9, -inf  ;;  %v5236_v56 = vrot.slane %v5235_v43, 4 }
 0x357   :  { %6425 = vmatmul.msk.f32.gmra.mxu1 %vm739_vm1, %v677_v16  ;;  %v5242_v48 = vsel %vm739_vm1, %v4958_v15, 0.0  ;;  %v4959_v6 = vmul.f32 %v4891_v35, %v8752_v37  ;;  %v4960_v34 = vmul.f32 %v4891_v35, %v8768_v19  ;;  %v3275_v24 = vadd.f32 %v3274_v36, %v3273_v4  ;;  %v1300_v4 = vpop.f32.mrf.mxu1 }
 0x358   :  { %v2018_v58 = vmax.f32 %v2016_v62, %v2017_v40  ;;  %v2022_v8 = vrot.slane %v2021_v20, 2  ;;  %6832 = vrcp.f32 %v3270_v3  ;;  %v4961_v53 = vmul.f32 %v4891_v35, %v8799_v31 }
 0x359   :  { %v2027_v5 = vrot.slane %v2026_v32, 4  ;;  %v678_v11 = vmul.f32 %v7654_v29, %v374_v30  ;;  %v254_v46 = vrot.slane %v7371_v28, 6  ;;  %v5243_v14 = vrot.slane %v5242_v48, 4 }
 0x35a   :  { %v3280_v1 = vadd.f32 %v3279_v38, %v3278_v7  ;;  %v5230_v27 = vadd.f32 %v5229_v21, %v5228_v47  ;;  %v5249_v13 = vsel %vm739_vm1, %v4959_v6, 0.0  ;;  %v5256_v37 = vsel %vm739_vm1, %v4960_v34, 0.0 }
 0x35b   :  { %v4962_v19 = vmul.f32 %v4891_v35, %v4590_v59  ;;  %v5237_v33 = vadd.f32 %v5236_v56, %v5235_v43  ;;  %v2608_v31 = vsub.f32 %v8774_v22, %v2018_v58  ;;  %v2023_v23 = vmax.f32 %v2021_v20, %v2022_v8  ;;  %v8871_v3 = vpop.f32.mrf.mxu3 }
 0x35c   :  { %v8855_v12 = vpop.eup %6830  ;;  %v4963_v50 = vmul.f32 %v4891_v35, %v4593_v2  ;;  %v3276_v62 = vrot.slane %v3275_v24, 1  ;;  %v5263_v61 = vsel %vm739_vm1, %v4961_v53, 0.0  ;;  %v2028_v63 = vmax.f32 %v2026_v32, %v2027_v5  ;;  %v8866_v35 = vld [vmem:[%s10706_s4 + $0x28] sm:$0xff]  ;;  %10772 = vst [vmem:[#allocation50_spill] sm:$0xff] %v8871_v3 }
 0x35d   :  { %v375_v39 = vperm.slane %v254_v46, 0  ;;  %v5244_v10 = vadd.f32 %v5243_v14, %v5242_v48  ;;  %v3281_v26 = vrot.slane %v3280_v1, 2  ;;  %v5250_v47 = vrot.slane %v5249_v13, 4 }
 0x35e   :  { %v6833_v16 = vpop.eup %6832  ;;  %v5257_v59 = vrot.slane %v5256_v37, 4  ;;  %v3285_v15 = vsel %vm1661_vm2, %v8855_v12, 0.0  ;;  %v5270_v7 = vsel %vm739_vm1, %v4962_v19, 0.0  ;;  %v8869_v43 = vadd.f32 %v8866_v35, %v1300_v4 }
 0x35f   :  { %6426 = vmatmul.msk.f32.gmra.mxu1 %vm739_vm1, %v678_v11  ;;  %v4012_v22 = vmul.f32 %v6833_v16, %v8766_v57  ;;  %v2786_v36 = vmul.f32 1.442695, %v2608_v31  ;;  %v5264_v40 = vrot.slane %v5263_v61, 4  ;;  %v2024_v20 = vrot.slane %v2023_v23, 1 }
 0x360   :  { %v5277_v30 = vsel %vm739_vm1, %v4963_v50, 0.0  ;;  %v2029_v21 = vrot.slane %v2028_v63, 2  ;;  %v3277_v38 = vadd.f32 %v3276_v62, %v3275_v24  ;;  %v679_v57 = vmul.f32 %v7654_v29, %v375_v39 }
 0x361   :  { %6532 = vmatmul.msk.f32.gmra.mxu0 %vm1661_vm2, %v4012_v22  ;;  %v255_v32 = vrot.slane %v7371_v28, 7  ;;  %v5231_v56 = vrot.slane %v5230_v27, 2  ;;  %v5238_v48 = vrot.slane %v5237_v33, 2  ;;  %v5245_v6 = vrot.slane %v5244_v10, 2 }
 0x362   :  { %v5271_v34 = vrot.slane %v5270_v7, 4  ;;  %v5251_v58 = vadd.f32 %v5250_v47, %v5249_v13  ;;  %v5278_v8 = vrot.slane %v5277_v30, 4  ;;  %v2033_v53 = vsel %vm1661_vm2, %v8869_v43, -inf }
 0x363   :  { %6834 = vrcp.f32 %v3277_v38  ;;  %v3282_v5 = vadd.f32 %v3281_v26, %v3280_v1  ;;  %v3286_v11 = vrot.slane %v3285_v15, 4  ;;  %v5258_v46 = vadd.f32 %v5257_v59, %v5256_v37  ;;  %v1303_v38 = vpop.f32.mrf.mxu1  ;;  %v8884_v59 = vpop.f32.mrf.mxu3 }
 0x364   :  { %6836 = vpow2.f32 %v2786_v36  ;;  %v5265_v24 = vadd.f32 %v5264_v40, %v5263_v61  ;;  %v2025_v14 = vmax.f32 %v2023_v23, %v2024_v20  ;;  %v2030_v2 = vmax.f32 %v2028_v63, %v2029_v21  ;;  %10773 = vst [vmem:[#allocation51_spill] sm:$0xff] %v8884_v59  ;;  %v8890_v36 = vld [vmem:[%s10706_s4 + $0x30] sm:$0xff] }
 0x365   :  { %v376_v28 = vperm.slane %v255_v32, 0  ;;  %v5272_v19 = vadd.f32 %v5271_v34, %v5270_v7  ;;  %v2034_v31 = vrot.slane %v2033_v53, 4  ;;  %v5232_v50 = vadd.f32 %v5231_v56, %v5230_v27 }
 0x366   :  { %v5239_v4 = vadd.f32 %v5238_v48, %v5237_v33  ;;  %v5252_v13 = vrot.slane %v5251_v58, 2  ;;  %v5279_v62 = vadd.f32 %v5278_v8, %v5277_v30  ;;  %v5246_v39 = vadd.f32 %v5245_v6, %v5244_v10 }
 0x367   :  { %6427 = vmatmul.msk.f32.gmra.mxu1 %vm739_vm1, %v679_v57  ;;  %v3283_v16 = vrot.slane %v3282_v5, 1  ;;  %v3287_v47 = vadd.f32 %v3286_v11, %v3285_v15  ;;  %v5259_v22 = vrot.slane %v5258_v46, 2  ;;  %v5266_v1 = vrot.slane %v5265_v24, 2 }
 0x368   :  { %v2609_v37 = vsub.f32 %v8804_v45, %v2025_v14  ;;  %v2031_v26 = vrot.slane %v2030_v2, 1  ;;  %v680_v23 = vmul.f32 %v7654_v29, %v376_v28  ;;  %v5273_v63 = vrot.slane %v5272_v19, 2 }
 0x369   :  { %v6835_v57 = vpop.eup %6834  ;;  %v2035_v27 = vmax.f32 %v2033_v53, %v2034_v31  ;;  %v5233_v10 = vrot.slane %v5232_v50, 1  ;;  %v5253_v7 = vadd.f32 %v5252_v13, %v5251_v58  ;;  %v5280_v15 = vrot.slane %v5279_v62, 2 }
 0x36a   :  { %v8882_v61 = vpop.eup %6836  ;;  %v4013_v33 = vmul.f32 %v6835_v57, %v8796_v18  ;;  %v8893_v45 = vadd.f32 %v8890_v36, %v1303_v38  ;;  %v5240_v29 = vrot.slane %v5239_v4, 1  ;;  %v3288_v40 = vrot.slane %v3287_v47, 2  ;;  %v8902_v57 = vpop.f32.mrf.mxu0 }
 0x36b   :  { %v5260_v20 = vadd.f32 %v5259_v22, %v5258_v46  ;;  %v3284_v30 = vadd.f32 %v3283_v16, %v3282_v5  ;;  %v5247_v18 = vrot.slane %v5246_v39, 1  ;;  %v5267_v21 = vadd.f32 %v5266_v1, %v5265_v24 }
 0x36c   :  { %6533 = vmatmul.msk.f32.gmra.mxu0 %vm1661_vm2, %v4013_v33  ;;  %v2788_v32 = vmul.f32 1.442695, %v2609_v37  ;;  %v2032_v56 = vmax.f32 %v2030_v2, %v2031_v26  ;;  %v3292_v48 = vsel %vm1661_vm2, %v8882_v61, 0.0  ;;  %v5274_v6 = vadd.f32 %v5273_v63, %v5272_v19 }
 0x36d   :  { %v2036_v34 = vrot.slane %v2035_v27, 2  ;;  %6838 = vrcp.f32 %v3284_v30  ;;  %v5254_v58 = vrot.slane %v5253_v7, 1  ;;  %v5281_v8 = vadd.f32 %v5280_v15, %v5279_v62 }
 0x36e   :  { %v2040_v53 = vsel %vm1661_vm2, %v8893_v45, -inf  ;;  %v5234_v11 = vadd.f32 %v5233_v10, %v5232_v50  ;;  %v5241_v46 = vadd.f32 %v5240_v29, %v5239_v4  ;;  %v3289_v14 = vadd.f32 %v3288_v40, %v3287_v47  ;;  %v8905_v47 = vpop.f32.mrf.mxu3 }
 0x36f   :  { %6428 = vmatmul.msk.f32.gmra.mxu1 %vm739_vm1, %v680_v23  ;;  %v5261_v28 = vrot.slane %v5260_v20, 1  ;;  %v3293_v5 = vrot.slane %v3292_v48, 4  ;;  %v5268_v31 = vrot.slane %v5267_v21, 1  ;;  %6840 = vpow2.f32 %v2788_v32  ;;  %10774 = vst [vmem:[#allocation52_spill] sm:$0xff] %v8905_v47 }
 0x370   :  { %v2610_v24 = vsub.f32 %v8834_v9, %v2032_v56  ;;  %v5248_v2 = vadd.f32 %v5247_v18, %v5246_v39  ;;  %v5275_v13 = vrot.slane %v5274_v6, 1  ;;  %v2037_v16 = vmax.f32 %v2035_v27, %v2036_v34 }
 0x371   :  { %v2041_v19 = vrot.slane %v2040_v53, 4  ;;  %v5255_v22 = vadd.f32 %v5254_v58, %v5253_v7  ;;  %v5282_v38 = vrot.slane %v5281_v8, 1  ;;  %v6118_v1 = vsel %vm6090_vm4, %v5241_v46, %v5234_v11 }
 0x372   :  { %v3290_v50 = vrot.slane %v3289_v14, 1  ;;  %v5262_v4 = vadd.f32 %v5261_v28, %v5260_v20  ;;  %v3294_v37 = vadd.f32 %v3293_v5, %v3292_v48  ;;  %v5269_v26 = vadd.f32 %v5268_v31, %v5267_v21  ;;  %v1306_v48 = vpop.f32.mrf.mxu1  ;;  %v8920_v58 = vpop.f32.mrf.mxu0 }
 0x373   :  { %v6839_v62 = vpop.eup %6838  ;;  %v2790_v23 = vmul.f32 1.442695, %v2610_v24  ;;  %v6119_v39 = vsel %vm6092_vm5, %v5248_v2, %v6118_v1  ;;  %v5276_v63 = vadd.f32 %v5275_v13, %v5274_v6  ;;  %v2038_v27 = vrot.slane %v2037_v16, 1 }
 0x374   :  { %v4014_v9 = vmul.f32 %v6839_v62, %v8822_v25  ;;  %v2042_v33 = vmax.f32 %v2040_v53, %v2041_v19  ;;  %v5283_v7 = vadd.f32 %v5282_v38, %v5281_v8  ;;  %v6120_v15 = vsel %vm6094_vm6, %v5255_v22, %v6119_v39 }
 0x375   :  { %v8909_v10 = vpop.eup %6840  ;;  %v6121_v29 = vsel %vm6096_vm7, %v5262_v4, %v6120_v15  ;;  %v3295_v40 = vrot.slane %v3294_v37, 2  ;;  %6842 = vpow2.f32 %v2790_v23  ;;  %v3291_v30 = vadd.f32 %v3290_v50, %v3289_v14  ;;  %v8930_v14 = vld [vmem:[%s10706_s4 + $0x38] sm:$0xff] }
 0x376   :  { %6534 = vmatmul.msk.f32.gmra.mxu0 %vm1661_vm2, %v4014_v9  ;;  %v6122_v20 = vsel %vm6098_vm8, %v5269_v26, %v6121_v29  ;;  %v3299_v25 = vsel %vm1661_vm2, %v8909_v10, 0.0  ;;  %v2039_v18 = vmax.f32 %v2037_v16, %v2038_v27  ;;  %v2043_v21 = vrot.slane %v2042_v33, 2  ;;  %v8923_v11 = vpop.f32.mrf.mxu3 }
 0x377   :  { %v6123_v32 = vsel %vm6100_vm9, %v5276_v63, %v6122_v20  ;;  %6844 = vrcp.f32 %v3291_v30  ;;  %v3296_v6 = vadd.f32 %v3295_v40, %v3294_v37  ;;  %v3300_v34 = vrot.slane %v3299_v25, 4  ;;  %10775 = vst [vmem:[#allocation53_spill] sm:$0xff] %v8923_v11 }
 0x378   :  { %v6124_v56 = vsel %vm6102_vm10, %v5283_v7, %v6123_v32  ;;  %v2611_v8 = vsub.f32 %v8869_v43, %v2039_v18  ;;  %v2044_v53 = vmax.f32 %v2042_v33, %v2043_v21  ;;  %v8933_v28 = vadd.f32 %v8930_v14, %v1306_v48 }
 0x379   :  { %6617 = vmatmul.msk.f32.gmra.mxu3 %vm739_vm1, %v6124_v56  ;;  %v3297_v31 = vrot.slane %v3296_v6, 1  ;;  %v3301_v24 = vadd.f32 %v3300_v34, %v3299_v25 }
 0x37a   :  { %v2792_v43 = vmul.f32 1.442695, %v2611_v8  ;;  %v2045_v13 = vrot.slane %v2044_v53, 1  ;;  %v2047_v19 = vsel %vm1661_vm2, %v8933_v28, -inf  ;;  %v1309_v1 = vpop.f32.mrf.mxu1  ;;  %v8941_v37 = vpop.f32.mrf.mxu0 }
 0x37b   :  { %v8925_v46 = vpop.eup %6842  ;;  %v3302_v22 = vrot.slane %v3301_v24, 2  ;;  %v3298_v50 = vadd.f32 %v3297_v31, %v3296_v6  ;;  %v2048_v4 = vrot.slane %v2047_v19, 4 }
 0x37c   :  { %v3306_v2 = vsel %vm1661_vm2, %v8925_v46, 0.0  ;;  %6846 = vpow2.f32 %v2792_v43  ;;  %v2046_v62 = vmax.f32 %v2044_v53, %v2045_v13 }
 0x37d   :  { %v6845_v5 = vpop.eup %6844  ;;  %v3307_v38 = vrot.slane %v3306_v2, 4  ;;  %6848 = vrcp.f32 %v3298_v50  ;;  %v3303_v23 = vadd.f32 %v3302_v22, %v3301_v24  ;;  %v2049_v27 = vmax.f32 %v2047_v19, %v2048_v4 }
 0x37e   :  { %v4015_v16 = vmul.f32 %v6845_v5, %v8855_v12  ;;  %v8943_v26 = vpop.f32.mrf.mxu3  ;;  %v8948_v12 = vld [vmem:[%s10706_s4] sm:$0xff]  ;;  %v2612_v63 = vsub.f32 %v8893_v45, %v2046_v62 }
 0x37f   :  { %10776 = vst [vmem:[#allocation54_spill] sm:$0xff] %v8943_v26  ;;  %v3308_v9 = vadd.f32 %v3307_v38, %v3306_v2  ;;  %v8951_v39 = vadd.f32 %v8948_v12, %v1309_v1  ;;  %v3304_v7 = vrot.slane %v3303_v23, 1  ;;  %v2050_v25 = vrot.slane %v2049_v27, 2 }
 0x380   :  { %6535 = vmatmul.msk.f32.gmra.mxu0 %vm1661_vm2, %v4015_v16  ;;  %v2794_v20 = vmul.f32 1.442695, %v2612_v63 }
 0x381   :  { %v3309_v15 = vrot.slane %v3308_v9, 2  ;;  %v2054_v29 = vsel %vm1661_vm2, %v8951_v39, -inf  ;;  %v3305_v56 = vadd.f32 %v3304_v7, %v3303_v23  ;;  %v2051_v8 = vmax.f32 %v2049_v27, %v2050_v25  ;;  %v8990_v25 = vld [vmem:[%s10706_s4 + $0x10] sm:$0xff] }
 0x382   :  { %v8954_v33 = vpop.eup %6846  ;;  %v2055_v21 = vrot.slane %v2054_v29, 4  ;;  %v8962_v45 = vpop.f32.mrf.mxu0  ;;  %6850 = vpow2.f32 %v2794_v20 }
 0x383   :  { %v6849_v40 = vpop.eup %6848  ;;  %v3313_v30 = vsel %vm1661_vm2, %v8954_v33, 0.0  ;;  %v3310_v32 = vadd.f32 %v3309_v15, %v3308_v9  ;;  %v1312_v34 = vpop.f32.mrf.mxu1  ;;  %6852 = vrcp.f32 %v3305_v56  ;;  %v2052_v24 = vrot.slane %v2051_v8, 1 }
 0x384   :  { %v4016_v18 = vmul.f32 %v6849_v40, %v8882_v61  ;;  %v3314_v48 = vrot.slane %v3313_v30, 4  ;;  %v2056_v53 = vmax.f32 %v2054_v29, %v2055_v21  ;;  %v8969_v61 = vld [vmem:[%s10706_s4 + $0x8] sm:$0xff] }
 0x385   :  { %v3311_v5 = vrot.slane %v3310_v32, 1  ;;  %v8972_v2 = vadd.f32 %v8969_v61, %v1312_v34  ;;  %v2053_v1 = vmax.f32 %v2051_v8, %v2052_v24 }
 0x386   :  { %v8964_v6 = vpop.f32.mrf.mxu3  ;;  %v3315_v31 = vadd.f32 %v3314_v48, %v3313_v30  ;;  %v2057_v13 = vrot.slane %v2056_v53, 2 }
 0x387   :  { %10777 = vst [vmem:[#allocation55_spill] sm:$0xff] %v8964_v6  ;;  %v3312_v19 = vadd.f32 %v3311_v5, %v3310_v32  ;;  %v2061_v50 = vsel %vm1661_vm2, %v8972_v2, -inf }
 0x388   :  { %6536 = vmatmul.msk.f32.gmra.mxu0 %vm1661_vm2, %v4016_v18  ;;  %v8974_v43 = vpop.eup %6850  ;;  %v3316_v22 = vrot.slane %v3315_v31, 2  ;;  %v2058_v23 = vmax.f32 %v2056_v53, %v2057_v13  ;;  %v2062_v15 = vrot.slane %v2061_v50, 4  ;;  %v9001_v13 = vpop.permute.xlu2 %4892 }
 0x389   :  { %v6853_v16 = vpop.eup %6852  ;;  %v3320_v62 = vsel %vm1661_vm2, %v8974_v43, 0.0  ;;  %6854 = vrcp.f32 %v3312_v19 }
 0x38a   :  { %v4017_v38 = vmul.f32 %v6853_v16, %v8909_v10  ;;  %v8981_v4 = vpop.f32.mrf.mxu0  ;;  %v3317_v27 = vadd.f32 %v3316_v22, %v3315_v31  ;;  %v3321_v7 = vrot.slane %v3320_v62, 4  ;;  %v2613_v10 = vsub.f32 %v8933_v28, %v2053_v1 }
 0x38b   :  { %v1315_v63 = vpop.f32.mrf.mxu1  ;;  %v2059_v29 = vrot.slane %v2058_v23, 1  ;;  %v2063_v30 = vmax.f32 %v2061_v50, %v2062_v15  ;;  %v4964_v16 = vmul.f32 %v9001_v13, %v8902_v57 }
 0x38c   :  { %v3318_v40 = vrot.slane %v3317_v27, 1  ;;  %v3322_v20 = vadd.f32 %v3321_v7, %v3320_v62  ;;  %v8993_v18 = vadd.f32 %v8990_v25, %v1315_v63  ;;  %v2796_v32 = vmul.f32 1.442695, %v2613_v10  ;;  %v9012_v63 = vld [vmem:[%s10706_s4 + $0x18] sm:$0xff]  ;;  %v10780_v10 = vld [vmem:[#allocation8_spill] sm:$0xff] }
 0x38d   :  { %v2060_v56 = vmax.f32 %v2058_v23, %v2059_v29  ;;  %v2064_v28 = vrot.slane %v2063_v30, 2  ;;  %v5284_v62 = vsel %vm739_vm1, %v4964_v16, 0.0  ;;  %v9021_v29 = vadd.f32 %v8948_v12, %v10780_v10 }
 0x38e   :  { %v8984_v9 = vpop.f32.mrf.mxu3  ;;  %v3323_v8 = vrot.slane %v3322_v20, 2  ;;  %v2068_v53 = vsel %vm1661_vm2, %v8993_v18, -inf  ;;  %v3319_v24 = vadd.f32 %v3318_v40, %v3317_v27  ;;  %6856 = vpow2.f32 %v2796_v32 }
 0x38f   :  { %10778 = vst [vmem:[#allocation56_spill] sm:$0xff] %v8984_v9  ;;  %v6855_v21 = vpop.eup %6854  ;;  %v2069_v19 = vrot.slane %v2068_v53, 4  ;;  %v5285_v40 = vrot.slane %v5284_v62, 4  ;;  %v4967_v32 = vmul.f32 %v9001_v13, %v8962_v45 }
 0x390   :  { %6537 = vmatmul.msk.f32.gmra.mxu0 %vm1661_vm2, %v4017_v38  ;;  %v4018_v48 = vmul.f32 %v6855_v21, %v8925_v46  ;;  %v2614_v46 = vsub.f32 %v8951_v39, %v2060_v56  ;;  %6858 = vrcp.f32 %v3319_v24  ;;  %v3324_v22 = vadd.f32 %v3323_v8, %v3322_v20 }
 0x391   :  { %v2065_v38 = vmax.f32 %v2063_v30, %v2064_v28  ;;  %v2070_v23 = vmax.f32 %v2068_v53, %v2069_v19  ;;  %v4965_v39 = vmul.f32 %v9001_v13, %v8920_v58  ;;  %v4966_v20 = vmul.f32 %v9001_v13, %v8941_v37 }
 0x392   :  { %v4611_v34 = vpop.f32.mrf.mxu0  ;;  %v2798_v1 = vmul.f32 1.442695, %v2614_v46  ;;  %v3325_v57 = vrot.slane %v3324_v22, 1  ;;  %v2166_v24 = vsel %vm1661_vm2, %v9021_v29, -inf  ;;  %v5305_v46 = vsel %vm739_vm1, %v4967_v32, 0.0 }
 0x393   :  { %v1318_v31 = vpop.f32.mrf.mxu1  ;;  %v2066_v7 = vrot.slane %v2065_v38, 1  ;;  %v2071_v8 = vrot.slane %v2070_v23, 2  ;;  %v5291_v53 = vsel %vm739_vm1, %v4965_v39, 0.0  ;;  %v5298_v45 = vsel %vm739_vm1, %v4966_v20, 0.0 }
 0x394   :  { %v9007_v50 = vpop.eup %6856  ;;  %v9015_v27 = vadd.f32 %v9012_v63, %v1318_v31  ;;  %6860 = vpow2.f32 %v2798_v1  ;;  %v3326_v31 = vadd.f32 %v3325_v57, %v3324_v22  ;;  %v4968_v19 = vmul.f32 %v9001_v13, %v8981_v4 }
 0x395   :  { %v3327_v21 = vsel %vm1661_vm2, %v9007_v50, 0.0  ;;  %v2067_v37 = vmax.f32 %v2065_v38, %v2066_v7  ;;  %v2072_v10 = vmax.f32 %v2070_v23, %v2071_v8  ;;  %v4969_v38 = vmul.f32 %v9001_v13, %v4611_v34 }
 0x396   :  { %v8999_v5 = vpop.f32.mrf.mxu3  ;;  %v6859_v15 = vpop.eup %6858  ;;  %v2075_v28 = vsel %vm1661_vm2, %v9015_v27, -inf  ;;  %v3328_v16 = vrot.slane %v3327_v21, 4  ;;  %6862 = vrcp.f32 %v3326_v31  ;;  %v5299_v22 = vrot.slane %v5298_v45, 4 }
 0x397   :  { %10779 = vst [vmem:[#allocation57_spill] sm:$0xff] %v8999_v5  ;;  %v4019_v58 = vmul.f32 %v6859_v15, %v8954_v33  ;;  %v5286_v33 = vadd.f32 %v5285_v40, %v5284_v62  ;;  %v2076_v1 = vrot.slane %v2075_v28, 4  ;;  %v5292_v15 = vrot.slane %v5291_v53, 4 }
 0x398   :  { %6538 = vmatmul.msk.f32.gmra.mxu0 %vm1661_vm2, %v4018_v48  ;;  %v2615_v57 = vsub.f32 %v8972_v2, %v2067_v37  ;;  %v3329_v40 = vadd.f32 %v3328_v16, %v3327_v21  ;;  %v5306_v20 = vrot.slane %v5305_v46, 4  ;;  %v2167_v32 = vrot.slane %v2166_v24, 4 }
 0x399   :  { %v5287_v4 = vrot.slane %v5286_v33, 2  ;;  %v2077_v23 = vmax.f32 %v2075_v28, %v2076_v1  ;;  %v5293_v8 = vadd.f32 %v5292_v15, %v5291_v53  ;;  %v2073_v31 = vrot.slane %v2072_v10, 1 }
 0x39a   :  { %v4614_v30 = vpop.f32.mrf.mxu0  ;;  %v9043_v39 = vpop.eup %6860  ;;  %v5300_v37 = vadd.f32 %v5299_v22, %v5298_v45  ;;  %v3330_v28 = vrot.slane %v3329_v40, 2  ;;  %v5307_v53 = vadd.f32 %v5306_v20, %v5305_v46  ;;  %v9066_v47 = vmax.f32 %v2166_v24, %v2167_v32 }
 0x39b   :  { %v1321_v48 = vpop.f32.mrf.mxu1  ;;  %v4970_v7 = vmul.f32 %v9001_v13, %v4614_v30  ;;  %v3334_v34 = vsel %vm1661_vm2, %v9043_v39, 0.0  ;;  %v2800_v30 = vmul.f32 1.442695, %v2615_v57  ;;  %v2074_v22 = vmax.f32 %v2072_v10, %v2073_v31 }
 0x39c   :  { %v9048_v62 = vadd.f32 %v8831_v60, %v1321_v48  ;;  %v3335_v5 = vrot.slane %v3334_v34, 4  ;;  %v5294_v26 = vrot.slane %v5293_v8, 2  ;;  %v5301_v11 = vrot.slane %v5300_v37, 2 }
 0x39d   :  { %v5326_v60 = vsel %vm739_vm1, %v4970_v7, 0.0  ;;  %6864 = vpow2.f32 %v2800_v30  ;;  %v5308_v46 = vrot.slane %v5307_v53, 2  ;;  %v10783_v30 = vld [vmem:[#allocation9_spill] sm:$0xff] }
 0x39e   :  { %v9030_v56 = vpop.f32.mrf.mxu3  ;;  %v2082_v21 = vsel %vm1661_vm2, %v9048_v62, -inf  ;;  %v5327_v57 = vrot.slane %v5326_v60, 4  ;;  %v5295_v55 = vadd.f32 %v5294_v26, %v5293_v8 }
 0x39f   :  { %10781 = vst [vmem:[#allocation8_spill] sm:$0xff] %v9030_v56  ;;  %v5319_v56 = vsel %vm739_vm1, %v4969_v38, 0.0  ;;  %v2078_v38 = vrot.slane %v2077_v23, 2  ;;  %v2083_v7 = vrot.slane %v2082_v21, 4 }
 0x3a0   :  { %6539 = vmatmul.msk.f32.gmra.mxu0 %vm1661_vm2, %v4019_v58  ;;  %v5312_v58 = vsel %vm739_vm1, %v4968_v19, 0.0  ;;  %v6863_v19 = vpop.eup %6862  ;;  %v5320_v9 = vrot.slane %v5319_v56, 4  ;;  %v5328_v59 = vadd.f32 %v5327_v57, %v5326_v60  ;;  %v5296_v8 = vrot.slane %v5295_v55, 1 }
 0x3a1   :  { %v5313_v1 = vrot.slane %v5312_v58, 4  ;;  %v4020_v45 = vmul.f32 %v6863_v19, %v8974_v43  ;;  %v3336_v43 = vadd.f32 %v3335_v5, %v3334_v34  ;;  %v2079_v31 = vmax.f32 %v2077_v23, %v2078_v38 }
 0x3a2   :  { %v4617_v2 = vpop.f32.mrf.mxu0  ;;  %v5321_v10 = vadd.f32 %v5320_v9, %v5319_v56  ;;  %v5288_v19 = vadd.f32 %v5287_v4, %v5286_v33  ;;  %v2084_v3 = vmax.f32 %v2082_v21, %v2083_v7  ;;  %v5329_v26 = vrot.slane %v5328_v59, 2 }
 0x3a3   :  { %v1324_v16 = vpop.f32.mrf.mxu1  ;;  %v4971_v15 = vmul.f32 %v9001_v13, %v4617_v2  ;;  %v5314_v20 = vadd.f32 %v5313_v1, %v5312_v58  ;;  %v3331_v2 = vadd.f32 %v3330_v28, %v3329_v40  ;;  %v9075_v9 = vpop.eup %6864  ;;  %v3337_v56 = vrot.slane %v3336_v43, 2 }
 0x3a4   :  { %v9064_v13 = vadd.f32 %v8866_v35, %v1324_v16  ;;  %v5302_v35 = vadd.f32 %v5301_v11, %v5300_v37  ;;  %v5309_v16 = vadd.f32 %v5308_v46, %v5307_v53  ;;  %v5322_v24 = vrot.slane %v5321_v10, 2 }
 0x3a5   :  { %v5333_v6 = vsel %vm739_vm1, %v4971_v15, 0.0  ;;  %v2616_v15 = vsub.f32 %v8993_v18, %v2074_v22  ;;  %v3332_v1 = vrot.slane %v3331_v2, 1  ;;  %v5315_v40 = vrot.slane %v5314_v20, 2 }
 0x3a6   :  { %v9057_v48 = vpop.f32.mrf.mxu3  ;;  %v2089_v5 = vsel %vm1661_vm2, %v9064_v13, -inf  ;;  %v2080_v18 = vrot.slane %v2079_v31, 1  ;;  %v5289_v23 = vrot.slane %v5288_v19, 1  ;;  %v5303_v60 = vrot.slane %v5302_v35, 1 }
 0x3a7   :  { %10782 = vst [vmem:[#allocation58_spill] sm:$0xff] %v9057_v48  ;;  %v5334_v48 = vrot.slane %v5333_v6, 4  ;;  %v3333_v33 = vadd.f32 %v3332_v1, %v3331_v2  ;;  %v2802_v34 = vmul.f32 1.442695, %v2616_v15  ;;  %v2090_v37 = vrot.slane %v2089_v5, 4 }
 0x3a8   :  { %6540 = vmatmul.msk.f32.gmra.mxu0 %vm1661_vm2, %v4020_v45  ;;  %v9071_v45 = vadd.f32 %v8969_v61, %v10783_v30  ;;  %v3341_v21 = vsel %vm1661_vm2, %v9075_v9, 0.0  ;;  %v5310_v53 = vrot.slane %v5309_v16, 1  ;;  %v5323_v38 = vadd.f32 %v5322_v24, %v5321_v10 }
 0x3a9   :  { %v5335_v58 = vadd.f32 %v5334_v48, %v5333_v6  ;;  %v2085_v6 = vrot.slane %v2084_v3, 2  ;;  %6866 = vrcp.f32 %v3333_v33  ;;  %v5316_v48 = vadd.f32 %v5315_v40, %v5314_v20 }
 0x3aa   :  { %v2081_v22 = vmax.f32 %v2079_v31, %v2080_v18  ;;  %v3338_v57 = vadd.f32 %v3337_v56, %v3336_v43  ;;  %6868 = vpow2.f32 %v2802_v34  ;;  %v5330_v7 = vadd.f32 %v5329_v26, %v5328_v59  ;;  %v9087_v31 = vpop.f32.mrf.mxu0 }
 0x3ab   :  { %v1327_v4 = vpop.f32.mrf.mxu1  ;;  %v5336_v11 = vrot.slane %v5335_v58, 2  ;;  %v2086_v46 = vmax.f32 %v2084_v3, %v2085_v6  ;;  %v5297_v15 = vadd.f32 %v5296_v8, %v5295_v55  ;;  %v3342_v30 = vrot.slane %v3341_v21, 4 }
 0x3ac   :  { %v9082_v28 = vadd.f32 %v8890_v36, %v1327_v4  ;;  %v2091_v33 = vmax.f32 %v2089_v5, %v2090_v37  ;;  %v5317_v41 = vrot.slane %v5316_v48, 1  ;;  %v3339_v40 = vrot.slane %v3338_v57, 1 }
 0x3ad   :  { %v5337_v1 = vadd.f32 %v5336_v11, %v5335_v58  ;;  %v5290_v4 = vadd.f32 %v5289_v23, %v5288_v19  ;;  %v5311_v52 = vadd.f32 %v5310_v53, %v5309_v16  ;;  %v5324_v10 = vrot.slane %v5323_v38, 1 }
 0x3ae   :  { %v9077_v32 = vpop.f32.mrf.mxu3  ;;  %v2096_v2 = vsel %vm1661_vm2, %v9082_v28, -inf  ;;  %v2617_v43 = vsub.f32 %v9015_v27, %v2081_v22  ;;  %v5331_v3 = vrot.slane %v5330_v7, 1  ;;  %v2087_v59 = vrot.slane %v2086_v46, 1 }
 0x3af   :  { %10784 = vst [vmem:[#allocation9_spill] sm:$0xff] %v9077_v32  ;;  %v5304_v32 = vadd.f32 %v5303_v60, %v5302_v35  ;;  %v2097_v20 = vrot.slane %v2096_v2, 4  ;;  %v6867_v36 = vpop.eup %6866  ;;  %v3340_v55 = vadd.f32 %v3339_v40, %v3338_v57  ;;  %v6125_v58 = vsel %vm6090_vm4, %v5297_v15, %v5290_v4 }
 0x3b0   :  { %v4021_v56 = vmul.f32 %v6867_v36, %v9007_v50  ;;  %v3343_v5 = vadd.f32 %v3342_v30, %v3341_v21  ;;  %v5338_v35 = vrot.slane %v5337_v1, 1  ;;  %v2092_v24 = vrot.slane %v2091_v33, 2  ;;  %v9093_v34 = vpop.eup %6868 }
 0x3b1   :  { %v6126_v19 = vsel %vm6092_vm5, %v5304_v32, %v6125_v58  ;;  %v5318_v16 = vadd.f32 %v5317_v41, %v5316_v48  ;;  %v2098_v27 = vmax.f32 %v2096_v2, %v2097_v20  ;;  %v2169_v23 = vrot.slane %v9066_v47, 2 }
 0x3b2   :  { %6541 = vmatmul.msk.f32.vlgmr.msra.gmra.mxu2 %vm1661_vm2, %v4021_v56  ;;  %v2173_v50 = vsel %vm1661_vm2, %v9071_v45, -inf  ;;  %v6127_v26 = vsel %vm6094_vm6, %v5311_v52, %v6126_v19  ;;  %v5325_v6 = vadd.f32 %v5324_v10, %v5323_v38  ;;  %v2804_v8 = vmul.f32 1.442695, %v2617_v43  ;;  %v4623_v30 = vpop.f32.mrf.mxu0 }
 0x3b3   :  { %v5332_v11 = vadd.f32 %v5331_v3, %v5330_v7  ;;  %v2088_v37 = vmax.f32 %v2086_v46, %v2087_v59  ;;  %6870 = vrcp.f32 %v3340_v55  ;;  %v3344_v60 = vrot.slane %v3343_v5, 2  ;;  %v1330_v22 = vpop.f32.mrf.mxu1 }
 0x3b4   :  { %v3348_v32 = vsel %vm1661_vm2, %v9093_v34, 0.0  ;;  %v5339_v41 = vadd.f32 %v5338_v35, %v5337_v1  ;;  %v2093_v21 = vmax.f32 %v2091_v33, %v2092_v24  ;;  %v2099_v48 = vrot.slane %v2098_v27, 2 }
 0x3b5   :  { %v6128_v53 = vsel %vm6096_vm7, %v5318_v16, %v6127_v26  ;;  %v2170_v57 = vmax.f32 %v9066_v47, %v2169_v23  ;;  %v2174_v2 = vrot.slane %v2173_v50, 4  ;;  %v3349_v38 = vrot.slane %v3348_v32, 4  ;;  %v10787_v16 = vld [vmem:[#allocation10_spill] sm:$0xff] }
 0x3b6   :  { %v9091_v18 = vpop.f32.mrf.mxu3  ;;  %v6129_v52 = vsel %vm6098_vm8, %v5325_v6, %v6128_v53  ;;  %6872 = vpow2.f32 %v2804_v8  ;;  %v2618_v7 = vsub.f32 %v9048_v62, %v2088_v37  ;;  %v2094_v15 = vrot.slane %v2093_v21, 1 }
 0x3b7   :  { %10785 = vst [vmem:[#allocation59_spill] sm:$0xff] %v9091_v18  ;;  %v6130_v46 = vsel %vm6100_vm9, %v5332_v11, %v6129_v52  ;;  %v9110_v33 = vadd.f32 %v8930_v14, %v1330_v22  ;;  %v3345_v20 = vadd.f32 %v3344_v60, %v3343_v5  ;;  %v2100_v36 = vmax.f32 %v2098_v27, %v2099_v48  ;;  %v9131_v48 = vpop.permute.xlu0 %4894 }
 0x3b8   :  { %v6131_v1 = vsel %vm6102_vm10, %v5339_v41, %v6130_v46  ;;  %v2175_v47 = vmax.f32 %v2173_v50, %v2174_v2  ;;  %v2171_v3 = vrot.slane %v2170_v57, 1  ;;  %v3350_v59 = vadd.f32 %v3349_v38, %v3348_v32 }
 0x3b9   :  { %v6871_v40 = vpop.eup %6870  ;;  %6618 = vmatmul.msk.f32.gmra.mxu3 %vm739_vm1, %v6131_v1  ;;  %v2103_v62 = vsel %vm1661_vm2, %v9110_v33, -inf  ;;  %v3346_v10 = vrot.slane %v3345_v20, 1  ;;  %v2806_v56 = vmul.f32 1.442695, %v2618_v7  ;;  %v2095_v55 = vmax.f32 %v2093_v21, %v2094_v15 }
 0x3ba   :  { %v4022_v4 = vmul.f32 %v6871_v40, %v9043_v39  ;;  %v2104_v14 = vrot.slane %v2103_v62, 4  ;;  %v2101_v35 = vrot.slane %v2100_v36, 1  ;;  %v2176_v24 = vrot.slane %v2175_v47, 2  ;;  %v4626_v32 = vpop.f32.mrf.mxu0 }
 0x3bb   :  { %v3347_v58 = vadd.f32 %v3346_v10, %v3345_v20  ;;  %v2172_v39 = vmax.f32 %v2170_v57, %v2171_v3  ;;  %v9123_v27 = vadd.f32 %v8990_v25, %v10787_v16  ;;  %v3351_v23 = vrot.slane %v3350_v59, 2  ;;  %v1333_v11 = vpop.f32.mrf.mxu1 }
 0x3bc   :  { %6542 = vmatmul.msk.f32.gmra.mxu2 %vm1661_vm2, %v4022_v4  ;;  %v9119_v5 = vpop.eup %6872  ;;  %v2105_v19 = vmax.f32 %v2103_v62, %v2104_v14  ;;  %v2619_v50 = vsub.f32 %v9064_v13, %v2095_v55  ;;  %v2102_v8 = vmax.f32 %v2100_v36, %v2101_v35  ;;  %v2177_v37 = vmax.f32 %v2175_v47, %v2176_v24 }
 0x3bd   :  { %6874 = vrcp.f32 %v3347_v58  ;;  %v3355_v6 = vsel %vm1661_vm2, %v9119_v5, 0.0  ;;  %v2630_v41 = vsub.f32 %v9021_v29, %v2172_v39  ;;  %v2180_v21 = vsel %vm1661_vm2, %v9123_v27, -inf }
 0x3be   :  { %v9116_v43 = vpop.f32.mrf.mxu3  ;;  %6876 = vpow2.f32 %v2806_v56  ;;  %v2106_v26 = vrot.slane %v2105_v19, 2  ;;  %v9134_v53 = vadd.f32 %v8948_v12, %v1333_v11  ;;  %v3352_v13 = vadd.f32 %v3351_v23, %v3350_v59 }
 0x3bf   :  { %10786 = vst [vmem:[#allocation60_spill] sm:$0xff] %v9116_v43  ;;  %v3356_v57 = vrot.slane %v3355_v6, 4  ;;  %v2808_v2 = vmul.f32 1.442695, %v2619_v50  ;;  %v4972_v52 = vmul.f32 %v9131_v48, %v9087_v31  ;;  %v2620_v29 = vsub.f32 %v9082_v28, %v2102_v8 }
 0x3c0   :  { %v2107_v60 = vmax.f32 %v2105_v19, %v2106_v26  ;;  %v2178_v1 = vrot.slane %v2177_v37, 1  ;;  %v2181_v20 = vrot.slane %v2180_v21, 4  ;;  %v4973_v12 = vmul.f32 %v9131_v48, %v4623_v30 }
 0x3c1   :  { %v2110_v40 = vsel %vm1661_vm2, %v9134_v53, -inf  ;;  %v4974_v31 = vmul.f32 %v9131_v48, %v4626_v32  ;;  %v3353_v4 = vrot.slane %v3352_v13, 1  ;;  %v2830_v62 = vmul.f32 1.442695, %v2630_v41 }
 0x3c2   :  { %v2108_v38 = vrot.slane %v2107_v60, 1  ;;  %v2111_v47 = vrot.slane %v2110_v40, 4  ;;  %v3357_v28 = vadd.f32 %v3356_v57, %v3355_v6  ;;  %6878 = vpow2.f32 %v2808_v2  ;;  %v4629_v23 = vpop.f32.mrf.mxu0 }
 0x3c3   :  { %v6875_v22 = vpop.eup %6874  ;;  %v2810_v3 = vmul.f32 1.442695, %v2620_v29  ;;  %v3354_v59 = vadd.f32 %v3353_v4, %v3352_v13  ;;  %v9152_v56 = vmax.f32 %v2177_v37, %v2178_v1  ;;  %v2182_v55 = vmax.f32 %v2180_v21, %v2181_v20  ;;  %v1336_v50 = vpop.f32.mrf.mxu1  ;;  %v10789_v37 = vld [vmem:[#allocation11_spill] sm:$0xff] }
 0x3c4   :  { %v4023_v46 = vmul.f32 %v6875_v22, %v9075_v9  ;;  %v9142_v15 = vpop.eup %6876  ;;  %v2109_v36 = vmax.f32 %v2107_v60, %v2108_v38  ;;  %v5340_v9 = vsel %vm739_vm1, %v4972_v52, 0.0  ;;  %v2112_v30 = vmax.f32 %v2110_v40, %v2111_v47  ;;  %v9176_v40 = vld [vmem:[%s10705_s3] ss:$0 sm:$0xff] }
 0x3c5   :  { %v3362_v10 = vsel %vm1661_vm2, %v9142_v15, 0.0  ;;  %v5347_v14 = vsel %vm739_vm1, %v4973_v12, 0.0  ;;  %v5354_v35 = vsel %vm739_vm1, %v4974_v31, 0.0  ;;  %6880 = vrcp.f32 %v3354_v59 }
 0x3c6   :  { %v9138_v7 = vpop.f32.mrf.mxu3  ;;  %6543 = vmatmul.msk.f32.gmra.mxu2 %vm1661_vm2, %v4023_v46  ;;  %v2621_v58 = vsub.f32 %v9110_v33, %v2109_v36  ;;  %v2113_v24 = vrot.slane %v2112_v30, 2  ;;  %6882 = vpow2.f32 %v2830_v62  ;;  %v3358_v19 = vrot.slane %v3357_v28, 2 }
 0x3c7   :  { %10788 = vst [vmem:[#allocation10_spill] sm:$0xff] %v9138_v7  ;;  %v3363_v39 = vrot.slane %v3362_v10, 4  ;;  %v5341_v16 = vrot.slane %v5340_v9, 4  ;;  %6884 = vpow2.f32 %v2810_v3  ;;  %v5348_v26 = vrot.slane %v5347_v14, 4 }
 0x3c8   :  { %v2114_v6 = vmax.f32 %v2112_v30, %v2113_v24  ;;  %v9157_v8 = vpop.eup %6878  ;;  %v2183_v11 = vrot.slane %v2182_v55, 2  ;;  %v9161_v60 = vadd.f32 %v9012_v63, %v10789_v37  ;;  %v5355_v33 = vrot.slane %v5354_v35, 4 }
 0x3c9   :  { %v9164_v32 = vadd.f32 %v8969_v61, %v1336_v50  ;;  %v2631_v21 = vsub.f32 %v9071_v45, %v9152_v56  ;;  %v2812_v13 = vmul.f32 1.442695, %v2621_v58  ;;  %v4975_v57 = vmul.f32 %v9131_v48, %v4629_v23  ;;  %v10791_v45 = vld [vmem:[#allocation13_spill] sm:$0xff] }
 0x3ca   :  { %v2115_v22 = vrot.slane %v2114_v6, 1  ;;  %v3364_v2 = vadd.f32 %v3363_v39, %v3362_v10  ;;  %v5342_v52 = vadd.f32 %v5341_v16, %v5340_v9  ;;  %v3359_v29 = vadd.f32 %v3358_v19, %v3357_v28  ;;  %v4632_v58 = vpop.f32.mrf.mxu0 }
 0x3cb   :  { %v2117_v38 = vsel %vm1661_vm2, %v9164_v32, -inf  ;;  %v6881_v46 = vpop.eup %6880  ;;  %v3369_v1 = vsel %vm1661_vm2, %v9157_v8, 0.0  ;;  %v5349_v61 = vadd.f32 %v5348_v26, %v5347_v14  ;;  %v9180_v31 = vmax.f32 %v2182_v55, %v2183_v11  ;;  %v1339_v24 = vpop.f32.mrf.mxu1 }
 0x3cc   :  { %v2116_v20 = vmax.f32 %v2114_v6, %v2115_v22  ;;  %v2118_v12 = vrot.slane %v2117_v38, 4  ;;  %v9178_v36 = vpop.eup %6882  ;;  %v9184_v47 = vsel %vm1661_vm2, %v9161_v60, -inf  ;;  %v5356_v4 = vadd.f32 %v5355_v33, %v5354_v35 }
 0x3cd   :  { %v4024_v62 = vmul.f32 %v6881_v46, %v9093_v34  ;;  %v9187_v28 = vpop.eup %6884  ;;  %6886 = vpow2.f32 %v2812_v13  ;;  %v5361_v10 = vsel %vm739_vm1, %v4975_v57, 0.0  ;;  %v3365_v30 = vrot.slane %v3364_v2, 2 }
 0x3ce   :  { %v6258_v41 = vpop.f32.mrf.mxu3  ;;  %v2622_v9 = vsub.f32 %v9134_v53, %v2116_v20  ;;  %v2119_v3 = vmax.f32 %v2117_v38, %v2118_v12  ;;  %v3370_v59 = vrot.slane %v3369_v1, 4  ;;  %v5343_v14 = vrot.slane %v5342_v52, 2 }
 0x3cf   :  { %6544 = vmatmul.msk.f32.gmra.mxu2 %vm1661_vm2, %v4024_v62  ;;  %v3360_v55 = vrot.slane %v3359_v29, 1  ;;  %v5350_v19 = vrot.slane %v5349_v61, 2  ;;  %v4976_v34 = vmul.f32 %v9131_v48, %v4632_v58  ;;  %v6259_v39 = vadd.f32 %v9176_v40, %v6258_v41 }
 0x3d0   :  { %v2120_v35 = vrot.slane %v2119_v3, 2  ;;  %v3376_v53 = vsel %vm1661_vm2, %v9187_v28, 0.0  ;;  %v5357_v16 = vrot.slane %v5356_v4, 2  ;;  %v5362_v23 = vrot.slane %v5361_v10, 4 }
 0x3d1   :  { %v3361_v50 = vadd.f32 %v3360_v55, %v3359_v29  ;;  %v2185_v26 = vrot.slane %v9180_v31, 1  ;;  %v2814_v6 = vmul.f32 1.442695, %v2622_v9  ;;  %6306 = vst.msk [vmem:[#allocation5] sm:$0xff] %vm63_vm0, %v6259_v39  ;;  %v9199_v37 = vadd.f32 %v8990_v25, %v1339_v24 }
 0x3d2   :  { %v2121_v11 = vmax.f32 %v2119_v3, %v2120_v35  ;;  %v2188_v33 = vrot.slane %v9184_v47, 4  ;;  %v3371_v13 = vadd.f32 %v3370_v59, %v3369_v1  ;;  %v5344_v22 = vadd.f32 %v5343_v14, %v5342_v52  ;;  %v4635_v58 = vpop.f32.mrf.mxu0 }
 0x3d3   :  { %v5368_v41 = vsel %vm739_vm1, %v4976_v34, 0.0  ;;  %v9203_v38 = vpop.eup %6886  ;;  %v3377_v46 = vrot.slane %v3376_v53, 4  ;;  %v5351_v29 = vadd.f32 %v5350_v19, %v5349_v61  ;;  %6888 = vrcp.f32 %v3361_v50  ;;  %v1342_v24 = vpop.f32.mrf.mxu1 }
 0x3d4   :  { %v2122_v20 = vrot.slane %v2121_v11, 1  ;;  %v5358_v12 = vadd.f32 %v5357_v16, %v5356_v4  ;;  %v5363_v62 = vadd.f32 %v5362_v23, %v5361_v10  ;;  %v2124_v9 = vsel %vm1661_vm2, %v9199_v37, -inf }
 0x3d5   :  { %v3366_v25 = vadd.f32 %v3365_v30, %v3364_v2  ;;  %6890 = vpow2.f32 %v2814_v6  ;;  %v5369_v55 = vrot.slane %v5368_v41, 4  ;;  %v2125_v1 = vrot.slane %v2124_v9, 4 }
 0x3d6   :  { %v6261_v57 = vpop.f32.mrf.mxu3  ;;  %v2123_v3 = vmax.f32 %v2121_v11, %v2122_v20  ;;  %v5345_v52 = vrot.slane %v5344_v22, 1  ;;  %v3383_v59 = vsel %vm1661_vm2, %v9203_v38, 0.0  ;;  %v9210_v19 = vadd.f32 %v3377_v46, %v3376_v53 }
 0x3d7   :  { %v3367_v14 = vrot.slane %v3366_v25, 1  ;;  %v6262_v61 = vadd.f32 %v9176_v40, %v6261_v57  ;;  %v5352_v4 = vrot.slane %v5351_v29, 1  ;;  %v2126_v35 = vmax.f32 %v2124_v9, %v2125_v1 }
 0x3d8   :  { %v2623_v10 = vsub.f32 %v9164_v32, %v2123_v3  ;;  %v3372_v2 = vrot.slane %v3371_v13, 2  ;;  %v4977_v34 = vmul.f32 %v9131_v48, %v4635_v58  ;;  %v9216_v39 = vadd.f32 %v9012_v63, %v1342_v24 }
 0x3d9   :  { %v3368_v30 = vadd.f32 %v3367_v14, %v3366_v25  ;;  %6307 = vst.msk [vmem:[#allocation5 + $0x8] sm:$0xff] %vm63_vm0, %v6262_v61  ;;  %v6889_v16 = vpop.eup %6888  ;;  %v3384_v23 = vrot.slane %v3383_v59, 4  ;;  %v5359_v50 = vrot.slane %v5358_v12, 1  ;;  %v5364_v6 = vrot.slane %v5363_v62, 2 }
 0x3da   :  { %v5370_v11 = vadd.f32 %v5369_v55, %v5368_v41  ;;  %v4025_v53 = vmul.f32 %v6889_v16, %v9119_v5  ;;  %v2127_v57 = vrot.slane %v2126_v35, 2  ;;  %v5375_v32 = vsel %vm739_vm1, %v4977_v34, 0.0 }
 0x3db   :  { %6892 = vrcp.f32 %v3368_v30  ;;  %v9220_v46 = vpop.eup %6890  ;;  %v5346_v20 = vadd.f32 %v5345_v52, %v5344_v22  ;;  %v3379_v9 = vrot.slane %v9210_v19, 2  ;;  %v5353_v25 = vadd.f32 %v5352_v4, %v5351_v29 }
 0x3dc   :  { %v2816_v3 = vmul.f32 1.442695, %v2623_v10  ;;  %6545 = vmatmul.msk.f32.gmra.mxu2 %vm1661_vm2, %v4025_v53  ;;  %v2128_v63 = vmax.f32 %v2126_v35, %v2127_v57  ;;  %v5376_v1 = vrot.slane %v5375_v32, 4  ;;  %v2131_v41 = vsel %vm1661_vm2, %v9216_v39, -inf  ;;  %v1345_v10 = vpop.f32.mrf.mxu1 }
 0x3dd   :  { %v3373_v55 = vadd.f32 %v3372_v2, %v3371_v13  ;;  %v3385_v14 = vadd.f32 %v3384_v23, %v3383_v59  ;;  %v5360_v58 = vadd.f32 %v5359_v50, %v5358_v12  ;;  %v5365_v61 = vadd.f32 %v5364_v6, %v5363_v62  ;;  %v9233_v13 = vld [vmem:[%s10706_s4 + $0x20] sm:$0xff] }
 0x3de   :  { %v6264_v5 = vpop.f32.mrf.mxu3  ;;  %v2132_v24 = vrot.slane %v2131_v41, 4  ;;  %v3390_v22 = vsel %vm1661_vm2, %v9220_v46, 0.0  ;;  %v5371_v52 = vrot.slane %v5370_v11, 2  ;;  %v2129_v30 = vrot.slane %v2128_v63, 1  ;;  %v4638_v4 = vpop.f32.mrf.mxu0 }
 0x3df   :  { %v3374_v29 = vrot.slane %v3373_v55, 1  ;;  %v4978_v35 = vmul.f32 %v9131_v48, %v4638_v4  ;;  %v6265_v16 = vadd.f32 %v9176_v40, %v6264_v5  ;;  %v9236_v12 = vadd.f32 %v9233_v13, %v1345_v10 }
 0x3e0   :  { %v2133_v34 = vmax.f32 %v2131_v41, %v2132_v24  ;;  %6894 = vpow2.f32 %v2816_v3  ;;  %v2130_v59 = vmax.f32 %v2128_v63, %v2129_v30  ;;  %v5377_v2 = vadd.f32 %v5376_v1, %v5375_v32 }
 0x3e1   :  { %v6893_v62 = vpop.eup %6892  ;;  %v3375_v23 = vadd.f32 %v3374_v29, %v3373_v55  ;;  %v5382_v53 = vsel %vm739_vm1, %v4978_v35, 0.0  ;;  %6308 = vst.msk [vmem:[#allocation5 + $0x10] sm:$0xff] %vm63_vm0, %v6265_v16  ;;  %v2138_v57 = vsel %vm1661_vm2, %v9236_v12, -inf  ;;  %v6132_v41 = vsel %vm6090_vm4, %v5353_v25, %v5346_v20 }
 0x3e2   :  { %v4026_v50 = vmul.f32 %v6893_v62, %v9142_v15  ;;  %v2134_v6 = vrot.slane %v2133_v34, 2  ;;  %v3391_v5 = vrot.slane %v3390_v22, 4  ;;  %v5366_v24 = vrot.slane %v5365_v61, 1 }
 0x3e3   :  { %v2624_v4 = vsub.f32 %v9199_v37, %v2130_v59  ;;  %v5372_v3 = vadd.f32 %v5371_v52, %v5370_v11  ;;  %6896 = vrcp.f32 %v3375_v23  ;;  %v5383_v32 = vrot.slane %v5382_v53, 4 }
 0x3e4   :  { %v2135_v63 = vmax.f32 %v2133_v34, %v2134_v6  ;;  %v3386_v1 = vrot.slane %v3385_v14, 2  ;;  %v9246_v15 = vsel %vm6092_vm5, %v5360_v58, %v6132_v41  ;;  %6546 = vmatmul.msk.f32.gmra.mxu2 %vm1661_vm2, %v4026_v50  ;;  %v2139_v30 = vrot.slane %v2138_v57, 4  ;;  %v1348_v16 = vpop.f32.mrf.mxu1 }
 0x3e5   :  { %v2818_v55 = vmul.f32 1.442695, %v2624_v4  ;;  %v5378_v29 = vrot.slane %v5377_v2, 2  ;;  %v5384_v35 = vadd.f32 %v5383_v32, %v5382_v53  ;;  %v3380_v20 = vadd.f32 %v3379_v9, %v9210_v19  ;;  %v9258_v19 = vld [vmem:[%s10706_s4 + $0x28] sm:$0xff] }
 0x3e6   :  { %v2136_v10 = vrot.slane %v2135_v63, 1  ;;  %v9250_v25 = vpop.eup %6894  ;;  %v3392_v37 = vadd.f32 %v3391_v5, %v3390_v22  ;;  %v9252_v11 = vadd.f32 %v5366_v24, %v5365_v61  ;;  %v2140_v52 = vmax.f32 %v2138_v57, %v2139_v30 }
 0x3e7   :  { %6898 = vpow2.f32 %v2818_v55  ;;  %v5373_v58 = vrot.slane %v5372_v3, 1  ;;  %v5385_v59 = vrot.slane %v5384_v35, 2  ;;  %v3381_v23 = vrot.slane %v3380_v20, 1 }
 0x3e8   :  { %v2137_v62 = vmax.f32 %v2135_v63, %v2136_v10  ;;  %v2141_v50 = vrot.slane %v2140_v52, 2  ;;  %v9261_v9 = vadd.f32 %v9258_v19, %v1348_v16  ;;  %v3387_v61 = vadd.f32 %v3386_v1, %v3385_v14 }
 0x3e9   :  { %v4641_v34 = vpop.f32.mrf.mxu0  ;;  %v6897_v22 = vpop.eup %6896  ;;  %v3397_v53 = vsel %vm1661_vm2, %v9250_v25, 0.0  ;;  %v5379_v57 = vadd.f32 %v5378_v29, %v5377_v2  ;;  %v3382_v5 = vadd.f32 %v3381_v23, %v3380_v20  ;;  %v3393_v32 = vrot.slane %v3392_v37, 2 }
 0x3ea   :  { %v4979_v6 = vmul.f32 %v9131_v48, %v4641_v34  ;;  %v2625_v41 = vsub.f32 %v9216_v39, %v2137_v62  ;;  %v4027_v24 = vmul.f32 %v6897_v22, %v9157_v8  ;;  %v2142_v48 = vmax.f32 %v2140_v52, %v2141_v50 }
 0x3eb   :  { %v2145_v63 = vsel %vm1661_vm2, %v9261_v9, -inf  ;;  %6900 = vrcp.f32 %v3382_v5  ;;  %v5386_v2 = vadd.f32 %v5385_v59, %v5384_v35  ;;  %v3388_v29 = vrot.slane %v3387_v61, 1  ;;  %v9280_v35 = vld [vmem:[%s10706_s4 + $0x30] sm:$0xff] }
 0x3ec   :  { %v5389_v4 = vsel %vm739_vm1, %v4979_v6, 0.0  ;;  %v2820_v55 = vmul.f32 1.442695, %v2625_v41  ;;  %6547 = vmatmul.msk.f32.gmra.mxu2 %vm1661_vm2, %v4027_v24  ;;  %v2143_v30 = vrot.slane %v2142_v48, 1  ;;  %v2146_v39 = vrot.slane %v2145_v63, 4  ;;  %v1351_v50 = vpop.f32.mrf.mxu1 }
 0x3ed   :  { %v5390_v14 = vrot.slane %v5389_v4, 4  ;;  %v9270_v1 = vpop.eup %6898  ;;  %v3398_v10 = vrot.slane %v3397_v53, 4  ;;  %v5374_v8 = vadd.f32 %v5373_v58, %v5372_v3  ;;  %v5380_v52 = vrot.slane %v5379_v57, 1 }
 0x3ee   :  { %6902 = vpow2.f32 %v2820_v55  ;;  %v2144_v34 = vmax.f32 %v2142_v48, %v2143_v30  ;;  %v2147_v16 = vmax.f32 %v2145_v63, %v2146_v39  ;;  %v3389_v62 = vadd.f32 %v3388_v29, %v3387_v61 }
 0x3ef   :  { %v5391_v20 = vadd.f32 %v5390_v14, %v5389_v4  ;;  %v3404_v6 = vsel %vm1661_vm2, %v9270_v1, 0.0  ;;  %v9283_v3 = vadd.f32 %v9280_v35, %v1351_v50  ;;  %v3394_v58 = vadd.f32 %v3393_v32, %v3392_v37 }
 0x3f0   :  { %v5387_v59 = vrot.slane %v5386_v2, 1  ;;  %v2626_v41 = vsub.f32 %v9236_v12, %v2144_v34  ;;  %v2148_v61 = vrot.slane %v2147_v16, 2  ;;  %6904 = vrcp.f32 %v3389_v62 }
 0x3f1   :  { %v5392_v22 = vrot.slane %v5391_v20, 2  ;;  %v6901_v5 = vpop.eup %6900  ;;  %v3399_v24 = vadd.f32 %v3398_v10, %v3397_v53  ;;  %v2152_v4 = vsel %vm1661_vm2, %v9283_v3, -inf  ;;  %v3395_v63 = vrot.slane %v3394_v58, 1 }
 0x3f2   :  { %v3405_v55 = vrot.slane %v3404_v6, 4  ;;  %v2822_v14 = vmul.f32 1.442695, %v2626_v41  ;;  %v4028_v30 = vmul.f32 %v6901_v5, %v9187_v28  ;;  %v2149_v39 = vmax.f32 %v2147_v16, %v2148_v61 }
 0x3f3   :  { %v9273_v23 = vpop.f32.mrf.mxu0  ;;  %v5393_v48 = vadd.f32 %v5392_v22, %v5391_v20  ;;  %v5381_v37 = vadd.f32 %v5380_v52, %v5379_v57  ;;  %v2153_v50 = vrot.slane %v2152_v4, 4  ;;  %v3396_v12 = vadd.f32 %v3395_v63, %v3394_v58 }
 0x3f4   :  { %v9289_v29 = vpop.eup %6902  ;;  %v5388_v53 = vadd.f32 %v5387_v59, %v5386_v2  ;;  %6906 = vpow2.f32 %v2822_v14  ;;  %6548 = vmatmul.msk.f32.gmra.mxu2 %vm1661_vm2, %v4028_v30  ;;  %v2150_v10 = vrot.slane %v2149_v39, 1  ;;  %v2189_v20 = vmax.f32 %v9184_v47, %v2188_v33  ;;  %v1354_v59 = vpop.f32.mrf.mxu1 }
 0x3f5   :  { %v5394_v32 = vrot.slane %v5393_v48, 1  ;;  %v3411_v34 = vsel %vm1661_vm2, %v9289_v29, 0.0  ;;  %v6134_v28 = vsel %vm6094_vm6, %v9252_v11, %v9246_v15  ;;  %v2154_v52 = vmax.f32 %v2152_v4, %v2153_v50  ;;  %v10790_v4 = vld [vmem:[#allocation12_spill] sm:$0xff] }
 0x3f6   :  { %v6905_v16 = vpop.eup %6904  ;;  %v3400_v62 = vrot.slane %v3399_v24, 2  ;;  %v3406_v22 = vadd.f32 %v3405_v55, %v3404_v6  ;;  %v2151_v58 = vmax.f32 %v2149_v39, %v2150_v10  ;;  %v6135_v2 = vsel %vm6096_vm7, %v5374_v8, %v6134_v28  ;;  %v9310_v6 = vld [vmem:[%s10706_s4 + $0x38] sm:$0xff] }
 0x3f7   :  { %v5395_v57 = vadd.f32 %v5394_v32, %v5393_v48  ;;  %v3412_v61 = vrot.slane %v3411_v34, 4  ;;  %v2155_v5 = vrot.slane %v2154_v52, 2  ;;  %6908 = vrcp.f32 %v3396_v12 }
 0x3f8   :  { %v6136_v47 = vsel %vm6098_vm8, %v5381_v37, %v6135_v2  ;;  %v2627_v33 = vsub.f32 %v9261_v9, %v2151_v58  ;;  %v4029_v15 = vmul.f32 %v6905_v16, %v9203_v38  ;;  %v9313_v48 = vadd.f32 %v9310_v6, %v1354_v59 }
 0x3f9   :  { %v6137_v11 = vsel %vm6100_vm9, %v5388_v53, %v6136_v47  ;;  %v2186_v8 = vmax.f32 %v9180_v31, %v2185_v26  ;;  %v9320_v63 = vadd.f32 %v9233_v13, %v10790_v4  ;;  %v2156_v9 = vmax.f32 %v2154_v52, %v2155_v5 }
 0x3fa   :  { %v6138_v38 = vsel %vm6102_vm10, %v5395_v57, %v6137_v11  ;;  %v9323_v55 = vpop.eup %6906  ;;  %v2190_v14 = vrot.slane %v2189_v20, 2  ;;  %v2824_v30 = vmul.f32 1.442695, %v2627_v33  ;;  %v2159_v39 = vsel %vm1661_vm2, %v9313_v48, -inf }
 0x3fb   :  { %6619 = vmatmul.msk.f32.gmra.mxu3 %vm739_vm1, %v6138_v38  ;;  %v3401_v37 = vadd.f32 %v3400_v62, %v3399_v24  ;;  %v2832_v31 = vmul.f32 1.442695, %v2631_v21  ;;  %v3407_v26 = vrot.slane %v3406_v22, 2  ;;  %v3413_v32 = vadd.f32 %v3412_v61, %v3411_v34 }
 0x3fc   :  { %v2157_v50 = vrot.slane %v2156_v9, 1  ;;  %v6267_v12 = vpop.f32.mrf.mxu3  ;;  %v3418_v53 = vsel %vm1661_vm2, %v9323_v55, 0.0  ;;  %6910 = vpow2.f32 %v2824_v30  ;;  %6549 = vmatmul.msk.f32.gmra.mxu2 %vm1661_vm2, %v4029_v15  ;;  %v2160_v10 = vrot.slane %v2159_v39, 4 }
 0x3fd   :  { %v9300_v41 = vpop.f32.mrf.mxu0  ;;  %v3402_v28 = vrot.slane %v3401_v37, 1  ;;  %v6909_v57 = vpop.eup %6908  ;;  %v2632_v52 = vsub.f32 %v9123_v27, %v2186_v8  ;;  %v2194_v24 = vsel %vm1661_vm2, %v9320_v63, -inf  ;;  %v9339_v56 = vadd.f32 %v9258_v19, %v10791_v45 }
 0x3fe   :  { %v2158_v21 = vmax.f32 %v2156_v9, %v2157_v50  ;;  %v2191_v34 = vmax.f32 %v2189_v20, %v2190_v14  ;;  %v2161_v16 = vmax.f32 %v2159_v39, %v2160_v10  ;;  %v6268_v58 = vadd.f32 %v9176_v40, %v6267_v12 }
 0x3ff   :  { %v3403_v62 = vadd.f32 %v3402_v28, %v3401_v37  ;;  %v3414_v59 = vrot.slane %v3413_v32, 2  ;;  %v3419_v61 = vrot.slane %v3418_v53, 4  ;;  %v3408_v27 = vadd.f32 %v3407_v26, %v3406_v22 }
 0x400   :  { %v2628_v5 = vsub.f32 %v9283_v3, %v2158_v21  ;;  %v2195_v47 = vrot.slane %v2194_v24, 4  ;;  %v4030_v33 = vmul.f32 %v6909_v57, %v9220_v46  ;;  %v2162_v15 = vrot.slane %v2161_v16, 2  ;;  %6309 = vst.msk [vmem:[#allocation5 + $0x18] sm:$0xff] %vm63_vm0, %v6268_v58 }
 0x401   :  { %6912 = vrcp.f32 %v3403_v62  ;;  %v2834_v11 = vmul.f32 1.442695, %v2632_v52  ;;  %v2201_v20 = vsel %vm1661_vm2, %v9339_v56, -inf  ;;  %v3409_v4 = vrot.slane %v3408_v27, 1  ;;  %v10792_v62 = vld [vmem:[#allocation14_spill] sm:$0xff] }
 0x402   :  { %v2826_v8 = vmul.f32 1.442695, %v2628_v5  ;;  %v9349_v9 = vpop.eup %6910  ;;  %6914 = vpow2.f32 %v2832_v31  ;;  %v2192_v38 = vrot.slane %v2191_v34, 1  ;;  %v2163_v14 = vmax.f32 %v2161_v16, %v2162_v15 }
 0x403   :  { %v3420_v3 = vadd.f32 %v3419_v61, %v3418_v53  ;;  %v3410_v22 = vadd.f32 %v3409_v4, %v3408_v27  ;;  %v3415_v30 = vadd.f32 %v3414_v59, %v3413_v32  ;;  %v2196_v46 = vmax.f32 %v2194_v24, %v2195_v47 }
 0x404   :  { %6916 = vpow2.f32 %v2826_v8  ;;  %v2202_v39 = vrot.slane %v2201_v20, 4  ;;  %v3425_v37 = vsel %vm1661_vm2, %v9349_v9, 0.0  ;;  %6550 = vmatmul.msk.f32.gmra.mxu2 %vm1661_vm2, %v4030_v33  ;;  %v2164_v26 = vrot.slane %v2163_v14, 1 }
 0x405   :  { %v9342_v2 = vpop.f32.mrf.mxu0  ;;  %6918 = vpow2.f32 %v2834_v11  ;;  %v2193_v12 = vmax.f32 %v2191_v34, %v2192_v38  ;;  %v3421_v31 = vrot.slane %v3420_v3, 2  ;;  %v3426_v57 = vrot.slane %v3425_v37, 4 }
 0x406   :  { %v2165_v10 = vmax.f32 %v2163_v14, %v2164_v26  ;;  %6920 = vrcp.f32 %v3410_v22  ;;  %v3416_v53 = vrot.slane %v3415_v30, 1  ;;  %v2197_v32 = vrot.slane %v2196_v46, 2 }
 0x407   :  { %v6913_v50 = vpop.eup %6912  ;;  %v2203_v24 = vmax.f32 %v2201_v20, %v2202_v39  ;;  %v9364_v34 = vadd.f32 %v9280_v35, %v10792_v62  ;;  %v2633_v58 = vsub.f32 %v9161_v60, %v2193_v12  ;;  %v3446_v5 = vsel %vm1661_vm2, %v9178_v36, 0.0 }
 0x408   :  { %v9356_v52 = vpop.eup %6914  ;;  %v2629_v45 = vsub.f32 %v9313_v48, %v2165_v10  ;;  %v4031_v21 = vmul.f32 %v6913_v50, %v9250_v25  ;;  %v3427_v27 = vadd.f32 %v3426_v57, %v3425_v37  ;;  %v3417_v47 = vadd.f32 %v3416_v53, %v3415_v30 }
 0x409   :  { %v3422_v33 = vadd.f32 %v3421_v31, %v3420_v3  ;;  %v2198_v48 = vmax.f32 %v2196_v46, %v2197_v32  ;;  %v2204_v15 = vrot.slane %v2203_v24, 2  ;;  %v2208_v60 = vsel %vm1661_vm2, %v9364_v34, -inf }
 0x40a   :  { %v9360_v16 = vpop.eup %6916  ;;  %v2828_v59 = vmul.f32 1.442695, %v2629_v45  ;;  %v3447_v20 = vrot.slane %v3446_v5, 4  ;;  %v3453_v8 = vsel %vm1661_vm2, %v9356_v52, 0.0  ;;  %v2836_v38 = vmul.f32 1.442695, %v2633_v58 }
 0x40b   :  { %v9367_v61 = vpop.eup %6918  ;;  %v3432_v25 = vsel %vm1661_vm2, %v9360_v16, 0.0  ;;  %v3428_v3 = vrot.slane %v3427_v27, 2  ;;  %v3423_v30 = vrot.slane %v3422_v33, 1  ;;  %v2199_v46 = vrot.slane %v2198_v48, 1 }
 0x40c   :  { %6922 = vpow2.f32 %v2828_v59  ;;  %6551 = vmatmul.msk.f32.gmra.mxu2 %vm1661_vm2, %v4031_v21  ;;  %v6921_v11 = vpop.eup %6920  ;;  %v3460_v4 = vsel %vm1661_vm2, %v9367_v61, 0.0  ;;  %v3433_v22 = vrot.slane %v3432_v25, 4  ;;  %v2205_v39 = vmax.f32 %v2203_v24, %v2204_v15 }
 0x40d   :  { %v9354_v28 = vpop.f32.mrf.mxu0  ;;  %6924 = vrcp.f32 %v3417_v47  ;;  %v2209_v37 = vrot.slane %v2208_v60, 4  ;;  %v4032_v26 = vmul.f32 %v6921_v11, %v9270_v1  ;;  %v3454_v50 = vrot.slane %v3453_v8, 4  ;;  %v10793_v47 = vld [vmem:[#allocation15_spill] sm:$0xff] }
 0x40e   :  { %v3461_v12 = vrot.slane %v3460_v4, 4  ;;  %v9383_v31 = vadd.f32 %v3447_v20, %v3446_v5  ;;  %6926 = vpow2.f32 %v2836_v38  ;;  %v3434_v57 = vadd.f32 %v3433_v22, %v3432_v25  ;;  %v9400_v38 = vpop.permute.xlu1 %4896 }
 0x40f   :  { %v3424_v53 = vadd.f32 %v3423_v30, %v3422_v33  ;;  %v3429_v32 = vadd.f32 %v3428_v3, %v3427_v27  ;;  %v2200_v45 = vmax.f32 %v2198_v48, %v2199_v46  ;;  %v2206_v21 = vrot.slane %v2205_v39, 1  ;;  %v9408_v30 = vld [vmem:[%s10706_s4] sm:$0xff] }
 0x410   :  { %v2210_v62 = vmax.f32 %v2208_v60, %v2209_v37  ;;  %v9388_v1 = vadd.f32 %v3454_v50, %v3453_v8  ;;  %v9390_v59 = vadd.f32 %v3461_v12, %v3460_v4  ;;  %v9395_v15 = vadd.f32 %v9310_v6, %v10793_v47  ;;  %10794 = vst [vmem:[#allocation11_spill] sm:$0xff] %v9408_v30  ;;  %v10795_v46 = vld [vmem:[#allocation16_spill] sm:$0xff] }
 0x411   :  { %v3435_v33 = vrot.slane %v3434_v57, 2  ;;  %6928 = vrcp.f32 %v3424_v53  ;;  %v3430_v25 = vrot.slane %v3429_v32, 1  ;;  %v2634_v60 = vsub.f32 %v9320_v63, %v2200_v45 }
 0x412   :  { %v9381_v10 = vpop.eup %6922  ;;  %v2207_v20 = vmax.f32 %v2205_v39, %v2206_v21  ;;  %v2211_v8 = vrot.slane %v2210_v62, 2  ;;  %v9412_v37 = vadd.f32 %v9408_v30, %v10795_v46  ;;  %v4981_v63 = vmul.f32 %v9400_v38, %v9300_v41 }
 0x413   :  { %v3439_v58 = vsel %vm1661_vm2, %v9381_v10, 0.0  ;;  %v6925_v24 = vpop.eup %6924  ;;  %v2215_v39 = vsel %vm1661_vm2, %v9395_v15, -inf  ;;  %v4983_v50 = vmul.f32 %v9400_v38, %v9354_v28  ;;  %v3431_v45 = vadd.f32 %v3430_v25, %v3429_v32 }
 0x414   :  { %6552 = vmatmul.msk.f32.gmra.mxu2 %vm1661_vm2, %v4032_v26  ;;  %v3440_v48 = vrot.slane %v3439_v58, 4  ;;  %v9397_v11 = vpop.eup %6926  ;;  %v4033_v4 = vmul.f32 %v6925_v24, %v9289_v29  ;;  %v4980_v29 = vmul.f32 %v9400_v38, %v9273_v23  ;;  %v4982_v26 = vmul.f32 %v9400_v38, %v9342_v2 }
 0x415   :  { %v4656_v14 = vpop.f32.mrf.mxu0  ;;  %v9426_v12 = vsel %vm1661_vm2, %v9397_v11, 0.0  ;;  %v3436_v21 = vadd.f32 %v3435_v33, %v3434_v57  ;;  %v2838_v41 = vmul.f32 1.442695, %v2634_v60  ;;  %v2635_v24 = vsub.f32 %v9339_v56, %v2207_v20  ;;  %v9438_v57 = vld [vmem:[%s10706_s4 + $0x8] sm:$0xff] }
 0x416   :  { %v3441_v53 = vadd.f32 %v3440_v48, %v3439_v58  ;;  %v2212_v47 = vmax.f32 %v2210_v62, %v2211_v8  ;;  %v4984_v23 = vmul.f32 %v9400_v38, %v4656_v14  ;;  %v2216_v2 = vrot.slane %v2215_v39, 4  ;;  %10796 = vst [vmem:[#allocation12_spill] sm:$0xff] %v9438_v57  ;;  %v10797_v56 = vld [vmem:[#allocation17_spill] sm:$0xff] }
 0x417   :  { %v6929_v46 = vpop.eup %6928  ;;  %v2222_v28 = vsel %vm1661_vm2, %v9412_v37, -inf  ;;  %v5403_v22 = vsel %vm739_vm1, %v4981_v63, 0.0  ;;  %v9442_v32 = vadd.f32 %v9438_v57, %v10797_v56  ;;  %v5396_v14 = vsel %vm739_vm1, %v4980_v29, 0.0 }
 0x418   :  { %v5410_v62 = vsel %vm739_vm1, %v4982_v26, 0.0  ;;  %v5417_v58 = vsel %vm739_vm1, %v4983_v50, 0.0  ;;  %v3442_v48 = vrot.slane %v3441_v53, 2  ;;  %6930 = vrcp.f32 %v3431_v45 }
 0x419   :  { %v3437_v25 = vrot.slane %v3436_v21, 1  ;;  %v2213_v60 = vrot.slane %v2212_v47, 1  ;;  %v5404_v20 = vrot.slane %v5403_v22, 4  ;;  %v5424_v8 = vsel %vm739_vm1, %v4984_v23, 0.0  ;;  %v10799_v23 = vld [vmem:[#allocation18_spill] sm:$0xff] }
 0x41a   :  { %v2217_v63 = vmax.f32 %v2215_v39, %v2216_v2  ;;  %v2223_v56 = vrot.slane %v2222_v28, 4  ;;  %v5411_v5 = vrot.slane %v5410_v62, 4  ;;  %v2229_v26 = vsel %vm1661_vm2, %v9442_v32, -inf }
 0x41b   :  { %v5397_v50 = vrot.slane %v5396_v14, 4  ;;  %v5418_v7 = vrot.slane %v5417_v58, 4  ;;  %v5425_v39 = vrot.slane %v5424_v8, 4  ;;  %v3443_v2 = vadd.f32 %v3442_v48, %v3441_v53 }
 0x41c   :  { %6553 = vmatmul.msk.f32.gmra.mxu2 %vm1661_vm2, %v4033_v4  ;;  %v4034_v4 = vmul.f32 %v6929_v46, %v9323_v55  ;;  %v3438_v46 = vadd.f32 %v3437_v25, %v3436_v21  ;;  %v2840_v43 = vmul.f32 1.442695, %v2635_v24  ;;  %v5405_v18 = vadd.f32 %v5404_v20, %v5403_v22  ;;  %v9472_v22 = vld [vmem:[%s10706_s4 + $0x18] sm:$0xff] }
 0x41d   :  { %v4659_v27 = vpop.f32.mrf.mxu0  ;;  %v9465_v49 = vmax.f32 %v2212_v47, %v2213_v60  ;;  %v2218_v54 = vrot.slane %v2217_v63, 2  ;;  %v5412_v51 = vadd.f32 %v5411_v5, %v5410_v62  ;;  %v2224_v42 = vmax.f32 %v2222_v28, %v2223_v56  ;;  %10800 = vst [vmem:[#allocation14_spill] sm:$0xff] %v9472_v22  ;;  %v10801_v47 = vld [vmem:[#allocation19_spill] sm:$0xff] }
 0x41e   :  { %v4985_v3 = vmul.f32 %v9400_v38, %v4659_v27  ;;  %v2230_v44 = vrot.slane %v2229_v26, 4  ;;  %v5426_v21 = vadd.f32 %v5425_v39, %v5424_v8  ;;  %6932 = vrcp.f32 %v3438_v46 }
 0x41f   :  { %v3444_v24 = vrot.slane %v3443_v2, 1  ;;  %v9476_v48 = vadd.f32 %v9472_v22, %v10801_v47  ;;  %v5406_v5 = vrot.slane %v5405_v18, 2  ;;  %6934 = vpow2.f32 %v2838_v41 }
 0x420   :  { %v5431_v29 = vsel %vm739_vm1, %v4985_v3, 0.0  ;;  %v5413_v62 = vrot.slane %v5412_v51, 2  ;;  %v2225_v25 = vrot.slane %v2224_v42, 2  ;;  %6936 = vpow2.f32 %v2840_v43 }
 0x421   :  { %v5432_v0 = vrot.slane %v5431_v29, 4  ;;  %v5427_v56 = vrot.slane %v5426_v21, 2  ;;  %v2231_v39 = vmax.f32 %v2229_v26, %v2230_v44  ;;  %v10802_v43 = vrot.slane %v9383_v31, 2 }
 0x422   :  { %v2226_v46 = vmax.f32 %v2224_v42, %v2225_v25 }
 0x423   :  { %v5433_v28 = vadd.f32 %v5432_v0, %v5431_v29  ;;  %v2243_v0 = vsel %vm1661_vm2, %v9476_v48, -inf  ;;  %v5428_v47 = vadd.f32 %v5427_v56, %v5426_v21  ;;  %v10803_v56 = vld [vmem:[#allocation20_spill] sm:$0xff] }
 0x424   :  { %6554 = vmatmul.msk.f32.gmra.mxu2 %vm1661_vm2, %v4034_v4  ;;  %v2227_v21 = vrot.slane %v2226_v46, 1 }
 0x425   :  { %v4662_v33 = vpop.f32.mrf.mxu0  ;;  %v5434_v41 = vrot.slane %v5433_v28, 2 }
 0x426   :  { %v4986_v27 = vmul.f32 %v9400_v38, %v4662_v33  ;;  %v9457_v33 = vld [vmem:[%s10706_s4 + $0x10] sm:$0xff] }
 0x427   :  { %10798 = vst [vmem:[#allocation13_spill] sm:$0xff] %v9457_v33  ;;  %v9461_v55 = vadd.f32 %v9457_v33, %v10799_v23  ;;  %v5398_v23 = vadd.f32 %v5397_v50, %v5396_v14  ;;  %v5419_v33 = vadd.f32 %v5418_v7, %v5417_v58  ;;  %v9479_v7 = vmax.f32 %v2217_v63, %v2218_v54 }
 0x428   :  { %v5438_v45 = vsel %vm739_vm1, %v4986_v27, 0.0  ;;  %v6931_v27 = vpop.eup %6930  ;;  %v3445_v50 = vadd.f32 %v3444_v24, %v3443_v2  ;;  %v5414_v63 = vadd.f32 %v5413_v62, %v5412_v51  ;;  %v5435_v51 = vadd.f32 %v5434_v41, %v5433_v28 }
 0x429   :  { %v5439_v17 = vrot.slane %v5438_v45, 4  ;;  %v2236_v53 = vsel %vm1661_vm2, %v9461_v55, -inf  ;;  %v4035_v14 = vmul.f32 %v6931_v27, %v9349_v9  ;;  %v5399_v20 = vrot.slane %v5398_v23, 2  ;;  %v6933_v54 = vpop.eup %6932 }
 0x42a   :  { %v2237_v60 = vrot.slane %v2236_v53, 4  ;;  %v5420_v8 = vrot.slane %v5419_v33, 2  ;;  %v5407_v9 = vadd.f32 %v5406_v5, %v5405_v18  ;;  %v9490_v24 = vpop.eup %6934  ;;  %v2244_v18 = vrot.slane %v2243_v0, 4 }
 0x42b   :  { %v5440_v58 = vadd.f32 %v5439_v17, %v5438_v45  ;;  %v2220_v17 = vrot.slane %v9479_v7, 1  ;;  %v3450_v45 = vadd.f32 %v10802_v43, %v9383_v31  ;;  %v5400_v2 = vadd.f32 %v5399_v20, %v5398_v23  ;;  %v9494_v3 = vpop.eup %6936 }
 0x42c   :  { %6555 = vmatmul.msk.f32.gmra.mxu2 %vm1661_vm2, %v4035_v14  ;;  %v2238_v27 = vmax.f32 %v2236_v53, %v2237_v60  ;;  %v5421_v44 = vadd.f32 %v5420_v8, %v5419_v33  ;;  %6938 = vrcp.f32 %v3445_v50  ;;  %v2232_v14 = vrot.slane %v2231_v39, 2 }
 0x42d   :  { %v5441_v29 = vrot.slane %v5440_v58, 2  ;;  %v5408_v4 = vrot.slane %v5407_v9, 1  ;;  %v4036_v62 = vmul.f32 %v6933_v54, %v9360_v16  ;;  %v5415_v31 = vrot.slane %v5414_v63, 1 }
 0x42e   :  { %v3451_v33 = vrot.slane %v3450_v45, 1  ;;  %v2239_v53 = vrot.slane %v2238_v27, 2  ;;  %v5401_v25 = vrot.slane %v5400_v2, 1  ;;  %v5422_v60 = vrot.slane %v5421_v44, 1 }
 0x42f   :  { %v5442_v42 = vadd.f32 %v5441_v29, %v5440_v58  ;;  %v2245_v8 = vmax.f32 %v2243_v0, %v2244_v18  ;;  %v5429_v28 = vrot.slane %v5428_v47, 1  ;;  %v2233_v50 = vmax.f32 %v2231_v39, %v2232_v14 }
 0x430   :  { %v5409_v16 = vadd.f32 %v5408_v4, %v5407_v9  ;;  %v5436_v41 = vrot.slane %v5435_v51, 1  ;;  %v5416_v29 = vadd.f32 %v5415_v31, %v5414_v63  ;;  %v2240_v0 = vmax.f32 %v2238_v27, %v2239_v53  ;;  %v10805_v53 = vld [vmem:[#allocation21_spill] sm:$0xff] }
 0x431   :  { %v5443_v43 = vrot.slane %v5442_v42, 1  ;;  %v5402_v18 = vadd.f32 %v5401_v25, %v5400_v2  ;;  %v5423_v57 = vadd.f32 %v5422_v60, %v5421_v44  ;;  %v2246_v30 = vrot.slane %v2245_v8, 2 }
 0x432   :  { %v6939_v54 = vpop.eup %6938  ;;  %v5430_v39 = vadd.f32 %v5429_v28, %v5428_v47  ;;  %v5437_v14 = vadd.f32 %v5436_v41, %v5435_v51  ;;  %v2221_v44 = vmax.f32 %v9479_v7, %v2220_v17  ;;  %v9516_v51 = vadd.f32 %v9258_v19, %v10805_v53 }
 0x433   :  { %v6139_v63 = vsel %vm6090_vm4, %v5409_v16, %v5402_v18  ;;  %v5444_v27 = vadd.f32 %v5443_v43, %v5442_v42  ;;  %v2241_v25 = vrot.slane %v2240_v0, 1  ;;  %v2247_v42 = vmax.f32 %v2245_v8, %v2246_v30 }
 0x434   :  { %6556 = vmatmul.msk.f32.gmra.mxu2 %vm1661_vm2, %v4036_v62  ;;  %v10806_v7 = vrot.slane %v9426_v12, 4  ;;  %v10807_v19 = vrot.slane %v9390_v59, 2  ;;  %v3474_v28 = vsel %vm1661_vm2, %v9490_v24, 0.0  ;;  %v2637_v41 = vsub.f32 %v9395_v15, %v2221_v44 }
 0x435   :  { %v4665_v26 = vpop.f32.mrf.mxu2  ;;  %v2248_v43 = vrot.slane %v2247_v42, 1 }
 0x436   :  { %v4987_v5 = vmul.f32 %v9400_v38, %v4665_v26  ;;  %v9499_v38 = vadd.f32 %v9233_v13, %v10803_v56  ;;  %v3452_v26 = vadd.f32 %v3451_v33, %v3450_v45  ;;  %v4037_v45 = vmul.f32 %v6939_v54, %v9381_v10 }
 0x437   :  { %v2234_v33 = vrot.slane %v2233_v50, 1 }
 0x438   :  { %v5445_v23 = vsel %vm739_vm1, %v4987_v5, 0.0  ;;  %v10804_v5 = vrot.slane %v9388_v1, 2  ;;  %v2250_v4 = vsel %vm1661_vm2, %v9499_v38, -inf  ;;  %6940 = vrcp.f32 %v3452_v26 }
 0x439   :  { %v5446_v20 = vrot.slane %v5445_v23, 4  ;;  %v2251_v31 = vrot.slane %v2250_v4, 4 }
 0x43a   :  { %v3457_v22 = vadd.f32 %v10804_v5, %v9388_v1  ;;  %v6140_v1 = vsel %vm6092_vm5, %v5416_v29, %v6139_v63  ;;  %v2242_v29 = vmax.f32 %v2240_v0, %v2241_v25  ;;  %v3475_v5 = vrot.slane %v3474_v28, 4 }
 0x43b   :  { %v5447_v58 = vadd.f32 %v5446_v20, %v5445_v23  ;;  %v6141_v47 = vsel %vm6094_vm6, %v5423_v57, %v6140_v1  ;;  %v3469_v57 = vadd.f32 %v10806_v7, %v9426_v12  ;;  %v2252_v30 = vmax.f32 %v2250_v4, %v2251_v31  ;;  %v10809_v1 = vld [vmem:[#allocation22_spill] sm:$0xff] }
 0x43c   :  { %v6270_v56 = vpop.f32.mrf.mxu3  ;;  %v3458_v2 = vrot.slane %v3457_v22, 1  ;;  %v6142_v10 = vsel %vm6096_vm7, %v5430_v39, %v6141_v47  ;;  %6557 = vmatmul.msk.f32.gmra.mxu2 %vm1661_vm2, %v4037_v45  ;;  %v2257_v12 = vsel %vm1661_vm2, %v9516_v51, -inf  ;;  %v2844_v4 = vmul.f32 1.442695, %v2637_v41 }
 0x43d   :  { %v5448_v13 = vrot.slane %v5447_v58, 2  ;;  %v6271_v9 = vadd.f32 %v9176_v40, %v6270_v56  ;;  %v2228_v40 = vmax.f32 %v2226_v46, %v2227_v21  ;;  %v6143_v20 = vsel %vm6098_vm8, %v5437_v14, %v6142_v10 }
 0x43e   :  { %v3459_v17 = vadd.f32 %v3458_v2, %v3457_v22  ;;  %v6144_v46 = vsel %vm6100_vm9, %v5444_v27, %v6143_v20  ;;  %v3464_v21 = vadd.f32 %v10807_v19, %v9390_v59  ;;  %v6941_v16 = vpop.eup %6940  ;;  %v10808_v22 = vsub.f32 %v9364_v34, %v9465_v49 }
 0x43f   :  { %v5449_v62 = vadd.f32 %v5448_v13, %v5447_v58  ;;  %6310 = vst.msk [vmem:[#allocation5 + $0x20] sm:$0xff] %vm63_vm0, %v6271_v9  ;;  %v2235_v58 = vmax.f32 %v2233_v50, %v2234_v33  ;;  %v2638_v59 = vsub.f32 %v9412_v37, %v2228_v40  ;;  %v3470_v26 = vrot.slane %v3469_v57, 2  ;;  %v9539_v18 = vpop.f32.mrf.mxu2 }
 0x440   :  { %v2842_v54 = vmul.f32 1.442695, %v10808_v22  ;;  %6942 = vrcp.f32 %v3459_v17  ;;  %v3465_v15 = vrot.slane %v3464_v21, 1  ;;  %v2253_v50 = vrot.slane %v2252_v30, 2 }
 0x441   :  { %v5450_v23 = vrot.slane %v5449_v62, 1  ;;  %v2258_v13 = vrot.slane %v2257_v12, 4  ;;  %v4038_v56 = vmul.f32 %v6941_v16, %v9178_v36  ;;  %v2639_v39 = vsub.f32 %v9442_v32, %v2235_v58 }
 0x442   :  { %6944 = vpow2.f32 %v2842_v54  ;;  %v2846_v49 = vmul.f32 1.442695, %v2638_v59  ;;  %v2640_v34 = vsub.f32 %v9461_v55, %v2242_v29  ;;  %v2249_v37 = vmax.f32 %v2247_v42, %v2248_v43 }
 0x443   :  { %v5451_v60 = vadd.f32 %v5450_v23, %v5449_v62  ;;  %v3476_v0 = vadd.f32 %v3475_v5, %v3474_v28  ;;  %v3481_v9 = vsel %vm1661_vm2, %v9494_v3, 0.0  ;;  %v3466_v63 = vadd.f32 %v3465_v15, %v3464_v21  ;;  %v10810_v28 = vld [vmem:[#allocation23_spill] sm:$0xff] }
 0x444   :  { %6558 = vmatmul.msk.f32.gmra.mxu2 %vm1661_vm2, %v4038_v56  ;;  %v3471_v14 = vadd.f32 %v3470_v26, %v3469_v57  ;;  %v2254_v45 = vmax.f32 %v2252_v30, %v2253_v50  ;;  %v2259_v62 = vmax.f32 %v2257_v12, %v2258_v13  ;;  %v9549_v36 = vadd.f32 %v9280_v35, %v10809_v1 }
 0x445   :  { %v6145_v8 = vsel %vm6102_vm10, %v5451_v60, %v6144_v46  ;;  %6946 = vpow2.f32 %v2844_v4  ;;  %v2848_v27 = vmul.f32 1.442695, %v2639_v39  ;;  %v3482_v2 = vrot.slane %v3481_v9, 4 }
 0x446   :  { %6620 = vmatmul.msk.f32.gmra.mxu3 %vm739_vm1, %v6145_v8  ;;  %v6943_v32 = vpop.eup %6942  ;;  %6948 = vpow2.f32 %v2846_v49  ;;  %v2850_v55 = vmul.f32 1.442695, %v2640_v34  ;;  %v2641_v44 = vsub.f32 %v9476_v48, %v2249_v37  ;;  %v3477_v31 = vrot.slane %v3476_v0, 2 }
 0x447   :  { %6950 = vrcp.f32 %v3466_v63  ;;  %v3472_v47 = vrot.slane %v3471_v14, 1  ;;  %v2255_v40 = vrot.slane %v2254_v45, 1  ;;  %v2260_v33 = vrot.slane %v2259_v62, 2 }
 0x448   :  { %v9552_v23 = vpop.eup %6944  ;;  %v2264_v53 = vsel %vm1661_vm2, %v9549_v36, -inf  ;;  %v4039_v35 = vmul.f32 %v6943_v32, %v9356_v52  ;;  %6952 = vpow2.f32 %v2848_v27  ;;  %v3483_v25 = vadd.f32 %v3482_v2, %v3481_v9 }
 0x449   :  { %v9557_v10 = vpop.f32.mrf.mxu2  ;;  %6954 = vpow2.f32 %v2850_v55  ;;  %v2852_v42 = vmul.f32 1.442695, %v2641_v44  ;;  %v3488_v60 = vsel %vm1661_vm2, %v9552_v23, 0.0  ;;  %v2265_v20 = vrot.slane %v2264_v53, 4 }
 0x44a   :  { %v3473_v7 = vadd.f32 %v3472_v47, %v3471_v14  ;;  %v3478_v57 = vadd.f32 %v3477_v31, %v3476_v0  ;;  %v2256_v46 = vmax.f32 %v2254_v45, %v2255_v40  ;;  %v2261_v52 = vmax.f32 %v2259_v62, %v2260_v33  ;;  %v10811_v40 = vld [vmem:[#allocation24_spill] sm:$0xff]  ;;  %v10812_v33 = vld [vmem:[#allocation11_spill] sm:$0xff] }
 0x44b   :  { %v9560_v48 = vpop.eup %6946  ;;  %v3489_v21 = vrot.slane %v3488_v60, 4  ;;  %6956 = vpow2.f32 %v2852_v42  ;;  %v9568_v30 = vadd.f32 %v9310_v6, %v10810_v28  ;;  %v3484_v16 = vrot.slane %v3483_v25, 2 }
 0x44c   :  { %6559 = vmatmul.msk.f32.gmra.mxu2 %vm1661_vm2, %v4039_v35  ;;  %v9564_v17 = vpop.eup %6948  ;;  %v2266_v41 = vmax.f32 %v2264_v53, %v2265_v20  ;;  %6958 = vrcp.f32 %v3473_v7  ;;  %v3479_v58 = vrot.slane %v3478_v57, 1  ;;  %v2642_v22 = vsub.f32 %v9499_v38, %v2256_v46  ;;  %v10813_v46 = vld [vmem:[#allocation25_spill] sm:$0xff] }
 0x44d   :  { %v6951_v19 = vpop.eup %6950  ;;  %v2262_v54 = vrot.slane %v2261_v52, 1  ;;  %v3495_v29 = vsel %vm1661_vm2, %v9560_v48, 0.0  ;;  %v3490_v43 = vadd.f32 %v3489_v21, %v3488_v60  ;;  %v3502_v6 = vsel %vm1661_vm2, %v9564_v17, 0.0 }
 0x44e   :  { %v9570_v8 = vpop.eup %6952  ;;  %v4040_v59 = vmul.f32 %v6951_v19, %v9367_v61  ;;  %v2271_v5 = vsel %vm1661_vm2, %v9568_v30, -inf  ;;  %v2267_v15 = vrot.slane %v2266_v41, 2  ;;  %v3480_v50 = vadd.f32 %v3479_v58, %v3478_v57 }
 0x44f   :  { %v9572_v12 = vpop.eup %6954  ;;  %v3509_v26 = vsel %vm1661_vm2, %v9570_v8, 0.0  ;;  %v3485_v13 = vadd.f32 %v3484_v16, %v3483_v25  ;;  %v3496_v4 = vrot.slane %v3495_v29, 4  ;;  %v2854_v39 = vmul.f32 1.442695, %v2642_v22 }
 0x450   :  { %v3516_v38 = vsel %vm1661_vm2, %v9572_v12, 0.0  ;;  %v2263_v49 = vmax.f32 %v2261_v52, %v2262_v54  ;;  %v2272_v37 = vrot.slane %v2271_v5, 4  ;;  %v3491_v0 = vrot.slane %v3490_v43, 2 }
 0x451   :  { %v9589_v56 = vpop.eup %6956  ;;  %v3503_v9 = vrot.slane %v3502_v6, 4  ;;  %v3510_v63 = vrot.slane %v3509_v26, 4  ;;  %v3517_v14 = vrot.slane %v3516_v38, 4  ;;  %v2268_v62 = vmax.f32 %v2266_v41, %v2267_v15 }
 0x452   :  { %v9587_v61 = vpop.f32.mrf.mxu2  ;;  %v6959_v34 = vpop.eup %6958  ;;  %v3523_v45 = vsel %vm1661_vm2, %v9589_v56, 0.0  ;;  %6960 = vrcp.f32 %v3480_v50  ;;  %v3486_v1 = vrot.slane %v3485_v13, 1  ;;  %v3497_v32 = vadd.f32 %v3496_v4, %v3495_v29 }
 0x453   :  { %6962 = vpow2.f32 %v2854_v39  ;;  %v2643_v27 = vsub.f32 %v9516_v51, %v2263_v49  ;;  %v4041_v2 = vmul.f32 %v6959_v34, %v9397_v11  ;;  %v2273_v55 = vmax.f32 %v2271_v5, %v2272_v37  ;;  %v10814_v11 = vld [vmem:[#allocation12_spill] sm:$0xff] }
 0x454   :  { %6560 = vmatmul.msk.f32.gmra.mxu2 %vm1661_vm2, %v4040_v59  ;;  %v3504_v44 = vadd.f32 %v3503_v9, %v3502_v6  ;;  %v3511_v31 = vadd.f32 %v3510_v63, %v3509_v26  ;;  %v3524_v47 = vrot.slane %v3523_v45, 4  ;;  %v9597_v53 = vadd.f32 %v10812_v33, %v10811_v40  ;;  %v9636_v33 = vpop.permute.xlu2 %4898 }
 0x455   :  { %v3518_v35 = vadd.f32 %v3517_v14, %v3516_v38  ;;  %v2269_v25 = vrot.slane %v2268_v62, 1  ;;  %v3487_v42 = vadd.f32 %v3486_v1, %v3485_v13  ;;  %v3492_v60 = vadd.f32 %v3491_v0, %v3490_v43 }
 0x456   :  { %v3498_v20 = vrot.slane %v3497_v32, 2  ;;  %v2856_v7 = vmul.f32 1.442695, %v2643_v27  ;;  %v2274_v51 = vrot.slane %v2273_v55, 2  ;;  %v9602_v52 = vadd.f32 %v10814_v11, %v10813_v46  ;;  %v10815_v27 = vld [vmem:[#allocation26_spill] sm:$0xff] }
 0x457   :  { %v3505_v28 = vrot.slane %v3504_v44, 2  ;;  %v3512_v16 = vrot.slane %v3511_v31, 2  ;;  %v3525_v41 = vadd.f32 %v3524_v47, %v3523_v45  ;;  %v2278_v58 = vsel %vm1661_vm2, %v9597_v53, -inf  ;;  %v10818_v47 = vld [vmem:[#allocation14_spill] sm:$0xff] }
 0x458   :  { %v6961_v57 = vpop.eup %6960  ;;  %v3519_v22 = vrot.slane %v3518_v35, 2  ;;  %v2270_v54 = vmax.f32 %v2268_v62, %v2269_v25  ;;  %6964 = vrcp.f32 %v3487_v42  ;;  %v3493_v59 = vrot.slane %v3492_v60, 1 }
 0x459   :  { %v9604_v21 = vpop.eup %6962  ;;  %v3499_v29 = vadd.f32 %v3498_v20, %v3497_v32  ;;  %6966 = vpow2.f32 %v2856_v7  ;;  %v4042_v43 = vmul.f32 %v6961_v57, %v9490_v24  ;;  %v2275_v26 = vmax.f32 %v2273_v55, %v2274_v51 }
 0x45a   :  { %v3530_v6 = vsel %vm1661_vm2, %v9604_v21, 0.0  ;;  %v2279_v5 = vrot.slane %v2278_v58, 4  ;;  %v2285_v38 = vsel %vm1661_vm2, %v9602_v52, -inf  ;;  %v9613_v15 = vadd.f32 %v3505_v28, %v3504_v44 }
 0x45b   :  { %v9615_v50 = vadd.f32 %v3512_v16, %v3511_v31  ;;  %v3526_v13 = vrot.slane %v3525_v41, 2  ;;  %v9618_v4 = vadd.f32 %v3519_v22, %v3518_v35  ;;  %v2644_v39 = vsub.f32 %v9549_v36, %v2270_v54  ;;  %v10817_v31 = vld [vmem:[#allocation27_spill] sm:$0xff] }
 0x45c   :  { %6561 = vmatmul.msk.f32.gmra.mxu2 %vm1661_vm2, %v4041_v2  ;;  %v3494_v24 = vadd.f32 %v3493_v59, %v3492_v60  ;;  %v3531_v49 = vrot.slane %v3530_v6, 4  ;;  %v2286_v34 = vrot.slane %v2285_v38, 4  ;;  %v3500_v0 = vrot.slane %v3499_v29, 1  ;;  %v10816_v2 = vld [vmem:[#allocation13_spill] sm:$0xff] }
 0x45d   :  { %v2276_v9 = vrot.slane %v2275_v26, 1  ;;  %v2280_v63 = vmax.f32 %v2278_v58, %v2279_v5  ;;  %v3507_v62 = vrot.slane %v9613_v15, 1  ;;  %v3514_v1 = vrot.slane %v9615_v50, 1 }
 0x45e   :  { %v6965_v37 = vpop.eup %6964  ;;  %v9625_v32 = vadd.f32 %v3526_v13, %v3525_v41  ;;  %v9629_v55 = vadd.f32 %v10816_v2, %v10815_v27  ;;  %v3521_v36 = vrot.slane %v9618_v4, 1  ;;  %v2858_v44 = vmul.f32 1.442695, %v2644_v39  ;;  %v9664_v39 = vld [vmem:[%s10706_s4 + $0x20] sm:$0xff] }
 0x45f   :  { %v4677_v19 = vpop.f32.mrf.mxu2  ;;  %v9621_v45 = vpop.eup %6966  ;;  %v9634_v40 = vadd.f32 %v10818_v47, %v10817_v31  ;;  %6968 = vrcp.f32 %v3494_v24  ;;  %v3532_v35 = vadd.f32 %v3531_v49, %v3530_v6  ;;  %v2287_v25 = vmax.f32 %v2285_v38, %v2286_v34  ;;  %v10819_v24 = vld [vmem:[#allocation28_spill] sm:$0xff] }
 0x460   :  { %v4989_v42 = vmul.f32 %v9636_v33, %v9557_v10  ;;  %v4043_v60 = vmul.f32 %v6965_v37, %v9494_v3  ;;  %v3537_v20 = vsel %vm1661_vm2, %v9621_v45, 0.0  ;;  %v2277_v7 = vmax.f32 %v2275_v26, %v2276_v9 }
 0x461   :  { %v2281_v57 = vrot.slane %v2280_v63, 2  ;;  %v4990_v51 = vmul.f32 %v9636_v33, %v9587_v61  ;;  %v3528_v46 = vrot.slane %v9625_v32, 1  ;;  %v2292_v11 = vsel %vm1661_vm2, %v9629_v55, -inf }
 0x462   :  { %v4988_v28 = vmul.f32 %v9636_v33, %v9539_v18  ;;  %v4991_v10 = vmul.f32 %v9636_v33, %v4677_v19  ;;  %6970 = vpow2.f32 %v2858_v44  ;;  %v2299_v3 = vsel %vm1661_vm2, %v9634_v40, -inf }
 0x463   :  { %v3501_v41 = vadd.f32 %v3500_v0, %v3499_v29  ;;  %v3533_v61 = vrot.slane %v3532_v35, 2  ;;  %v3538_v58 = vrot.slane %v3537_v20, 4  ;;  %v2288_v22 = vrot.slane %v2287_v25, 2 }
 0x464   :  { %6562 = vmatmul.msk.f32.gmra.mxu2 %vm1661_vm2, %v4042_v43  ;;  %v5459_v54 = vsel %vm739_vm1, %v4989_v42, 0.0  ;;  %v2645_v43 = vsub.f32 %v9568_v30, %v2277_v7  ;;  %v2282_v18 = vmax.f32 %v2280_v63, %v2281_v57  ;;  %v2293_v6 = vrot.slane %v2292_v11, 4 }
 0x465   :  { %v6969_v59 = vpop.eup %6968  ;;  %v5466_v19 = vsel %vm739_vm1, %v4990_v51, 0.0  ;;  %v2300_v5 = vrot.slane %v2299_v3, 4  ;;  %v5452_v38 = vsel %vm739_vm1, %v4988_v28, 0.0  ;;  %v5473_v13 = vsel %vm739_vm1, %v4991_v10, 0.0 }
 0x466   :  { %v9668_v30 = vadd.f32 %v9664_v39, %v10819_v24  ;;  %v5460_v49 = vrot.slane %v5459_v54, 4  ;;  %6972 = vrcp.f32 %v3501_v41  ;;  %v2289_v37 = vmax.f32 %v2287_v25, %v2288_v22 }
 0x467   :  { %v4680_v14 = vpop.f32.mrf.mxu2  ;;  %v5467_v0 = vrot.slane %v5466_v19, 4  ;;  %v4044_v63 = vmul.f32 %v6969_v59, %v9552_v23  ;;  %v2860_v27 = vmul.f32 1.442695, %v2645_v43  ;;  %v2294_v2 = vmax.f32 %v2292_v11, %v2293_v6 }
 0x468   :  { %v4992_v16 = vmul.f32 %v9636_v33, %v4680_v14  ;;  %v9673_v14 = vpop.eup %6970  ;;  %v5453_v44 = vrot.slane %v5452_v38, 4  ;;  %v5474_v31 = vrot.slane %v5473_v13, 4  ;;  %v9675_v47 = vadd.f32 %v3533_v61, %v3532_v35 }
 0x469   :  { %v2283_v42 = vrot.slane %v2282_v18, 1  ;;  %v2306_v25 = vsel %vm1661_vm2, %v9668_v30, -inf  ;;  %v5461_v57 = vadd.f32 %v5460_v49, %v5459_v54  ;;  %v3508_v23 = vadd.f32 %v3507_v62, %v9613_v15 }
 0x46a   :  { %v5480_v34 = vsel %vm739_vm1, %v4992_v16, 0.0  ;;  %v9681_v28 = vadd.f32 %v3538_v58, %v3537_v20  ;;  %v9685_v11 = vsel %vm1661_vm2, %v9673_v14, 0.0  ;;  %v2290_v35 = vrot.slane %v2289_v37, 1 }
 0x46b   :  { %v5481_v7 = vrot.slane %v5480_v34, 4  ;;  %v5468_v10 = vadd.f32 %v5467_v0, %v5466_v19  ;;  %6974 = vpow2.f32 %v2860_v27  ;;  %v5454_v41 = vadd.f32 %v5453_v44, %v5452_v38 }
 0x46c   :  { %6563 = vmatmul.msk.f32.gmra.mxu2 %vm1661_vm2, %v4043_v60  ;;  %v2301_v60 = vmax.f32 %v2299_v3, %v2300_v5  ;;  %v6973_v16 = vpop.eup %6972  ;;  %v2295_v3 = vrot.slane %v2294_v2, 2  ;;  %v5475_v61 = vadd.f32 %v5474_v31, %v5473_v13  ;;  %v2307_v43 = vrot.slane %v2306_v25, 4 }
 0x46d   :  { %v5482_v54 = vadd.f32 %v5481_v7, %v5480_v34  ;;  %v2284_v15 = vmax.f32 %v2282_v18, %v2283_v42  ;;  %v5462_v62 = vrot.slane %v5461_v57, 2  ;;  %6976 = vrcp.f32 %v3508_v23  ;;  %v9693_v34 = vld [vmem:[%s10706_s4 + $0x28] sm:$0xff] }
 0x46e   :  { %v2302_v59 = vrot.slane %v2301_v60, 2  ;;  %v2291_v58 = vmax.f32 %v2289_v37, %v2290_v35  ;;  %v4045_v19 = vmul.f32 %v6973_v16, %v9560_v48  ;;  %v5455_v24 = vrot.slane %v5454_v41, 2  ;;  %v10820_v18 = vld [vmem:[#allocation29_spill] sm:$0xff] }
 0x46f   :  { %v4683_v26 = vpop.f32.mrf.mxu2  ;;  %v5476_v38 = vrot.slane %v5475_v61, 2  ;;  %v2308_v0 = vmax.f32 %v2306_v25, %v2307_v43  ;;  %v5483_v37 = vrot.slane %v5482_v54, 2  ;;  %v5463_v48 = vadd.f32 %v5462_v62, %v5461_v57  ;;  %v9710_v25 = vld [vmem:[%s10705_s3] ss:$0 sm:$0xff] }
 0x470   :  { %v4993_v29 = vmul.f32 %v9636_v33, %v4683_v26  ;;  %v5469_v26 = vrot.slane %v5468_v10, 2  ;;  %v2303_v49 = vmax.f32 %v2301_v60, %v2302_v59  ;;  %v3515_v44 = vadd.f32 %v3514_v1, %v9615_v50 }
 0x471   :  { %v2646_v42 = vsub.f32 %v9597_v53, %v2284_v15  ;;  %v2647_v60 = vsub.f32 %v9602_v52, %v2291_v58  ;;  %v5456_v35 = vadd.f32 %v5455_v24, %v5454_v41  ;;  %v5477_v16 = vadd.f32 %v5476_v38, %v5475_v61 }
 0x472   :  { %v5487_v9 = vsel %vm739_vm1, %v4993_v29, 0.0  ;;  %v2296_v29 = vmax.f32 %v2294_v2, %v2295_v3  ;;  %v5470_v7 = vadd.f32 %v5469_v26, %v5468_v10  ;;  %v2304_v50 = vrot.slane %v2303_v49, 1 }
 0x473   :  { %v5488_v51 = vrot.slane %v5487_v9, 4  ;;  %v2309_v1 = vrot.slane %v2308_v0, 2  ;;  %v5484_v59 = vadd.f32 %v5483_v37, %v5482_v54  ;;  %v5464_v10 = vrot.slane %v5463_v48, 1 }
 0x474   :  { %6564 = vmatmul.msk.f32.gmra.mxu2 %vm1661_vm2, %v4044_v63  ;;  %v9700_v63 = vpop.eup %6974  ;;  %v2297_v23 = vrot.slane %v2296_v29, 1  ;;  %6978 = vrcp.f32 %v3515_v44  ;;  %v5457_v58 = vrot.slane %v5456_v35, 1  ;;  %v5478_v26 = vrot.slane %v5477_v16, 1 }
 0x475   :  { %v5489_v20 = vadd.f32 %v5488_v51, %v5487_v9  ;;  %v9697_v9 = vadd.f32 %v9693_v34, %v10820_v18  ;;  %v6977_v57 = vpop.eup %6976  ;;  %v5485_v24 = vrot.slane %v5484_v59, 1  ;;  %v5465_v38 = vadd.f32 %v5464_v10, %v5463_v48 }
 0x476   :  { %v4046_v61 = vmul.f32 %v6977_v57, %v9564_v17  ;;  %v2298_v62 = vmax.f32 %v2296_v29, %v2297_v23  ;;  %v3522_v18 = vadd.f32 %v3521_v36, %v9618_v4  ;;  %v2862_v37 = vmul.f32 1.442695, %v2646_v42 }
 0x477   :  { %v4686_v22 = vpop.f32.mrf.mxu2  ;;  %v5490_v27 = vrot.slane %v5489_v20, 2  ;;  %v2313_v52 = vsel %vm1661_vm2, %v9697_v9, -inf }
 0x478   :  { %v4994_v6 = vmul.f32 %v9636_v33, %v4686_v22  ;;  %v2648_v44 = vsub.f32 %v9629_v55, %v2298_v62  ;;  %6980 = vrcp.f32 %v3522_v18 }
 0x479   :  { %v5491_v43 = vadd.f32 %v5490_v27, %v5489_v20  ;;  %v2864_v27 = vmul.f32 1.442695, %v2647_v60  ;;  %6982 = vpow2.f32 %v2862_v37 }
 0x47a   :  { %v5494_v5 = vsel %vm739_vm1, %v4994_v6, 0.0  ;;  %v5471_v6 = vrot.slane %v5470_v7, 1 }
 0x47b   :  { %v5495_v13 = vrot.slane %v5494_v5, 4  ;;  %6984 = vpow2.f32 %v2864_v27  ;;  %v3551_v27 = vsel %vm1661_vm2, %v9700_v63, 0.0 }
 0x47c   :  { %6565 = vmatmul.msk.f32.gmra.mxu2 %vm1661_vm2, %v4045_v19  ;;  %v2314_v19 = vrot.slane %v2313_v52, 4  ;;  %v5472_v17 = vadd.f32 %v5471_v6, %v5470_v7  ;;  %v2866_v7 = vmul.f32 1.442695, %v2648_v44  ;;  %v3529_v6 = vadd.f32 %v3528_v46, %v9625_v32  ;;  %v9760_v46 = vld [vmem:[%s10706_s4 + $0x38] sm:$0xff] }
 0x47d   :  { %v5496_v2 = vadd.f32 %v5495_v13, %v5494_v5  ;;  %v2305_v5 = vmax.f32 %v2303_v49, %v2304_v50  ;;  %v5492_v13 = vrot.slane %v5491_v43, 1  ;;  %v5458_v49 = vadd.f32 %v5457_v58, %v5456_v35  ;;  %v9733_v35 = vld [vmem:[%s10706_s4 + $0x30] sm:$0xff] }
 0x47e   :  { %v6273_v31 = vpop.f32.mrf.mxu3  ;;  %v2315_v23 = vmax.f32 %v2313_v52, %v2314_v19  ;;  %6986 = vpow2.f32 %v2866_v7 }
 0x47f   :  { %v6274_v51 = vadd.f32 %v9710_v25, %v6273_v31  ;;  %v5497_v3 = vrot.slane %v5496_v2, 2  ;;  %v4689_v22 = vpop.f32.mrf.mxu2  ;;  %v2649_v48 = vsub.f32 %v9634_v40, %v2305_v5  ;;  %v5493_v4 = vadd.f32 %v5492_v13, %v5491_v43  ;;  %v10821_v40 = vld [vmem:[#allocation30_spill] sm:$0xff] }
 0x480   :  { %v4995_v53 = vmul.f32 %v9636_v33, %v4689_v22  ;;  %v2310_v33 = vmax.f32 %v2308_v0, %v2309_v1  ;;  %v5479_v0 = vadd.f32 %v5478_v26, %v5477_v16  ;;  %v6146_v22 = vsel %vm6090_vm4, %v5465_v38, %v5458_v49 }
 0x481   :  { %6311 = vst.msk [vmem:[#allocation5 + $0x28] sm:$0xff] %vm63_vm0, %v6274_v51  ;;  %v5498_v15 = vadd.f32 %v5497_v3, %v5496_v2  ;;  %v6979_v2 = vpop.eup %6978  ;;  %v5486_v3 = vadd.f32 %v5485_v24, %v5484_v59  ;;  %v6147_v42 = vsel %vm6092_vm5, %v5472_v17, %v6146_v22  ;;  %v9737_v16 = vadd.f32 %v9733_v35, %v10821_v40 }
 0x482   :  { %v5501_v41 = vsel %vm739_vm1, %v4995_v53, 0.0  ;;  %v2311_v57 = vrot.slane %v2310_v33, 1  ;;  %v4047_v55 = vmul.f32 %v6979_v2, %v9570_v8  ;;  %v6148_v1 = vsel %vm6094_vm6, %v5479_v0, %v6147_v42 }
 0x483   :  { %v5502_v54 = vrot.slane %v5501_v41, 4  ;;  %v5499_v29 = vrot.slane %v5498_v15, 1  ;;  %v2868_v59 = vmul.f32 1.442695, %v2649_v48  ;;  %v6149_v8 = vsel %vm6096_vm7, %v5486_v3, %v6148_v1 }
 0x484   :  { %6566 = vmatmul.msk.f32.gmra.mxu2 %vm1661_vm2, %v4046_v61  ;;  %v2312_v53 = vmax.f32 %v2310_v33, %v2311_v57  ;;  %v2316_v52 = vrot.slane %v2315_v23, 2  ;;  %v6150_v43 = vsel %vm6098_vm8, %v5493_v4, %v6149_v8  ;;  %v3545_v61 = vrot.slane %v9685_v11, 4  ;;  %v10822_v33 = vld [vmem:[#allocation31_spill] sm:$0xff] }
 0x485   :  { %v5503_v20 = vadd.f32 %v5502_v54, %v5501_v41  ;;  %v5500_v60 = vadd.f32 %v5499_v29, %v5498_v15  ;;  %v6981_v41 = vpop.eup %6980  ;;  %v2320_v62 = vsel %vm1661_vm2, %v9737_v16, -inf  ;;  %v3540_v5 = vrot.slane %v9681_v28, 2 }
 0x486   :  { %v9753_v54 = vpop.eup %6982  ;;  %6988 = vpow2.f32 %v2868_v59  ;;  %v2650_v32 = vsub.f32 %v9668_v30, %v2312_v53  ;;  %v9764_v19 = vadd.f32 %v9760_v46, %v10822_v33  ;;  %v3535_v24 = vrot.slane %v9675_v47, 1 }
 0x487   :  { %v5504_v31 = vrot.slane %v5503_v20, 2  ;;  %v9724_v51 = vpop.f32.mrf.mxu2  ;;  %v6151_v15 = vsel %vm6100_vm9, %v5500_v60, %v6150_v43  ;;  %v2317_v38 = vmax.f32 %v2315_v23, %v2316_v52  ;;  %6990 = vrcp.f32 %v3529_v6  ;;  %v9768_v13 = vpop.eup %6984 }
 0x488   :  { %v4048_v30 = vmul.f32 %v6981_v41, %v9572_v12  ;;  %v3546_v18 = vadd.f32 %v3545_v61, %v9685_v11  ;;  %v3541_v37 = vadd.f32 %v3540_v5, %v9681_v28  ;;  %v2870_v17 = vmul.f32 1.442695, %v2650_v32  ;;  %v9778_v2 = vpop.eup %6986 }
 0x489   :  { %v5505_v36 = vadd.f32 %v5504_v31, %v5503_v20  ;;  %v2321_v20 = vrot.slane %v2320_v62, 4  ;;  %v2327_v29 = vsel %vm1661_vm2, %v9764_v19, -inf  ;;  %v3558_v44 = vsel %vm1661_vm2, %v9753_v54, 0.0 }
 0x48a   :  { %v3565_v12 = vsel %vm1661_vm2, %v9768_v13, 0.0  ;;  %v2318_v11 = vrot.slane %v2317_v38, 1  ;;  %v3536_v28 = vadd.f32 %v3535_v24, %v9675_v47  ;;  %v3547_v48 = vrot.slane %v3546_v18, 2  ;;  %v9794_v47 = vld [vmem:[%s10706_s4] sm:$0xff]  ;;  %v9812_v24 = vld [vmem:[%s10706_s4 + $0x8] sm:$0xff] }
 0x48b   :  { %v5506_v50 = vrot.slane %v5505_v36, 1  ;;  %v2322_v0 = vmax.f32 %v2320_v62, %v2321_v20  ;;  %v3552_v57 = vrot.slane %v3551_v27, 4  ;;  %v2328_v23 = vrot.slane %v2327_v29, 4 }
 0x48c   :  { %6567 = vmatmul.msk.f32.gmra.mxu2 %vm1661_vm2, %v4047_v55  ;;  %v9785_v49 = vpop.eup %6988  ;;  %v3559_v22 = vrot.slane %v3558_v44, 4  ;;  %v3566_v4 = vrot.slane %v3565_v12, 4  ;;  %6992 = vpow2.f32 %v2870_v17  ;;  %v3542_v42 = vrot.slane %v3541_v37, 1  ;;  %v10823_v55 = vld [vmem:[#allocation32_spill] sm:$0xff] }
 0x48d   :  { %v5507_v10 = vadd.f32 %v5506_v50, %v5505_v36  ;;  %v6991_v31 = vpop.eup %6990  ;;  %v3572_v36 = vsel %vm1661_vm2, %v9778_v2, 0.0  ;;  %v2319_v60 = vmax.f32 %v2317_v38, %v2318_v11  ;;  %v9798_v7 = vadd.f32 %v9794_v47, %v10823_v55  ;;  %v10824_v38 = vld [vmem:[#allocation33_spill] sm:$0xff] }
 0x48e   :  { %6994 = vrcp.f32 %v3536_v28  ;;  %v3579_v40 = vsel %vm1661_vm2, %v9785_v49, 0.0  ;;  %v2323_v50 = vrot.slane %v2322_v0, 2  ;;  %v4049_v1 = vmul.f32 %v6991_v31, %v9589_v56 }
 0x48f   :  { %v9750_v58 = vpop.f32.mrf.mxu2  ;;  %v6152_v26 = vsel %vm6102_vm10, %v5507_v10, %v6151_v15  ;;  %v3553_v59 = vadd.f32 %v3552_v57, %v3551_v27  ;;  %v3573_v53 = vrot.slane %v3572_v36, 4  ;;  %v2329_v8 = vmax.f32 %v2327_v29, %v2328_v23 }
 0x490   :  { %6621 = vmatmul.msk.f32.gmra.mxu3 %vm739_vm1, %v6152_v26  ;;  %v3548_v52 = vadd.f32 %v3547_v48, %v3546_v18  ;;  %v3560_v10 = vadd.f32 %v3559_v22, %v3558_v44  ;;  %v3567_v43 = vadd.f32 %v3566_v4, %v3565_v12  ;;  %v3580_v6 = vrot.slane %v3579_v40, 4  ;;  %v9830_v4 = vld [vmem:[%s10706_s4 + $0x10] sm:$0xff] }
 0x491   :  { %v2651_v15 = vsub.f32 %v9697_v9, %v2319_v60  ;;  %v2334_v41 = vsel %vm1661_vm2, %v9798_v7, -inf  ;;  %v3543_v61 = vadd.f32 %v3542_v42, %v3541_v37  ;;  %v2324_v26 = vmax.f32 %v2322_v0, %v2323_v50 }
 0x492   :  { %v9807_v62 = vpop.eup %6992  ;;  %v3554_v56 = vrot.slane %v3553_v59, 2  ;;  %v3574_v32 = vadd.f32 %v3573_v53, %v3572_v36  ;;  %v2330_v33 = vrot.slane %v2329_v8, 2  ;;  %v9816_v20 = vadd.f32 %v9812_v24, %v10824_v38  ;;  %v10825_v36 = vld [vmem:[#allocation34_spill] sm:$0xff] }
 0x493   :  { %v3568_v18 = vrot.slane %v3567_v43, 2  ;;  %v2335_v37 = vrot.slane %v2334_v41, 4  ;;  %v3549_v27 = vrot.slane %v3548_v52, 1  ;;  %v3581_v17 = vadd.f32 %v3580_v6, %v3579_v40 }
 0x494   :  { %6568 = vmatmul.msk.f32.gmra.mxu2 %vm1661_vm2, %v4048_v30  ;;  %v6995_v5 = vpop.eup %6994  ;;  %v3561_v30 = vrot.slane %v3560_v10, 2  ;;  %v2872_v29 = vmul.f32 1.442695, %v2651_v15  ;;  %6996 = vrcp.f32 %v3543_v61  ;;  %v3586_v44 = vsel %vm1661_vm2, %v9807_v62, 0.0 }
 0x495   :  { %v2325_v12 = vrot.slane %v2324_v26, 1  ;;  %v4050_v11 = vmul.f32 %v6995_v5, %v9604_v21  ;;  %v3555_v28 = vadd.f32 %v3554_v56, %v3553_v59  ;;  %v3575_v0 = vrot.slane %v3574_v32, 2 }
 0x496   :  { %v2331_v31 = vmax.f32 %v2329_v8, %v2330_v33  ;;  %v2341_v48 = vsel %vm1661_vm2, %v9816_v20, -inf  ;;  %v9823_v57 = vadd.f32 %v3561_v30, %v3560_v10  ;;  %v9825_v23 = vadd.f32 %v3568_v18, %v3567_v43 }
 0x497   :  { %v9787_v3 = vpop.f32.mrf.mxu2  ;;  %v2336_v22 = vmax.f32 %v2334_v41, %v2335_v37  ;;  %v9834_v42 = vadd.f32 %v9830_v4, %v10825_v36  ;;  %v3582_v21 = vrot.slane %v3581_v17, 2  ;;  %v3587_v60 = vrot.slane %v3586_v44, 4  ;;  %v9845_v41 = vld [vmem:[%s10706_s4 + $0x18] sm:$0xff] }
 0x498   :  { %6998 = vpow2.f32 %v2872_v29  ;;  %v3550_v55 = vadd.f32 %v3549_v27, %v3548_v52  ;;  %v2326_v40 = vmax.f32 %v2324_v26, %v2325_v12  ;;  %v2342_v50 = vrot.slane %v2341_v48, 4  ;;  %v10826_v52 = vld [vmem:[#allocation36_spill] sm:$0xff] }
 0x499   :  { %v3556_v59 = vrot.slane %v3555_v28, 1  ;;  %v9837_v53 = vadd.f32 %v3575_v0, %v3574_v32  ;;  %v2332_v8 = vrot.slane %v2331_v31, 1  ;;  %v3563_v43 = vrot.slane %v9823_v57, 1  ;;  %v9854_v32 = vpop.permute.xlu0 %4900 }
 0x49a   :  { %v2337_v6 = vrot.slane %v2336_v22, 2  ;;  %v2348_v15 = vsel %vm1661_vm2, %v9834_v42, -inf  ;;  %v9849_v61 = vadd.f32 %v9845_v41, %v10826_v52  ;;  %v3570_v26 = vrot.slane %v9825_v23, 1 }
 0x49b   :  { %v9852_v5 = vadd.f32 %v3582_v21, %v3581_v17  ;;  %v3588_v56 = vadd.f32 %v3587_v60, %v3586_v44  ;;  %7000 = vrcp.f32 %v3550_v55  ;;  %v2652_v33 = vsub.f32 %v9737_v16, %v2326_v40 }
 0x49c   :  { %6569 = vmatmul.msk.f32.gmra.mxu2 %vm1661_vm2, %v4049_v1  ;;  %v6997_v1 = vpop.eup %6996  ;;  %v2343_v38 = vmax.f32 %v2341_v48, %v2342_v50  ;;  %v4997_v30 = vmul.f32 %v9854_v32, %v9750_v58  ;;  %v2333_v29 = vmax.f32 %v2331_v31, %v2332_v8  ;;  %v2349_v12 = vrot.slane %v2348_v15, 4 }
 0x49d   :  { %v4051_v18 = vmul.f32 %v6997_v1, %v9621_v45  ;;  %v4998_v17 = vmul.f32 %v9854_v32, %v9787_v3  ;;  %v2338_v44 = vmax.f32 %v2336_v22, %v2337_v6  ;;  %v4996_v16 = vmul.f32 %v9854_v32, %v9724_v51 }
 0x49e   :  { %v9860_v37 = vpop.eup %6998  ;;  %v3589_v0 = vrot.slane %v3588_v56, 2  ;;  %v3557_v48 = vadd.f32 %v3556_v59, %v3555_v28  ;;  %v2874_v22 = vmul.f32 1.442695, %v2652_v33  ;;  %v2344_v36 = vrot.slane %v2343_v38, 2 }
 0x49f   :  { %v4701_v9 = vpop.f32.mrf.mxu2  ;;  %v9875_v3 = vsel %vm1661_vm2, %v9860_v37, 0.0  ;;  %v5515_v21 = vsel %vm739_vm1, %v4997_v30, 0.0  ;;  %v2653_v51 = vsub.f32 %v9764_v19, %v2333_v29  ;;  %v5522_v40 = vsel %vm739_vm1, %v4998_v17, 0.0 }
 0x4a0   :  { %v4999_v58 = vmul.f32 %v9854_v32, %v4701_v9  ;;  %v2350_v9 = vmax.f32 %v2348_v15, %v2349_v12  ;;  %v2339_v1 = vrot.slane %v2338_v44, 1  ;;  %v5508_v8 = vsel %vm739_vm1, %v4996_v16, 0.0 }
 0x4a1   :  { %v7001_v60 = vpop.eup %7000  ;;  %v5516_v52 = vrot.slane %v5515_v21, 4  ;;  %7002 = vrcp.f32 %v3557_v48  ;;  %v2345_v19 = vmax.f32 %v2343_v38, %v2344_v36  ;;  %v5523_v15 = vrot.slane %v5522_v40, 4 }
 0x4a2   :  { %v5529_v28 = vsel %vm739_vm1, %v4999_v58, 0.0  ;;  %v2351_v29 = vrot.slane %v2350_v9, 2  ;;  %v5509_v17 = vrot.slane %v5508_v8, 4  ;;  %v9890_v58 = vadd.f32 %v3589_v0, %v3588_v56 }
 0x4a3   :  { %v5530_v16 = vrot.slane %v5529_v28, 4  ;;  %v3564_v36 = vadd.f32 %v3563_v43, %v9823_v57  ;;  %7004 = vpow2.f32 %v2874_v22 }
 0x4a4   :  { %6570 = vmatmul.msk.f32.gmra.mxu2 %vm1661_vm2, %v4050_v11  ;;  %v2355_v11 = vsel %vm1661_vm2, %v9849_v61, -inf  ;;  %v2352_v56 = vmax.f32 %v2350_v9, %v2351_v29 }
 0x4a5   :  { %v2356_v55 = vrot.slane %v2355_v11, 4  ;;  %v5531_v45 = vadd.f32 %v5530_v16, %v5529_v28  ;;  %7006 = vrcp.f32 %v3564_v36 }
 0x4a7   :  { %v4704_v10 = vpop.f32.mrf.mxu2  ;;  %v2357_v12 = vmax.f32 %v2355_v11, %v2356_v55  ;;  %v2346_v11 = vrot.slane %v2345_v19, 1  ;;  %v7003_v55 = vpop.eup %7002 }
 0x4a8   :  { %v5000_v31 = vmul.f32 %v9854_v32, %v4704_v10  ;;  %v10827_v10 = vld [vmem:[#allocation37_spill] sm:$0xff] }
 0x4a9   :  { %v9885_v6 = vadd.f32 %v9664_v39, %v10827_v10  ;;  %v2340_v39 = vmax.f32 %v2338_v44, %v2339_v1  ;;  %v2358_v0 = vrot.slane %v2357_v12, 2 }
 0x4aa   :  { %v5536_v33 = vsel %vm739_vm1, %v5000_v31, 0.0  ;;  %v5517_v31 = vadd.f32 %v5516_v52, %v5515_v21 }
 0x4ab   :  { %v5537_v10 = vrot.slane %v5536_v33, 4  ;;  %v2362_v38 = vsel %vm1661_vm2, %v9885_v6, -inf  ;;  %v2654_v57 = vsub.f32 %v9798_v7, %v2340_v39  ;;  %v2359_v28 = vmax.f32 %v2357_v12, %v2358_v0 }
 0x4ac   :  { %6571 = vmatmul.msk.f32.gmra.mxu2 %vm1661_vm2, %v4051_v18  ;;  %v4052_v18 = vmul.f32 %v7001_v60, %v9673_v14  ;;  %v2876_v14 = vmul.f32 1.442695, %v2653_v51  ;;  %v5524_v60 = vadd.f32 %v5523_v15, %v5522_v40  ;;  %v2363_v1 = vrot.slane %v2362_v38, 4 }
 0x4ad   :  { %v5538_v27 = vadd.f32 %v5537_v10, %v5536_v33  ;;  %v5518_v43 = vrot.slane %v5517_v31, 2  ;;  %v2347_v51 = vmax.f32 %v2345_v19, %v2346_v11  ;;  %v5532_v15 = vrot.slane %v5531_v45, 2 }
 0x4ae   :  { %v5525_v40 = vrot.slane %v5524_v60, 2  ;;  %v2353_v33 = vrot.slane %v2352_v56, 1  ;;  %7008 = vpow2.f32 %v2876_v14  ;;  %v2878_v12 = vmul.f32 1.442695, %v2654_v57 }
 0x4af   :  { %v4707_v50 = vpop.f32.mrf.mxu2  ;;  %v5539_v16 = vrot.slane %v5538_v27, 2  ;;  %v5519_v19 = vadd.f32 %v5518_v43, %v5517_v31  ;;  %v2655_v39 = vsub.f32 %v9816_v20, %v2347_v51  ;;  %v5533_v11 = vadd.f32 %v5532_v15, %v5531_v45 }
 0x4b0   :  { %v5001_v59 = vmul.f32 %v9854_v32, %v4707_v50  ;;  %v10828_v50 = vld [vmem:[#allocation39_spill] sm:$0xff]  ;;  %v5526_v10 = vadd.f32 %v5525_v40, %v5524_v60  ;;  %v2354_v43 = vmax.f32 %v2352_v56, %v2353_v33 }
 0x4b1   :  { %v5540_v31 = vadd.f32 %v5539_v16, %v5538_v27  ;;  %v5534_v45 = vrot.slane %v5533_v11, 1  ;;  %v2880_v16 = vmul.f32 1.442695, %v2655_v39 }
 0x4b2   :  { %v5543_v30 = vsel %vm739_vm1, %v5001_v59, 0.0  ;;  %v5510_v59 = vadd.f32 %v5509_v17, %v5508_v8  ;;  %v4053_v8 = vmul.f32 %v7003_v55, %v9700_v63  ;;  %v2364_v17 = vmax.f32 %v2362_v38, %v2363_v1 }
 0x4b3   :  { %v5544_v48 = vrot.slane %v5543_v30, 4  ;;  %v3571_v63 = vadd.f32 %v3570_v26, %v9825_v23  ;;  %v2360_v38 = vrot.slane %v2359_v28, 1  ;;  %v5527_v23 = vrot.slane %v5526_v10, 1 }
 0x4b4   :  { %6572 = vmatmul.msk.f32.gmra.mxu2 %vm1661_vm2, %v4052_v18  ;;  %v9899_v18 = vadd.f32 %v9693_v34, %v10828_v50  ;;  %v5511_v52 = vrot.slane %v5510_v59, 2  ;;  %v9905_v34 = vpop.eup %7004 }
 0x4b5   :  { %v5545_v22 = vadd.f32 %v5544_v48, %v5543_v30  ;;  %v7007_v48 = vpop.eup %7006  ;;  %7010 = vrcp.f32 %v3571_v63  ;;  %v2361_v27 = vmax.f32 %v2359_v28, %v2360_v38  ;;  %v2656_v28 = vsub.f32 %v9834_v42, %v2354_v43 }
 0x4b6   :  { %v2369_v7 = vsel %vm1661_vm2, %v9899_v18, -inf  ;;  %v5512_v36 = vadd.f32 %v5511_v52, %v5510_v59  ;;  %v4054_v14 = vmul.f32 %v7007_v48, %v9753_v54  ;;  %v9918_v40 = vpop.eup %7008  ;;  %v5541_v52 = vrot.slane %v5540_v31, 1 }
 0x4b7   :  { %v4710_v44 = vpop.f32.mrf.mxu2  ;;  %v5546_v30 = vrot.slane %v5545_v22, 2  ;;  %v2370_v1 = vrot.slane %v2369_v7, 4  ;;  %v10829_v54 = vrot.slane %v9837_v53, 1  ;;  %7012 = vpow2.f32 %v2878_v12 }
 0x4b8   :  { %v5002_v21 = vmul.f32 %v9854_v32, %v4710_v44  ;;  %v2365_v44 = vrot.slane %v2364_v17, 2  ;;  %v5513_v59 = vrot.slane %v5512_v36, 1 }
 0x4b9   :  { %v2371_v56 = vmax.f32 %v2369_v7, %v2370_v1  ;;  %v3578_v33 = vadd.f32 %v10829_v54, %v9837_v53  ;;  %v5535_v7 = vadd.f32 %v5534_v45, %v5533_v11  ;;  %v10830_v11 = vld [vmem:[#allocation41_spill] sm:$0xff] }
 0x4ba   :  { %v5550_v9 = vsel %vm739_vm1, %v5002_v21, 0.0  ;;  %v9934_v1 = vadd.f32 %v9733_v35, %v10830_v11 }
 0x4bb   :  { %v5551_v29 = vrot.slane %v5550_v9, 4  ;;  %7014 = vrcp.f32 %v3578_v33 }
 0x4bc   :  { %6573 = vmatmul.msk.f32.gmra.mxu2 %vm1661_vm2, %v4053_v8  ;;  %v5547_v8 = vadd.f32 %v5546_v30, %v5545_v22  ;;  %7016 = vpow2.f32 %v2880_v16  ;;  %v3607_v16 = vsel %vm1661_vm2, %v9918_v40, 0.0 }
 0x4bd   :  { %v5552_v50 = vadd.f32 %v5551_v29, %v5550_v9  ;;  %v5520_v9 = vrot.slane %v5519_v19, 1 }
 0x4be   :  { %v5548_v15 = vrot.slane %v5547_v8, 1 }
 0x4bf   :  { %v5553_v55 = vrot.slane %v5552_v50, 2  ;;  %v4713_v0 = vpop.f32.mrf.mxu2  ;;  %v5521_v22 = vadd.f32 %v5520_v9, %v5519_v19  ;;  %v2657_v19 = vsub.f32 %v9849_v61, %v2361_v27  ;;  %v10833_v27 = vld [vmem:[#allocation43_spill] sm:$0xff] }
 0x4c0   :  { %v5003_v21 = vmul.f32 %v9854_v32, %v4713_v0  ;;  %v2366_v32 = vmax.f32 %v2364_v17, %v2365_v44  ;;  %v5514_v17 = vadd.f32 %v5513_v59, %v5512_v36  ;;  %v5542_v0 = vadd.f32 %v5541_v52, %v5540_v31 }
 0x4c1   :  { %v5554_v26 = vadd.f32 %v5553_v55, %v5552_v50  ;;  %v7011_v50 = vpop.eup %7010  ;;  %v2372_v55 = vrot.slane %v2371_v56, 2  ;;  %v5549_v53 = vadd.f32 %v5548_v15, %v5547_v8  ;;  %v2882_v36 = vmul.f32 1.442695, %v2656_v28 }
 0x4c2   :  { %v5557_v20 = vsel %vm739_vm1, %v5003_v21, 0.0  ;;  %v2367_v38 = vrot.slane %v2366_v32, 1  ;;  %v6153_v44 = vsel %vm6090_vm4, %v5521_v22, %v5514_v17  ;;  %v4055_v42 = vmul.f32 %v7011_v50, %v9768_v13  ;;  %v9937_v31 = vpop.eup %7012 }
 0x4c3   :  { %v5558_v57 = vrot.slane %v5557_v20, 4  ;;  %v5555_v30 = vrot.slane %v5554_v26, 1  ;;  %v2884_v43 = vmul.f32 1.442695, %v2657_v19  ;;  %v2373_v8 = vmax.f32 %v2371_v56, %v2372_v55 }
 0x4c4   :  { %6574 = vmatmul.msk.f32.gmra.mxu2 %vm1661_vm2, %v4054_v14  ;;  %v2368_v9 = vmax.f32 %v2366_v32, %v2367_v38  ;;  %v10831_v13 = vrot.slane %v9875_v3, 4  ;;  %v10832_v14 = vrot.slane %v9852_v5, 1  ;;  %v3600_v59 = vsel %vm1661_vm2, %v9905_v34, 0.0 }
 0x4c5   :  { %v5559_v29 = vadd.f32 %v5558_v57, %v5557_v20  ;;  %v7015_v57 = vpop.eup %7014  ;;  %7018 = vpow2.f32 %v2882_v36  ;;  %v2374_v22 = vrot.slane %v2373_v8, 1  ;;  %v3591_v15 = vrot.slane %v9890_v58, 1 }
 0x4c6   :  { %v9960_v52 = vpop.eup %7016  ;;  %7020 = vpow2.f32 %v2884_v43  ;;  %v3601_v54 = vrot.slane %v3600_v59, 4 }
 0x4c7   :  { %v5560_v63 = vrot.slane %v5559_v29, 2  ;;  %v9926_v48 = vpop.f32.mrf.mxu2  ;;  %v2375_v28 = vmax.f32 %v2373_v8, %v2374_v22 }
 0x4c9   :  { %v6276_v60 = vpop.f32.mrf.mxu3  ;;  %v5561_v12 = vadd.f32 %v5560_v63, %v5559_v29  ;;  %v3592_v63 = vadd.f32 %v3591_v15, %v9890_v58  ;;  %v10835_v15 = vld [vmem:[#allocation45_spill] sm:$0xff] }
 0x4ca   :  { %v6277_v51 = vadd.f32 %v9710_v25, %v6276_v60  ;;  %v5528_v25 = vadd.f32 %v5527_v23, %v5526_v10  ;;  %v5556_v10 = vadd.f32 %v5555_v30, %v5554_v26  ;;  %v3595_v26 = vadd.f32 %v10831_v13, %v9875_v3 }
 0x4cb   :  { %v5562_v61 = vrot.slane %v5561_v12, 1  ;;  %v3585_v60 = vadd.f32 %v10832_v14, %v9852_v5  ;;  %v9955_v3 = vadd.f32 %v9760_v46, %v10833_v27  ;;  %v2658_v5 = vsub.f32 %v9885_v6, %v2368_v9  ;;  %v9975_v17 = vpop.eup %7018 }
 0x4cc   :  { %6312 = vst.msk [vmem:[#allocation5 + $0x30] sm:$0xff] %vm63_vm0, %v6277_v51  ;;  %v6154_v39 = vsel %vm6092_vm5, %v5528_v25, %v6153_v44  ;;  %6575 = vmatmul.msk.f32.gmra.mxu2 %vm1661_vm2, %v4055_v42  ;;  %v2376_v51 = vsel %vm1661_vm2, %v9934_v1, -inf  ;;  %v3596_v29 = vrot.slane %v3595_v26, 2  ;;  %v4056_v46 = vmul.f32 %v7015_v57, %v9778_v2  ;;  %v9978_v19 = vpop.eup %7020 }
 0x4cd   :  { %v6155_v21 = vsel %vm6094_vm6, %v5535_v7, %v6154_v39  ;;  %v5563_v20 = vadd.f32 %v5562_v61, %v5561_v12  ;;  %7022 = vrcp.f32 %v3585_v60  ;;  %v2377_v33 = vrot.slane %v2376_v51, 4 }
 0x4ce   :  { %v6156_v23 = vsel %vm6096_vm7, %v5542_v0, %v6155_v21  ;;  %v2383_v25 = vsel %vm1661_vm2, %v9955_v3, -inf  ;;  %v3614_v6 = vsel %vm1661_vm2, %v9937_v31, 0.0  ;;  %v3621_v30 = vsel %vm1661_vm2, %v9960_v52, 0.0 }
 0x4cf   :  { %v6157_v35 = vsel %vm6098_vm8, %v5549_v53, %v6156_v23  ;;  %v9957_v32 = vpop.f32.mrf.mxu2  ;;  %v2886_v50 = vmul.f32 1.442695, %v2658_v5  ;;  %v3597_v7 = vadd.f32 %v3596_v29, %v3595_v26  ;;  %v3602_v2 = vadd.f32 %v3601_v54, %v3600_v59 }
 0x4d0   :  { %v6158_v45 = vsel %vm6100_vm9, %v5556_v10, %v6157_v35  ;;  %v2378_v38 = vmax.f32 %v2376_v51, %v2377_v33  ;;  %v2384_v55 = vrot.slane %v2383_v25, 4  ;;  %v3608_v44 = vrot.slane %v3607_v16, 4 }
 0x4d1   :  { %v6159_v56 = vsel %vm6102_vm10, %v5563_v20, %v6158_v45  ;;  %v3615_v53 = vrot.slane %v3614_v6, 4  ;;  %v3622_v12 = vrot.slane %v3621_v30, 4  ;;  %7024 = vpow2.f32 %v2886_v50  ;;  %v10834_v20 = vld [vmem:[#allocation44_spill] sm:$0xff] }
 0x4d2   :  { %6622 = vmatmul.msk.f32.gmra.mxu3 %vm739_vm1, %v6159_v56  ;;  %v2659_v10 = vsub.f32 %v9899_v18, %v2375_v28  ;;  %v3598_v42 = vrot.slane %v3597_v7, 1  ;;  %v3603_v36 = vrot.slane %v3602_v2, 2  ;;  %v3628_v11 = vsel %vm1661_vm2, %v9975_v17, 0.0 }
 0x4d3   :  { %v7023_v0 = vpop.eup %7022  ;;  %7026 = vrcp.f32 %v3592_v63  ;;  %v3635_v58 = vsel %vm1661_vm2, %v9978_v19, 0.0  ;;  %v2379_v61 = vrot.slane %v2378_v38, 2  ;;  %v2385_v21 = vmax.f32 %v2383_v25, %v2384_v55 }
 0x4d4   :  { %6576 = vmatmul.msk.f32.gmra.mxu2 %vm1661_vm2, %v4056_v46  ;;  %v4057_v43 = vmul.f32 %v7023_v0, %v9785_v49  ;;  %v3609_v9 = vadd.f32 %v3608_v44, %v3607_v16  ;;  %v3616_v8 = vadd.f32 %v3615_v53, %v3614_v6  ;;  %v3623_v23 = vadd.f32 %v3622_v12, %v3621_v30 }
 0x4d5   :  { %v3629_v13 = vrot.slane %v3628_v11, 4  ;;  %v2888_v26 = vmul.f32 1.442695, %v2659_v10  ;;  %v9990_v18 = vadd.f32 %v9794_v47, %v10834_v20  ;;  %v3604_v35 = vadd.f32 %v3603_v36, %v3602_v2 }
 0x4d6   :  { %v3636_v14 = vrot.slane %v3635_v58, 4  ;;  %v3599_v60 = vadd.f32 %v3598_v42, %v3597_v7  ;;  %v2380_v45 = vmax.f32 %v2378_v38, %v2379_v61  ;;  %v2386_v57 = vrot.slane %v2385_v21, 2  ;;  %v10836_v42 = vld [vmem:[#allocation46_spill] sm:$0xff] }
 0x4d7   :  { %v9980_v39 = vpop.f32.mrf.mxu2  ;;  %v9993_v59 = vpop.eup %7024  ;;  %v3610_v49 = vrot.slane %v3609_v9, 2  ;;  %v3617_v27 = vrot.slane %v3616_v8, 2  ;;  %v3624_v56 = vrot.slane %v3623_v23, 2  ;;  %v3630_v22 = vadd.f32 %v3629_v13, %v3628_v11 }
 0x4d8   :  { %7028 = vpow2.f32 %v2888_v26  ;;  %v2390_v47 = vsel %vm1661_vm2, %v9990_v18, -inf  ;;  %v9999_v29 = vadd.f32 %v9812_v24, %v10835_v15  ;;  %v3605_v54 = vrot.slane %v3604_v35, 1  ;;  %v10025_v13 = vpop.permute.xlu1 %4902 }
 0x4d9   :  { %v7027_v51 = vpop.eup %7026  ;;  %v3637_v33 = vadd.f32 %v3636_v14, %v3635_v58  ;;  %7030 = vrcp.f32 %v3599_v60  ;;  %v3642_v46 = vsel %vm1661_vm2, %v9993_v59, 0.0  ;;  %v2381_v16 = vrot.slane %v2380_v45, 1 }
 0x4da   :  { %v2387_v25 = vmax.f32 %v2385_v21, %v2386_v57  ;;  %v4058_v6 = vmul.f32 %v7027_v51, %v9807_v62  ;;  %v3611_v30 = vadd.f32 %v3610_v49, %v3609_v9  ;;  %v2391_v50 = vrot.slane %v2390_v47, 4  ;;  %v10837_v49 = vld [vmem:[#allocation47_spill] sm:$0xff] }
 0x4db   :  { %v10004_v28 = vadd.f32 %v3617_v27, %v3616_v8  ;;  %v10006_v7 = vadd.f32 %v3624_v56, %v3623_v23  ;;  %v3631_v2 = vrot.slane %v3630_v22, 2  ;;  %v2397_v24 = vsel %vm1661_vm2, %v9999_v29, -inf }
 0x4dc   :  { %6577 = vmatmul.msk.f32.gmra.mxu2 %vm1661_vm2, %v4057_v43  ;;  %v3638_v63 = vrot.slane %v3637_v33, 2  ;;  %v3643_v38 = vrot.slane %v3642_v46, 4  ;;  %v3606_v55 = vadd.f32 %v3605_v54, %v3604_v35  ;;  %v2382_v44 = vmax.f32 %v2380_v45, %v2381_v16 }
 0x4dd   :  { %v2388_v53 = vrot.slane %v2387_v25, 1  ;;  %v2392_v12 = vmax.f32 %v2390_v47, %v2391_v50  ;;  %v2398_v10 = vrot.slane %v2397_v24, 4  ;;  %v10015_v36 = vadd.f32 %v9830_v4, %v10836_v42 }
 0x4de   :  { %v10011_v0 = vpop.eup %7028  ;;  %v3612_v58 = vrot.slane %v3611_v30, 1  ;;  %v3619_v61 = vrot.slane %v10004_v28, 1  ;;  %v3626_v21 = vrot.slane %v10006_v7, 1  ;;  %v10019_v43 = vadd.f32 %v3631_v2, %v3630_v22 }
 0x4df   :  { %v4725_v5 = vpop.f32.mrf.mxu2  ;;  %v7031_v62 = vpop.eup %7030  ;;  %v10021_v9 = vadd.f32 %v3638_v63, %v3637_v33  ;;  %v3644_v8 = vadd.f32 %v3643_v38, %v3642_v46  ;;  %v3649_v23 = vsel %vm1661_vm2, %v10011_v0, 0.0  ;;  %7032 = vrcp.f32 %v3606_v55 }
 0x4e0   :  { %v2660_v4 = vsub.f32 %v9934_v1, %v2382_v44  ;;  %v2389_v26 = vmax.f32 %v2387_v25, %v2388_v53  ;;  %v5005_v20 = vmul.f32 %v10025_v13, %v9957_v32  ;;  %v4059_v35 = vmul.f32 %v7031_v62, %v9860_v37 }
 0x4e1   :  { %v2393_v14 = vrot.slane %v2392_v12, 2  ;;  %v2399_v60 = vmax.f32 %v2397_v24, %v2398_v10  ;;  %v2404_v45 = vsel %vm1661_vm2, %v10015_v36, -inf  ;;  %v5006_v57 = vmul.f32 %v10025_v13, %v9980_v39  ;;  %v10057_v24 = vld [vmem:[%s10706_s4 + $0x20] sm:$0xff] }
 0x4e2   :  { %v3633_v51 = vrot.slane %v10019_v43, 1  ;;  %v10038_v27 = vadd.f32 %v9845_v41, %v10837_v49  ;;  %v5004_v1 = vmul.f32 %v10025_v13, %v9926_v48  ;;  %v5007_v32 = vmul.f32 %v10025_v13, %v4725_v5 }
 0x4e3   :  { %v3640_v37 = vrot.slane %v10021_v9, 1  ;;  %v3645_v56 = vrot.slane %v3644_v8, 2  ;;  %v3613_v47 = vadd.f32 %v3612_v58, %v3611_v30  ;;  %v3650_v39 = vrot.slane %v3649_v23, 4 }
 0x4e4   :  { %6578 = vmatmul.msk.f32.gmra.mxu2 %vm1661_vm2, %v4058_v6  ;;  %v2890_v15 = vmul.f32 1.442695, %v2660_v4  ;;  %v2405_v54 = vrot.slane %v2404_v45, 4  ;;  %v5571_v33 = vsel %vm739_vm1, %v5005_v20, 0.0  ;;  %v2661_v46 = vsub.f32 %v9955_v3, %v2389_v26  ;;  %v10838_v3 = vld [vmem:[#allocation48_spill] sm:$0xff] }
 0x4e5   :  { %v7033_v41 = vpop.eup %7032  ;;  %v2394_v16 = vmax.f32 %v2392_v12, %v2393_v14  ;;  %v2400_v48 = vrot.slane %v2399_v60, 2  ;;  %v5578_v5 = vsel %vm739_vm1, %v5006_v57, 0.0  ;;  %v2411_v6 = vsel %vm1661_vm2, %v10038_v27, -inf }
 0x4e6   :  { %v5564_v50 = vsel %vm739_vm1, %v5004_v1, 0.0  ;;  %v5585_v30 = vsel %vm739_vm1, %v5007_v32, 0.0  ;;  %v10061_v63 = vadd.f32 %v10057_v24, %v10838_v3  ;;  %v5572_v38 = vrot.slane %v5571_v33, 4 }
 0x4e7   :  { %v4728_v11 = vpop.f32.mrf.mxu2  ;;  %7034 = vrcp.f32 %v3613_v47  ;;  %v2406_v44 = vmax.f32 %v2404_v45, %v2405_v54  ;;  %v5579_v53 = vrot.slane %v5578_v5, 4  ;;  %v4060_v12 = vmul.f32 %v7033_v41, %v9905_v34  ;;  %v10077_v54 = vld [vmem:[%s10706_s4 + $0x28] sm:$0xff] }
 0x4e8   :  { %v5008_v22 = vmul.f32 %v10025_v13, %v4728_v11  ;;  %v2401_v10 = vmax.f32 %v2399_v60, %v2400_v48  ;;  %v2412_v42 = vrot.slane %v2411_v6, 4  ;;  %v5565_v11 = vrot.slane %v5564_v50, 4 }
 0x4e9   :  { %v5586_v58 = vrot.slane %v5585_v30, 4  ;;  %v10066_v4 = vadd.f32 %v3645_v56, %v3644_v8  ;;  %v10068_v26 = vadd.f32 %v3650_v39, %v3649_v23  ;;  %v2395_v20 = vrot.slane %v2394_v16, 1 }
 0x4ea   :  { %v5592_v55 = vsel %vm739_vm1, %v5008_v22, 0.0  ;;  %v2418_v14 = vsel %vm1661_vm2, %v10061_v63, -inf  ;;  %v5573_v45 = vadd.f32 %v5572_v38, %v5571_v33  ;;  %v3620_v49 = vadd.f32 %v3619_v61, %v10004_v28  ;;  %v10839_v33 = vld [vmem:[#allocation42_spill] sm:$0xff] }
 0x4eb   :  { %7036 = vpow2.f32 %v2890_v15  ;;  %v2892_v34 = vmul.f32 1.442695, %v2661_v46  ;;  %v2407_v60 = vrot.slane %v2406_v44, 2  ;;  %v5580_v1 = vadd.f32 %v5579_v53, %v5578_v5 }
 0x4ec   :  { %6579 = vmatmul.msk.f32.gmra.mxu2 %vm1661_vm2, %v4059_v35  ;;  %v5593_v35 = vrot.slane %v5592_v55, 4  ;;  %v2402_v8 = vrot.slane %v2401_v10, 1  ;;  %v2413_v56 = vmax.f32 %v2411_v6, %v2412_v42  ;;  %v5566_v23 = vadd.f32 %v5565_v11, %v5564_v50 }
 0x4ed   :  { %v7035_v32 = vpop.eup %7034  ;;  %v5587_v22 = vadd.f32 %v5586_v58, %v5585_v30  ;;  %v2419_v39 = vrot.slane %v2418_v14, 4  ;;  %v10081_v41 = vadd.f32 %v10077_v54, %v10839_v33  ;;  %v2396_v15 = vmax.f32 %v2394_v16, %v2395_v20 }
 0x4ee   :  { %v5594_v28 = vadd.f32 %v5593_v35, %v5592_v55  ;;  %v5574_v46 = vrot.slane %v5573_v45, 2  ;;  %7038 = vrcp.f32 %v3620_v49  ;;  %v2408_v5 = vmax.f32 %v2406_v44, %v2407_v60 }
 0x4ef   :  { %v4731_v25 = vpop.f32.mrf.mxu2  ;;  %v4061_v50 = vmul.f32 %v7035_v32, %v9918_v40  ;;  %v2414_v30 = vrot.slane %v2413_v56, 2  ;;  %v5588_v3 = vrot.slane %v5587_v22, 2  ;;  %v2420_v55 = vmax.f32 %v2418_v14, %v2419_v39 }
 0x4f0   :  { %v5009_v2 = vmul.f32 %v10025_v13, %v4731_v25  ;;  %v5581_v25 = vrot.slane %v5580_v1, 2  ;;  %v2425_v16 = vsel %vm1661_vm2, %v10081_v41, -inf  ;;  %v5595_v42 = vrot.slane %v5594_v28, 2 }
 0x4f1   :  { %v10086_v53 = vpop.eup %7036  ;;  %v5575_v44 = vadd.f32 %v5574_v46, %v5573_v45  ;;  %v3627_v40 = vadd.f32 %v3626_v21, %v10006_v7  ;;  %7040 = vpow2.f32 %v2892_v34  ;;  %v2662_v58 = vsub.f32 %v9990_v18, %v2396_v15 }
 0x4f2   :  { %v5599_v62 = vsel %vm739_vm1, %v5009_v2, 0.0  ;;  %v5567_v2 = vrot.slane %v5566_v23, 2  ;;  %v2409_v20 = vrot.slane %v2408_v5, 1  ;;  %v5582_v35 = vadd.f32 %v5581_v25, %v5580_v1 }
 0x4f3   :  { %v5600_v57 = vrot.slane %v5599_v62, 4  ;;  %v2415_v14 = vmax.f32 %v2413_v56, %v2414_v30  ;;  %v5589_v49 = vadd.f32 %v5588_v3, %v5587_v22  ;;  %v5596_v45 = vadd.f32 %v5595_v42, %v5594_v28 }
 0x4f4   :  { %6580 = vmatmul.msk.f32.gmra.mxu2 %vm1661_vm2, %v4060_v12  ;;  %v2403_v12 = vmax.f32 %v2401_v10, %v2402_v8  ;;  %v7039_v10 = vpop.eup %7038  ;;  %v2421_v8 = vrot.slane %v2420_v55, 2  ;;  %7042 = vrcp.f32 %v3627_v40  ;;  %v5583_v21 = vrot.slane %v5582_v35, 1 }
 0x4f5   :  { %v5601_v48 = vadd.f32 %v5600_v57, %v5599_v62  ;;  %v5568_v57 = vadd.f32 %v5567_v2, %v5566_v23  ;;  %v4062_v1 = vmul.f32 %v7039_v10, %v9937_v31  ;;  %v2410_v56 = vmax.f32 %v2408_v5, %v2409_v20 }
 0x4f6   :  { %v2663_v33 = vsub.f32 %v9999_v29, %v2403_v12  ;;  %v5590_v22 = vrot.slane %v5589_v49, 1  ;;  %v2416_v28 = vrot.slane %v2415_v14, 1  ;;  %v2422_v25 = vmax.f32 %v2420_v55, %v2421_v8  ;;  %v10115_v8 = vld [vmem:[%s10706_s4 + $0x30] sm:$0xff] }
 0x4f7   :  { %v4734_v47 = vpop.f32.mrf.mxu2  ;;  %v5602_v62 = vrot.slane %v5601_v48, 2  ;;  %v5569_v23 = vrot.slane %v5568_v57, 1  ;;  %v10099_v46 = vpop.eup %7040  ;;  %v3634_v30 = vadd.f32 %v3633_v51, %v10019_v43  ;;  %v2894_v31 = vmul.f32 1.442695, %v2662_v58 }
 0x4f8   :  { %v5010_v61 = vmul.f32 %v10025_v13, %v4734_v47  ;;  %v2426_v47 = vrot.slane %v2425_v16, 4  ;;  %v2896_v5 = vmul.f32 1.442695, %v2663_v33  ;;  %v5584_v2 = vadd.f32 %v5583_v21, %v5582_v35 }
 0x4f9   :  { %v5603_v7 = vadd.f32 %v5602_v62, %v5601_v48  ;;  %v2664_v12 = vsub.f32 %v10015_v36, %v2410_v56  ;;  %v5570_v42 = vadd.f32 %v5569_v23, %v5568_v57  ;;  %v5591_v55 = vadd.f32 %v5590_v22, %v5589_v49 }
 0x4fa   :  { %v5606_v6 = vsel %vm739_vm1, %v5010_v61, 0.0  ;;  %v5576_v61 = vrot.slane %v5575_v44, 1  ;;  %7044 = vrcp.f32 %v3634_v30  ;;  %v3656_v21 = vsel %vm1661_vm2, %v10086_v53, 0.0 }
 0x4fb   :  { %v5607_v38 = vrot.slane %v5606_v6, 4  ;;  %v5604_v48 = vrot.slane %v5603_v7, 1  ;;  %7046 = vpow2.f32 %v2894_v31  ;;  %v2898_v35 = vmul.f32 1.442695, %v2664_v12 }
 0x4fc   :  { %6581 = vmatmul.msk.f32.gmra.mxu2 %vm1661_vm2, %v4061_v50  ;;  %v5577_v29 = vadd.f32 %v5576_v61, %v5575_v44  ;;  %v2423_v44 = vrot.slane %v2422_v25, 1  ;;  %7048 = vpow2.f32 %v2896_v5  ;;  %v10151_v5 = vld [vmem:[%s10705_s3] ss:$0 sm:$0xff] }
 0x4fd   :  { %v5608_v11 = vadd.f32 %v5607_v38, %v5606_v6  ;;  %v5597_v6 = vrot.slane %v5596_v45, 1  ;;  %v7043_v38 = vpop.eup %7042  ;;  %7050 = vpow2.f32 %v2898_v35 }
 0x4fe   :  { %v6160_v10 = vsel %vm6090_vm4, %v5577_v29, %v5570_v42  ;;  %v4063_v36 = vmul.f32 %v7043_v38, %v9960_v52 }
 0x4ff   :  { %v5609_v60 = vrot.slane %v5608_v11, 2  ;;  %v4737_v32 = vpop.f32.mrf.mxu2  ;;  %v5598_v20 = vadd.f32 %v5597_v6, %v5596_v45  ;;  %v6161_v51 = vsel %vm6092_vm5, %v5584_v2, %v6160_v10 }
 0x500   :  { %v5011_v39 = vmul.f32 %v10025_v13, %v4737_v32  ;;  %v2427_v13 = vmax.f32 %v2425_v16, %v2426_v47  ;;  %v6162_v49 = vsel %vm6094_vm6, %v5591_v55, %v6161_v51  ;;  %v10840_v47 = vld [vmem:[#allocation35_spill] sm:$0xff] }
 0x501   :  { %v5610_v18 = vadd.f32 %v5609_v60, %v5608_v11  ;;  %v2417_v11 = vmax.f32 %v2415_v14, %v2416_v28  ;;  %v5605_v60 = vadd.f32 %v5604_v48, %v5603_v7  ;;  %v2424_v14 = vmax.f32 %v2422_v25, %v2423_v44 }
 0x502   :  { %v5613_v34 = vsel %vm739_vm1, %v5011_v39, 0.0  ;;  %v2428_v40 = vrot.slane %v2427_v13, 2  ;;  %v10119_v45 = vadd.f32 %v10115_v8, %v10840_v47  ;;  %v6163_v52 = vsel %vm6096_vm7, %v5598_v20, %v6162_v49 }
 0x503   :  { %v5614_v15 = vrot.slane %v5613_v34, 4  ;;  %v5611_v3 = vrot.slane %v5610_v18, 1  ;;  %v2665_v39 = vsub.f32 %v10038_v27, %v2417_v11  ;;  %v6164_v61 = vsel %vm6098_vm8, %v5605_v60, %v6163_v52 }
 0x504   :  { %6582 = vmatmul.msk.f32.gmra.mxu2 %vm1661_vm2, %v4062_v1  ;;  %v2429_v32 = vmax.f32 %v2427_v13, %v2428_v40  ;;  %v3641_v7 = vadd.f32 %v3640_v37, %v10021_v9  ;;  %v3652_v1 = vrot.slane %v10068_v26, 2  ;;  %v2666_v22 = vsub.f32 %v10061_v63, %v2424_v14 }
 0x505   :  { %v5615_v50 = vadd.f32 %v5614_v15, %v5613_v34  ;;  %v5612_v58 = vadd.f32 %v5611_v3, %v5610_v18  ;;  %v7045_v34 = vpop.eup %7044  ;;  %v2432_v9 = vsel %vm1661_vm2, %v10119_v45, -inf  ;;  %v3647_v28 = vrot.slane %v10066_v4, 1 }
 0x506   :  { %v10135_v27 = vpop.eup %7046  ;;  %v2430_v15 = vrot.slane %v2429_v32, 1  ;;  %v3657_v25 = vrot.slane %v3656_v21, 4  ;;  %v2900_v13 = vmul.f32 1.442695, %v2665_v39  ;;  %7052 = vrcp.f32 %v3641_v7 }
 0x507   :  { %v5616_v16 = vrot.slane %v5615_v50, 2  ;;  %v10106_v62 = vpop.f32.mrf.mxu2  ;;  %v6165_v18 = vsel %vm6100_vm9, %v5612_v58, %v6164_v61  ;;  %v10141_v37 = vpop.eup %7048  ;;  %v4064_v6 = vmul.f32 %v7045_v34, %v9975_v17  ;;  %v3653_v29 = vadd.f32 %v3652_v1, %v10068_v26  ;;  %v10841_v34 = vld [vmem:[#allocation38_spill] sm:$0xff] }
 0x508   :  { %v2433_v48 = vrot.slane %v2432_v9, 4  ;;  %v3663_v63 = vsel %vm1661_vm2, %v10099_v46, 0.0  ;;  %v2902_v30 = vmul.f32 1.442695, %v2666_v22  ;;  %v2431_v31 = vmax.f32 %v2429_v32, %v2430_v15  ;;  %v10158_v38 = vpop.eup %7050 }
 0x509   :  { %v5617_v43 = vadd.f32 %v5616_v16, %v5615_v50  ;;  %v3658_v3 = vadd.f32 %v3657_v25, %v3656_v21  ;;  %v3670_v17 = vsel %vm1661_vm2, %v10135_v27, 0.0  ;;  %7054 = vpow2.f32 %v2900_v13  ;;  %v10191_v13 = vld [vmem:[%s10706_s4] sm:$0xff] }
 0x50a   :  { %v3648_v26 = vadd.f32 %v3647_v28, %v10066_v4  ;;  %v3677_v12 = vsel %vm1661_vm2, %v10141_v37, 0.0  ;;  %v3664_v55 = vrot.slane %v3663_v63, 4  ;;  %v2434_v16 = vmax.f32 %v2432_v9, %v2433_v48  ;;  %10842 = vst [vmem:[#allocation15_spill] sm:$0xff] %v10191_v13 }
 0x50b   :  { %v5618_v57 = vrot.slane %v5617_v43, 1  ;;  %v3654_v44 = vrot.slane %v3653_v29, 1  ;;  %v3671_v40 = vrot.slane %v3670_v17, 4  ;;  %7056 = vpow2.f32 %v2902_v30 }
 0x50c   :  { %6583 = vmatmul.msk.f32.gmra.mxu2 %vm1661_vm2, %v4063_v36  ;;  %v7053_v42 = vpop.eup %7052  ;;  %v2667_v20 = vsub.f32 %v10081_v41, %v2431_v31  ;;  %v3659_v10 = vrot.slane %v3658_v3, 2  ;;  %v3678_v60 = vrot.slane %v3677_v12, 4  ;;  %v3684_v4 = vsel %vm1661_vm2, %v10158_v38, 0.0 }
 0x50d   :  { %v5619_v33 = vadd.f32 %v5618_v57, %v5617_v43  ;;  %7058 = vrcp.f32 %v3648_v26  ;;  %v4065_v43 = vmul.f32 %v7053_v42, %v9978_v19  ;;  %v3665_v58 = vadd.f32 %v3664_v55, %v3663_v63 }
 0x50e   :  { %v2435_v36 = vrot.slane %v2434_v16, 2  ;;  %v3672_v35 = vadd.f32 %v3671_v40, %v3670_v17  ;;  %v3685_v57 = vrot.slane %v3684_v4, 4  ;;  %v2904_v49 = vmul.f32 1.442695, %v2667_v20 }
 0x50f   :  { %v10132_v56 = vpop.f32.mrf.mxu2  ;;  %v6166_v23 = vsel %vm6102_vm10, %v5619_v33, %v6165_v18  ;;  %v10169_v51 = vpop.eup %7054  ;;  %v3660_v14 = vadd.f32 %v3659_v10, %v3658_v3  ;;  %v3679_v32 = vadd.f32 %v3678_v60, %v3677_v12  ;;  %v3655_v41 = vadd.f32 %v3654_v44, %v3653_v29  ;;  %v10179_v18 = vld [vmem:[%s10706_s4 + $0x38] sm:$0xff] }
 0x510   :  { %6623 = vmatmul.msk.f32.gmra.mxu3 %vm739_vm1, %v6166_v23  ;;  %v3691_v52 = vsel %vm1661_vm2, %v10169_v51, 0.0  ;;  %v3666_v33 = vrot.slane %v3665_v58, 2  ;;  %v2436_v19 = vmax.f32 %v2434_v16, %v2435_v36  ;;  %v3673_v7 = vrot.slane %v3672_v35, 2 }
 0x511   :  { %v10172_v47 = vpop.eup %7056  ;;  %v3686_v21 = vadd.f32 %v3685_v57, %v3684_v4  ;;  %7060 = vpow2.f32 %v2904_v49  ;;  %v10183_v1 = vadd.f32 %v10179_v18, %v10841_v34  ;;  %v3661_v23 = vrot.slane %v3660_v14, 1  ;;  %v10850_v34 = vld [vmem:[#allocation51_spill] sm:$0xff] }
 0x512   :  { %v3680_v22 = vrot.slane %v3679_v32, 2  ;;  %v3692_v15 = vrot.slane %v3691_v52, 4  ;;  %7062 = vrcp.f32 %v3655_v41  ;;  %v3698_v9 = vsel %vm1661_vm2, %v10172_v47, 0.0  ;;  %v10846_v41 = vld [vmem:[#allocation49_spill] sm:$0xff] }
 0x513   :  { %v6279_v50 = vpop.f32.mrf.mxu3  ;;  %v7059_v39 = vpop.eup %7058  ;;  %v2437_v25 = vrot.slane %v2436_v19, 1  ;;  %v3667_v48 = vadd.f32 %v3666_v33, %v3665_v58  ;;  %v3687_v63 = vrot.slane %v3686_v21, 2  ;;  %v2439_v30 = vsel %vm1661_vm2, %v10183_v1, -inf }
 0x514   :  { %v6280_v2 = vadd.f32 %v10151_v5, %v6279_v50  ;;  %6584 = vmatmul.msk.f32.gmra.mxu2 %vm1661_vm2, %v4064_v6  ;;  %v4066_v28 = vmul.f32 %v7059_v39, %v9993_v59  ;;  %v10843_v6 = vld [vmem:[#allocation40_spill] sm:$0xff]  ;;  %v10197_v50 = vadd.f32 %v3673_v7, %v3672_v35  ;;  %v10202_v59 = vadd.f32 %v3680_v22, %v3679_v32  ;;  %v10223_v32 = vld [vmem:[%s10706_s4 + $0x8] sm:$0xff] }
 0x515   :  { %v10195_v29 = vadd.f32 %v10191_v13, %v10843_v6  ;;  %v3693_v31 = vadd.f32 %v3692_v15, %v3691_v52  ;;  %v3662_v3 = vadd.f32 %v3661_v23, %v3660_v14  ;;  %v2438_v12 = vmax.f32 %v2436_v19, %v2437_v25  ;;  %10845 = vst [vmem:[#allocation17_spill] sm:$0xff] %v10223_v32  ;;  %v10851_v13 = vld [vmem:[#allocation52_spill] sm:$0xff] }
 0x516   :  { %6313 = vst.msk [vmem:[#allocation5 + $0x38] sm:$0xff] %vm63_vm0, %v6280_v2  ;;  %v3699_v2 = vrot.slane %v3698_v9, 4  ;;  %v2440_v42 = vrot.slane %v2439_v30, 4  ;;  %v3668_v44 = vrot.slane %v3667_v48, 1  ;;  %v3675_v40 = vrot.slane %v10197_v50, 1 }
 0x517   :  { %v10163_v11 = vpop.f32.mrf.mxu2  ;;  %v10204_v17 = vpop.eup %7060  ;;  %v2446_v55 = vsel %vm1661_vm2, %v10195_v29, -inf  ;;  %v10209_v20 = vadd.f32 %v3687_v63, %v3686_v21  ;;  %v3694_v60 = vrot.slane %v3693_v31, 2  ;;  %7064 = vrcp.f32 %v3662_v3 }
 0x518   :  { %10844 = vst [vmem:[#allocation16_spill] sm:$0xff] %v10204_v17  ;;  %v7063_v26 = vpop.eup %7062  ;;  %v3700_v4 = vadd.f32 %v3699_v2, %v3698_v9  ;;  %v3705_v58 = vsel %vm1661_vm2, %v10204_v17, 0.0  ;;  %v2447_v36 = vrot.slane %v2446_v55, 4  ;;  %v2668_v49 = vsub.f32 %v10119_v45, %v2438_v12  ;;  %v10848_v45 = vld [vmem:[#allocation50_spill] sm:$0xff] }
 0x519   :  { %v4067_v57 = vmul.f32 %v7063_v26, %v10011_v0  ;;  %v2441_v14 = vmax.f32 %v2439_v30, %v2440_v42  ;;  %v10227_v52 = vadd.f32 %v10223_v32, %v10846_v41  ;;  %v10235_v0 = vld [vmem:[%s10706_s4 + $0x10] sm:$0xff]  ;;  %v10245_v21 = vadd.f32 %v3694_v60, %v3693_v31 }
 0x51a   :  { %10847 = vst [vmem:[#allocation18_spill] sm:$0xff] %v10235_v0  ;;  %v3669_v15 = vadd.f32 %v3668_v44, %v3667_v48  ;;  %v3701_v9 = vrot.slane %v3700_v4, 2  ;;  %v2906_v6 = vmul.f32 1.442695, %v2668_v49 }
 0x51b   :  { %v2442_v63 = vrot.slane %v2441_v14, 2  ;;  %v2453_v30 = vsel %vm1661_vm2, %v10227_v52, -inf }
 0x51c   :  { %6585 = vmatmul.msk.f32.gmra.mxu2 %vm1661_vm2, %v4065_v43  ;;  %v10212_v43 = vpop.permute.xlu2 %4904  ;;  %7066 = vrcp.f32 %v3669_v15  ;;  %v10274_v33 = vadd.f32 %v3701_v9, %v3700_v4 }
 0x51d   :  { %v5013_v35 = vmul.f32 %v10212_v43, %v10132_v56  ;;  %v5014_v39 = vmul.f32 %v10212_v43, %v10163_v11  ;;  %v10239_v56 = vadd.f32 %v10235_v0, %v10848_v45  ;;  %v5012_v19 = vmul.f32 %v10212_v43, %v10106_v62  ;;  %v10250_v11 = vld [vmem:[%s10706_s4 + $0x18] sm:$0xff]  ;;  %v7065_v25 = vpop.eup %7064 }
 0x51e   :  { %10849 = vst [vmem:[#allocation19_spill] sm:$0xff] %v10250_v11  ;;  %v10254_v23 = vadd.f32 %v10250_v11, %v10850_v34  ;;  %v3706_v62 = vrot.slane %v3705_v58, 4  ;;  %7068 = vpow2.f32 %v2906_v6  ;;  %v2443_v34 = vmax.f32 %v2441_v14, %v2442_v63 }
 0x51f   :  { %v4749_v61 = vpop.f32.mrf.mxu2  ;;  %v5634_v31 = vsel %vm739_vm1, %v5014_v39, 0.0  ;;  %v2460_v3 = vsel %vm1661_vm2, %v10239_v56, -inf  ;;  %v5620_v26 = vsel %vm739_vm1, %v5012_v19, 0.0  ;;  %v10280_v14 = vadd.f32 %v10057_v24, %v10851_v13 }
 0x520   :  { %v5015_v7 = vmul.f32 %v10212_v43, %v4749_v61  ;;  %v5627_v61 = vsel %vm739_vm1, %v5013_v35, 0.0  ;;  %v2467_v42 = vsel %vm1661_vm2, %v10254_v23, -inf  ;;  %v5635_v60 = vrot.slane %v5634_v31, 4 }
 0x521   :  { %v4068_v35 = vmul.f32 %v7065_v25, %v10086_v53  ;;  %v2461_v49 = vrot.slane %v2460_v3, 4  ;;  %v5621_v41 = vrot.slane %v5620_v26, 4  ;;  %v2468_v19 = vrot.slane %v2467_v42, 4 }
 0x522   :  { %v5641_v48 = vsel %vm739_vm1, %v5015_v7, 0.0  ;;  %v5636_v25 = vadd.f32 %v5635_v60, %v5634_v31  ;;  %v7067_v10 = vpop.eup %7066  ;;  %v10852_v60 = vrot.slane %v10202_v59, 1 }
 0x523   :  { %v5642_v39 = vrot.slane %v5641_v48, 4  ;;  %v2462_v0 = vmax.f32 %v2460_v3, %v2461_v49  ;;  %v5622_v45 = vadd.f32 %v5621_v41, %v5620_v26  ;;  %v2469_v17 = vmax.f32 %v2467_v42, %v2468_v19 }
 0x524   :  { %6586 = vmatmul.msk.f32.gmra.mxu2 %vm1661_vm2, %v4066_v28  ;;  %v2448_v28 = vmax.f32 %v2446_v55, %v2447_v36  ;;  %v5628_v55 = vrot.slane %v5627_v61, 4  ;;  %v10283_v9 = vpop.eup %7068 }
 0x525   :  { %v5643_v6 = vadd.f32 %v5642_v39, %v5641_v48  ;;  %v5623_v3 = vrot.slane %v5622_v45, 2  ;;  %v2463_v13 = vrot.slane %v2462_v0, 2  ;;  %v2470_v48 = vrot.slane %v2469_v17, 2 }
 0x526   :  { %v2449_v44 = vrot.slane %v2448_v28, 2 }
 0x527   :  { %v4752_v16 = vpop.f32.mrf.mxu2  ;;  %v5644_v26 = vrot.slane %v5643_v6, 2  ;;  %v5624_v39 = vadd.f32 %v5623_v3, %v5622_v45 }
 0x528   :  { %v5016_v22 = vmul.f32 %v10212_v43, %v4752_v16  ;;  %v2450_v53 = vmax.f32 %v2448_v28, %v2449_v44  ;;  %v5637_v28 = vrot.slane %v5636_v25, 2 }
 0x529   :  { %v5645_v19 = vadd.f32 %v5644_v26, %v5643_v6  ;;  %v5625_v45 = vrot.slane %v5624_v39, 1 }
 0x52a   :  { %v5648_v16 = vsel %vm739_vm1, %v5016_v22, 0.0  ;;  %v5629_v22 = vadd.f32 %v5628_v55, %v5627_v61 }
 0x52b   :  { %v5649_v7 = vrot.slane %v5648_v16, 4  ;;  %v5646_v6 = vrot.slane %v5645_v19, 1 }
 0x52c   :  { %6587 = vmatmul.msk.f32.gmra.mxu2 %vm1661_vm2, %v4067_v57  ;;  %v2454_v57 = vrot.slane %v2453_v30, 4  ;;  %v5630_v4 = vrot.slane %v5629_v22, 2 }
 0x52d   :  { %v5650_v61 = vadd.f32 %v5649_v7, %v5648_v16 }
 0x52e   :  { %v2455_v11 = vmax.f32 %v2453_v30, %v2454_v57  ;;  %v4069_v30 = vmul.f32 %v7067_v10, %v10099_v46  ;;  %v5631_v55 = vadd.f32 %v5630_v4, %v5629_v22  ;;  %v10295_v46 = vsel %vm1661_vm2, %v10283_v9, 0.0 }
 0x52f   :  { %v4755_v2 = vpop.f32.mrf.mxu2  ;;  %v5651_v42 = vrot.slane %v5650_v61, 2  ;;  %v5638_v57 = vadd.f32 %v5637_v28, %v5636_v25  ;;  %v10853_v28 = vrot.slane %v10209_v20, 1 }
 0x530   :  { %v5017_v12 = vmul.f32 %v10212_v43, %v4755_v2  ;;  %v3676_v2 = vadd.f32 %v3675_v40, %v10197_v50  ;;  %v2444_v40 = vrot.slane %v2443_v34, 1  ;;  %v2456_v31 = vrot.slane %v2455_v11, 2 }
 0x532   :  { %v5655_v36 = vsel %vm739_vm1, %v5017_v12, 0.0  ;;  %v10276_v12 = vadd.f32 %v3706_v62, %v3705_v58  ;;  %7070 = vrcp.f32 %v3676_v2  ;;  %v2451_v62 = vrot.slane %v2450_v53, 1 }
 0x533   :  { %v5656_v15 = vrot.slane %v5655_v36, 4  ;;  %v2445_v10 = vmax.f32 %v2443_v34, %v2444_v40  ;;  %v2457_v22 = vmax.f32 %v2455_v11, %v2456_v31  ;;  %v2464_v2 = vmax.f32 %v2462_v0, %v2463_v13 }
 0x534   :  { %6588 = vmatmul.msk.f32.gmra.mxu2 %vm1661_vm2, %v4068_v35  ;;  %v2452_v35 = vmax.f32 %v2450_v53, %v2451_v62  ;;  %v3690_v31 = vadd.f32 %v10853_v28, %v10209_v20 }
 0x535   :  { %v5657_v58 = vadd.f32 %v5656_v15, %v5655_v36  ;;  %v3683_v36 = vadd.f32 %v10852_v60, %v10202_v59  ;;  %v5632_v59 = vrot.slane %v5631_v55, 1  ;;  %v2669_v11 = vsub.f32 %v10183_v1, %v2445_v10 }
 0x536   :  { %v2458_v0 = vrot.slane %v2457_v22, 1  ;;  %v5626_v1 = vadd.f32 %v5625_v45, %v5624_v39 }
 0x537   :  { %v4758_v32 = vpop.f32.mrf.mxu2  ;;  %v5658_v16 = vrot.slane %v5657_v58, 2  ;;  %7072 = vrcp.f32 %v3683_v36  ;;  %v2908_v36 = vmul.f32 1.442695, %v2669_v11 }
 0x538   :  { %v5018_v50 = vmul.f32 %v10212_v43, %v4758_v32  ;;  %v2474_v32 = vsel %vm1661_vm2, %v10280_v14, -inf  ;;  %v7071_v49 = vpop.eup %7070  ;;  %7074 = vrcp.f32 %v3690_v31 }
 0x539   :  { %v2475_v41 = vrot.slane %v2474_v32, 4  ;;  %v4070_v53 = vmul.f32 %v7071_v49, %v10135_v27  ;;  %v2670_v27 = vsub.f32 %v10195_v29, %v2452_v35  ;;  %7076 = vpow2.f32 %v2908_v36 }
 0x53a   :  { %v5662_v63 = vsel %vm739_vm1, %v5018_v50, 0.0  ;;  %v5652_v50 = vadd.f32 %v5651_v42, %v5650_v61  ;;  %v2465_v61 = vrot.slane %v2464_v2, 1  ;;  %v5647_v42 = vadd.f32 %v5646_v6, %v5645_v19 }
 0x53b   :  { %v5663_v24 = vrot.slane %v5662_v63, 4  ;;  %v2476_v25 = vmax.f32 %v2474_v32, %v2475_v41  ;;  %v2910_v39 = vmul.f32 1.442695, %v2670_v27 }
 0x53c   :  { %6589 = vmatmul.msk.f32.gmra.mxu2 %vm1661_vm2, %v4069_v30  ;;  %v5659_v30 = vadd.f32 %v5658_v16, %v5657_v58  ;;  %v5653_v62 = vrot.slane %v5652_v50, 1  ;;  %v2466_v10 = vmax.f32 %v2464_v2, %v2465_v61  ;;  %v10854_v2 = vld [vmem:[#allocation53_spill] sm:$0xff] }
 0x53d   :  { %v5664_v44 = vadd.f32 %v5663_v24, %v5662_v63  ;;  %v2471_v63 = vmax.f32 %v2469_v17, %v2470_v48  ;;  %v5639_v24 = vrot.slane %v5638_v57, 1  ;;  %v5633_v17 = vadd.f32 %v5632_v59, %v5631_v55  ;;  %v7073_v48 = vpop.eup %7072 }
 0x53e   :  { %v2477_v32 = vrot.slane %v2476_v25, 2  ;;  %v2459_v55 = vmax.f32 %v2457_v22, %v2458_v0  ;;  %v5654_v49 = vadd.f32 %v5653_v62, %v5652_v50  ;;  %v10315_v50 = vadd.f32 %v10077_v54, %v10854_v2 }
 0x53f   :  { %v5665_v7 = vrot.slane %v5664_v44, 2  ;;  %v4761_v15 = vpop.f32.mrf.mxu2  ;;  %v2472_v3 = vrot.slane %v2471_v63, 1  ;;  %v5640_v26 = vadd.f32 %v5639_v24, %v5638_v57  ;;  %v6167_v41 = vsel %vm6090_vm4, %v5633_v17, %v5626_v1 }
 0x540   :  { %v5019_v4 = vmul.f32 %v10212_v43, %v4761_v15  ;;  %v5660_v43 = vrot.slane %v5659_v30, 1  ;;  %v4071_v15 = vmul.f32 %v7073_v48, %v10141_v37  ;;  %v2478_v19 = vmax.f32 %v2476_v25, %v2477_v32  ;;  %v7075_v25 = vpop.eup %7074 }
 0x541   :  { %v5666_v60 = vadd.f32 %v5665_v7, %v5664_v44  ;;  %v2473_v29 = vmax.f32 %v2471_v63, %v2472_v3  ;;  %v6168_v35 = vsel %vm6092_vm5, %v5640_v26, %v6167_v41  ;;  %v2671_v22 = vsub.f32 %v10227_v52, %v2459_v55  ;;  %v10335_v61 = vpop.eup %7076 }
 0x542   :  { %v5669_v34 = vsel %vm739_vm1, %v5019_v4, 0.0  ;;  %v5661_v7 = vadd.f32 %v5660_v43, %v5659_v30  ;;  %v6169_v59 = vsel %vm6094_vm6, %v5647_v42, %v6168_v35  ;;  %v2672_v30 = vsub.f32 %v10239_v56, %v2466_v10 }
 0x543   :  { %v5670_v40 = vrot.slane %v5669_v34, 4  ;;  %v5667_v13 = vrot.slane %v5666_v60, 1  ;;  %v6170_v63 = vsel %vm6096_vm7, %v5654_v49, %v6169_v59  ;;  %7078 = vpow2.f32 %v2910_v39 }
 0x544   :  { %6590 = vmatmul.msk.f32.gmra.mxu2 %vm1661_vm2, %v4070_v53  ;;  %v6171_v37 = vsel %vm6098_vm8, %v5661_v7, %v6170_v63  ;;  %v2673_v53 = vsub.f32 %v10254_v23, %v2473_v29  ;;  %v2479_v54 = vrot.slane %v2478_v19, 1  ;;  %v3713_v56 = vrot.slane %v10295_v46, 4 }
 0x545   :  { %v5671_v58 = vadd.f32 %v5670_v40, %v5669_v34  ;;  %v5668_v57 = vadd.f32 %v5667_v13, %v5666_v60  ;;  %v10855_v60 = vrot.slane %v10245_v21, 1  ;;  %v2912_v40 = vmul.f32 1.442695, %v2671_v22  ;;  %v10856_v13 = vld [vmem:[#allocation54_spill] sm:$0xff] }
 0x546   :  { %v2481_v11 = vsel %vm1661_vm2, %v10315_v50, -inf  ;;  %v3708_v23 = vrot.slane %v10276_v12, 2  ;;  %v2914_v0 = vmul.f32 1.442695, %v2672_v30  ;;  %v2916_v62 = vmul.f32 1.442695, %v2673_v53 }
 0x547   :  { %v5672_v16 = vrot.slane %v5671_v58, 2  ;;  %v10306_v44 = vpop.f32.mrf.mxu2  ;;  %v3697_v34 = vadd.f32 %v10855_v60, %v10245_v21  ;;  %v6172_v52 = vsel %vm6100_vm9, %v5668_v57, %v6171_v37  ;;  %v3703_v21 = vrot.slane %v10274_v33, 1 }
 0x548   :  { %v4072_v17 = vmul.f32 %v7075_v25, %v10158_v38  ;;  %v2480_v43 = vmax.f32 %v2478_v19, %v2479_v54  ;;  %v3714_v31 = vadd.f32 %v3713_v56, %v10295_v46  ;;  %v3709_v26 = vadd.f32 %v3708_v23, %v10276_v12 }
 0x549   :  { %v5673_v20 = vadd.f32 %v5672_v16, %v5671_v58  ;;  %7080 = vrcp.f32 %v3697_v34  ;;  %v2482_v58 = vrot.slane %v2481_v11, 4  ;;  %v10341_v3 = vpop.eup %7078  ;;  %v10346_v48 = vadd.f32 %v10115_v8, %v10856_v13  ;;  %v10859_v13 = vld [vmem:[#allocation15_spill] sm:$0xff] }
 0x54a   :  { %7082 = vpow2.f32 %v2912_v40  ;;  %v3704_v38 = vadd.f32 %v3703_v21, %v10274_v33  ;;  %v3719_v32 = vsel %vm1661_vm2, %v10335_v61, 0.0  ;;  %v2674_v1 = vsub.f32 %v10280_v14, %v2480_v43 }
 0x54b   :  { %v5674_v4 = vrot.slane %v5673_v20, 1  ;;  %7084 = vpow2.f32 %v2914_v0  ;;  %v2483_v42 = vmax.f32 %v2481_v11, %v2482_v58  ;;  %v3715_v12 = vrot.slane %v3714_v31, 2 }
 0x54c   :  { %6591 = vmatmul.msk.f32.gmra.mxu2 %vm1661_vm2, %v4071_v15  ;;  %7086 = vpow2.f32 %v2916_v62  ;;  %v3726_v36 = vsel %vm1661_vm2, %v10341_v3, 0.0  ;;  %v3710_v8 = vrot.slane %v3709_v26, 1  ;;  %v3720_v55 = vrot.slane %v3719_v32, 4 }
 0x54d   :  { %v5675_v24 = vadd.f32 %v5674_v4, %v5673_v20  ;;  %v2488_v33 = vsel %vm1661_vm2, %v10346_v48, -inf  ;;  %7088 = vrcp.f32 %v3704_v38  ;;  %v3727_v14 = vrot.slane %v3726_v36, 4 }
 0x54e   :  { %v2918_v7 = vmul.f32 1.442695, %v2674_v1  ;;  %v2484_v20 = vrot.slane %v2483_v42, 2  ;;  %v3716_v35 = vadd.f32 %v3715_v12, %v3714_v31  ;;  %v2489_v57 = vrot.slane %v2488_v33, 4 }
 0x54f   :  { %v10326_v45 = vpop.f32.mrf.mxu2  ;;  %v6173_v6 = vsel %vm6102_vm10, %v5675_v24, %v6172_v52  ;;  %v7081_v46 = vpop.eup %7080  ;;  %v3721_v15 = vadd.f32 %v3720_v55, %v3719_v32  ;;  %v3711_v39 = vadd.f32 %v3710_v8, %v3709_v26  ;;  %v3728_v59 = vadd.f32 %v3727_v14, %v3726_v36  ;;  %v10858_v26 = vld [vmem:[#allocation56_spill] sm:$0xff] }
 0x550   :  { %6624 = vmatmul.msk.f32.gmra.mxu3 %vm739_vm1, %v6173_v6  ;;  %v10359_v10 = vpop.eup %7082  ;;  %v4073_v49 = vmul.f32 %v7081_v46, %v10169_v51  ;;  %7090 = vpow2.f32 %v2918_v7  ;;  %v2485_v2 = vmax.f32 %v2483_v42, %v2484_v20  ;;  %v3717_v30 = vrot.slane %v3716_v35, 1  ;;  %v10857_v6 = vld [vmem:[#allocation55_spill] sm:$0xff]  ;;  %v10391_v42 = vpop.permute.xlu0 %4906  ;;  %v10860_v55 = vld [vmem:[#allocation16_spill] sm:$0xff] }
 0x551   :  { %v10362_v41 = vpop.eup %7084  ;;  %v3733_v19 = vsel %vm1661_vm2, %v10359_v10, 0.0  ;;  %v2490_v24 = vmax.f32 %v2488_v33, %v2489_v57  ;;  %v3722_v37 = vrot.slane %v3721_v15, 2  ;;  %7092 = vrcp.f32 %v3711_v39 }
 0x552   :  { %v10364_v29 = vpop.eup %7086  ;;  %v3740_v4 = vsel %vm1661_vm2, %v10362_v41, 0.0  ;;  %v3734_v60 = vrot.slane %v3733_v19, 4  ;;  %v3729_v25 = vrot.slane %v3728_v59, 2  ;;  %v2486_v54 = vrot.slane %v2485_v2, 1 }
 0x553   :  { %v7089_v51 = vpop.eup %7088  ;;  %v3747_v22 = vsel %vm1661_vm2, %v10364_v29, 0.0  ;;  %v3741_v34 = vrot.slane %v3740_v4, 4  ;;  %v10376_v56 = vadd.f32 %v10179_v18, %v10857_v6  ;;  %v2491_v40 = vrot.slane %v2490_v24, 2 }
 0x554   :  { %6592 = vmatmul.msk.f32.gmra.mxu2 %vm1661_vm2, %v4072_v17  ;;  %v3748_v53 = vrot.slane %v3747_v22, 4  ;;  %v4074_v52 = vmul.f32 %v7089_v51, %v10172_v47  ;;  %v3723_v21 = vadd.f32 %v3722_v37, %v3721_v15  ;;  %v3735_v23 = vadd.f32 %v3734_v60, %v3733_v19  ;;  %v10861_v19 = vld [vmem:[#allocation57_spill] sm:$0xff] }
 0x555   :  { %v6282_v28 = vpop.f32.mrf.mxu3  ;;  %v3742_v0 = vadd.f32 %v3741_v34, %v3740_v4  ;;  %v3718_v62 = vadd.f32 %v3717_v30, %v3716_v35  ;;  %v10381_v58 = vadd.f32 %v3729_v25, %v3728_v59  ;;  %v2487_v47 = vmax.f32 %v2485_v2, %v2486_v54  ;;  %v10862_v4 = vld [vmem:[#allocation17_spill] sm:$0xff] }
 0x556   :  { %v6283_v27 = vadd.f32 %v10151_v5, %v6282_v28  ;;  %v10379_v11 = vpop.eup %7090  ;;  %v3749_v17 = vadd.f32 %v3748_v53, %v3747_v22  ;;  %v2495_v28 = vsel %vm1661_vm2, %v10376_v56, -inf  ;;  %v10389_v38 = vadd.f32 %v10859_v13, %v10858_v26 }
 0x557   :  { %v10353_v16 = vpop.f32.mrf.mxu2  ;;  %v7093_v43 = vpop.eup %7092  ;;  %v3754_v18 = vsel %vm1661_vm2, %v10379_v11, 0.0  ;;  %v3724_v32 = vrot.slane %v3723_v21, 1  ;;  %v3736_v46 = vrot.slane %v3735_v23, 2  ;;  %v3743_v1 = vrot.slane %v3742_v0, 2 }
 0x558   :  { %6314 = vst.msk [vmem:[#allocation5 + $0x40] sm:$0xff] %vm63_vm0, %v6283_v27  ;;  %v2492_v27 = vmax.f32 %v2490_v24, %v2491_v40  ;;  %7094 = vrcp.f32 %v3718_v62  ;;  %v3750_v12 = vrot.slane %v3749_v17, 2  ;;  %v2496_v36 = vrot.slane %v2495_v28, 4 }
 0x559   :  { %v5021_v8 = vmul.f32 %v10391_v42, %v10326_v45  ;;  %v4075_v33 = vmul.f32 %v7093_v43, %v10860_v55  ;;  %v3755_v14 = vrot.slane %v3754_v18, 4  ;;  %v2675_v7 = vsub.f32 %v10315_v50, %v2487_v47 }
 0x55a   :  { %v5022_v20 = vmul.f32 %v10391_v42, %v10353_v16  ;;  %v2493_v35 = vrot.slane %v2492_v27, 1  ;;  %v2502_v57 = vsel %vm1661_vm2, %v10389_v38, -inf  ;;  %v5020_v15 = vmul.f32 %v10391_v42, %v10306_v44 }
 0x55b   :  { %v10406_v45 = vadd.f32 %v3736_v46, %v3735_v23  ;;  %v10410_v51 = vadd.f32 %v10862_v4, %v10861_v19  ;;  %v3725_v16 = vadd.f32 %v3724_v32, %v3723_v21  ;;  %v10413_v59 = vadd.f32 %v3743_v1, %v3742_v0 }
 0x55c   :  { %6593 = vmatmul.msk.f32.gmra.mxu2 %vm1661_vm2, %v4073_v49  ;;  %v3731_v49 = vrot.slane %v10381_v58, 1  ;;  %v10415_v22 = vadd.f32 %v3750_v12, %v3749_v17  ;;  %v2497_v2 = vmax.f32 %v2495_v28, %v2496_v36  ;;  %v5683_v44 = vsel %vm739_vm1, %v5021_v8, 0.0 }
 0x55d   :  { %v2920_v24 = vmul.f32 1.442695, %v2675_v7  ;;  %v2503_v37 = vrot.slane %v2502_v57, 4  ;;  %v5690_v60 = vsel %vm739_vm1, %v5022_v20, 0.0  ;;  %v2494_v53 = vmax.f32 %v2492_v27, %v2493_v35 }
 0x55e   :  { %v7095_v30 = vpop.eup %7094  ;;  %v2509_v6 = vsel %vm1661_vm2, %v10410_v51, -inf  ;;  %v5684_v40 = vrot.slane %v5683_v44, 4  ;;  %7096 = vrcp.f32 %v3725_v16  ;;  %v2498_v23 = vrot.slane %v2497_v2, 2 }
 0x55f   :  { %v4773_v63 = vpop.f32.mrf.mxu2  ;;  %v5691_v0 = vrot.slane %v5690_v60, 4  ;;  %v4076_v17 = vmul.f32 %v7095_v30, %v10283_v9  ;;  %v2504_v47 = vmax.f32 %v2502_v57, %v2503_v37  ;;  %7098 = vpow2.f32 %v2920_v24 }
 0x560   :  { %v5023_v39 = vmul.f32 %v10391_v42, %v4773_v63  ;;  %v3756_v63 = vadd.f32 %v3755_v14, %v3754_v18  ;;  %v3738_v18 = vrot.slane %v10406_v45, 1  ;;  %v2510_v27 = vrot.slane %v2509_v6, 4 }
 0x561   :  { %v2676_v13 = vsub.f32 %v10346_v48, %v2494_v53  ;;  %v5685_v32 = vadd.f32 %v5684_v40, %v5683_v44  ;;  %v3732_v1 = vadd.f32 %v3731_v49, %v10381_v58  ;;  %v3745_v12 = vrot.slane %v10413_v59, 1  ;;  %v10864_v48 = vld [vmem:[#allocation18_spill] sm:$0xff] }
 0x562   :  { %v5697_v25 = vsel %vm739_vm1, %v5023_v39, 0.0  ;;  %v3757_v43 = vrot.slane %v3756_v63, 2  ;;  %v3752_v9 = vrot.slane %v10415_v22, 1  ;;  %v2499_v36 = vmax.f32 %v2497_v2, %v2498_v23 }
 0x563   :  { %v5692_v8 = vadd.f32 %v5691_v0, %v5690_v60  ;;  %v2505_v14 = vrot.slane %v2504_v47, 2  ;;  %v2511_v57 = vmax.f32 %v2509_v6, %v2510_v27  ;;  %v2922_v49 = vmul.f32 1.442695, %v2676_v13 }
 0x564   :  { %6594 = vmatmul.msk.f32.gmra.mxu2 %vm1661_vm2, %v4074_v52  ;;  %v5676_v52 = vsel %vm739_vm1, %v5020_v15, 0.0  ;;  %v7097_v55 = vpop.eup %7096  ;;  %v10863_v15 = vld [vmem:[#allocation8_spill] sm:$0xff]  ;;  %v5686_v4 = vrot.slane %v5685_v32, 2  ;;  %7100 = vrcp.f32 %v3732_v1  ;;  %v2500_v2 = vrot.slane %v2499_v36, 1 }
 0x565   :  { %v5677_v28 = vrot.slane %v5676_v52, 4  ;;  %v10437_v39 = vadd.f32 %v10864_v48, %v10863_v15  ;;  %v10440_v16 = vpop.eup %7098  ;;  %v5693_v44 = vrot.slane %v5692_v8, 2  ;;  %v2506_v24 = vmax.f32 %v2504_v47, %v2505_v14 }
 0x566   :  { %v2512_v53 = vrot.slane %v2511_v57, 2  ;;  %7102 = vpow2.f32 %v2922_v49 }
 0x567   :  { %v4776_v31 = vpop.f32.mrf.mxu2  ;;  %v5678_v7 = vadd.f32 %v5677_v28, %v5676_v52  ;;  %v2516_v52 = vsel %vm1661_vm2, %v10437_v39, -inf  ;;  %v2507_v28 = vrot.slane %v2506_v24, 1 }
 0x568   :  { %v5024_v50 = vmul.f32 %v10391_v42, %v4776_v31  ;;  %v5698_v31 = vrot.slane %v5697_v25, 4  ;;  %v2517_v1 = vrot.slane %v2516_v52, 4 }
 0x569   :  { %v5679_v37 = vrot.slane %v5678_v7, 2 }
 0x56a   :  { %v5704_v21 = vsel %vm739_vm1, %v5024_v50, 0.0  ;;  %v5699_v20 = vadd.f32 %v5698_v31, %v5697_v25  ;;  %v10865_v25 = vld [vmem:[#allocation58_spill] sm:$0xff]  ;;  %v7101_v47 = vpop.eup %7100 }
 0x56b   :  { %v5705_v26 = vrot.slane %v5704_v21, 4  ;;  %v5680_v31 = vadd.f32 %v5679_v37, %v5678_v7  ;;  %v4078_v7 = vmul.f32 %v7101_v47, %v10341_v3  ;;  %v3746_v3 = vadd.f32 %v3745_v12, %v10413_v59 }
 0x56c   :  { %6595 = vmatmul.msk.f32.gmra.mxu2 %vm1661_vm2, %v4075_v33  ;;  %v10433_v33 = vadd.f32 %v3757_v43, %v3756_v63  ;;  %v4077_v63 = vmul.f32 %v7097_v55, %v10335_v61  ;;  %v5700_v60 = vrot.slane %v5699_v20, 2  ;;  %v3739_v61 = vadd.f32 %v3738_v18, %v10406_v45 }
 0x56d   :  { %v5706_v19 = vadd.f32 %v5705_v26, %v5704_v21  ;;  %v5687_v21 = vadd.f32 %v5686_v4, %v5685_v32  ;;  %v5694_v43 = vadd.f32 %v5693_v44, %v5692_v8  ;;  %v5681_v15 = vrot.slane %v5680_v31, 1 }
 0x56e   :  { %v5701_v27 = vadd.f32 %v5700_v60, %v5699_v20  ;;  %7104 = vrcp.f32 %v3739_v61 }
 0x56f   :  { %v4779_v34 = vpop.f32.mrf.mxu2  ;;  %v5707_v40 = vrot.slane %v5706_v19, 2  ;;  %v5688_v18 = vrot.slane %v5687_v21, 1  ;;  %7106 = vrcp.f32 %v3746_v3  ;;  %v10868_v3 = vld [vmem:[#allocation59_spill] sm:$0xff] }
 0x570   :  { %v5025_v54 = vmul.f32 %v10391_v42, %v4779_v34 }
 0x571   :  { %v5708_v55 = vadd.f32 %v5707_v40, %v5706_v19  ;;  %v10460_v19 = vpop.eup %7102 }
 0x572   :  { %v5711_v62 = vsel %vm739_vm1, %v5025_v54, 0.0  ;;  %v10866_v54 = vld [vmem:[#allocation19_spill] sm:$0xff] }
 0x573   :  { %v5712_v46 = vrot.slane %v5711_v62, 4  ;;  %v10448_v6 = vadd.f32 %v10866_v54, %v10865_v25  ;;  %v5709_v4 = vrot.slane %v5708_v55, 1 }
 0x574   :  { %6596 = vmatmul.msk.f32.gmra.mxu2 %vm1661_vm2, %v4076_v17  ;;  %v2501_v17 = vmax.f32 %v2499_v36, %v2500_v2  ;;  %v7105_v60 = vpop.eup %7104 }
 0x575   :  { %v5713_v50 = vadd.f32 %v5712_v46, %v5711_v62  ;;  %v3761_v62 = vsel %vm1661_vm2, %v10440_v16, 0.0  ;;  %v2513_v46 = vmax.f32 %v2511_v57, %v2512_v53  ;;  %v2523_v45 = vsel %vm1661_vm2, %v10448_v6, -inf }
 0x576   :  { %v2677_v20 = vsub.f32 %v10376_v56, %v2501_v17  ;;  %v5702_v57 = vrot.slane %v5701_v27, 1  ;;  %v2524_v49 = vrot.slane %v2523_v45, 4  ;;  %v5682_v53 = vadd.f32 %v5681_v15, %v5680_v31 }
 0x577   :  { %v4782_v35 = vpop.f32.mrf.mxu2  ;;  %v5714_v23 = vrot.slane %v5713_v50, 2  ;;  %v2514_v56 = vrot.slane %v2513_v46, 1  ;;  %v4079_v47 = vmul.f32 %v7105_v60, %v10359_v10 }
 0x578   :  { %v5026_v58 = vmul.f32 %v10391_v42, %v4782_v35  ;;  %v5695_v35 = vrot.slane %v5694_v43, 1 }
 0x579   :  { %v5715_v14 = vadd.f32 %v5714_v23, %v5713_v50  ;;  %v5689_v50 = vadd.f32 %v5688_v18, %v5687_v21  ;;  %v2525_v21 = vmax.f32 %v2523_v45, %v2524_v49  ;;  %v5710_v23 = vadd.f32 %v5709_v4, %v5708_v55 }
 0x57a   :  { %v5718_v30 = vsel %vm739_vm1, %v5026_v58, 0.0  ;;  %v2518_v58 = vmax.f32 %v2516_v52, %v2517_v1  ;;  %v2515_v12 = vmax.f32 %v2513_v46, %v2514_v56  ;;  %v10867_v1 = vld [vmem:[#allocation9_spill] sm:$0xff]  ;;  %v3753_v45 = vadd.f32 %v3752_v9, %v10415_v22 }
 0x57b   :  { %v5719_v34 = vrot.slane %v5718_v30, 4  ;;  %v5716_v2 = vrot.slane %v5715_v14, 1  ;;  %v3768_v18 = vsel %vm1661_vm2, %v10460_v19, 0.0  ;;  %v3759_v9 = vrot.slane %v10433_v33, 1 }
 0x57c   :  { %6597 = vmatmul.msk.f32.gmra.mxu2 %vm1661_vm2, %v4077_v63  ;;  %v5696_v63 = vadd.f32 %v5695_v35, %v5694_v43  ;;  %v2519_v40 = vrot.slane %v2518_v58, 2 }
 0x57d   :  { %v5720_v0 = vadd.f32 %v5719_v34, %v5718_v30  ;;  %v3762_v30 = vrot.slane %v3761_v62, 4  ;;  %v2924_v34 = vmul.f32 1.442695, %v2677_v20  ;;  %v5717_v61 = vadd.f32 %v5716_v2, %v5715_v14 }
 0x57e   :  { %v2679_v14 = vsub.f32 %v10410_v51, %v2515_v12  ;;  %v3769_v51 = vrot.slane %v3768_v18, 4  ;;  %v3760_v60 = vadd.f32 %v3759_v9, %v10433_v33 }
 0x57f   :  { %v5721_v26 = vrot.slane %v5720_v0, 2  ;;  %v4785_v13 = vpop.f32.mrf.mxu2  ;;  %7108 = vpow2.f32 %v2924_v34 }
 0x580   :  { %v5027_v32 = vmul.f32 %v10391_v42, %v4785_v13  ;;  %v2508_v42 = vmax.f32 %v2506_v24, %v2507_v28  ;;  %v5703_v24 = vadd.f32 %v5702_v57, %v5701_v27  ;;  %v3763_v28 = vadd.f32 %v3762_v30, %v3761_v62  ;;  %v7202_v13 = vld [vmem:[%s10706_s4 + $0x20] sm:$0xff] }
 0x581   :  { %v5722_v36 = vadd.f32 %v5721_v26, %v5720_v0  ;;  %v6174_v0 = vsel %vm6090_vm4, %v5689_v50, %v5682_v53  ;;  %v2520_v26 = vmax.f32 %v2518_v58, %v2519_v40  ;;  %v10477_v55 = vadd.f32 %v7202_v13, %v10867_v1 }
 0x582   :  { %v5725_v8 = vsel %vm739_vm1, %v5027_v32, 0.0  ;;  %v2678_v54 = vsub.f32 %v10389_v38, %v2508_v42  ;;  %v6175_v17 = vsel %vm6092_vm5, %v5696_v63, %v6174_v0  ;;  %v2526_v32 = vrot.slane %v2525_v21, 2 }
 0x583   :  { %v5726_v48 = vrot.slane %v5725_v8, 4  ;;  %v5723_v37 = vrot.slane %v5722_v36, 1  ;;  %v6176_v27 = vsel %vm6094_vm6, %v5703_v24, %v6175_v17  ;;  %v3764_v20 = vrot.slane %v3763_v28, 2 }
 0x584   :  { %6598 = vmatmul.msk.f32.gmra.mxu2 %vm1661_vm2, %v4078_v7  ;;  %v2926_v38 = vmul.f32 1.442695, %v2678_v54  ;;  %v6177_v46 = vsel %vm6096_vm7, %v5710_v23, %v6176_v27  ;;  %v2521_v15 = vrot.slane %v2520_v26, 1  ;;  %v2530_v57 = vsel %vm1661_vm2, %v10477_v55, -inf }
 0x585   :  { %v5727_v44 = vadd.f32 %v5726_v48, %v5725_v8  ;;  %v5724_v43 = vadd.f32 %v5723_v37, %v5722_v36  ;;  %v6178_v62 = vsel %vm6098_vm8, %v5717_v61, %v6177_v46  ;;  %v7107_v36 = vpop.eup %7106  ;;  %v2527_v48 = vmax.f32 %v2525_v21, %v2526_v32 }
 0x586   :  { %7110 = vpow2.f32 %v2926_v38  ;;  %v10495_v22 = vpop.eup %7108  ;;  %v2928_v42 = vmul.f32 1.442695, %v2679_v14  ;;  %v4080_v58 = vmul.f32 %v7107_v36, %v10362_v41  ;;  %v2531_v49 = vrot.slane %v2530_v57, 4 }
 0x587   :  { %v5728_v52 = vrot.slane %v5727_v44, 2  ;;  %v10466_v25 = vpop.f32.mrf.mxu2  ;;  %v6179_v35 = vsel %vm6100_vm9, %v5724_v43, %v6178_v62  ;;  %7112 = vrcp.f32 %v3753_v45  ;;  %v3765_v50 = vadd.f32 %v3764_v20, %v3763_v28  ;;  %v10869_v28 = vld [vmem:[#allocation60_spill] sm:$0xff] }
 0x588   :  { %v2522_v2 = vmax.f32 %v2520_v26, %v2521_v15  ;;  %v3770_v63 = vadd.f32 %v3769_v51, %v3768_v18  ;;  %v3775_v37 = vsel %vm1661_vm2, %v10495_v22, 0.0  ;;  %v2528_v41 = vrot.slane %v2527_v48, 1  ;;  %v7205_v51 = vld [vmem:[%s10706_s4 + $0x38] sm:$0xff] }
 0x589   :  { %v5729_v59 = vadd.f32 %v5728_v52, %v5727_v44  ;;  %v7203_v44 = vld [vmem:[%s10706_s4 + $0x28] sm:$0xff]  ;;  %7114 = vpow2.f32 %v2928_v42  ;;  %v2532_v24 = vmax.f32 %v2530_v57, %v2531_v49  ;;  %v3776_v54 = vrot.slane %v3775_v37, 4 }
 0x58a   :  { %v10503_v30 = vadd.f32 %v7203_v44, %v10868_v3  ;;  %v3766_v21 = vrot.slane %v3765_v50, 1  ;;  %v3771_v23 = vrot.slane %v3770_v63, 2  ;;  %v2529_v0 = vmax.f32 %v2527_v48, %v2528_v41  ;;  %v10870_v48 = vld [vmem:[#allocation10_spill] sm:$0xff]  ;;  %v10547_v41 = vpop.permute.xlu1 %4908 }
 0x58b   :  { %v5730_v31 = vrot.slane %v5729_v59, 1  ;;  %7116 = vrcp.f32 %v3760_v60  ;;  %v3777_v43 = vadd.f32 %v3776_v54, %v3775_v37  ;;  %v10541_v42 = vadd.f32 %v7205_v51, %v10870_v48 }
 0x58c   :  { %6599 = vmatmul.msk.f32.gmra.mxu2 %vm1661_vm2, %v4079_v47  ;;  %v10510_v34 = vpop.eup %7110  ;;  %v2537_v40 = vsel %vm1661_vm2, %v10503_v30, -inf  ;;  %v3772_v27 = vadd.f32 %v3771_v23, %v3770_v63  ;;  %v2681_v26 = vsub.f32 %v10448_v6, %v2529_v0 }
 0x58d   :  { %v5731_v10 = vadd.f32 %v5730_v31, %v5729_v59  ;;  %v7113_v53 = vpop.eup %7112  ;;  %v3782_v33 = vsel %vm1661_vm2, %v10510_v34, 0.0  ;;  %v2533_v59 = vrot.slane %v2532_v24, 2  ;;  %v2538_v12 = vrot.slane %v2537_v40, 4 }
 0x58e   :  { %v4081_v61 = vmul.f32 %v7113_v53, %v10364_v29  ;;  %v3783_v38 = vrot.slane %v3782_v33, 4  ;;  %v3767_v29 = vadd.f32 %v3766_v21, %v3765_v50  ;;  %v3778_v62 = vrot.slane %v3777_v43, 2 }
 0x58f   :  { %v10489_v8 = vpop.f32.mrf.mxu2  ;;  %v6180_v7 = vsel %vm6102_vm10, %v5731_v10, %v6179_v35  ;;  %v10521_v17 = vpop.eup %7114  ;;  %v2534_v46 = vmax.f32 %v2532_v24, %v2533_v59  ;;  %v2539_v32 = vmax.f32 %v2537_v40, %v2538_v12  ;;  %v3773_v18 = vrot.slane %v3772_v27, 1 }
 0x590   :  { %6625 = vmatmul.msk.f32.gmra.mxu3 %vm739_vm1, %v6180_v7  ;;  %v3789_v1 = vsel %vm1661_vm2, %v10521_v17, 0.0  ;;  %v3784_v14 = vadd.f32 %v3783_v38, %v3782_v33  ;;  %v2932_v35 = vmul.f32 1.442695, %v2681_v26  ;;  %v3779_v57 = vadd.f32 %v3778_v62, %v3777_v43 }
 0x591   :  { %v7117_v13 = vpop.eup %7116  ;;  %v3790_v36 = vrot.slane %v3789_v1, 4  ;;  %v2535_v7 = vrot.slane %v2534_v46, 1  ;;  %v2540_v20 = vrot.slane %v2539_v32, 2  ;;  %v2551_v37 = vsel %vm1661_vm2, %v10541_v42, -inf }
 0x592   :  { %v4082_v6 = vmul.f32 %v7117_v13, %v10379_v11  ;;  %v3785_v9 = vrot.slane %v3784_v14, 2  ;;  %v5029_v24 = vmul.f32 %v10547_v41, %v10489_v8  ;;  %v2552_v33 = vrot.slane %v2551_v37, 4 }
 0x593   :  { %v6285_v4 = vpop.f32.mrf.mxu3  ;;  %v2536_v50 = vmax.f32 %v2534_v46, %v2535_v7 }
 0x594   :  { %v6286_v56 = vadd.f32 %v10151_v5, %v6285_v4  ;;  %6600 = vmatmul.msk.f32.gmra.mxu2 %vm1661_vm2, %v4080_v58  ;;  %v2680_v5 = vsub.f32 %v10437_v39, %v2522_v2  ;;  %v7204_v39 = vld [vmem:[%s10706_s4 + $0x30] sm:$0xff]  ;;  %v3774_v58 = vadd.f32 %v3773_v18, %v3772_v27  ;;  %v3791_v4 = vadd.f32 %v3790_v36, %v3789_v1 }
 0x595   :  { %v10527_v31 = vadd.f32 %v7204_v39, %v10869_v28  ;;  %v2541_v2 = vmax.f32 %v2539_v32, %v2540_v20  ;;  %v3786_v63 = vadd.f32 %v3785_v9, %v3784_v14  ;;  %v2682_v40 = vsub.f32 %v10477_v55, %v2536_v50 }
 0x596   :  { %6315 = vst.msk [vmem:[#allocation5 + $0x48] sm:$0xff] %vm63_vm0, %v6286_v56  ;;  %v2930_v47 = vmul.f32 1.442695, %v2680_v5  ;;  %v3780_v56 = vrot.slane %v3779_v57, 1  ;;  %v3792_v60 = vrot.slane %v3791_v4, 2 }
 0x597   :  { %v10513_v52 = vpop.f32.mrf.mxu2  ;;  %v2544_v45 = vsel %vm1661_vm2, %v10527_v31, -inf  ;;  %v2542_v21 = vrot.slane %v2541_v2, 1  ;;  %v3787_v43 = vrot.slane %v3786_v63, 1  ;;  %v2934_v28 = vmul.f32 1.442695, %v2682_v40 }
 0x598   :  { %7118 = vpow2.f32 %v2930_v47  ;;  %v2545_v15 = vrot.slane %v2544_v45, 4  ;;  %v5030_v0 = vmul.f32 %v10547_v41, %v10513_v52  ;;  %v3781_v12 = vadd.f32 %v3780_v56, %v3779_v57 }
 0x599   :  { %7120 = vrcp.f32 %v3767_v29  ;;  %v10564_v47 = vadd.f32 %v3792_v60, %v3791_v4  ;;  %v5739_v52 = vsel %vm739_vm1, %v5029_v24, 0.0  ;;  %v2543_v27 = vmax.f32 %v2541_v2, %v2542_v21 }
 0x59a   :  { %7122 = vpow2.f32 %v2932_v35  ;;  %v2546_v44 = vmax.f32 %v2544_v45, %v2545_v15  ;;  %v5746_v38 = vsel %vm739_vm1, %v5030_v0, 0.0  ;;  %v2553_v29 = vmax.f32 %v2551_v37, %v2552_v33 }
 0x59b   :  { %7124 = vrcp.f32 %v3774_v58  ;;  %v5747_v18 = vrot.slane %v5746_v38, 4  ;;  %v2683_v36 = vsub.f32 %v10503_v30, %v2543_v27  ;;  %v3788_v58 = vadd.f32 %v3787_v43, %v3786_v63 }
 0x59c   :  { %6601 = vmatmul.msk.f32.gmra.mxu2 %vm1661_vm2, %v4081_v61  ;;  %v2547_v23 = vrot.slane %v2546_v44, 2  ;;  %v5028_v61 = vmul.f32 %v10547_v41, %v10466_v25  ;;  %7126 = vrcp.f32 %v3781_v12  ;;  %v2554_v15 = vrot.slane %v2553_v29, 2 }
 0x59d   :  { %7128 = vpow2.f32 %v2934_v28  ;;  %v3794_v2 = vrot.slane %v10564_v47, 1 }
 0x59e   :  { %v10543_v49 = vpop.eup %7118  ;;  %v2548_v25 = vmax.f32 %v2546_v44, %v2547_v23  ;;  %v5732_v13 = vsel %vm739_vm1, %v5028_v61, 0.0  ;;  %v2555_v37 = vmax.f32 %v2553_v29, %v2554_v15  ;;  %7130 = vrcp.f32 %v3788_v58 }
 0x59f   :  { %v4797_v10 = vpop.f32.mrf.mxu2  ;;  %v7121_v11 = vpop.eup %7120  ;;  %v3796_v53 = vsel %vm1661_vm2, %v10543_v49, 0.0  ;;  %v3795_v27 = vadd.f32 %v3794_v2, %v10564_v47 }
 0x5a0   :  { %v4083_v54 = vmul.f32 %v7121_v11, %v10440_v16  ;;  %v10554_v5 = vpop.eup %7122  ;;  %v5031_v59 = vmul.f32 %v10547_v41, %v4797_v10  ;;  %v3797_v8 = vrot.slane %v3796_v53, 4  ;;  %v5740_v10 = vrot.slane %v5739_v52, 4 }
 0x5a1   :  { %v3803_v55 = vsel %vm1661_vm2, %v10554_v5, 0.0  ;;  %v7125_v39 = vpop.eup %7124  ;;  %v2549_v20 = vrot.slane %v2548_v25, 1  ;;  %v5748_v11 = vadd.f32 %v5747_v18, %v5746_v38  ;;  %v2556_v43 = vrot.slane %v2555_v37, 1 }
 0x5a2   :  { %v5753_v1 = vsel %vm739_vm1, %v5031_v59, 0.0  ;;  %v3798_v32 = vadd.f32 %v3797_v8, %v3796_v53  ;;  %v3804_v45 = vrot.slane %v3803_v55, 4  ;;  %v4084_v35 = vmul.f32 %v7125_v39, %v10460_v19  ;;  %v7127_v50 = vpop.eup %7126 }
 0x5a3   :  { %v5754_v7 = vrot.slane %v5753_v1, 4  ;;  %v5741_v51 = vadd.f32 %v5740_v10, %v5739_v52  ;;  %v2936_v19 = vmul.f32 1.442695, %v2683_v36  ;;  %v2550_v56 = vmax.f32 %v2548_v25, %v2549_v20  ;;  %v10580_v24 = vpop.eup %7128 }
 0x5a4   :  { %6602 = vmatmul.msk.f32.gmra.mxu2 %vm1661_vm2, %v4082_v6  ;;  %v5733_v6 = vrot.slane %v5732_v13, 4  ;;  %v3799_v9 = vrot.slane %v3798_v32, 2  ;;  %v3805_v4 = vadd.f32 %v3804_v45, %v3803_v55  ;;  %v5749_v23 = vrot.slane %v5748_v11, 2  ;;  %v7131_v38 = vpop.eup %7130 }
 0x5a5   :  { %v5742_v40 = vrot.slane %v5741_v51, 2  ;;  %v4085_v33 = vmul.f32 %v7127_v50, %v10495_v22  ;;  %7132 = vpow2.f32 %v2936_v19  ;;  %v2684_v12 = vsub.f32 %v10527_v31, %v2550_v56 }
 0x5a6   :  { %v5734_v44 = vadd.f32 %v5733_v6, %v5732_v13  ;;  %v3806_v63 = vrot.slane %v3805_v4, 2  ;;  %v5750_v22 = vadd.f32 %v5749_v23, %v5748_v11  ;;  %v2557_v10 = vmax.f32 %v2555_v37, %v2556_v43 }
 0x5a7   :  { %v4800_v3 = vpop.f32.mrf.mxu2  ;;  %v5743_v52 = vadd.f32 %v5742_v40, %v5741_v51  ;;  %7134 = vrcp.f32 %v3795_v27 }
 0x5a8   :  { %v5032_v16 = vmul.f32 %v10547_v41, %v4800_v3  ;;  %v5755_v3 = vadd.f32 %v5754_v7, %v5753_v1  ;;  %v5735_v61 = vrot.slane %v5734_v44, 2  ;;  %v3807_v18 = vadd.f32 %v3806_v63, %v3805_v4 }
 0x5a9   :  { %v5751_v47 = vrot.slane %v5750_v22, 1  ;;  %v4086_v7 = vmul.f32 %v7131_v38, %v10510_v34 }
 0x5aa   :  { %v5760_v62 = vsel %vm739_vm1, %v5032_v16, 0.0  ;;  %v5756_v59 = vrot.slane %v5755_v3, 2  ;;  %v3810_v16 = vsel %vm1661_vm2, %v10580_v24, 0.0  ;;  %v5736_v29 = vadd.f32 %v5735_v61, %v5734_v44 }
 0x5ab   :  { %v5761_v57 = vrot.slane %v5760_v62, 4  ;;  %v10590_v45 = vpop.eup %7132  ;;  %v5752_v2 = vadd.f32 %v5751_v47, %v5750_v22  ;;  %v3808_v44 = vrot.slane %v3807_v18, 1 }
 0x5ac   :  { %6603 = vmatmul.msk.f32.gmra.mxu2 %vm1661_vm2, %v4083_v54  ;;  %v3800_v54 = vadd.f32 %v3799_v9, %v3798_v32  ;;  %v5757_v13 = vadd.f32 %v5756_v59, %v5755_v3  ;;  %v2938_v32 = vmul.f32 1.442695, %v2684_v12  ;;  %v5737_v15 = vrot.slane %v5736_v29, 1 }
 0x5ad   :  { %v5762_v60 = vadd.f32 %v5761_v57, %v5760_v62  ;;  %v3817_v51 = vsel %vm1661_vm2, %v10590_v45, 0.0  ;;  %v7135_v34 = vpop.eup %7134 }
 0x5ae   :  { %v3801_v25 = vrot.slane %v3800_v54, 1  ;;  %v5758_v57 = vrot.slane %v5757_v13, 1  ;;  %7136 = vpow2.f32 %v2938_v32  ;;  %v5738_v3 = vadd.f32 %v5737_v15, %v5736_v29  ;;  %v10620_v32 = vld [vmem:[%s10705_s3] ss:$0 sm:$0xff]  ;;  %s7264_s3 = smov [#allocation5]  }
 0x5af   :  { %v4803_v26 = vpop.f32.mrf.mxu2  ;;  %v5763_v55 = vrot.slane %v5762_v60, 2  ;;  %v4087_v61 = vmul.f32 %v7135_v34, %v10521_v17  ;;  %s6326_s23 = sshll.u32 %s7264_s3, 4  ;;  %s6327_s23 = int_to_ptr.vmem [resolvable:$true] %s6326_s23 }
 0x5b0   :  { %v5033_v46 = vmul.f32 %v10547_v41, %v4803_v26  ;;  %v3811_v26 = vrot.slane %v3810_v16, 4  ;;  %v3802_v50 = vadd.f32 %v3801_v25, %v3800_v54 }
 0x5b1   :  { %v5764_v31 = vadd.f32 %v5763_v55, %v5762_v60 }
 0x5b2   :  { %v5767_v14 = vsel %vm739_vm1, %v5033_v46, 0.0  ;;  %v3812_v20 = vadd.f32 %v3811_v26, %v3810_v16  ;;  %7138 = vrcp.f32 %v3802_v50 }
 0x5b3   :  { %v5768_v48 = vrot.slane %v5767_v14, 4 }
 0x5b4   :  { %6604 = vmatmul.msk.f32.gmra.mxu2 %vm1661_vm2, %v4084_v35  ;;  %v3813_v60 = vrot.slane %v3812_v20, 2 }
 0x5b5   :  { %v5769_v21 = vadd.f32 %v5768_v48, %v5767_v14  ;;  %v5744_v14 = vrot.slane %v5743_v52, 1  ;;  %v5765_v48 = vrot.slane %v5764_v31, 1 }
 0x5b6   :  { %v3814_v16 = vadd.f32 %v3813_v60, %v3812_v20 }
 0x5b7   :  { %v4806_v30 = vpop.f32.mrf.mxu2  ;;  %v5770_v39 = vrot.slane %v5769_v21, 2  ;;  %v5745_v58 = vadd.f32 %v5744_v14, %v5743_v52 }
 0x5b8   :  { %v5034_v53 = vmul.f32 %v10547_v41, %v4806_v30  ;;  %v5759_v30 = vadd.f32 %v5758_v57, %v5757_v13  ;;  %v3815_v38 = vrot.slane %v3814_v16, 1 }
 0x5b9   :  { %v5771_v35 = vadd.f32 %v5770_v39, %v5769_v21  ;;  %v6181_v21 = vsel %vm6090_vm4, %v5745_v58, %v5738_v3  ;;  %v3809_v39 = vadd.f32 %v3808_v44, %v3807_v18 }
 0x5ba   :  { %v5774_v0 = vsel %vm739_vm1, %v5034_v53, 0.0  ;;  %v3818_v53 = vrot.slane %v3817_v51, 4  ;;  %v6182_v54 = vsel %vm6092_vm5, %v5752_v2, %v6181_v21  ;;  %v3816_v18 = vadd.f32 %v3815_v38, %v3814_v16 }
 0x5bb   :  { %v5775_v8 = vrot.slane %v5774_v0, 4  ;;  %v5772_v4 = vrot.slane %v5771_v35, 1 }
 0x5bc   :  { %6605 = vmatmul.msk.f32.gmra.mxu2 %vm1661_vm2, %v4085_v33  ;;  %v3819_v12 = vadd.f32 %v3818_v53, %v3817_v51 }
 0x5bd   :  { %v5776_v28 = vadd.f32 %v5775_v8, %v5774_v0  ;;  %v5773_v63 = vadd.f32 %v5772_v4, %v5771_v35  ;;  %v10601_v0 = vpop.eup %7136  ;;  %v6183_v8 = vsel %vm6094_vm6, %v5759_v30, %v6182_v54 }
 0x5be   :  { %v7139_v17 = vpop.eup %7138  ;;  %v3820_v26 = vrot.slane %v3819_v12, 2 }
 0x5bf   :  { %v5777_v1 = vrot.slane %v5776_v28, 2  ;;  %v4809_v46 = vpop.f32.mrf.mxu2  ;;  %v4088_v13 = vmul.f32 %v7139_v17, %v10543_v49 }
 0x5c0   :  { %v5035_v62 = vmul.f32 %v10547_v41, %v4809_v46  ;;  %v2685_v41 = vsub.f32 %v10541_v42, %v2557_v10  ;;  %v5766_v42 = vadd.f32 %v5765_v48, %v5764_v31  ;;  %v3821_v31 = vadd.f32 %v3820_v26, %v3819_v12 }
 0x5c1   :  { %v5778_v36 = vadd.f32 %v5777_v1, %v5776_v28  ;;  %v3824_v28 = vsel %vm1661_vm2, %v10601_v0, 0.0 }
 0x5c2   :  { %v5781_v6 = vsel %vm739_vm1, %v5035_v62, 0.0  ;;  %v2940_v40 = vmul.f32 1.442695, %v2685_v41  ;;  %v6184_v43 = vsel %vm6096_vm7, %v5766_v42, %v6183_v8  ;;  %v3825_v29 = vrot.slane %v3824_v28, 4 }
 0x5c3   :  { %v5782_v9 = vrot.slane %v5781_v6, 4  ;;  %v5779_v19 = vrot.slane %v5778_v36, 1  ;;  %v6185_v52 = vsel %vm6098_vm8, %v5773_v63, %v6184_v43  ;;  %v3822_v47 = vrot.slane %v3821_v31, 1 }
 0x5c4   :  { %6606 = vmatmul.msk.f32.gmra.mxu2 %vm1661_vm2, %v4086_v7  ;;  %7140 = vpow2.f32 %v2940_v40  ;;  %v3826_v62 = vadd.f32 %v3825_v29, %v3824_v28 }
 0x5c5   :  { %v5783_v11 = vadd.f32 %v5782_v9, %v5781_v6  ;;  %v5780_v33 = vadd.f32 %v5779_v19, %v5778_v36  ;;  %7142 = vrcp.f32 %v3809_v39  ;;  %v3823_v57 = vadd.f32 %v3822_v47, %v3821_v31 }
 0x5c6   :  { %v3827_v36 = vrot.slane %v3826_v62, 2  ;;  %7144 = vrcp.f32 %v3816_v18 }
 0x5c7   :  { %v5784_v56 = vrot.slane %v5783_v11, 2  ;;  %v10598_v37 = vpop.f32.mrf.mxu2  ;;  %v6186_v27 = vsel %vm6100_vm9, %v5780_v33, %v6185_v52  ;;  %7146 = vrcp.f32 %v3823_v57 }
 0x5c8   :  { %v3828_v20 = vadd.f32 %v3827_v36, %v3826_v62 }
 0x5c9   :  { %v5785_v23 = vadd.f32 %v5784_v56, %v5783_v11 }
 0x5ca   :  { %v10615_v1 = vpop.eup %7140  ;;  %v3829_v41 = vrot.slane %v3828_v20, 1 }
 0x5cb   :  { %v5786_v59 = vrot.slane %v5785_v23, 1  ;;  %v3831_v14 = vsel %vm1661_vm2, %v10615_v1, 0.0  ;;  %v7143_v49 = vpop.eup %7142 }
 0x5cc   :  { %6607 = vmatmul.msk.f32.gmra.mxu2 %vm1661_vm2, %v4087_v61  ;;  %v3832_v6 = vrot.slane %v3831_v14, 4  ;;  %v4089_v7 = vmul.f32 %v7143_v49, %v10554_v5  ;;  %v7145_v9 = vpop.eup %7144  ;;  %v3830_v11 = vadd.f32 %v3829_v41, %v3828_v20  ;;  %v4911_v5 = vpop.permute.xlu2 %4910 }
 0x5cd   :  { %v5787_v55 = vadd.f32 %v5786_v59, %v5785_v23  ;;  %v4090_v58 = vmul.f32 %v7145_v9, %v10580_v24  ;;  %v7147_v50 = vpop.eup %7146  ;;  %v5036_v30 = vmul.f32 %v4911_v5, %v10598_v37 }
 0x5ce   :  { %v3833_v15 = vadd.f32 %v3832_v6, %v3831_v14  ;;  %7148 = vrcp.f32 %v3830_v11  ;;  %v4091_v44 = vmul.f32 %v7147_v50, %v10590_v45 }
 0x5cf   :  { %v4815_v25 = vpop.f32.mrf.mxu2  ;;  %v6187_v22 = vsel %vm6102_vm10, %v5787_v55, %v6186_v27  ;;  %v5788_v63 = vsel %vm739_vm1, %v5036_v30, 0.0 }
 0x5d0   :  { %6626 = vmatmul.msk.f32.gmra.mxu3 %vm739_vm1, %v6187_v22  ;;  %v3834_v48 = vrot.slane %v3833_v15, 2  ;;  %v5037_v34 = vmul.f32 %v4911_v5, %v4815_v25  ;;  %v5789_v8 = vrot.slane %v5788_v63, 4 }
 0x5d2   :  { %v3835_v4 = vadd.f32 %v3834_v48, %v3833_v15  ;;  %v5795_v53 = vsel %vm739_vm1, %v5037_v34, 0.0  ;;  %v5790_v28 = vadd.f32 %v5789_v8, %v5788_v63 }
 0x5d3   :  { %v6288_v46 = vpop.f32.mrf.mxu3  ;;  %v5796_v45 = vrot.slane %v5795_v53, 4 }
 0x5d4   :  { %v6289_v10 = vadd.f32 %v10620_v32, %v6288_v46  ;;  %6608 = vmatmul.msk.f32.gmra.mxu2 %vm1661_vm2, %v4088_v13  ;;  %v3836_v19 = vrot.slane %v3835_v4, 1  ;;  %v7149_v40 = vpop.eup %7148  ;;  %v5791_v46 = vrot.slane %v5790_v28, 2 }
 0x5d5   :  { %v4092_v59 = vmul.f32 %v7149_v40, %v10601_v0  ;;  %v5797_v43 = vadd.f32 %v5796_v45, %v5795_v53 }
 0x5d6   :  { %6316 = vst.msk [vmem:[#allocation5 + $0x50] sm:$0xff] %vm63_vm0, %v6289_v10  ;;  %v3837_v24 = vadd.f32 %v3836_v19, %v3835_v4  ;;  %v5792_v47 = vadd.f32 %v5791_v46, %v5790_v28 }
 0x5d7   :  { %v4818_v35 = vpop.f32.mrf.mxu2  ;;  %v5798_v38 = vrot.slane %v5797_v43, 2 }
 0x5d8   :  { %v5038_v3 = vmul.f32 %v4911_v5, %v4818_v35  ;;  %7150 = vrcp.f32 %v3837_v24  ;;  %v5793_v48 = vrot.slane %v5792_v47, 1 }
 0x5d9   :  { %v5799_v18 = vadd.f32 %v5798_v38, %v5797_v43 }
 0x5da   :  { %v5802_v42 = vsel %vm739_vm1, %v5038_v3, 0.0  ;;  %v5794_v3 = vadd.f32 %v5793_v48, %v5792_v47 }
 0x5db   :  { %v5803_v37 = vrot.slane %v5802_v42, 4  ;;  %v5800_v57 = vrot.slane %v5799_v18, 1 }
 0x5dc   :  { %6609 = vmatmul.msk.f32.gmra.mxu2 %vm1661_vm2, %v4089_v7 }
 0x5dd   :  { %v5804_v52 = vadd.f32 %v5803_v37, %v5802_v42  ;;  %v5801_v50 = vadd.f32 %v5800_v57, %v5799_v18 }
 0x5de   :  { %v7151_v39 = vpop.eup %7150 }
 0x5df   :  { %v4821_v51 = vpop.f32.mrf.mxu2  ;;  %v5805_v29 = vrot.slane %v5804_v52, 2  ;;  %v4093_v0 = vmul.f32 %v7151_v39, %v10615_v1  ;;  %v6188_v24 = vsel %vm6090_vm4, %v5801_v50, %v5794_v3 }
 0x5e0   :  { %v5039_v56 = vmul.f32 %v4911_v5, %v4821_v51 }
 0x5e1   :  { %v5806_v35 = vadd.f32 %v5805_v29, %v5804_v52  ;;  %v4913_v52 = vpop.permute.xlu0 %4912 }
 0x5e2   :  { %v5809_v23 = vsel %vm739_vm1, %v5039_v56, 0.0 }
 0x5e3   :  { %v5810_v16 = vrot.slane %v5809_v23, 4  ;;  %v5807_v51 = vrot.slane %v5806_v35, 1 }
 0x5e4   :  { %6610 = vmatmul.msk.f32.gmra.mxu2 %vm1661_vm2, %v4090_v58 }
 0x5e5   :  { %v5811_v27 = vadd.f32 %v5810_v16, %v5809_v23  ;;  %v5808_v34 = vadd.f32 %v5807_v51, %v5806_v35 }
 0x5e7   :  { %v4824_v2 = vpop.f32.mrf.mxu2  ;;  %v5812_v10 = vrot.slane %v5811_v27, 2  ;;  %v6189_v42 = vsel %vm6092_vm5, %v5808_v34, %v6188_v24 }
 0x5e8   :  { %v5040_v60 = vmul.f32 %v4911_v5, %v4824_v2 }
 0x5e9   :  { %v5813_v36 = vadd.f32 %v5812_v10, %v5811_v27 }
 0x5ea   :  { %v5816_v33 = vsel %vm739_vm1, %v5040_v60, 0.0 }
 0x5eb   :  { %v5817_v12 = vrot.slane %v5816_v33, 4  ;;  %v5814_v58 = vrot.slane %v5813_v36, 1 }
 0x5ec   :  { %6611 = vmatmul.msk.f32.gmra.mxu2 %vm1661_vm2, %v4091_v44 }
 0x5ed   :  { %v5818_v25 = vadd.f32 %v5817_v12, %v5816_v33  ;;  %v5815_v30 = vadd.f32 %v5814_v58, %v5813_v36 }
 0x5ef   :  { %v4827_v21 = vpop.f32.mrf.mxu2  ;;  %v5819_v62 = vrot.slane %v5818_v25, 2  ;;  %v6190_v63 = vsel %vm6094_vm6, %v5815_v30, %v6189_v42 }
 0x5f0   :  { %v5041_v54 = vmul.f32 %v4911_v5, %v4827_v21 }
 0x5f1   :  { %v5820_v20 = vadd.f32 %v5819_v62, %v5818_v25 }
 0x5f2   :  { %v5823_v61 = vsel %vm739_vm1, %v5041_v54, 0.0 }
 0x5f3   :  { %v5824_v55 = vrot.slane %v5823_v61, 4  ;;  %v5821_v11 = vrot.slane %v5820_v20, 1 }
 0x5f4   :  { %6612 = vmatmul.msk.f32.gmra.mxu2 %vm1661_vm2, %v4092_v59 }
 0x5f5   :  { %v5825_v26 = vadd.f32 %v5824_v55, %v5823_v61 }
 0x5f7   :  { %v4830_v17 = vpop.f32.mrf.mxu2  ;;  %v5826_v14 = vrot.slane %v5825_v26, 2 }
 0x5f8   :  { %v5042_v22 = vmul.f32 %v4911_v5, %v4830_v17 }
 0x5f9   :  { %v5827_v9 = vadd.f32 %v5826_v14, %v5825_v26 }
 0x5fa   :  { %v5830_v13 = vsel %vm739_vm1, %v5042_v22, 0.0 }
 0x5fb   :  { %v5831_v31 = vrot.slane %v5830_v13, 4  ;;  %v5828_v2 = vrot.slane %v5827_v9, 1 }
 0x5fc   :  { %6613 = vmatmul.msk.f32.gmra.mxu2 %vm1661_vm2, %v4093_v0 }
 0x5fd   :  { %v5832_v49 = vadd.f32 %v5831_v31, %v5830_v13  ;;  %v5829_v53 = vadd.f32 %v5828_v2, %v5827_v9 }
 0x5ff   :  { %v5833_v6 = vrot.slane %v5832_v49, 2  ;;  %v4833_v7 = vpop.f32.mrf.mxu2 }
 0x600   :  { %v5043_v15 = vmul.f32 %v4911_v5, %v4833_v7  ;;  %v5822_v5 = vadd.f32 %v5821_v11, %v5820_v20 }
 0x601   :  { %v5834_v1 = vadd.f32 %v5833_v6, %v5832_v49 }
 0x602   :  { %v5837_v41 = vsel %vm739_vm1, %v5043_v15, 0.0  ;;  %v6191_v54 = vsel %vm6096_vm7, %v5822_v5, %v6190_v63 }
 0x603   :  { %v5838_v4 = vrot.slane %v5837_v41, 4  ;;  %v5835_v44 = vrot.slane %v5834_v1, 1  ;;  %v6192_v33 = vsel %vm6098_vm8, %v5829_v53, %v6191_v54 }
 0x605   :  { %v5839_v19 = vadd.f32 %v5838_v4, %v5837_v41  ;;  %v5836_v21 = vadd.f32 %v5835_v44, %v5834_v1 }
 0x607   :  { %v5840_v56 = vrot.slane %v5839_v19, 2  ;;  %v4836_v60 = vpop.f32.mrf.mxu2  ;;  %v6193_v37 = vsel %vm6100_vm9, %v5836_v21, %v6192_v33 }
 0x608   :  { %v5044_v27 = vmul.f32 %v4913_v52, %v4836_v60 }
 0x609   :  { %v5841_v40 = vadd.f32 %v5840_v56, %v5839_v19 }
 0x60a   :  { %v5844_v29 = vsel %vm739_vm1, %v5044_v27, 0.0 }
 0x60b   :  { %v5842_v23 = vrot.slane %v5841_v40, 1  ;;  %v5845_v18 = vrot.slane %v5844_v29, 4 }
 0x60d   :  { %v5843_v45 = vadd.f32 %v5842_v23, %v5841_v40  ;;  %v5846_v6 = vadd.f32 %v5845_v18, %v5844_v29 }
 0x60f   :  { %v4839_v61 = vpop.f32.mrf.mxu2  ;;  %v6194_v59 = vsel %vm6102_vm10, %v5843_v45, %v6193_v37  ;;  %v5847_v48 = vrot.slane %v5846_v6, 2 }
 0x610   :  { %6627 = vmatmul.msk.f32.gmra.mxu3 %vm739_vm1, %v6194_v59  ;;  %v5045_v39 = vmul.f32 %v4913_v52, %v4839_v61 }
 0x611   :  { %v5848_v44 = vadd.f32 %v5847_v48, %v5846_v6 }
 0x612   :  { %v5851_v22 = vsel %vm739_vm1, %v5045_v39, 0.0 }
 0x613   :  { %v6291_v8 = vpop.f32.mrf.mxu3  ;;  %v5852_v46 = vrot.slane %v5851_v22, 4  ;;  %v5849_v63 = vrot.slane %v5848_v44, 1 }
 0x614   :  { %v6292_v16 = vadd.f32 %v10620_v32, %v6291_v8 }
 0x615   :  { %v5853_v35 = vadd.f32 %v5852_v46, %v5851_v22 }
 0x616   :  { %6317 = vst.msk [vmem:[#allocation5 + $0x58] sm:$0xff] %vm63_vm0, %v6292_v16  ;;  %v5850_v16 = vadd.f32 %v5849_v63, %v5848_v44 }
 0x617   :  { %v4842_v12 = vpop.f32.mrf.mxu2  ;;  %v5854_v9 = vrot.slane %v5853_v35, 2 }
 0x618   :  { %v5046_v28 = vmul.f32 %v4913_v52, %v4842_v12 }
 0x619   :  { %v5855_v50 = vadd.f32 %v5854_v9, %v5853_v35  ;;  %v4915_v35 = vpop.permute.xlu1 %4914 }
 0x61a   :  { %v5858_v38 = vsel %vm739_vm1, %v5046_v28, 0.0 }
 0x61b   :  { %v5859_v31 = vrot.slane %v5858_v38, 4  ;;  %v5856_v24 = vrot.slane %v5855_v50, 1 }
 0x61d   :  { %v5860_v36 = vadd.f32 %v5859_v31, %v5858_v38  ;;  %v5857_v33 = vadd.f32 %v5856_v24, %v5855_v50 }
 0x61f   :  { %v4845_v43 = vpop.f32.mrf.mxu2  ;;  %v5861_v1 = vrot.slane %v5860_v36, 2  ;;  %v6195_v39 = vsel %vm6090_vm4, %v5857_v33, %v5850_v16 }
 0x620   :  { %v5047_v17 = vmul.f32 %v4913_v52, %v4845_v43 }
 0x621   :  { %v5862_v34 = vadd.f32 %v5861_v1, %v5860_v36 }
 0x622   :  { %v5865_v13 = vsel %vm739_vm1, %v5047_v17, 0.0 }
 0x623   :  { %v5866_v14 = vrot.slane %v5865_v13, 4  ;;  %v5863_v40 = vrot.slane %v5862_v34, 1 }
 0x625   :  { %v5867_v7 = vadd.f32 %v5866_v14, %v5865_v13  ;;  %v5864_v59 = vadd.f32 %v5863_v40, %v5862_v34 }
 0x627   :  { %v4848_v55 = vpop.f32.mrf.mxu2  ;;  %v5868_v58 = vrot.slane %v5867_v7, 2  ;;  %v6196_v17 = vsel %vm6092_vm5, %v5864_v59, %v6195_v39 }
 0x628   :  { %v5048_v25 = vmul.f32 %v4913_v52, %v4848_v55 }
 0x629   :  { %v5869_v3 = vadd.f32 %v5868_v58, %v5867_v7 }
 0x62a   :  { %v5872_v10 = vsel %vm739_vm1, %v5048_v25, 0.0 }
 0x62b   :  { %v5873_v49 = vrot.slane %v5872_v10, 4  ;;  %v5870_v23 = vrot.slane %v5869_v3, 1 }
 0x62d   :  { %v5874_v15 = vadd.f32 %v5873_v49, %v5872_v10  ;;  %v5871_v12 = vadd.f32 %v5870_v23, %v5869_v3 }
 0x62f   :  { %v4851_v26 = vpop.f32.mrf.mxu2  ;;  %v5875_v11 = vrot.slane %v5874_v15, 2  ;;  %v6197_v22 = vsel %vm6094_vm6, %v5871_v12, %v6196_v17 }
 0x630   :  { %v5049_v0 = vmul.f32 %v4913_v52, %v4851_v26 }
 0x631   :  { %v5876_v60 = vadd.f32 %v5875_v11, %v5874_v15 }
 0x632   :  { %v5879_v62 = vsel %vm739_vm1, %v5049_v0, 0.0 }
 0x633   :  { %v5880_v47 = vrot.slane %v5879_v62, 4  ;;  %v5877_v45 = vrot.slane %v5876_v60, 1 }
 0x635   :  { %v5881_v51 = vadd.f32 %v5880_v47, %v5879_v62 }
 0x637   :  { %v4854_v20 = vpop.f32.mrf.mxu2  ;;  %v5882_v2 = vrot.slane %v5881_v51, 2 }
 0x638   :  { %v5050_v57 = vmul.f32 %v4913_v52, %v4854_v20 }
 0x639   :  { %v5883_v53 = vadd.f32 %v5882_v2, %v5881_v51 }
 0x63a   :  { %v5886_v41 = vsel %vm739_vm1, %v5050_v57, 0.0 }
 0x63b   :  { %v5887_v4 = vrot.slane %v5886_v41, 4  ;;  %v5884_v37 = vrot.slane %v5883_v53, 1 }
 0x63d   :  { %v5888_v19 = vadd.f32 %v5887_v4, %v5886_v41  ;;  %v5885_v28 = vadd.f32 %v5884_v37, %v5883_v53 }
 0x63f   :  { %v5889_v30 = vrot.slane %v5888_v19, 2  ;;  %v4857_v56 = vpop.f32.mrf.mxu2 }
 0x640   :  { %v5051_v5 = vmul.f32 %v4913_v52, %v4857_v56  ;;  %v5878_v52 = vadd.f32 %v5877_v45, %v5876_v60 }
 0x641   :  { %v5890_v42 = vadd.f32 %v5889_v30, %v5888_v19 }
 0x642   :  { %v5893_v21 = vsel %vm739_vm1, %v5051_v5, 0.0  ;;  %v6198_v26 = vsel %vm6096_vm7, %v5878_v52, %v6197_v22 }
 0x643   :  { %v5894_v54 = vrot.slane %v5893_v21, 4  ;;  %v5891_v8 = vrot.slane %v5890_v42, 1  ;;  %v6199_v13 = vsel %vm6098_vm8, %v5885_v28, %v6198_v26 }
 0x645   :  { %v5895_v61 = vadd.f32 %v5894_v54, %v5893_v21  ;;  %v5892_v25 = vadd.f32 %v5891_v8, %v5890_v42 }
 0x647   :  { %v5896_v43 = vrot.slane %v5895_v61, 2  ;;  %v4860_v55 = vpop.f32.mrf.mxu2  ;;  %v6200_v0 = vsel %vm6100_vm9, %v5892_v25, %v6199_v13 }
 0x648   :  { %v5052_v6 = vmul.f32 %v4915_v35, %v4860_v55 }
 0x649   :  { %v5897_v27 = vadd.f32 %v5896_v43, %v5895_v61 }
 0x64a   :  { %v5900_v51 = vsel %vm739_vm1, %v5052_v6, 0.0 }
 0x64b   :  { %v5898_v38 = vrot.slane %v5897_v27, 1  ;;  %v5901_v50 = vrot.slane %v5900_v51, 4 }
 0x64d   :  { %v5899_v29 = vadd.f32 %v5898_v38, %v5897_v27  ;;  %v5902_v30 = vadd.f32 %v5901_v50, %v5900_v51 }
 0x64f   :  { %v4863_v46 = vpop.f32.mrf.mxu2  ;;  %v6201_v10 = vsel %vm6102_vm10, %v5899_v29, %v6200_v0  ;;  %v5903_v63 = vrot.slane %v5902_v30, 2 }
 0x650   :  { %6628 = vmatmul.msk.f32.gmra.mxu3 %vm739_vm1, %v6201_v10  ;;  %v5053_v47 = vmul.f32 %v4915_v35, %v4863_v46 }
 0x651   :  { %v5904_v8 = vadd.f32 %v5903_v63, %v5902_v30 }
 0x652   :  { %v5907_v15 = vsel %vm739_vm1, %v5053_v47, 0.0 }
 0x653   :  { %v6294_v31 = vpop.f32.mrf.mxu3  ;;  %v5908_v48 = vrot.slane %v5907_v15, 4  ;;  %v5905_v22 = vrot.slane %v5904_v8, 1 }
 0x654   :  { %v6295_v62 = vadd.f32 %v10620_v32, %v6294_v31 }
 0x655   :  { %v5909_v34 = vadd.f32 %v5908_v48, %v5907_v15 }
 0x656   :  { %6318 = vst.msk [vmem:[#allocation5 + $0x60] sm:$0xff] %vm63_vm0, %v6295_v62  ;;  %v5906_v62 = vadd.f32 %v5905_v22, %v5904_v8 }
 0x657   :  { %v4866_v18 = vpop.f32.mrf.mxu2  ;;  %v5910_v53 = vrot.slane %v5909_v34, 2 }
 0x658   :  { %v5054_v36 = vmul.f32 %v4915_v35, %v4866_v18 }
 0x659   :  { %v5911_v33 = vadd.f32 %v5910_v53, %v5909_v34 }
 0x65a   :  { %v5914_v57 = vsel %vm739_vm1, %v5054_v36, 0.0 }
 0x65b   :  { %v5915_v4 = vrot.slane %v5914_v57, 4  ;;  %v5912_v39 = vrot.slane %v5911_v33, 1 }
 0x65d   :  { %v5916_v3 = vadd.f32 %v5915_v4, %v5914_v57  ;;  %v5913_v13 = vadd.f32 %v5912_v39, %v5911_v33 }
 0x65f   :  { %v4869_v14 = vpop.f32.mrf.mxu2  ;;  %v5917_v42 = vrot.slane %v5916_v3, 2 }
 0x660   :  { %v5055_v7 = vmul.f32 %v4915_v35, %v4869_v14 }
 0x661   :  { %v5918_v59 = vadd.f32 %v5917_v42, %v5916_v3 }
 0x662   :  { %v5921_v1 = vsel %vm739_vm1, %v5055_v7, 0.0 }
 0x663   :  { %v5922_v2 = vrot.slane %v5921_v1, 4  ;;  %v5919_v27 = vrot.slane %v5918_v59, 1 }
 0x665   :  { %v5923_v56 = vadd.f32 %v5922_v2, %v5921_v1  ;;  %v5920_v10 = vadd.f32 %v5919_v27, %v5918_v59 }
 0x667   :  { %v4872_v49 = vpop.f32.mrf.mxu2  ;;  %v5924_v23 = vrot.slane %v5923_v56, 2 }
 0x668   :  { %v5056_v20 = vmul.f32 %v4915_v35, %v4872_v49 }
 0x669   :  { %v5925_v16 = vadd.f32 %v5924_v23, %v5923_v56 }
 0x66a   :  { %v5928_v58 = vsel %vm739_vm1, %v5056_v20, 0.0 }
 0x66b   :  { %v5929_v19 = vrot.slane %v5928_v58, 4  ;;  %v5926_v38 = vrot.slane %v5925_v16, 1 }
 0x66d   :  { %v5930_v5 = vadd.f32 %v5929_v19, %v5928_v58  ;;  %v5927_v18 = vadd.f32 %v5926_v38, %v5925_v16 }
 0x66f   :  { %v4875_v9 = vpop.f32.mrf.mxu2  ;;  %v5931_v45 = vrot.slane %v5930_v5, 2 }
 0x670   :  { %v5057_v41 = vmul.f32 %v4915_v35, %v4875_v9 }
 0x671   :  { %v5932_v55 = vadd.f32 %v5931_v45, %v5930_v5 }
 0x672   :  { %v5935_v11 = vsel %vm739_vm1, %v5057_v41, 0.0 }
 0x673   :  { %v5936_v44 = vrot.slane %v5935_v11, 4  ;;  %v5933_v29 = vrot.slane %v5932_v55, 1 }
 0x675   :  { %v5937_v40 = vadd.f32 %v5936_v44, %v5935_v11  ;;  %v5934_v49 = vadd.f32 %v5933_v29, %v5932_v55 }
 0x677   :  { %v4878_v60 = vpop.f32.mrf.mxu2  ;;  %v5938_v37 = vrot.slane %v5937_v40, 2 }
 0x678   :  { %v5058_v24 = vmul.f32 %v4915_v35, %v4878_v60 }
 0x679   :  { %v5939_v28 = vadd.f32 %v5938_v37, %v5937_v40 }
 0x67a   :  { %v5942_v21 = vsel %vm739_vm1, %v5058_v24, 0.0 }
 0x67b   :  { %v5943_v54 = vrot.slane %v5942_v21, 4  ;;  %v5940_v0 = vrot.slane %v5939_v28, 1 }
 0x67d   :  { %v5944_v61 = vadd.f32 %v5943_v54, %v5942_v21  ;;  %v5941_v47 = vadd.f32 %v5940_v0, %v5939_v28 }
 0x67f   :  { %v5945_v12 = vrot.slane %v5944_v61, 2  ;;  %v4881_v43 = vpop.f32.mrf.mxu2 }
 0x680   :  { %v5059_v52 = vmul.f32 %v4915_v35, %v4881_v43  ;;  %v6202_v35 = vsel %vm6090_vm4, %v5913_v13, %v5906_v62 }
 0x681   :  { %v5946_v17 = vadd.f32 %v5945_v12, %v5944_v61  ;;  %v6203_v6 = vsel %vm6092_vm5, %v5920_v10, %v6202_v35 }
 0x682   :  { %v5949_v25 = vsel %vm739_vm1, %v5059_v52, 0.0  ;;  %v6204_v20 = vsel %vm6094_vm6, %v5927_v18, %v6203_v6 }
 0x683   :  { %v5950_v26 = vrot.slane %v5949_v25, 4  ;;  %v5947_v31 = vrot.slane %v5946_v17, 1  ;;  %v6205_v57 = vsel %vm6096_vm7, %v5934_v49, %v6204_v20 }
 0x684   :  { %v6206_v51 = vsel %vm6098_vm8, %v5941_v47, %v6205_v57 }
 0x685   :  { %v5951_v46 = vadd.f32 %v5950_v26, %v5949_v25  ;;  %v5948_v7 = vadd.f32 %v5947_v31, %v5946_v17 }
 0x687   :  { %v5952_v14 = vrot.slane %v5951_v46, 2  ;;  %v6207_v1 = vsel %vm6100_vm9, %v5948_v7, %v6206_v51 }
 0x689   :  { %v5953_v36 = vadd.f32 %v5952_v14, %v5951_v46 }
 0x68b   :  { %v5954_v15 = vrot.slane %v5953_v36, 1 }
 0x68d   :  { %v5955_v9 = vadd.f32 %v5954_v15, %v5953_v36 }
 0x68f   :  { %v6208_v41 = vsel %vm6102_vm10, %v5955_v9, %v6207_v1 }
 0x690   :  { %6629 = vmatmul.msk.f32.gmra.mxu3 %vm739_vm1, %v6208_v41 }
 0x693   :  { %v6297_v48 = vpop.f32.mrf.mxu3 }
 0x694   :  { %v6298_v58 = vadd.f32 %v10620_v32, %v6297_v48 }
 0x696   :  { %6319 = vst.msk [vmem:[#allocation5 + $0x68] sm:$0xff] %vm63_vm0, %v6298_v58 }
 0x6d3   :  { %v6300_v4 = vpop.f32.mrf.mxu3 }
 0x6d4   :  { %v6301_v11 = vadd.f32 %v10620_v32, %v6300_v4 }
 0x6d6   :  { %6320 = vst.msk [vmem:[#allocation5 + $0x70] sm:$0xff] %vm63_vm0, %v6301_v11 }
 0x713   :  { %v6303_v50 = vpop.f32.mrf.mxu3 }
 0x714   :  { %v6304_v2 = vadd.f32 %v10620_v32, %v6303_v50 }
 0x716   :  { %6321 = vst.msk [vmem:[#allocation5 + $0x78] sm:$0xff] %vm63_vm0, %v6304_v2 }
 0x717   :  { %6334 = dma.vmem_to_hbm [thread:$0]  %s6327_s23, 2048, %s6329_s26, [#allocation4], %s7260_s29, %s7260_s29, %s7261_s30  }
 0x718   :  { %7257 = dma.done.wait [#allocation4], 2048  }
 0x719   :  { %7258 = vsyncadd [#allocation4], 4294965248 }
 0x71a   :  { %6339 = vsyncpa [#allocation3], 1 }
 0x71b   :  { %6340 = vsyncpa [#allocation4], 1 }

</bundles_post_ra>
